<compile_context>
chip_gen: v7x
topology: tpu7x:2x2x1
jax: 0.10.0
libtpu: 0.0.40
codegen_flags: <defaults>
</compile_context>

<pallas_src>
import math
from functools import partial

import numpy as np
import jax
import jax.numpy as jnp
from jax import lax
from jax.experimental import pallas as pl
from jax.experimental.pallas import tpu as pltpu


# ------------------------------ Pallas kernel ------------------------------- #

def _fused_bottleneck_kernel(x_ref, w1_ref, b1_ref, w2_ref, b2_ref, w3_ref, b3_ref,
                             o_ref, h1buf_ref, *, D, H, W, mid):
    Cin = x_ref.shape[-1]
    Cout = o_ref.shape[-1]
    HW = H * W

    # Row masks for the in-register W shift: rolling the flattened (H*W, mid) slab
    # by +/-1 row wraps across h (and the array end); those rows are exactly the
    # w==0 / w==W-1 rows of the kw=0 / kw=2 taps and must be zeroed (= conv padding).
    row = lax.broadcasted_iota(jnp.int32, (HW, mid), 0)
    wpos = row % W
    left_ok = wpos != 0            # rows where the w-1 (kw=0) tap is in range
    right_ok = wpos != (W - 1)     # rows where the w+1 (kw=2) tap is in range

    zero_row = jnp.zeros((W, 3 * mid), dtype=h1buf_ref.dtype)

    # -------- Phase 1: conv1 (1x1x1) + BN + ReLU, one depth slab at a time ------ #
    # h1 never touches HBM.  Each slab is written (already kw-pre-shifted, bf16)
    # into h1buf of shape (D, (H+2)*W, 3*mid): rows 0..W-1 and (H+1)*W.. are the
    # zero kh-halo, the interior is tile-aligned, and every phase-2 tap becomes a
    # contiguous static-slice load.
    for d in range(D):
        x_d = x_ref[0, d]                                        # (HW, Cin) bf16
        h1 = jnp.dot(x_d, w1_ref[...], preferred_element_type=jnp.float32)
        h1 = jnp.maximum(h1 + b1_ref[...], 0.0)                  # (HW, mid) f32

        # kw = 0 / 2 taps via XLU sublane roll + VPU mask (no stores, no W halo).
        left = jnp.where(left_ok, pltpu.roll(h1, shift=1, axis=0), 0.0)
        right = jnp.where(right_ok, pltpu.roll(h1, shift=HW - 1, axis=0), 0.0)

        slab = jnp.concatenate([left, h1, right], axis=-1).astype(h1buf_ref.dtype)
        h1buf_ref[d, W:W + HW, :] = slab                         # full-tile store
        h1buf_ref[d, 0:W, :] = zero_row                          # kh halo (top)
        h1buf_ref[d, W + HW:2 * W + HW, :] = zero_row            # kh halo (bottom)

    # --- Phase 2: conv2 (3x3x3 grouped) + BN + ReLU + conv3 + residual + ReLU --- #
    # Register accumulation per depth slab; each matmul is (HW, 3*mid) x (3*mid, mid).
    for d in range(D):
        acc = None
        for kd in range(3):
            d_in = d + kd - 1
            if d_in < 0 or d_in >= D:
                continue                        # zero-padded depth tap: skip statically
            for kh in range(3):
                lhs = h1buf_ref[d_in, kh * W:kh * W + HW, :]     # contiguous view load
                prod = jnp.dot(lhs, w2_ref[kd * 3 + kh],
                               preferred_element_type=jnp.float32)
                acc = prod if acc is None else acc + prod

        h2 = jnp.maximum(acc + b2_ref[...], 0.0).astype(jnp.bfloat16)   # (HW, mid)

        y = jnp.dot(h2, w3_ref[...], preferred_element_type=jnp.float32)  # (HW, Cout)
        y = y + b3_ref[...] + x_ref[0, d].astype(jnp.float32)             # residual
        o_ref[0, d] = jnp.maximum(y, 0.0).astype(o_ref.dtype)   # lane-dense full store


def resnext_bottleneck_forward(x_ndhwc, params, stride=1):
    """Fused identity ResNeXtBottleneck forward. x: (N, D, H, W, Cin) bf16, NDHWC."""
    N, D, H, W, Cin = x_ndhwc.shape
    mid = params["w1"].shape[1]
    Cout = params["w3"].shape[1]
    # Identity block only (downsample=None): residual is x itself.
    assert stride == 1 and Cin == Cout, "only stride=1, Cin==Cout (downsample=None)"
    assert W % 8 == 0 and Cin % 128 == 0 and Cout % 128 == 0 and mid % 128 == 0
    HW = H * W

    # Flatten (H, W) -> HW on the host (contiguous reshape, no data movement) so
    # every in-kernel load/store is a plain 2-D tile-aligned access.
    x2 = x_ndhwc.reshape(N, D, HW, Cin)

    kernel = partial(_fused_bottleneck_kernel, D=D, H=H, W=W, mid=mid)
    out = pl.pallas_call(
        kernel,
        out_shape=jax.ShapeDtypeStruct((N, D, HW, Cout), jnp.bfloat16),
        grid=(N,),
        in_specs=[
            pl.BlockSpec((1, D, HW, Cin), lambda n: (n, 0, 0, 0)),     # x / residual
            pl.BlockSpec((Cin, mid), lambda n: (0, 0)),                # w1 (BN folded)
            pl.BlockSpec((1, mid), lambda n: (0, 0)),                  # b1
            pl.BlockSpec((9, 3 * mid, mid), lambda n: (0, 0, 0)),      # w2 (kw along K)
            pl.BlockSpec((1, mid), lambda n: (0, 0)),                  # b2
            pl.BlockSpec((mid, Cout), lambda n: (0, 0)),               # w3 (BN folded)
            pl.BlockSpec((1, Cout), lambda n: (0, 0)),                 # b3
        ],
        out_specs=pl.BlockSpec((1, D, HW, Cout), lambda n: (n, 0, 0, 0)),
        scratch_shapes=[
            # (D, (H+2)*W, 3*mid) bf16: h1 with kh halo rows and the 3 kw-shifted
            # copies concatenated along lanes (left | center | right).
            pltpu.VMEM((D, (H + 2) * W, 3 * mid), jnp.bfloat16),
        ],
        compiler_params=pltpu.CompilerParams(
            dimension_semantics=("parallel",)),
    )(x2, params["w1"], params["b1"], params["w2_dense"], params["b2"],
      params["w3"], params["b3"])
    return out.reshape(N, D, H, W, Cout)


# ----------------------------- host-side helpers ---------------------------- #

def grouped_weight_to_dense(w2_oidhw, cardinality):
    """PyTorch grouped weight (mid, mid//g, 3,3,3) -> dense (9, 3*mid, mid).

    First index is kd*3 + kh; the K rows are ordered kw-major (kw*mid + cin) to match
    the kernel's [left | center | right] lane layout of the LHS slab.
    """
    w2 = np.asarray(w2_oidhw, np.float32)
    mid = w2.shape[0]
    cpg = mid // cardinality
    taps = w2.reshape(mid, cpg, 27)                    # k = (kd*3+kh)*3 + kw
    dense = np.zeros((27, mid, mid), np.float32)       # (tap, cin, cout)
    for co in range(mid):
        g = co // cpg
        dense[:, g * cpg:(g + 1) * cpg, co] = taps[co].T
    return jnp.asarray(dense.reshape(9, 3 * mid, mid))


# --------------------------------- main ------------------------------------- #

if __name__ == "__main__":
    # Identity bottleneck of layer1 (ResNeXt-3D, cardinality=32):
    # inplanes=256, planes=128 -> mid = 32*int(128/32) = 128, out = planes*2 = 256.
    inplanes, planes, cardinality, stride = 256, 128, 32, 1
    mid = cardinality * int(planes / 32)     # 128
    outp = planes * 2                        # 256
    cpg = mid // cardinality                 # 4

    N, D, H, W = 2, 4, 8, 8

    key = jax.random.PRNGKey(0)
    ks = jax.random.split(key, 16)

    def winit(k, shape, fan_in):
        return jax.random.normal(k, shape, jnp.float32) / math.sqrt(fan_in)

    # PyTorch-shaped conv weights (OIDHW).
    w1 = winit(ks[0], (mid, inplanes, 1, 1, 1), inplanes)
    w2 = winit(ks[1], (mid, cpg, 3, 3, 3), cpg * 27)
    w3 = winit(ks[2], (outp, mid, 1, 1, 1), mid)

    def bn_fold(kg, kb, km, kv, c, eps=1e-5):
        gamma = 1.0 + 0.1 * jax.random.normal(kg, (c,), jnp.float32)
        beta = 0.1 * jax.random.normal(kb, (c,), jnp.float32)
        mean = 0.1 * jax.random.normal(km, (c,), jnp.float32)
        var = jnp.abs(jax.random.normal(kv, (c,), jnp.float32)) + 0.5
        scale = gamma / jnp.sqrt(var + eps)
        bias = beta - mean * scale
        return scale, bias

    s1, b1 = bn_fold(ks[3], ks[4], ks[5], ks[6], mid)
    s2, b2 = bn_fold(ks[7], ks[8], ks[9], ks[10], mid)
    s3, b3 = bn_fold(ks[11], ks[12], ks[13], ks[14], outp)

    # Fold BN scales into conv weight output-columns (eval-mode BN); keep bias adds.
    w1_lin = jnp.transpose(w1[:, :, 0, 0, 0], (1, 0)) * s1[None, :]    # (Cin, mid)
    w3_lin = jnp.transpose(w3[:, :, 0, 0, 0], (1, 0)) * s3[None, :]    # (mid, Cout)
    w2_folded = w2 * s2[:, None, None, None, None]                     # OIDHW, folded

    params = {
        "w1": w1_lin.astype(jnp.bfloat16),
        "w2_dense": grouped_weight_to_dense(w2_folded, cardinality).astype(jnp.bfloat16),
        "w3": w3_lin.astype(jnp.bfloat16),
        "b1": b1.reshape(1, mid),
        "b2": b2.reshape(1, mid),
        "b3": b3.reshape(1, outp),
    }

    # Channels-last input (the surrounding network stays NDHWC), bf16 at the boundary.
    x = jax.random.normal(ks[15], (N, D, H, W, inplanes),
                          jnp.float32).astype(jnp.bfloat16)

    out = resnext_bottleneck_forward(x, params, stride=stride)
    out = jax.block_until_ready(out)

    # ---- channels-last pure-JAX reference on the SAME folded bf16 weights ---- #
    dn = ("NDHWC", "DHWIO", "NDHWC")
    w1_dhwio = params["w1"].reshape(1, 1, 1, inplanes, mid)
    w2_dhwio = jnp.transpose(w2_folded, (2, 3, 4, 1, 0)).astype(jnp.bfloat16)
    w3_dhwio = params["w3"].reshape(1, 1, 1, mid, outp)

    def reference(xq):
        o = lax.conv_general_dilated(xq, w1_dhwio, (1, 1, 1), "VALID",
                                     dimension_numbers=dn,
                                     preferred_element_type=jnp.float32)
        o = jnp.maximum(o + b1, 0.0).astype(jnp.bfloat16)
        o = lax.conv_general_dilated(o, w2_dhwio, (stride,) * 3, [(1, 1)] * 3,
                                     dimension_numbers=dn,
                                     feature_group_count=cardinality,
                                     preferred_element_type=jnp.float32)
        o = jnp.maximum(o + b2, 0.0).astype(jnp.bfloat16)
        o = lax.conv_general_dilated(o, w3_dhwio, (1, 1, 1), "VALID",
                                     dimension_numbers=dn,
                                     preferred_element_type=jnp.float32)
        o = o + b3 + xq.astype(jnp.float32)
        return jnp.maximum(o, 0.0)

    ref = jax.block_until_ready(reference(x))

    assert out.shape == ref.shape == (N, D, H, W, outp)
    out_f32 = out.astype(jnp.float32)
    max_err = float(jnp.max(jnp.abs(out_f32 - ref)))
    assert jnp.allclose(out_f32, ref, rtol=2e-2, atol=2e-2), max_err

    print("KERNEL_OK")
</pallas_src>

<mosaic_0001>
module attributes {stable_mosaic.version = 11 : i64} {
  func.func @_fused_bottleneck_kernel(%arg0: i32, %arg1: memref<1x4x64x256xbf16, #tpu.memory_space<vmem>>, %arg2: memref<256x128xbf16, #tpu.memory_space<vmem>>, %arg3: memref<1x128xf32, #tpu.memory_space<vmem>>, %arg4: memref<9x384x128xbf16, #tpu.memory_space<vmem>>, %arg5: memref<1x128xf32, #tpu.memory_space<vmem>>, %arg6: memref<128x256xbf16, #tpu.memory_space<vmem>>, %arg7: memref<1x256xf32, #tpu.memory_space<vmem>>, %arg8: memref<1x4x64x256xbf16, #tpu.memory_space<vmem>>, %arg9: memref<4x80x384xbf16, #tpu.memory_space<vmem>>) attributes {dimension_semantics = [#tpu.dimension_semantics<parallel>], iteration_bounds = array<i64: 2>, scalar_prefetch = 0 : i64, scratch_operands = 1 : i64, tpu.core_type = #tpu.core_type<tc>, window_params = [{transform_indices = @transform_0, window_bounds = array<i64: 1, 4, 64, 256>}, {pipeline_mode = #tpu.pipeline_mode<synchronous>, transform_indices = @transform_1, window_bounds = array<i64: 256, 128>}, {pipeline_mode = #tpu.pipeline_mode<synchronous>, transform_indices = @transform_2, window_bounds = array<i64: 1, 128>}, {pipeline_mode = #tpu.pipeline_mode<synchronous>, transform_indices = @transform_3, window_bounds = array<i64: 9, 384, 128>}, {pipeline_mode = #tpu.pipeline_mode<synchronous>, transform_indices = @transform_4, window_bounds = array<i64: 1, 128>}, {pipeline_mode = #tpu.pipeline_mode<synchronous>, transform_indices = @transform_5, window_bounds = array<i64: 128, 256>}, {pipeline_mode = #tpu.pipeline_mode<synchronous>, transform_indices = @transform_6, window_bounds = array<i64: 1, 256>}, {transform_indices = @transform_7, window_bounds = array<i64: 1, 4, 64, 256>}]} {
    %0 = tpu.iota {dimensions = array<i32: 0>} : vector<64x128xi32>
    %c8_i32 = arith.constant 8 : i32
    %c0_i32 = arith.constant 0 : i32
    %1 = arith.cmpi eq, %c8_i32, %c0_i32 : i32
    %c1_i32 = arith.constant 1 : i32
    %2 = arith.select %1, %c1_i32, %c8_i32 : i32
    %3 = vector.broadcast %2 : i32 to vector<64x128xi32>
    %4 = arith.remsi %0, %3 : vector<64x128xi32>
    %c0_i32_0 = arith.constant 0 : i32
    %5 = vector.broadcast %c0_i32_0 : i32 to vector<64x128xi32>
    %6 = arith.cmpi ne, %4, %5 : vector<64x128xi32>
    %c0_i32_1 = arith.constant 0 : i32
    %7 = vector.broadcast %c0_i32_1 : i32 to vector<64x128xi32>
    %8 = arith.cmpi slt, %4, %7 : vector<64x128xi32>
    %c0_i32_2 = arith.constant 0 : i32
    %9 = arith.cmpi slt, %2, %c0_i32_2 : i32
    %10 = vector.broadcast %9 : i1 to vector<64x128xi1>
    %11 = vector.broadcast %10 : vector<64x128xi1> to vector<64x128xi1>
    %12 = arith.xori %8, %11 : vector<64x128xi1>
    %13 = arith.andi %12, %6 : vector<64x128xi1>
    %14 = vector.broadcast %2 : i32 to vector<64x128xi32>
    %15 = arith.addi %4, %14 : vector<64x128xi32>
    %16 = arith.select %13, %15, %4 : vector<64x128xi1>, vector<64x128xi32>
    %c0_i32_3 = arith.constant 0 : i32
    %17 = vector.broadcast %c0_i32_3 : i32 to vector<64x128xi32>
    %18 = arith.cmpi ne, %16, %17 : vector<64x128xi32>
    %c7_i32 = arith.constant 7 : i32
    %19 = vector.broadcast %c7_i32 : i32 to vector<64x128xi32>
    %20 = arith.cmpi ne, %16, %19 : vector<64x128xi32>
    %cst = arith.constant 0.000000e+00 : bf16
    %21 = vector.broadcast %cst : bf16 to vector<8x384xbf16>
    %c0 = arith.constant 0 : index
    %c0_4 = arith.constant 0 : index
    %c0_5 = arith.constant 0 : index
    %c0_6 = arith.constant 0 : index
    %22 = vector.load %arg1[%c0, %c0_4, %c0_5, %c0_6] : memref<1x4x64x256xbf16, #tpu.memory_space<vmem>>, vector<1x1x64x256xbf16>
    %23 = vector.shape_cast %22 : vector<1x1x64x256xbf16> to vector<64x256xbf16>
    %c0_7 = arith.constant 0 : index
    %c0_8 = arith.constant 0 : index
    %24 = vector.load %arg2[%c0_7, %c0_8] : memref<256x128xbf16, #tpu.memory_space<vmem>>, vector<256x128xbf16>
    %cst_9 = arith.constant dense<0.000000e+00> : vector<64x128xf32>
    %25 = tpu.matmul %23, %24, %cst_9 {dimension_numbers = #tpu.dot_dimension_numbers<[1], [0], [0], [1], [0, 0, 1, 1], [], []>} : vector<64x256xbf16>, vector<256x128xbf16>, vector<64x128xf32> -> vector<64x128xf32>
    %c0_10 = arith.constant 0 : index
    %c0_11 = arith.constant 0 : index
    %26 = vector.load %arg3[%c0_10, %c0_11] : memref<1x128xf32, #tpu.memory_space<vmem>>, vector<1x128xf32>
    %27 = vector.broadcast %26 : vector<1x128xf32> to vector<64x128xf32>
    %28 = arith.addf %25, %27 : vector<64x128xf32>
    %cst_12 = arith.constant 0.000000e+00 : f32
    %29 = vector.broadcast %cst_12 : f32 to vector<64x128xf32>
    %30 = arith.maximumf %28, %29 : vector<64x128xf32>
    %c1_i32_13 = arith.constant 1 : i32
    %31 = tpu.dynamic_rotate %30 by %c1_i32_13 dim 0 : vector<64x128xf32>, i32 -> vector<64x128xf32>
    %cst_14 = arith.constant 0.000000e+00 : f32
    %32 = vector.broadcast %cst_14 : f32 to vector<64x128xf32>
    %33 = arith.select %18, %31, %32 : vector<64x128xi1>, vector<64x128xf32>
    %c63_i32 = arith.constant 63 : i32
    %34 = tpu.dynamic_rotate %30 by %c63_i32 dim 0 : vector<64x128xf32>, i32 -> vector<64x128xf32>
    %cst_15 = arith.constant 0.000000e+00 : f32
    %35 = vector.broadcast %cst_15 : f32 to vector<64x128xf32>
    %36 = arith.select %20, %34, %35 : vector<64x128xi1>, vector<64x128xf32>
    %37 = tpu.concatenate %33, %30, %36 in 1 : vector<64x128xf32>, vector<64x128xf32>, vector<64x128xf32> -> vector<64x384xf32>
    %38 = arith.truncf %37 : vector<64x384xf32> to vector<64x384xbf16>
    %c0_16 = arith.constant 0 : index
    %c8 = arith.constant 8 : index
    %c0_17 = arith.constant 0 : index
    %39 = vector.load %arg9[%c0_16, %c8, %c0_17] : memref<4x80x384xbf16, #tpu.memory_space<vmem>>, vector<1x64x384xbf16>
    %40 = vector.shape_cast %39 : vector<1x64x384xbf16> to vector<64x384xbf16>
    %41 = vector.shape_cast %38 : vector<64x384xbf16> to vector<1x64x384xbf16>
    tpu.vector_store %arg9[%c0_16, %c8, %c0_17], %41 {strides = array<i32>} : memref<4x80x384xbf16, #tpu.memory_space<vmem>>, vector<1x64x384xbf16>,
    %c0_18 = arith.constant 0 : index
    %c0_19 = arith.constant 0 : index
    %c0_20 = arith.constant 0 : index
    %42 = vector.load %arg9[%c0_18, %c0_19, %c0_20] : memref<4x80x384xbf16, #tpu.memory_space<vmem>>, vector<1x8x384xbf16>
    %43 = vector.shape_cast %42 : vector<1x8x384xbf16> to vector<8x384xbf16>
    %44 = vector.shape_cast %21 : vector<8x384xbf16> to vector<1x8x384xbf16>
    tpu.vector_store %arg9[%c0_18, %c0_19, %c0_20], %44 {strides = array<i32>} : memref<4x80x384xbf16, #tpu.memory_space<vmem>>, vector<1x8x384xbf16>,
    %c0_21 = arith.constant 0 : index
    %c72 = arith.constant 72 : index
    %c0_22 = arith.constant 0 : index
    %45 = vector.load %arg9[%c0_21, %c72, %c0_22] : memref<4x80x384xbf16, #tpu.memory_space<vmem>>, vector<1x8x384xbf16>
    %46 = vector.shape_cast %45 : vector<1x8x384xbf16> to vector<8x384xbf16>
    %47 = vector.shape_cast %21 : vector<8x384xbf16> to vector<1x8x384xbf16>
    tpu.vector_store %arg9[%c0_21, %c72, %c0_22], %47 {strides = array<i32>} : memref<4x80x384xbf16, #tpu.memory_space<vmem>>, vector<1x8x384xbf16>,
    %c0_23 = arith.constant 0 : index
    %c1 = arith.constant 1 : index
    %c0_24 = arith.constant 0 : index
    %c0_25 = arith.constant 0 : index
    %48 = vector.load %arg1[%c0_23, %c1, %c0_24, %c0_25] : memref<1x4x64x256xbf16, #tpu.memory_space<vmem>>, vector<1x1x64x256xbf16>
    %49 = vector.shape_cast %48 : vector<1x1x64x256xbf16> to vector<64x256xbf16>
    %c0_26 = arith.constant 0 : index
    %c0_27 = arith.constant 0 : index
    %50 = vector.load %arg2[%c0_26, %c0_27] : memref<256x128xbf16, #tpu.memory_space<vmem>>, vector<256x128xbf16>
    %cst_28 = arith.constant dense<0.000000e+00> : vector<64x128xf32>
    %51 = tpu.matmul %49, %50, %cst_28 {dimension_numbers = #tpu.dot_dimension_numbers<[1], [0], [0], [1], [0, 0, 1, 1], [], []>} : vector<64x256xbf16>, vector<256x128xbf16>, vector<64x128xf32> -> vector<64x128xf32>
    %c0_29 = arith.constant 0 : index
    %c0_30 = arith.constant 0 : index
    %52 = vector.load %arg3[%c0_29, %c0_30] : memref<1x128xf32, #tpu.memory_space<vmem>>, vector<1x128xf32>
    %53 = vector.broadcast %52 : vector<1x128xf32> to vector<64x128xf32>
    %54 = arith.addf %51, %53 : vector<64x128xf32>
    %cst_31 = arith.constant 0.000000e+00 : f32
    %55 = vector.broadcast %cst_31 : f32 to vector<64x128xf32>
    %56 = arith.maximumf %54, %55 : vector<64x128xf32>
    %c1_i32_32 = arith.constant 1 : i32
    %57 = tpu.dynamic_rotate %56 by %c1_i32_32 dim 0 : vector<64x128xf32>, i32 -> vector<64x128xf32>
    %cst_33 = arith.constant 0.000000e+00 : f32
    %58 = vector.broadcast %cst_33 : f32 to vector<64x128xf32>
    %59 = arith.select %18, %57, %58 : vector<64x128xi1>, vector<64x128xf32>
    %c63_i32_34 = arith.constant 63 : i32
    %60 = tpu.dynamic_rotate %56 by %c63_i32_34 dim 0 : vector<64x128xf32>, i32 -> vector<64x128xf32>
    %cst_35 = arith.constant 0.000000e+00 : f32
    %61 = vector.broadcast %cst_35 : f32 to vector<64x128xf32>
    %62 = arith.select %20, %60, %61 : vector<64x128xi1>, vector<64x128xf32>
    %63 = tpu.concatenate %59, %56, %62 in 1 : vector<64x128xf32>, vector<64x128xf32>, vector<64x128xf32> -> vector<64x384xf32>
    %64 = arith.truncf %63 : vector<64x384xf32> to vector<64x384xbf16>
    %c1_36 = arith.constant 1 : index
    %c8_37 = arith.constant 8 : index
    %c0_38 = arith.constant 0 : index
    %65 = vector.load %arg9[%c1_36, %c8_37, %c0_38] : memref<4x80x384xbf16, #tpu.memory_space<vmem>>, vector<1x64x384xbf16>
    %66 = vector.shape_cast %65 : vector<1x64x384xbf16> to vector<64x384xbf16>
    %67 = vector.shape_cast %64 : vector<64x384xbf16> to vector<1x64x384xbf16>
    tpu.vector_store %arg9[%c1_36, %c8_37, %c0_38], %67 {strides = array<i32>} : memref<4x80x384xbf16, #tpu.memory_space<vmem>>, vector<1x64x384xbf16>,
    %c1_39 = arith.constant 1 : index
    %c0_40 = arith.constant 0 : index
    %c0_41 = arith.constant 0 : index
    %68 = vector.load %arg9[%c1_39, %c0_40, %c0_41] : memref<4x80x384xbf16, #tpu.memory_space<vmem>>, vector<1x8x384xbf16>
    %69 = vector.shape_cast %68 : vector<1x8x384xbf16> to vector<8x384xbf16>
    %70 = vector.shape_cast %21 : vector<8x384xbf16> to vector<1x8x384xbf16>
    tpu.vector_store %arg9[%c1_39, %c0_40, %c0_41], %70 {strides = array<i32>} : memref<4x80x384xbf16, #tpu.memory_space<vmem>>, vector<1x8x384xbf16>,
    %c1_42 = arith.constant 1 : index
    %c72_43 = arith.constant 72 : index
    %c0_44 = arith.constant 0 : index
    %71 = vector.load %arg9[%c1_42, %c72_43, %c0_44] : memref<4x80x384xbf16, #tpu.memory_space<vmem>>, vector<1x8x384xbf16>
    %72 = vector.shape_cast %71 : vector<1x8x384xbf16> to vector<8x384xbf16>
    %73 = vector.shape_cast %21 : vector<8x384xbf16> to vector<1x8x384xbf16>
    tpu.vector_store %arg9[%c1_42, %c72_43, %c0_44], %73 {strides = array<i32>} : memref<4x80x384xbf16, #tpu.memory_space<vmem>>, vector<1x8x384xbf16>,
    %c0_45 = arith.constant 0 : index
    %c2 = arith.constant 2 : index
    %c0_46 = arith.constant 0 : index
    %c0_47 = arith.constant 0 : index
    %74 = vector.load %arg1[%c0_45, %c2, %c0_46, %c0_47] : memref<1x4x64x256xbf16, #tpu.memory_space<vmem>>, vector<1x1x64x256xbf16>
    %75 = vector.shape_cast %74 : vector<1x1x64x256xbf16> to vector<64x256xbf16>
    %c0_48 = arith.constant 0 : index
    %c0_49 = arith.constant 0 : index
    %76 = vector.load %arg2[%c0_48, %c0_49] : memref<256x128xbf16, #tpu.memory_space<vmem>>, vector<256x128xbf16>
    %cst_50 = arith.constant dense<0.000000e+00> : vector<64x128xf32>
    %77 = tpu.matmul %75, %76, %cst_50 {dimension_numbers = #tpu.dot_dimension_numbers<[1], [0], [0], [1], [0, 0, 1, 1], [], []>} : vector<64x256xbf16>, vector<256x128xbf16>, vector<64x128xf32> -> vector<64x128xf32>
    %c0_51 = arith.constant 0 : index
    %c0_52 = arith.constant 0 : index
    %78 = vector.load %arg3[%c0_51, %c0_52] : memref<1x128xf32, #tpu.memory_space<vmem>>, vector<1x128xf32>
    %79 = vector.broadcast %78 : vector<1x128xf32> to vector<64x128xf32>
    %80 = arith.addf %77, %79 : vector<64x128xf32>
    %cst_53 = arith.constant 0.000000e+00 : f32
    %81 = vector.broadcast %cst_53 : f32 to vector<64x128xf32>
    %82 = arith.maximumf %80, %81 : vector<64x128xf32>
    %c1_i32_54 = arith.constant 1 : i32
    %83 = tpu.dynamic_rotate %82 by %c1_i32_54 dim 0 : vector<64x128xf32>, i32 -> vector<64x128xf32>
    %cst_55 = arith.constant 0.000000e+00 : f32
    %84 = vector.broadcast %cst_55 : f32 to vector<64x128xf32>
    %85 = arith.select %18, %83, %84 : vector<64x128xi1>, vector<64x128xf32>
    %c63_i32_56 = arith.constant 63 : i32
    %86 = tpu.dynamic_rotate %82 by %c63_i32_56 dim 0 : vector<64x128xf32>, i32 -> vector<64x128xf32>
    %cst_57 = arith.constant 0.000000e+00 : f32
    %87 = vector.broadcast %cst_57 : f32 to vector<64x128xf32>
    %88 = arith.select %20, %86, %87 : vector<64x128xi1>, vector<64x128xf32>
    %89 = tpu.concatenate %85, %82, %88 in 1 : vector<64x128xf32>, vector<64x128xf32>, vector<64x128xf32> -> vector<64x384xf32>
    %90 = arith.truncf %89 : vector<64x384xf32> to vector<64x384xbf16>
    %c2_58 = arith.constant 2 : index
    %c8_59 = arith.constant 8 : index
    %c0_60 = arith.constant 0 : index
    %91 = vector.load %arg9[%c2_58, %c8_59, %c0_60] : memref<4x80x384xbf16, #tpu.memory_space<vmem>>, vector<1x64x384xbf16>
    %92 = vector.shape_cast %91 : vector<1x64x384xbf16> to vector<64x384xbf16>
    %93 = vector.shape_cast %90 : vector<64x384xbf16> to vector<1x64x384xbf16>
    tpu.vector_store %arg9[%c2_58, %c8_59, %c0_60], %93 {strides = array<i32>} : memref<4x80x384xbf16, #tpu.memory_space<vmem>>, vector<1x64x384xbf16>,
    %c2_61 = arith.constant 2 : index
    %c0_62 = arith.constant 0 : index
    %c0_63 = arith.constant 0 : index
    %94 = vector.load %arg9[%c2_61, %c0_62, %c0_63] : memref<4x80x384xbf16, #tpu.memory_space<vmem>>, vector<1x8x384xbf16>
    %95 = vector.shape_cast %94 : vector<1x8x384xbf16> to vector<8x384xbf16>
    %96 = vector.shape_cast %21 : vector<8x384xbf16> to vector<1x8x384xbf16>
    tpu.vector_store %arg9[%c2_61, %c0_62, %c0_63], %96 {strides = array<i32>} : memref<4x80x384xbf16, #tpu.memory_space<vmem>>, vector<1x8x384xbf16>,
    %c2_64 = arith.constant 2 : index
    %c72_65 = arith.constant 72 : index
    %c0_66 = arith.constant 0 : index
    %97 = vector.load %arg9[%c2_64, %c72_65, %c0_66] : memref<4x80x384xbf16, #tpu.memory_space<vmem>>, vector<1x8x384xbf16>
    %98 = vector.shape_cast %97 : vector<1x8x384xbf16> to vector<8x384xbf16>
    %99 = vector.shape_cast %21 : vector<8x384xbf16> to vector<1x8x384xbf16>
    tpu.vector_store %arg9[%c2_64, %c72_65, %c0_66], %99 {strides = array<i32>} : memref<4x80x384xbf16, #tpu.memory_space<vmem>>, vector<1x8x384xbf16>,
    %c0_67 = arith.constant 0 : index
    %c3 = arith.constant 3 : index
    %c0_68 = arith.constant 0 : index
    %c0_69 = arith.constant 0 : index
    %100 = vector.load %arg1[%c0_67, %c3, %c0_68, %c0_69] : memref<1x4x64x256xbf16, #tpu.memory_space<vmem>>, vector<1x1x64x256xbf16>
    %101 = vector.shape_cast %100 : vector<1x1x64x256xbf16> to vector<64x256xbf16>
    %c0_70 = arith.constant 0 : index
    %c0_71 = arith.constant 0 : index
    %102 = vector.load %arg2[%c0_70, %c0_71] : memref<256x128xbf16, #tpu.memory_space<vmem>>, vector<256x128xbf16>
    %cst_72 = arith.constant dense<0.000000e+00> : vector<64x128xf32>
    %103 = tpu.matmul %101, %102, %cst_72 {dimension_numbers = #tpu.dot_dimension_numbers<[1], [0], [0], [1], [0, 0, 1, 1], [], []>} : vector<64x256xbf16>, vector<256x128xbf16>, vector<64x128xf32> -> vector<64x128xf32>
    %c0_73 = arith.constant 0 : index
    %c0_74 = arith.constant 0 : index
    %104 = vector.load %arg3[%c0_73, %c0_74] : memref<1x128xf32, #tpu.memory_space<vmem>>, vector<1x128xf32>
    %105 = vector.broadcast %104 : vector<1x128xf32> to vector<64x128xf32>
    %106 = arith.addf %103, %105 : vector<64x128xf32>
    %cst_75 = arith.constant 0.000000e+00 : f32
    %107 = vector.broadcast %cst_75 : f32 to vector<64x128xf32>
    %108 = arith.maximumf %106, %107 : vector<64x128xf32>
    %c1_i32_76 = arith.constant 1 : i32
    %109 = tpu.dynamic_rotate %108 by %c1_i32_76 dim 0 : vector<64x128xf32>, i32 -> vector<64x128xf32>
    %cst_77 = arith.constant 0.000000e+00 : f32
    %110 = vector.broadcast %cst_77 : f32 to vector<64x128xf32>
    %111 = arith.select %18, %109, %110 : vector<64x128xi1>, vector<64x128xf32>
    %c63_i32_78 = arith.constant 63 : i32
    %112 = tpu.dynamic_rotate %108 by %c63_i32_78 dim 0 : vector<64x128xf32>, i32 -> vector<64x128xf32>
    %cst_79 = arith.constant 0.000000e+00 : f32
    %113 = vector.broadcast %cst_79 : f32 to vector<64x128xf32>
    %114 = arith.select %20, %112, %113 : vector<64x128xi1>, vector<64x128xf32>
    %115 = tpu.concatenate %111, %108, %114 in 1 : vector<64x128xf32>, vector<64x128xf32>, vector<64x128xf32> -> vector<64x384xf32>
    %116 = arith.truncf %115 : vector<64x384xf32> to vector<64x384xbf16>
    %c3_80 = arith.constant 3 : index
    %c8_81 = arith.constant 8 : index
    %c0_82 = arith.constant 0 : index
    %117 = vector.load %arg9[%c3_80, %c8_81, %c0_82] : memref<4x80x384xbf16, #tpu.memory_space<vmem>>, vector<1x64x384xbf16>
    %118 = vector.shape_cast %117 : vector<1x64x384xbf16> to vector<64x384xbf16>
    %119 = vector.shape_cast %116 : vector<64x384xbf16> to vector<1x64x384xbf16>
    tpu.vector_store %arg9[%c3_80, %c8_81, %c0_82], %119 {strides = array<i32>} : memref<4x80x384xbf16, #tpu.memory_space<vmem>>, vector<1x64x384xbf16>,
    %c3_83 = arith.constant 3 : index
    %c0_84 = arith.constant 0 : index
    %c0_85 = arith.constant 0 : index
    %120 = vector.load %arg9[%c3_83, %c0_84, %c0_85] : memref<4x80x384xbf16, #tpu.memory_space<vmem>>, vector<1x8x384xbf16>
    %121 = vector.shape_cast %120 : vector<1x8x384xbf16> to vector<8x384xbf16>
    %122 = vector.shape_cast %21 : vector<8x384xbf16> to vector<1x8x384xbf16>
    tpu.vector_store %arg9[%c3_83, %c0_84, %c0_85], %122 {strides = array<i32>} : memref<4x80x384xbf16, #tpu.memory_space<vmem>>, vector<1x8x384xbf16>,
    %c3_86 = arith.constant 3 : index
    %c72_87 = arith.constant 72 : index
    %c0_88 = arith.constant 0 : index
    %123 = vector.load %arg9[%c3_86, %c72_87, %c0_88] : memref<4x80x384xbf16, #tpu.memory_space<vmem>>, vector<1x8x384xbf16>
    %124 = vector.shape_cast %123 : vector<1x8x384xbf16> to vector<8x384xbf16>
    %125 = vector.shape_cast %21 : vector<8x384xbf16> to vector<1x8x384xbf16>
    tpu.vector_store %arg9[%c3_86, %c72_87, %c0_88], %125 {strides = array<i32>} : memref<4x80x384xbf16, #tpu.memory_space<vmem>>, vector<1x8x384xbf16>,
    %c0_89 = arith.constant 0 : index
    %c0_90 = arith.constant 0 : index
    %c0_91 = arith.constant 0 : index
    %126 = vector.load %arg9[%c0_89, %c0_90, %c0_91] : memref<4x80x384xbf16, #tpu.memory_space<vmem>>, vector<1x64x384xbf16>
    %127 = vector.shape_cast %126 : vector<1x64x384xbf16> to vector<64x384xbf16>
    %c3_92 = arith.constant 3 : index
    %c0_93 = arith.constant 0 : index
    %c0_94 = arith.constant 0 : index
    %128 = vector.load %arg4[%c3_92, %c0_93, %c0_94] : memref<9x384x128xbf16, #tpu.memory_space<vmem>>, vector<1x384x128xbf16>
    %129 = vector.shape_cast %128 : vector<1x384x128xbf16> to vector<384x128xbf16>
    %cst_95 = arith.constant dense<0.000000e+00> : vector<64x128xf32>
    %130 = tpu.matmul %127, %129, %cst_95 {dimension_numbers = #tpu.dot_dimension_numbers<[1], [0], [0], [1], [0, 0, 1, 1], [], []>} : vector<64x384xbf16>, vector<384x128xbf16>, vector<64x128xf32> -> vector<64x128xf32>
    %c0_96 = arith.constant 0 : index
    %c8_97 = arith.constant 8 : index
    %c0_98 = arith.constant 0 : index
    %131 = vector.load %arg9[%c0_96, %c8_97, %c0_98] : memref<4x80x384xbf16, #tpu.memory_space<vmem>>, vector<1x64x384xbf16>
    %132 = vector.shape_cast %131 : vector<1x64x384xbf16> to vector<64x384xbf16>
    %c4 = arith.constant 4 : index
    %c0_99 = arith.constant 0 : index
    %c0_100 = arith.constant 0 : index
    %133 = vector.load %arg4[%c4, %c0_99, %c0_100] : memref<9x384x128xbf16, #tpu.memory_space<vmem>>, vector<1x384x128xbf16>
    %134 = vector.shape_cast %133 : vector<1x384x128xbf16> to vector<384x128xbf16>
    %cst_101 = arith.constant dense<0.000000e+00> : vector<64x128xf32>
    %135 = tpu.matmul %132, %134, %cst_101 {dimension_numbers = #tpu.dot_dimension_numbers<[1], [0], [0], [1], [0, 0, 1, 1], [], []>} : vector<64x384xbf16>, vector<384x128xbf16>, vector<64x128xf32> -> vector<64x128xf32>
    %136 = arith.addf %130, %135 : vector<64x128xf32>
    %c0_102 = arith.constant 0 : index
    %c16 = arith.constant 16 : index
    %c0_103 = arith.constant 0 : index
    %137 = vector.load %arg9[%c0_102, %c16, %c0_103] : memref<4x80x384xbf16, #tpu.memory_space<vmem>>, vector<1x64x384xbf16>
    %138 = vector.shape_cast %137 : vector<1x64x384xbf16> to vector<64x384xbf16>
    %c5 = arith.constant 5 : index
    %c0_104 = arith.constant 0 : index
    %c0_105 = arith.constant 0 : index
    %139 = vector.load %arg4[%c5, %c0_104, %c0_105] : memref<9x384x128xbf16, #tpu.memory_space<vmem>>, vector<1x384x128xbf16>
    %140 = vector.shape_cast %139 : vector<1x384x128xbf16> to vector<384x128xbf16>
    %cst_106 = arith.constant dense<0.000000e+00> : vector<64x128xf32>
    %141 = tpu.matmul %138, %140, %cst_106 {dimension_numbers = #tpu.dot_dimension_numbers<[1], [0], [0], [1], [0, 0, 1, 1], [], []>} : vector<64x384xbf16>, vector<384x128xbf16>, vector<64x128xf32> -> vector<64x128xf32>
    %142 = arith.addf %136, %141 : vector<64x128xf32>
    %c1_107 = arith.constant 1 : index
    %c0_108 = arith.constant 0 : index
    %c0_109 = arith.constant 0 : index
    %143 = vector.load %arg9[%c1_107, %c0_108, %c0_109] : memref<4x80x384xbf16, #tpu.memory_space<vmem>>, vector<1x64x384xbf16>
    %144 = vector.shape_cast %143 : vector<1x64x384xbf16> to vector<64x384xbf16>
    %c6 = arith.constant 6 : index
    %c0_110 = arith.constant 0 : index
    %c0_111 = arith.constant 0 : index
    %145 = vector.load %arg4[%c6, %c0_110, %c0_111] : memref<9x384x128xbf16, #tpu.memory_space<vmem>>, vector<1x384x128xbf16>
    %146 = vector.shape_cast %145 : vector<1x384x128xbf16> to vector<384x128xbf16>
    %cst_112 = arith.constant dense<0.000000e+00> : vector<64x128xf32>
    %147 = tpu.matmul %144, %146, %cst_112 {dimension_numbers = #tpu.dot_dimension_numbers<[1], [0], [0], [1], [0, 0, 1, 1], [], []>} : vector<64x384xbf16>, vector<384x128xbf16>, vector<64x128xf32> -> vector<64x128xf32>
    %148 = arith.addf %142, %147 : vector<64x128xf32>
    %c1_113 = arith.constant 1 : index
    %c8_114 = arith.constant 8 : index
    %c0_115 = arith.constant 0 : index
    %149 = vector.load %arg9[%c1_113, %c8_114, %c0_115] : memref<4x80x384xbf16, #tpu.memory_space<vmem>>, vector<1x64x384xbf16>
    %150 = vector.shape_cast %149 : vector<1x64x384xbf16> to vector<64x384xbf16>
    %c7 = arith.constant 7 : index
    %c0_116 = arith.constant 0 : index
    %c0_117 = arith.constant 0 : index
    %151 = vector.load %arg4[%c7, %c0_116, %c0_117] : memref<9x384x128xbf16, #tpu.memory_space<vmem>>, vector<1x384x128xbf16>
    %152 = vector.shape_cast %151 : vector<1x384x128xbf16> to vector<384x128xbf16>
    %cst_118 = arith.constant dense<0.000000e+00> : vector<64x128xf32>
    %153 = tpu.matmul %150, %152, %cst_118 {dimension_numbers = #tpu.dot_dimension_numbers<[1], [0], [0], [1], [0, 0, 1, 1], [], []>} : vector<64x384xbf16>, vector<384x128xbf16>, vector<64x128xf32> -> vector<64x128xf32>
    %154 = arith.addf %148, %153 : vector<64x128xf32>
    %c1_119 = arith.constant 1 : index
    %c16_120 = arith.constant 16 : index
    %c0_121 = arith.constant 0 : index
    %155 = vector.load %arg9[%c1_119, %c16_120, %c0_121] : memref<4x80x384xbf16, #tpu.memory_space<vmem>>, vector<1x64x384xbf16>
    %156 = vector.shape_cast %155 : vector<1x64x384xbf16> to vector<64x384xbf16>
    %c8_122 = arith.constant 8 : index
    %c0_123 = arith.constant 0 : index
    %c0_124 = arith.constant 0 : index
    %157 = vector.load %arg4[%c8_122, %c0_123, %c0_124] : memref<9x384x128xbf16, #tpu.memory_space<vmem>>, vector<1x384x128xbf16>
    %158 = vector.shape_cast %157 : vector<1x384x128xbf16> to vector<384x128xbf16>
    %cst_125 = arith.constant dense<0.000000e+00> : vector<64x128xf32>
    %159 = tpu.matmul %156, %158, %cst_125 {dimension_numbers = #tpu.dot_dimension_numbers<[1], [0], [0], [1], [0, 0, 1, 1], [], []>} : vector<64x384xbf16>, vector<384x128xbf16>, vector<64x128xf32> -> vector<64x128xf32>
    %160 = arith.addf %154, %159 : vector<64x128xf32>
    %c0_126 = arith.constant 0 : index
    %c0_127 = arith.constant 0 : index
    %161 = vector.load %arg5[%c0_126, %c0_127] : memref<1x128xf32, #tpu.memory_space<vmem>>, vector<1x128xf32>
    %162 = vector.broadcast %161 : vector<1x128xf32> to vector<64x128xf32>
    %163 = arith.addf %160, %162 : vector<64x128xf32>
    %cst_128 = arith.constant 0.000000e+00 : f32
    %164 = vector.broadcast %cst_128 : f32 to vector<64x128xf32>
    %165 = arith.maximumf %163, %164 : vector<64x128xf32>
    %166 = arith.truncf %165 : vector<64x128xf32> to vector<64x128xbf16>
    %c0_129 = arith.constant 0 : index
    %c0_130 = arith.constant 0 : index
    %167 = vector.load %arg6[%c0_129, %c0_130] : memref<128x256xbf16, #tpu.memory_space<vmem>>, vector<128x256xbf16>
    %cst_131 = arith.constant dense<0.000000e+00> : vector<64x256xf32>
    %168 = tpu.matmul %166, %167, %cst_131 {dimension_numbers = #tpu.dot_dimension_numbers<[1], [0], [0], [1], [0, 0, 1, 1], [], []>} : vector<64x128xbf16>, vector<128x256xbf16>, vector<64x256xf32> -> vector<64x256xf32>
    %c0_132 = arith.constant 0 : index
    %c0_133 = arith.constant 0 : index
    %169 = vector.load %arg7[%c0_132, %c0_133] : memref<1x256xf32, #tpu.memory_space<vmem>>, vector<1x256xf32>
    %170 = vector.broadcast %169 : vector<1x256xf32> to vector<64x256xf32>
    %171 = arith.addf %168, %170 : vector<64x256xf32>
    %c0_134 = arith.constant 0 : index
    %c0_135 = arith.constant 0 : index
    %c0_136 = arith.constant 0 : index
    %c0_137 = arith.constant 0 : index
    %172 = vector.load %arg1[%c0_134, %c0_135, %c0_136, %c0_137] : memref<1x4x64x256xbf16, #tpu.memory_space<vmem>>, vector<1x1x64x256xbf16>
    %173 = vector.shape_cast %172 : vector<1x1x64x256xbf16> to vector<64x256xbf16>
    %174 = arith.extf %173 : vector<64x256xbf16> to vector<64x256xf32>
    %175 = arith.addf %171, %174 : vector<64x256xf32>
    %cst_138 = arith.constant 0.000000e+00 : f32
    %176 = vector.broadcast %cst_138 : f32 to vector<64x256xf32>
    %177 = arith.maximumf %175, %176 : vector<64x256xf32>
    %178 = arith.truncf %177 : vector<64x256xf32> to vector<64x256xbf16>
    %c0_139 = arith.constant 0 : index
    %c0_140 = arith.constant 0 : index
    %c0_141 = arith.constant 0 : index
    %c0_142 = arith.constant 0 : index
    %179 = vector.load %arg8[%c0_139, %c0_140, %c0_141, %c0_142] : memref<1x4x64x256xbf16, #tpu.memory_space<vmem>>, vector<1x1x64x256xbf16>
    %180 = vector.shape_cast %179 : vector<1x1x64x256xbf16> to vector<64x256xbf16>
    %181 = vector.shape_cast %178 : vector<64x256xbf16> to vector<1x1x64x256xbf16>
    tpu.vector_store %arg8[%c0_139, %c0_140, %c0_141, %c0_142], %181 {strides = array<i32>} : memref<1x4x64x256xbf16, #tpu.memory_space<vmem>>, vector<1x1x64x256xbf16>,
    %c0_143 = arith.constant 0 : index
    %c0_144 = arith.constant 0 : index
    %c0_145 = arith.constant 0 : index
    %182 = vector.load %arg9[%c0_143, %c0_144, %c0_145] : memref<4x80x384xbf16, #tpu.memory_space<vmem>>, vector<1x64x384xbf16>
    %183 = vector.shape_cast %182 : vector<1x64x384xbf16> to vector<64x384xbf16>
    %c0_146 = arith.constant 0 : index
    %c0_147 = arith.constant 0 : index
    %c0_148 = arith.constant 0 : index
    %184 = vector.load %arg4[%c0_146, %c0_147, %c0_148] : memref<9x384x128xbf16, #tpu.memory_space<vmem>>, vector<1x384x128xbf16>
    %185 = vector.shape_cast %184 : vector<1x384x128xbf16> to vector<384x128xbf16>
    %cst_149 = arith.constant dense<0.000000e+00> : vector<64x128xf32>
    %186 = tpu.matmul %183, %185, %cst_149 {dimension_numbers = #tpu.dot_dimension_numbers<[1], [0], [0], [1], [0, 0, 1, 1], [], []>} : vector<64x384xbf16>, vector<384x128xbf16>, vector<64x128xf32> -> vector<64x128xf32>
    %c0_150 = arith.constant 0 : index
    %c8_151 = arith.constant 8 : index
    %c0_152 = arith.constant 0 : index
    %187 = vector.load %arg9[%c0_150, %c8_151, %c0_152] : memref<4x80x384xbf16, #tpu.memory_space<vmem>>, vector<1x64x384xbf16>
    %188 = vector.shape_cast %187 : vector<1x64x384xbf16> to vector<64x384xbf16>
    %c1_153 = arith.constant 1 : index
    %c0_154 = arith.constant 0 : index
    %c0_155 = arith.constant 0 : index
    %189 = vector.load %arg4[%c1_153, %c0_154, %c0_155] : memref<9x384x128xbf16, #tpu.memory_space<vmem>>, vector<1x384x128xbf16>
    %190 = vector.shape_cast %189 : vector<1x384x128xbf16> to vector<384x128xbf16>
    %cst_156 = arith.constant dense<0.000000e+00> : vector<64x128xf32>
    %191 = tpu.matmul %188, %190, %cst_156 {dimension_numbers = #tpu.dot_dimension_numbers<[1], [0], [0], [1], [0, 0, 1, 1], [], []>} : vector<64x384xbf16>, vector<384x128xbf16>, vector<64x128xf32> -> vector<64x128xf32>
    %192 = arith.addf %186, %191 : vector<64x128xf32>
    %c0_157 = arith.constant 0 : index
    %c16_158 = arith.constant 16 : index
    %c0_159 = arith.constant 0 : index
    %193 = vector.load %arg9[%c0_157, %c16_158, %c0_159] : memref<4x80x384xbf16, #tpu.memory_space<vmem>>, vector<1x64x384xbf16>
    %194 = vector.shape_cast %193 : vector<1x64x384xbf16> to vector<64x384xbf16>
    %c2_160 = arith.constant 2 : index
    %c0_161 = arith.constant 0 : index
    %c0_162 = arith.constant 0 : index
    %195 = vector.load %arg4[%c2_160, %c0_161, %c0_162] : memref<9x384x128xbf16, #tpu.memory_space<vmem>>, vector<1x384x128xbf16>
    %196 = vector.shape_cast %195 : vector<1x384x128xbf16> to vector<384x128xbf16>
    %cst_163 = arith.constant dense<0.000000e+00> : vector<64x128xf32>
    %197 = tpu.matmul %194, %196, %cst_163 {dimension_numbers = #tpu.dot_dimension_numbers<[1], [0], [0], [1], [0, 0, 1, 1], [], []>} : vector<64x384xbf16>, vector<384x128xbf16>, vector<64x128xf32> -> vector<64x128xf32>
    %198 = arith.addf %192, %197 : vector<64x128xf32>
    %c1_164 = arith.constant 1 : index
    %c0_165 = arith.constant 0 : index
    %c0_166 = arith.constant 0 : index
    %199 = vector.load %arg9[%c1_164, %c0_165, %c0_166] : memref<4x80x384xbf16, #tpu.memory_space<vmem>>, vector<1x64x384xbf16>
    %200 = vector.shape_cast %199 : vector<1x64x384xbf16> to vector<64x384xbf16>
    %c3_167 = arith.constant 3 : index
    %c0_168 = arith.constant 0 : index
    %c0_169 = arith.constant 0 : index
    %201 = vector.load %arg4[%c3_167, %c0_168, %c0_169] : memref<9x384x128xbf16, #tpu.memory_space<vmem>>, vector<1x384x128xbf16>
    %202 = vector.shape_cast %201 : vector<1x384x128xbf16> to vector<384x128xbf16>
    %cst_170 = arith.constant dense<0.000000e+00> : vector<64x128xf32>
    %203 = tpu.matmul %200, %202, %cst_170 {dimension_numbers = #tpu.dot_dimension_numbers<[1], [0], [0], [1], [0, 0, 1, 1], [], []>} : vector<64x384xbf16>, vector<384x128xbf16>, vector<64x128xf32> -> vector<64x128xf32>
    %204 = arith.addf %198, %203 : vector<64x128xf32>
    %c1_171 = arith.constant 1 : index
    %c8_172 = arith.constant 8 : index
    %c0_173 = arith.constant 0 : index
    %205 = vector.load %arg9[%c1_171, %c8_172, %c0_173] : memref<4x80x384xbf16, #tpu.memory_space<vmem>>, vector<1x64x384xbf16>
    %206 = vector.shape_cast %205 : vector<1x64x384xbf16> to vector<64x384xbf16>
    %c4_174 = arith.constant 4 : index
    %c0_175 = arith.constant 0 : index
    %c0_176 = arith.constant 0 : index
    %207 = vector.load %arg4[%c4_174, %c0_175, %c0_176] : memref<9x384x128xbf16, #tpu.memory_space<vmem>>, vector<1x384x128xbf16>
    %208 = vector.shape_cast %207 : vector<1x384x128xbf16> to vector<384x128xbf16>
    %cst_177 = arith.constant dense<0.000000e+00> : vector<64x128xf32>
    %209 = tpu.matmul %206, %208, %cst_177 {dimension_numbers = #tpu.dot_dimension_numbers<[1], [0], [0], [1], [0, 0, 1, 1], [], []>} : vector<64x384xbf16>, vector<384x128xbf16>, vector<64x128xf32> -> vector<64x128xf32>
    %210 = arith.addf %204, %209 : vector<64x128xf32>
    %c1_178 = arith.constant 1 : index
    %c16_179 = arith.constant 16 : index
    %c0_180 = arith.constant 0 : index
    %211 = vector.load %arg9[%c1_178, %c16_179, %c0_180] : memref<4x80x384xbf16, #tpu.memory_space<vmem>>, vector<1x64x384xbf16>
    %212 = vector.shape_cast %211 : vector<1x64x384xbf16> to vector<64x384xbf16>
    %c5_181 = arith.constant 5 : index
    %c0_182 = arith.constant 0 : index
    %c0_183 = arith.constant 0 : index
    %213 = vector.load %arg4[%c5_181, %c0_182, %c0_183] : memref<9x384x128xbf16, #tpu.memory_space<vmem>>, vector<1x384x128xbf16>
    %214 = vector.shape_cast %213 : vector<1x384x128xbf16> to vector<384x128xbf16>
    %cst_184 = arith.constant dense<0.000000e+00> : vector<64x128xf32>
    %215 = tpu.matmul %212, %214, %cst_184 {dimension_numbers = #tpu.dot_dimension_numbers<[1], [0], [0], [1], [0, 0, 1, 1], [], []>} : vector<64x384xbf16>, vector<384x128xbf16>, vector<64x128xf32> -> vector<64x128xf32>
    %216 = arith.addf %210, %215 : vector<64x128xf32>
    %c2_185 = arith.constant 2 : index
    %c0_186 = arith.constant 0 : index
    %c0_187 = arith.constant 0 : index
    %217 = vector.load %arg9[%c2_185, %c0_186, %c0_187] : memref<4x80x384xbf16, #tpu.memory_space<vmem>>, vector<1x64x384xbf16>
    %218 = vector.shape_cast %217 : vector<1x64x384xbf16> to vector<64x384xbf16>
    %c6_188 = arith.constant 6 : index
    %c0_189 = arith.constant 0 : index
    %c0_190 = arith.constant 0 : index
    %219 = vector.load %arg4[%c6_188, %c0_189, %c0_190] : memref<9x384x128xbf16, #tpu.memory_space<vmem>>, vector<1x384x128xbf16>
    %220 = vector.shape_cast %219 : vector<1x384x128xbf16> to vector<384x128xbf16>
    %cst_191 = arith.constant dense<0.000000e+00> : vector<64x128xf32>
    %221 = tpu.matmul %218, %220, %cst_191 {dimension_numbers = #tpu.dot_dimension_numbers<[1], [0], [0], [1], [0, 0, 1, 1], [], []>} : vector<64x384xbf16>, vector<384x128xbf16>, vector<64x128xf32> -> vector<64x128xf32>
    %222 = arith.addf %216, %221 : vector<64x128xf32>
    %c2_192 = arith.constant 2 : index
    %c8_193 = arith.constant 8 : index
    %c0_194 = arith.constant 0 : index
    %223 = vector.load %arg9[%c2_192, %c8_193, %c0_194] : memref<4x80x384xbf16, #tpu.memory_space<vmem>>, vector<1x64x384xbf16>
    %224 = vector.shape_cast %223 : vector<1x64x384xbf16> to vector<64x384xbf16>
    %c7_195 = arith.constant 7 : index
    %c0_196 = arith.constant 0 : index
    %c0_197 = arith.constant 0 : index
    %225 = vector.load %arg4[%c7_195, %c0_196, %c0_197] : memref<9x384x128xbf16, #tpu.memory_space<vmem>>, vector<1x384x128xbf16>
    %226 = vector.shape_cast %225 : vector<1x384x128xbf16> to vector<384x128xbf16>
    %cst_198 = arith.constant dense<0.000000e+00> : vector<64x128xf32>
    %227 = tpu.matmul %224, %226, %cst_198 {dimension_numbers = #tpu.dot_dimension_numbers<[1], [0], [0], [1], [0, 0, 1, 1], [], []>} : vector<64x384xbf16>, vector<384x128xbf16>, vector<64x128xf32> -> vector<64x128xf32>
    %228 = arith.addf %222, %227 : vector<64x128xf32>
    %c2_199 = arith.constant 2 : index
    %c16_200 = arith.constant 16 : index
    %c0_201 = arith.constant 0 : index
    %229 = vector.load %arg9[%c2_199, %c16_200, %c0_201] : memref<4x80x384xbf16, #tpu.memory_space<vmem>>, vector<1x64x384xbf16>
    %230 = vector.shape_cast %229 : vector<1x64x384xbf16> to vector<64x384xbf16>
    %c8_202 = arith.constant 8 : index
    %c0_203 = arith.constant 0 : index
    %c0_204 = arith.constant 0 : index
    %231 = vector.load %arg4[%c8_202, %c0_203, %c0_204] : memref<9x384x128xbf16, #tpu.memory_space<vmem>>, vector<1x384x128xbf16>
    %232 = vector.shape_cast %231 : vector<1x384x128xbf16> to vector<384x128xbf16>
    %cst_205 = arith.constant dense<0.000000e+00> : vector<64x128xf32>
    %233 = tpu.matmul %230, %232, %cst_205 {dimension_numbers = #tpu.dot_dimension_numbers<[1], [0], [0], [1], [0, 0, 1, 1], [], []>} : vector<64x384xbf16>, vector<384x128xbf16>, vector<64x128xf32> -> vector<64x128xf32>
    %234 = arith.addf %228, %233 : vector<64x128xf32>
    %c0_206 = arith.constant 0 : index
    %c0_207 = arith.constant 0 : index
    %235 = vector.load %arg5[%c0_206, %c0_207] : memref<1x128xf32, #tpu.memory_space<vmem>>, vector<1x128xf32>
    %236 = vector.broadcast %235 : vector<1x128xf32> to vector<64x128xf32>
    %237 = arith.addf %234, %236 : vector<64x128xf32>
    %cst_208 = arith.constant 0.000000e+00 : f32
    %238 = vector.broadcast %cst_208 : f32 to vector<64x128xf32>
    %239 = arith.maximumf %237, %238 : vector<64x128xf32>
    %240 = arith.truncf %239 : vector<64x128xf32> to vector<64x128xbf16>
    %c0_209 = arith.constant 0 : index
    %c0_210 = arith.constant 0 : index
    %241 = vector.load %arg6[%c0_209, %c0_210] : memref<128x256xbf16, #tpu.memory_space<vmem>>, vector<128x256xbf16>
    %cst_211 = arith.constant dense<0.000000e+00> : vector<64x256xf32>
    %242 = tpu.matmul %240, %241, %cst_211 {dimension_numbers = #tpu.dot_dimension_numbers<[1], [0], [0], [1], [0, 0, 1, 1], [], []>} : vector<64x128xbf16>, vector<128x256xbf16>, vector<64x256xf32> -> vector<64x256xf32>
    %c0_212 = arith.constant 0 : index
    %c0_213 = arith.constant 0 : index
    %243 = vector.load %arg7[%c0_212, %c0_213] : memref<1x256xf32, #tpu.memory_space<vmem>>, vector<1x256xf32>
    %244 = vector.broadcast %243 : vector<1x256xf32> to vector<64x256xf32>
    %245 = arith.addf %242, %244 : vector<64x256xf32>
    %c0_214 = arith.constant 0 : index
    %c1_215 = arith.constant 1 : index
    %c0_216 = arith.constant 0 : index
    %c0_217 = arith.constant 0 : index
    %246 = vector.load %arg1[%c0_214, %c1_215, %c0_216, %c0_217] : memref<1x4x64x256xbf16, #tpu.memory_space<vmem>>, vector<1x1x64x256xbf16>
    %247 = vector.shape_cast %246 : vector<1x1x64x256xbf16> to vector<64x256xbf16>
    %248 = arith.extf %247 : vector<64x256xbf16> to vector<64x256xf32>
    %249 = arith.addf %245, %248 : vector<64x256xf32>
    %cst_218 = arith.constant 0.000000e+00 : f32
    %250 = vector.broadcast %cst_218 : f32 to vector<64x256xf32>
    %251 = arith.maximumf %249, %250 : vector<64x256xf32>
    %252 = arith.truncf %251 : vector<64x256xf32> to vector<64x256xbf16>
    %c0_219 = arith.constant 0 : index
    %c1_220 = arith.constant 1 : index
    %c0_221 = arith.constant 0 : index
    %c0_222 = arith.constant 0 : index
    %253 = vector.load %arg8[%c0_219, %c1_220, %c0_221, %c0_222] : memref<1x4x64x256xbf16, #tpu.memory_space<vmem>>, vector<1x1x64x256xbf16>
    %254 = vector.shape_cast %253 : vector<1x1x64x256xbf16> to vector<64x256xbf16>
    %255 = vector.shape_cast %252 : vector<64x256xbf16> to vector<1x1x64x256xbf16>
    tpu.vector_store %arg8[%c0_219, %c1_220, %c0_221, %c0_222], %255 {strides = array<i32>} : memref<1x4x64x256xbf16, #tpu.memory_space<vmem>>, vector<1x1x64x256xbf16>,
    %c1_223 = arith.constant 1 : index
    %c0_224 = arith.constant 0 : index
    %c0_225 = arith.constant 0 : index
    %256 = vector.load %arg9[%c1_223, %c0_224, %c0_225] : memref<4x80x384xbf16, #tpu.memory_space<vmem>>, vector<1x64x384xbf16>
    %257 = vector.shape_cast %256 : vector<1x64x384xbf16> to vector<64x384xbf16>
    %c0_226 = arith.constant 0 : index
    %c0_227 = arith.constant 0 : index
    %c0_228 = arith.constant 0 : index
    %258 = vector.load %arg4[%c0_226, %c0_227, %c0_228] : memref<9x384x128xbf16, #tpu.memory_space<vmem>>, vector<1x384x128xbf16>
    %259 = vector.shape_cast %258 : vector<1x384x128xbf16> to vector<384x128xbf16>
    %cst_229 = arith.constant dense<0.000000e+00> : vector<64x128xf32>
    %260 = tpu.matmul %257, %259, %cst_229 {dimension_numbers = #tpu.dot_dimension_numbers<[1], [0], [0], [1], [0, 0, 1, 1], [], []>} : vector<64x384xbf16>, vector<384x128xbf16>, vector<64x128xf32> -> vector<64x128xf32>
    %c1_230 = arith.constant 1 : index
    %c8_231 = arith.constant 8 : index
    %c0_232 = arith.constant 0 : index
    %261 = vector.load %arg9[%c1_230, %c8_231, %c0_232] : memref<4x80x384xbf16, #tpu.memory_space<vmem>>, vector<1x64x384xbf16>
    %262 = vector.shape_cast %261 : vector<1x64x384xbf16> to vector<64x384xbf16>
    %c1_233 = arith.constant 1 : index
    %c0_234 = arith.constant 0 : index
    %c0_235 = arith.constant 0 : index
    %263 = vector.load %arg4[%c1_233, %c0_234, %c0_235] : memref<9x384x128xbf16, #tpu.memory_space<vmem>>, vector<1x384x128xbf16>
    %264 = vector.shape_cast %263 : vector<1x384x128xbf16> to vector<384x128xbf16>
    %cst_236 = arith.constant dense<0.000000e+00> : vector<64x128xf32>
    %265 = tpu.matmul %262, %264, %cst_236 {dimension_numbers = #tpu.dot_dimension_numbers<[1], [0], [0], [1], [0, 0, 1, 1], [], []>} : vector<64x384xbf16>, vector<384x128xbf16>, vector<64x128xf32> -> vector<64x128xf32>
    %266 = arith.addf %260, %265 : vector<64x128xf32>
    %c1_237 = arith.constant 1 : index
    %c16_238 = arith.constant 16 : index
    %c0_239 = arith.constant 0 : index
    %267 = vector.load %arg9[%c1_237, %c16_238, %c0_239] : memref<4x80x384xbf16, #tpu.memory_space<vmem>>, vector<1x64x384xbf16>
    %268 = vector.shape_cast %267 : vector<1x64x384xbf16> to vector<64x384xbf16>
    %c2_240 = arith.constant 2 : index
    %c0_241 = arith.constant 0 : index
    %c0_242 = arith.constant 0 : index
    %269 = vector.load %arg4[%c2_240, %c0_241, %c0_242] : memref<9x384x128xbf16, #tpu.memory_space<vmem>>, vector<1x384x128xbf16>
    %270 = vector.shape_cast %269 : vector<1x384x128xbf16> to vector<384x128xbf16>
    %cst_243 = arith.constant dense<0.000000e+00> : vector<64x128xf32>
    %271 = tpu.matmul %268, %270, %cst_243 {dimension_numbers = #tpu.dot_dimension_numbers<[1], [0], [0], [1], [0, 0, 1, 1], [], []>} : vector<64x384xbf16>, vector<384x128xbf16>, vector<64x128xf32> -> vector<64x128xf32>
    %272 = arith.addf %266, %271 : vector<64x128xf32>
    %c2_244 = arith.constant 2 : index
    %c0_245 = arith.constant 0 : index
    %c0_246 = arith.constant 0 : index
    %273 = vector.load %arg9[%c2_244, %c0_245, %c0_246] : memref<4x80x384xbf16, #tpu.memory_space<vmem>>, vector<1x64x384xbf16>
    %274 = vector.shape_cast %273 : vector<1x64x384xbf16> to vector<64x384xbf16>
    %c3_247 = arith.constant 3 : index
    %c0_248 = arith.constant 0 : index
    %c0_249 = arith.constant 0 : index
    %275 = vector.load %arg4[%c3_247, %c0_248, %c0_249] : memref<9x384x128xbf16, #tpu.memory_space<vmem>>, vector<1x384x128xbf16>
    %276 = vector.shape_cast %275 : vector<1x384x128xbf16> to vector<384x128xbf16>
    %cst_250 = arith.constant dense<0.000000e+00> : vector<64x128xf32>
    %277 = tpu.matmul %274, %276, %cst_250 {dimension_numbers = #tpu.dot_dimension_numbers<[1], [0], [0], [1], [0, 0, 1, 1], [], []>} : vector<64x384xbf16>, vector<384x128xbf16>, vector<64x128xf32> -> vector<64x128xf32>
    %278 = arith.addf %272, %277 : vector<64x128xf32>
    %c2_251 = arith.constant 2 : index
    %c8_252 = arith.constant 8 : index
    %c0_253 = arith.constant 0 : index
    %279 = vector.load %arg9[%c2_251, %c8_252, %c0_253] : memref<4x80x384xbf16, #tpu.memory_space<vmem>>, vector<1x64x384xbf16>
    %280 = vector.shape_cast %279 : vector<1x64x384xbf16> to vector<64x384xbf16>
    %c4_254 = arith.constant 4 : index
    %c0_255 = arith.constant 0 : index
    %c0_256 = arith.constant 0 : index
    %281 = vector.load %arg4[%c4_254, %c0_255, %c0_256] : memref<9x384x128xbf16, #tpu.memory_space<vmem>>, vector<1x384x128xbf16>
    %282 = vector.shape_cast %281 : vector<1x384x128xbf16> to vector<384x128xbf16>
    %cst_257 = arith.constant dense<0.000000e+00> : vector<64x128xf32>
    %283 = tpu.matmul %280, %282, %cst_257 {dimension_numbers = #tpu.dot_dimension_numbers<[1], [0], [0], [1], [0, 0, 1, 1], [], []>} : vector<64x384xbf16>, vector<384x128xbf16>, vector<64x128xf32> -> vector<64x128xf32>
    %284 = arith.addf %278, %283 : vector<64x128xf32>
    %c2_258 = arith.constant 2 : index
    %c16_259 = arith.constant 16 : index
    %c0_260 = arith.constant 0 : index
    %285 = vector.load %arg9[%c2_258, %c16_259, %c0_260] : memref<4x80x384xbf16, #tpu.memory_space<vmem>>, vector<1x64x384xbf16>
    %286 = vector.shape_cast %285 : vector<1x64x384xbf16> to vector<64x384xbf16>
    %c5_261 = arith.constant 5 : index
    %c0_262 = arith.constant 0 : index
    %c0_263 = arith.constant 0 : index
    %287 = vector.load %arg4[%c5_261, %c0_262, %c0_263] : memref<9x384x128xbf16, #tpu.memory_space<vmem>>, vector<1x384x128xbf16>
    %288 = vector.shape_cast %287 : vector<1x384x128xbf16> to vector<384x128xbf16>
    %cst_264 = arith.constant dense<0.000000e+00> : vector<64x128xf32>
    %289 = tpu.matmul %286, %288, %cst_264 {dimension_numbers = #tpu.dot_dimension_numbers<[1], [0], [0], [1], [0, 0, 1, 1], [], []>} : vector<64x384xbf16>, vector<384x128xbf16>, vector<64x128xf32> -> vector<64x128xf32>
    %290 = arith.addf %284, %289 : vector<64x128xf32>
    %c3_265 = arith.constant 3 : index
    %c0_266 = arith.constant 0 : index
    %c0_267 = arith.constant 0 : index
    %291 = vector.load %arg9[%c3_265, %c0_266, %c0_267] : memref<4x80x384xbf16, #tpu.memory_space<vmem>>, vector<1x64x384xbf16>
    %292 = vector.shape_cast %291 : vector<1x64x384xbf16> to vector<64x384xbf16>
    %c6_268 = arith.constant 6 : index
    %c0_269 = arith.constant 0 : index
    %c0_270 = arith.constant 0 : index
    %293 = vector.load %arg4[%c6_268, %c0_269, %c0_270] : memref<9x384x128xbf16, #tpu.memory_space<vmem>>, vector<1x384x128xbf16>
    %294 = vector.shape_cast %293 : vector<1x384x128xbf16> to vector<384x128xbf16>
    %cst_271 = arith.constant dense<0.000000e+00> : vector<64x128xf32>
    %295 = tpu.matmul %292, %294, %cst_271 {dimension_numbers = #tpu.dot_dimension_numbers<[1], [0], [0], [1], [0, 0, 1, 1], [], []>} : vector<64x384xbf16>, vector<384x128xbf16>, vector<64x128xf32> -> vector<64x128xf32>
    %296 = arith.addf %290, %295 : vector<64x128xf32>
    %c3_272 = arith.constant 3 : index
    %c8_273 = arith.constant 8 : index
    %c0_274 = arith.constant 0 : index
    %297 = vector.load %arg9[%c3_272, %c8_273, %c0_274] : memref<4x80x384xbf16, #tpu.memory_space<vmem>>, vector<1x64x384xbf16>
    %298 = vector.shape_cast %297 : vector<1x64x384xbf16> to vector<64x384xbf16>
    %c7_275 = arith.constant 7 : index
    %c0_276 = arith.constant 0 : index
    %c0_277 = arith.constant 0 : index
    %299 = vector.load %arg4[%c7_275, %c0_276, %c0_277] : memref<9x384x128xbf16, #tpu.memory_space<vmem>>, vector<1x384x128xbf16>
    %300 = vector.shape_cast %299 : vector<1x384x128xbf16> to vector<384x128xbf16>
    %cst_278 = arith.constant dense<0.000000e+00> : vector<64x128xf32>
    %301 = tpu.matmul %298, %300, %cst_278 {dimension_numbers = #tpu.dot_dimension_numbers<[1], [0], [0], [1], [0, 0, 1, 1], [], []>} : vector<64x384xbf16>, vector<384x128xbf16>, vector<64x128xf32> -> vector<64x128xf32>
    %302 = arith.addf %296, %301 : vector<64x128xf32>
    %c3_279 = arith.constant 3 : index
    %c16_280 = arith.constant 16 : index
    %c0_281 = arith.constant 0 : index
    %303 = vector.load %arg9[%c3_279, %c16_280, %c0_281] : memref<4x80x384xbf16, #tpu.memory_space<vmem>>, vector<1x64x384xbf16>
    %304 = vector.shape_cast %303 : vector<1x64x384xbf16> to vector<64x384xbf16>
    %c8_282 = arith.constant 8 : index
    %c0_283 = arith.constant 0 : index
    %c0_284 = arith.constant 0 : index
    %305 = vector.load %arg4[%c8_282, %c0_283, %c0_284] : memref<9x384x128xbf16, #tpu.memory_space<vmem>>, vector<1x384x128xbf16>
    %306 = vector.shape_cast %305 : vector<1x384x128xbf16> to vector<384x128xbf16>
    %cst_285 = arith.constant dense<0.000000e+00> : vector<64x128xf32>
    %307 = tpu.matmul %304, %306, %cst_285 {dimension_numbers = #tpu.dot_dimension_numbers<[1], [0], [0], [1], [0, 0, 1, 1], [], []>} : vector<64x384xbf16>, vector<384x128xbf16>, vector<64x128xf32> -> vector<64x128xf32>
    %308 = arith.addf %302, %307 : vector<64x128xf32>
    %c0_286 = arith.constant 0 : index
    %c0_287 = arith.constant 0 : index
    %309 = vector.load %arg5[%c0_286, %c0_287] : memref<1x128xf32, #tpu.memory_space<vmem>>, vector<1x128xf32>
    %310 = vector.broadcast %309 : vector<1x128xf32> to vector<64x128xf32>
    %311 = arith.addf %308, %310 : vector<64x128xf32>
    %cst_288 = arith.constant 0.000000e+00 : f32
    %312 = vector.broadcast %cst_288 : f32 to vector<64x128xf32>
    %313 = arith.maximumf %311, %312 : vector<64x128xf32>
    %314 = arith.truncf %313 : vector<64x128xf32> to vector<64x128xbf16>
    %c0_289 = arith.constant 0 : index
    %c0_290 = arith.constant 0 : index
    %315 = vector.load %arg6[%c0_289, %c0_290] : memref<128x256xbf16, #tpu.memory_space<vmem>>, vector<128x256xbf16>
    %cst_291 = arith.constant dense<0.000000e+00> : vector<64x256xf32>
    %316 = tpu.matmul %314, %315, %cst_291 {dimension_numbers = #tpu.dot_dimension_numbers<[1], [0], [0], [1], [0, 0, 1, 1], [], []>} : vector<64x128xbf16>, vector<128x256xbf16>, vector<64x256xf32> -> vector<64x256xf32>
    %c0_292 = arith.constant 0 : index
    %c0_293 = arith.constant 0 : index
    %317 = vector.load %arg7[%c0_292, %c0_293] : memref<1x256xf32, #tpu.memory_space<vmem>>, vector<1x256xf32>
    %318 = vector.broadcast %317 : vector<1x256xf32> to vector<64x256xf32>
    %319 = arith.addf %316, %318 : vector<64x256xf32>
    %c0_294 = arith.constant 0 : index
    %c2_295 = arith.constant 2 : index
    %c0_296 = arith.constant 0 : index
    %c0_297 = arith.constant 0 : index
    %320 = vector.load %arg1[%c0_294, %c2_295, %c0_296, %c0_297] : memref<1x4x64x256xbf16, #tpu.memory_space<vmem>>, vector<1x1x64x256xbf16>
    %321 = vector.shape_cast %320 : vector<1x1x64x256xbf16> to vector<64x256xbf16>
    %322 = arith.extf %321 : vector<64x256xbf16> to vector<64x256xf32>
    %323 = arith.addf %319, %322 : vector<64x256xf32>
    %cst_298 = arith.constant 0.000000e+00 : f32
    %324 = vector.broadcast %cst_298 : f32 to vector<64x256xf32>
    %325 = arith.maximumf %323, %324 : vector<64x256xf32>
    %326 = arith.truncf %325 : vector<64x256xf32> to vector<64x256xbf16>
    %c0_299 = arith.constant 0 : index
    %c2_300 = arith.constant 2 : index
    %c0_301 = arith.constant 0 : index
    %c0_302 = arith.constant 0 : index
    %327 = vector.load %arg8[%c0_299, %c2_300, %c0_301, %c0_302] : memref<1x4x64x256xbf16, #tpu.memory_space<vmem>>, vector<1x1x64x256xbf16>
    %328 = vector.shape_cast %327 : vector<1x1x64x256xbf16> to vector<64x256xbf16>
    %329 = vector.shape_cast %326 : vector<64x256xbf16> to vector<1x1x64x256xbf16>
    tpu.vector_store %arg8[%c0_299, %c2_300, %c0_301, %c0_302], %329 {strides = array<i32>} : memref<1x4x64x256xbf16, #tpu.memory_space<vmem>>, vector<1x1x64x256xbf16>,
    %c2_303 = arith.constant 2 : index
    %c0_304 = arith.constant 0 : index
    %c0_305 = arith.constant 0 : index
    %330 = vector.load %arg9[%c2_303, %c0_304, %c0_305] : memref<4x80x384xbf16, #tpu.memory_space<vmem>>, vector<1x64x384xbf16>
    %331 = vector.shape_cast %330 : vector<1x64x384xbf16> to vector<64x384xbf16>
    %c0_306 = arith.constant 0 : index
    %c0_307 = arith.constant 0 : index
    %c0_308 = arith.constant 0 : index
    %332 = vector.load %arg4[%c0_306, %c0_307, %c0_308] : memref<9x384x128xbf16, #tpu.memory_space<vmem>>, vector<1x384x128xbf16>
    %333 = vector.shape_cast %332 : vector<1x384x128xbf16> to vector<384x128xbf16>
    %cst_309 = arith.constant dense<0.000000e+00> : vector<64x128xf32>
    %334 = tpu.matmul %331, %333, %cst_309 {dimension_numbers = #tpu.dot_dimension_numbers<[1], [0], [0], [1], [0, 0, 1, 1], [], []>} : vector<64x384xbf16>, vector<384x128xbf16>, vector<64x128xf32> -> vector<64x128xf32>
    %c2_310 = arith.constant 2 : index
    %c8_311 = arith.constant 8 : index
    %c0_312 = arith.constant 0 : index
    %335 = vector.load %arg9[%c2_310, %c8_311, %c0_312] : memref<4x80x384xbf16, #tpu.memory_space<vmem>>, vector<1x64x384xbf16>
    %336 = vector.shape_cast %335 : vector<1x64x384xbf16> to vector<64x384xbf16>
    %c1_313 = arith.constant 1 : index
    %c0_314 = arith.constant 0 : index
    %c0_315 = arith.constant 0 : index
    %337 = vector.load %arg4[%c1_313, %c0_314, %c0_315] : memref<9x384x128xbf16, #tpu.memory_space<vmem>>, vector<1x384x128xbf16>
    %338 = vector.shape_cast %337 : vector<1x384x128xbf16> to vector<384x128xbf16>
    %cst_316 = arith.constant dense<0.000000e+00> : vector<64x128xf32>
    %339 = tpu.matmul %336, %338, %cst_316 {dimension_numbers = #tpu.dot_dimension_numbers<[1], [0], [0], [1], [0, 0, 1, 1], [], []>} : vector<64x384xbf16>, vector<384x128xbf16>, vector<64x128xf32> -> vector<64x128xf32>
    %340 = arith.addf %334, %339 : vector<64x128xf32>
    %c2_317 = arith.constant 2 : index
    %c16_318 = arith.constant 16 : index
    %c0_319 = arith.constant 0 : index
    %341 = vector.load %arg9[%c2_317, %c16_318, %c0_319] : memref<4x80x384xbf16, #tpu.memory_space<vmem>>, vector<1x64x384xbf16>
    %342 = vector.shape_cast %341 : vector<1x64x384xbf16> to vector<64x384xbf16>
    %c2_320 = arith.constant 2 : index
    %c0_321 = arith.constant 0 : index
    %c0_322 = arith.constant 0 : index
    %343 = vector.load %arg4[%c2_320, %c0_321, %c0_322] : memref<9x384x128xbf16, #tpu.memory_space<vmem>>, vector<1x384x128xbf16>
    %344 = vector.shape_cast %343 : vector<1x384x128xbf16> to vector<384x128xbf16>
    %cst_323 = arith.constant dense<0.000000e+00> : vector<64x128xf32>
    %345 = tpu.matmul %342, %344, %cst_323 {dimension_numbers = #tpu.dot_dimension_numbers<[1], [0], [0], [1], [0, 0, 1, 1], [], []>} : vector<64x384xbf16>, vector<384x128xbf16>, vector<64x128xf32> -> vector<64x128xf32>
    %346 = arith.addf %340, %345 : vector<64x128xf32>
    %c3_324 = arith.constant 3 : index
    %c0_325 = arith.constant 0 : index
    %c0_326 = arith.constant 0 : index
    %347 = vector.load %arg9[%c3_324, %c0_325, %c0_326] : memref<4x80x384xbf16, #tpu.memory_space<vmem>>, vector<1x64x384xbf16>
    %348 = vector.shape_cast %347 : vector<1x64x384xbf16> to vector<64x384xbf16>
    %c3_327 = arith.constant 3 : index
    %c0_328 = arith.constant 0 : index
    %c0_329 = arith.constant 0 : index
    %349 = vector.load %arg4[%c3_327, %c0_328, %c0_329] : memref<9x384x128xbf16, #tpu.memory_space<vmem>>, vector<1x384x128xbf16>
    %350 = vector.shape_cast %349 : vector<1x384x128xbf16> to vector<384x128xbf16>
    %cst_330 = arith.constant dense<0.000000e+00> : vector<64x128xf32>
    %351 = tpu.matmul %348, %350, %cst_330 {dimension_numbers = #tpu.dot_dimension_numbers<[1], [0], [0], [1], [0, 0, 1, 1], [], []>} : vector<64x384xbf16>, vector<384x128xbf16>, vector<64x128xf32> -> vector<64x128xf32>
    %352 = arith.addf %346, %351 : vector<64x128xf32>
    %c3_331 = arith.constant 3 : index
    %c8_332 = arith.constant 8 : index
    %c0_333 = arith.constant 0 : index
    %353 = vector.load %arg9[%c3_331, %c8_332, %c0_333] : memref<4x80x384xbf16, #tpu.memory_space<vmem>>, vector<1x64x384xbf16>
    %354 = vector.shape_cast %353 : vector<1x64x384xbf16> to vector<64x384xbf16>
    %c4_334 = arith.constant 4 : index
    %c0_335 = arith.constant 0 : index
    %c0_336 = arith.constant 0 : index
    %355 = vector.load %arg4[%c4_334, %c0_335, %c0_336] : memref<9x384x128xbf16, #tpu.memory_space<vmem>>, vector<1x384x128xbf16>
    %356 = vector.shape_cast %355 : vector<1x384x128xbf16> to vector<384x128xbf16>
    %cst_337 = arith.constant dense<0.000000e+00> : vector<64x128xf32>
    %357 = tpu.matmul %354, %356, %cst_337 {dimension_numbers = #tpu.dot_dimension_numbers<[1], [0], [0], [1], [0, 0, 1, 1], [], []>} : vector<64x384xbf16>, vector<384x128xbf16>, vector<64x128xf32> -> vector<64x128xf32>
    %358 = arith.addf %352, %357 : vector<64x128xf32>
    %c3_338 = arith.constant 3 : index
    %c16_339 = arith.constant 16 : index
    %c0_340 = arith.constant 0 : index
    %359 = vector.load %arg9[%c3_338, %c16_339, %c0_340] : memref<4x80x384xbf16, #tpu.memory_space<vmem>>, vector<1x64x384xbf16>
    %360 = vector.shape_cast %359 : vector<1x64x384xbf16> to vector<64x384xbf16>
    %c5_341 = arith.constant 5 : index
    %c0_342 = arith.constant 0 : index
    %c0_343 = arith.constant 0 : index
    %361 = vector.load %arg4[%c5_341, %c0_342, %c0_343] : memref<9x384x128xbf16, #tpu.memory_space<vmem>>, vector<1x384x128xbf16>
    %362 = vector.shape_cast %361 : vector<1x384x128xbf16> to vector<384x128xbf16>
    %cst_344 = arith.constant dense<0.000000e+00> : vector<64x128xf32>
    %363 = tpu.matmul %360, %362, %cst_344 {dimension_numbers = #tpu.dot_dimension_numbers<[1], [0], [0], [1], [0, 0, 1, 1], [], []>} : vector<64x384xbf16>, vector<384x128xbf16>, vector<64x128xf32> -> vector<64x128xf32>
    %364 = arith.addf %358, %363 : vector<64x128xf32>
    %c0_345 = arith.constant 0 : index
    %c0_346 = arith.constant 0 : index
    %365 = vector.load %arg5[%c0_345, %c0_346] : memref<1x128xf32, #tpu.memory_space<vmem>>, vector<1x128xf32>
    %366 = vector.broadcast %365 : vector<1x128xf32> to vector<64x128xf32>
    %367 = arith.addf %364, %366 : vector<64x128xf32>
    %cst_347 = arith.constant 0.000000e+00 : f32
    %368 = vector.broadcast %cst_347 : f32 to vector<64x128xf32>
    %369 = arith.maximumf %367, %368 : vector<64x128xf32>
    %370 = arith.truncf %369 : vector<64x128xf32> to vector<64x128xbf16>
    %c0_348 = arith.constant 0 : index
    %c0_349 = arith.constant 0 : index
    %371 = vector.load %arg6[%c0_348, %c0_349] : memref<128x256xbf16, #tpu.memory_space<vmem>>, vector<128x256xbf16>
    %cst_350 = arith.constant dense<0.000000e+00> : vector<64x256xf32>
    %372 = tpu.matmul %370, %371, %cst_350 {dimension_numbers = #tpu.dot_dimension_numbers<[1], [0], [0], [1], [0, 0, 1, 1], [], []>} : vector<64x128xbf16>, vector<128x256xbf16>, vector<64x256xf32> -> vector<64x256xf32>
    %c0_351 = arith.constant 0 : index
    %c0_352 = arith.constant 0 : index
    %373 = vector.load %arg7[%c0_351, %c0_352] : memref<1x256xf32, #tpu.memory_space<vmem>>, vector<1x256xf32>
    %374 = vector.broadcast %373 : vector<1x256xf32> to vector<64x256xf32>
    %375 = arith.addf %372, %374 : vector<64x256xf32>
    %c0_353 = arith.constant 0 : index
    %c3_354 = arith.constant 3 : index
    %c0_355 = arith.constant 0 : index
    %c0_356 = arith.constant 0 : index
    %376 = vector.load %arg1[%c0_353, %c3_354, %c0_355, %c0_356] : memref<1x4x64x256xbf16, #tpu.memory_space<vmem>>, vector<1x1x64x256xbf16>
    %377 = vector.shape_cast %376 : vector<1x1x64x256xbf16> to vector<64x256xbf16>
    %378 = arith.extf %377 : vector<64x256xbf16> to vector<64x256xf32>
    %379 = arith.addf %375, %378 : vector<64x256xf32>
    %cst_357 = arith.constant 0.000000e+00 : f32
    %380 = vector.broadcast %cst_357 : f32 to vector<64x256xf32>
    %381 = arith.maximumf %379, %380 : vector<64x256xf32>
    %382 = arith.truncf %381 : vector<64x256xf32> to vector<64x256xbf16>
    %c0_358 = arith.constant 0 : index
    %c3_359 = arith.constant 3 : index
    %c0_360 = arith.constant 0 : index
    %c0_361 = arith.constant 0 : index
    %383 = vector.load %arg8[%c0_358, %c3_359, %c0_360, %c0_361] : memref<1x4x64x256xbf16, #tpu.memory_space<vmem>>, vector<1x1x64x256xbf16>
    %384 = vector.shape_cast %383 : vector<1x1x64x256xbf16> to vector<64x256xbf16>
    %385 = vector.shape_cast %382 : vector<64x256xbf16> to vector<1x1x64x256xbf16>
    tpu.vector_store %arg8[%c0_358, %c3_359, %c0_360, %c0_361], %385 {strides = array<i32>} : memref<1x4x64x256xbf16, #tpu.memory_space<vmem>>, vector<1x1x64x256xbf16>,
    return
  }
  func.func @transform_0(%arg0: i32) -> (i32, i32, i32, i32) {
    %c0_i32 = arith.constant 0 : i32
    %c0_i32_0 = arith.constant 0 : i32
    %c0_i32_1 = arith.constant 0 : i32
    %c0_i32_2 = arith.constant 0 : i32
    return %arg0, %c0_i32, %c0_i32_0, %c0_i32_1 : i32, i32, i32, i32
  }
  func.func @transform_1(%arg0: i32) -> (i32, i32) {
    %c0_i32 = arith.constant 0 : i32
    %c0_i32_0 = arith.constant 0 : i32
    %c0_i32_1 = arith.constant 0 : i32
    return %c0_i32, %c0_i32_0 : i32, i32
  }
  func.func @transform_2(%arg0: i32) -> (i32, i32) {
    %c0_i32 = arith.constant 0 : i32
    %c0_i32_0 = arith.constant 0 : i32
    %c0_i32_1 = arith.constant 0 : i32
    return %c0_i32, %c0_i32_0 : i32, i32
  }
  func.func @transform_3(%arg0: i32) -> (i32, i32, i32) {
    %c0_i32 = arith.constant 0 : i32
    %c0_i32_0 = arith.constant 0 : i32
    %c0_i32_1 = arith.constant 0 : i32
    %c0_i32_2 = arith.constant 0 : i32
    return %c0_i32, %c0_i32_0, %c0_i32_1 : i32, i32, i32
  }
  func.func @transform_4(%arg0: i32) -> (i32, i32) {
    %c0_i32 = arith.constant 0 : i32
    %c0_i32_0 = arith.constant 0 : i32
    %c0_i32_1 = arith.constant 0 : i32
    return %c0_i32, %c0_i32_0 : i32, i32
  }
  func.func @transform_5(%arg0: i32) -> (i32, i32) {
    %c0_i32 = arith.constant 0 : i32
    %c0_i32_0 = arith.constant 0 : i32
    %c0_i32_1 = arith.constant 0 : i32
    return %c0_i32, %c0_i32_0 : i32, i32
  }
  func.func @transform_6(%arg0: i32) -> (i32, i32) {
    %c0_i32 = arith.constant 0 : i32
    %c0_i32_0 = arith.constant 0 : i32
    %c0_i32_1 = arith.constant 0 : i32
    return %c0_i32, %c0_i32_0 : i32, i32
  }
  func.func @transform_7(%arg0: i32) -> (i32, i32, i32, i32) {
    %c0_i32 = arith.constant 0 : i32
    %c0_i32_0 = arith.constant 0 : i32
    %c0_i32_1 = arith.constant 0 : i32
    %c0_i32_2 = arith.constant 0 : i32
    return %arg0, %c0_i32, %c0_i32_0, %c0_i32_1 : i32, i32, i32, i32
  }
}

</mosaic_0001>

<bundles_post_ra>
// kernel: tpu_custom_call.1
= control target key start
LH: loop header
LB: loop body
LE: loop exit
PB: predicated region body
PF: predicated region fallthrough
CT: control target
= control target key end

     0   :  { %12 = vsyncpa [#allocation4], 0  ;;  %s21922_s0 = inlined_call_operand.hbm [shape: bf16[2,4,64,256], index: 0, kind: input, shape index: {}]   ;;  %s21923_s1 = inlined_call_operand.hbm [shape: bf16[256,128], index: 1, kind: input, shape index: {}]   ;;  %s21924_s2 = inlined_call_operand.vmem [shape: f32[1,128], index: 2, kind: input, shape index: {}]   ;;  %s21925_s3 = inlined_call_operand.hbm [shape: bf16[9,384,128], index: 3, kind: input, shape index: {}]   ;;  %s21926_s4 = inlined_call_operand.vmem [shape: f32[1,128], index: 4, kind: input, shape index: {}]   ;;  %s21927_s5 = inlined_call_operand.hbm [shape: bf16[128,256], index: 5, kind: input, shape index: {}]   ;;  %s21928_s6 = inlined_call_operand.vmem [shape: f32[1,256], index: 6, kind: input, shape index: {}]   ;;  %s21929_s7 = inlined_call_operand.hbm [shape: bf16[2,4,64,256], index: 7, kind: output, shape index: {}]  }
   0x1   :  { %14 = vsyncpa [#allocation4 + $0x1], 0 }
   0x2   :  { %15 = vsyncpa [#allocation7], 0 }
   0x3   :  { %16 = vsyncpa [#allocation10], 0 }
   0x4   :  { %17 = vsyncpa [#allocation5], 0 }
   0x5   :  { %19 = vsyncpa [#allocation5 + $0x1], 0  ;;  %s19263_s24 = smov 0   ;;  %s19265_s25 = smov 0  }
   0x6   :  { %s19267_s26 = smov 0   ;;  %s19269_s27 = smov 0  }
   0x7 LB: > { %s19284_s28 = sadd.s32 4294967295, %s19209_s27   ;;  %s14059_s29 = sadd.s32 4294967294, %s19209_s27   ;;  %s19209_s27 = sphi %s19269_s27, %s22232_s27   ;;  %s19205_s26 = sphi %s19267_s26, %s22231_s26   ;;  %s19201_s25 = sphi %s19265_s25, %s22230_s25   ;;  %s19197_s24 = sphi %s19263_s24, %s22229_s24  }
   0x8   : > { %p45_p0 = scmp.ne.s32.totalorder %s19201_s25, %s19197_s24  ;;  %p21930_p1 = scmp.eq.s32.totalorder %s19284_s28, 0 }
   0x9   : > { %p201_p3 = scmp.eq.s32.totalorder %s14059_s29, 1  ;;  %p14060_p5 = scmp.ge.s32.totalorder %s19209_s27, 1 }
   0xa   : > { %p19293_p4 = por %p21930_p1, %p45_p0  ;;  %p208_p7 = scmp.lt.s32.totalorder %s19209_s27, 3 }
   0xb   : > { %p19298_p6 = por %p201_p3, %p45_p0  ;;  %s19211_s10 = smov [#allocation6]  }
   0xc   : > { %s21963_s30 = scalar_select %p19293_p4, 1, 0 }
   0xd   : > { %s21964_s8 = scalar_select %p19298_p6, 1, 0 }
   0xe   : > { %p19303_p8 = pnand %p14060_p5, %p208_p7  ;;  %s220_s11 = sshll.u32 %s19211_s10, 4  ;;  %s19307_s11 = int_to_ptr.vmem [resolvable:$true] %s220_s11 }
   0xf   : > { %21965 = sst [smem:[#allocation16_spill]] %s21964_s8  ;;  %s19212_s13 = smov [#allocation8]  }
  0x10   : > { %s21966_s9 = scalar_select %p19303_p8, 1, 0 }
  0x11   : > { %p18009_p9 = pneg %p19303_p8  ;;  %s236_s14 = sshll.u32 %s19212_s13, 4  ;;  %s19318_s14 = int_to_ptr.vmem [resolvable:$true] %s236_s14 }
  0x12   : > { %s19213_s15 = smov [#allocation9]   ;;  %s19021_s19 = scalar_lea.hbm %s21923_s1, 2048 }
  0x13   : > { %p19314_p11 = pnand %p18009_p9, %p21930_p1  ;;  %s19320_s16 = sshll.u32 %s19213_s15, 4  ;;  %s253_s16 = int_to_ptr.vmem [resolvable:$true] %s19320_s16 }
  0x14   : > { %p19022_p12 = scmp.ne.s32.totalorder %s21923_s1, %s19021_s19  ;;  %p19028_p5 = scmp.lt.u32.totalorder %s19021_s19, %s21923_s1 }
  0x15   : > { %p19330_p13 = pneg %p19314_p11 }
  0x17   : > { %p19024_p0 = pnand %p19330_p13, %p19022_p12 }
  0x19   : > { %p19025_p3 = pneg %p19024_p0 }
  0x1b   : > { %p19030_p7 = pnand %p19028_p5, %p19025_p3 }
  0x1d   : > { %19033 = shalt.err (!%p19030_p7)
}
  0x1e   : > { %s19034_s10 = scalar_lea.vmem %s19307_s11, 2048  ;;  %p19042_p2 = scmp.lt.s32.totalorder %s19307_s11, %s19307_s11 }
  0x1f   : > { %p19035_p9 = scmp.ne.s32.totalorder %s19307_s11, %s19034_s10  ;;  %p19043_p6 = scmp.lt.s32.totalorder %s19034_s10, %s19034_s10 }
  0x21   : > { %p19037_p10 = pnand %p19035_p9, %p19330_p13  ;;  %p19044_p12 = por %p19043_p6, %p19042_p2 }
  0x23   : > { %p19038_p1 = pneg %p19037_p10 }
  0x25   : > { %p19045_p0 = pnand %p19044_p12, %p19038_p1 }
  0x27   : > { %19048 = shalt.err (!%p19045_p0)
}
  0x28   : > { %s19214_s13 = smov 64   ;;  %s19215_s15 = smov 4  }
  0x29   : > { %18012 = dma.hbm_to_vmem [thread:$0]  (!%p19314_p11), %s21923_s1, 2048, %s19307_s11, [#allocation7], %s19214_s13, %s19214_s13, %s19215_s15  }
  0x2a   : > { %s19049_s21 = scalar_lea.hbm %s21925_s3, 27648 }
  0x2b   : > { %p19050_p2 = scmp.ne.s32.totalorder %s21925_s3, %s19049_s21  ;;  %p19056_p10 = scmp.lt.u32.totalorder %s19049_s21, %s21925_s3 }
  0x2d   : > { %p19052_p1 = pnand %p19050_p2, %p19330_p13 }
  0x2f   : > { %p19053_p6 = pneg %p19052_p1 }
  0x31   : > { %p19058_p3 = pnand %p19056_p10, %p19053_p6 }
  0x33   : > { %19061 = shalt.err (!%p19058_p3)
}
  0x34   : > { %s19062_s11 = scalar_lea.vmem %s19318_s14, 27648  ;;  %p19070_p12 = scmp.lt.s32.totalorder %s19318_s14, %s19318_s14 }
  0x35   : > { %p19063_p5 = scmp.ne.s32.totalorder %s19318_s14, %s19062_s11  ;;  %p19071_p0 = scmp.lt.s32.totalorder %s19062_s11, %s19062_s11 }
  0x37   : > { %p19065_p7 = pnand %p19063_p5, %p19330_p13  ;;  %p19072_p2 = por %p19071_p0, %p19070_p12 }
  0x39   : > { %p19066_p9 = pneg %p19065_p7 }
  0x3b   : > { %p19073_p1 = pnand %p19072_p2, %p19066_p9 }
  0x3d   : > { %19076 = shalt.err (!%p19073_p1)
}
  0x3e   : > { %18015 = dma.hbm_to_vmem [thread:$0]  (!%p19314_p11), %s21925_s3, 27648, %s19318_s14, [#allocation7], %s19214_s13, %s19214_s13, %s19215_s15  }
  0x3f   : > { %s19077_s20 = scalar_lea.hbm %s21927_s5, 2048 }
  0x40   : > { %p19078_p6 = scmp.ne.s32.totalorder %s21927_s5, %s19077_s20  ;;  %p19084_p5 = scmp.lt.u32.totalorder %s19077_s20, %s21927_s5 }
  0x42   : > { %p19080_p10 = pnand %p19078_p6, %p19330_p13 }
  0x44   : > { %p19081_p3 = pneg %p19080_p10 }
  0x46   : > { %p19086_p7 = pnand %p19084_p5, %p19081_p3 }
  0x48   : > { %19089 = shalt.err (!%p19086_p7)
}
  0x49   : > { %s19090_s11 = scalar_lea.vmem %s253_s16, 2048  ;;  %p19098_p2 = scmp.lt.s32.totalorder %s253_s16, %s253_s16 }
  0x4a   : > { %p19091_p9 = scmp.ne.s32.totalorder %s253_s16, %s19090_s11  ;;  %p19099_p1 = scmp.lt.s32.totalorder %s19090_s11, %s19090_s11 }
  0x4c   : > { %p19093_p12 = pnand %p19091_p9, %p19330_p13  ;;  %p19100_p4 = por %p19099_p1, %p19098_p2 }
  0x4e   : > { %p19094_p0 = pneg %p19093_p12 }
  0x50   : > { %p19101_p8 = pnand %p19100_p4, %p19094_p0 }
  0x52   : > { %19104 = shalt.err (!%p19101_p8)
}
  0x53   : > { %s19216_s14 = smov 128   ;;  %s19217_s22 = smov 8  }
  0x54   : > { %18018 = dma.hbm_to_vmem [thread:$0]  (!%p19314_p11), %s21927_s5, 2048, %s253_s16, [#allocation10], %s19216_s14, %s19216_s14, %s19217_s22  }
  0x55   : > { %s19397_s8 = sadd.s32 1, %s19209_s27   ;;  %s32_s18 = sadd.s32 1, %s19205_s26 }
  0x56   : > { %s29_s17 = ssub.s32 %s19209_s27, %s19397_s8  ;;  %p39_p8 = scmp.ne.s32.totalorder %s19205_s26, %s19201_s25 }
  0x57   : > { %p30_p4 = scmp.eq.s32.totalorder %s29_s17, 0  ;;  %p40_p13 = scmp.eq.s32.totalorder %s19209_s27, 0 }
  0x58   : > { %p18030_p6 = scmp.lt.s32.totalorder %s19209_s27, 2  ;;  %p21969_p3 = scmp.eq.s32.totalorder %s19284_s28, 1 }
  0x59   : > { %s19407_s19 = scalar_select %p30_p4, %s19205_s26, %s32_s18  }
  0x5a   : > { %p41_p10 = por %p40_p13, %p39_p8  ;;  %p19411_p5 = por %p21969_p3, %p39_p8 }
  0x5b   : > { %s269_s20 = sand.u32 1, %s19205_s26   ;;  %s15071_s21 = sshll.u32 %s19209_s27, 12 }
  0x5c   : > { %s14065_s16 = sshll.u32 %s269_s20, 8  ;;  %s19420_s10 = scalar_lea.hbm %s21922_s0, %s15071_s21 }
  0x5d   : > { %s273_s11 = scalar_lea.vmem [#allocation3], %s14065_s16  ;;  %p19422_p11 = pnand %p18030_p6, %p41_p10 }
  0x5e   : > { %s280_s13 = sshll.u32 %s273_s11, 4  ;;  %s19428_s17 = scalar_lea.sflag [#allocation4], %s269_s20  ;;  %s19426_s13 = int_to_ptr.vmem [resolvable:$true] %s280_s13 }
  0x5f   : > { %s19105_s18 = scalar_lea.hbm %s19420_s10, 4096  ;;  %p19107_p9 = pneg %p19422_p11 }
  0x60   : > { %p19106_p7 = scmp.ne.s32.totalorder %s19420_s10, %s19105_s18  ;;  %s19110_s23 = scalar_lea.hbm %s21922_s0, 8192 }
  0x61   : > { %p19111_p2 = scmp.lt.u32.totalorder %s19420_s10, %s21922_s0  ;;  %p19112_p1 = scmp.lt.u32.totalorder %s19110_s23, %s19105_s18 }
  0x62   : > { %p19108_p12 = pnand %p19107_p9, %p19106_p7  ;;  %p19114_p8 = scmp.lt.u32.totalorder %s19105_s18, %s19420_s10 }
  0x63   : > { %p19113_p4 = por %p19112_p1, %p19111_p2 }
  0x64   : > { %p19109_p0 = pneg %p19108_p12 }
  0x65   : > { %p19115_p13 = por %p19114_p8, %p19113_p4 }
  0x67   : > { %p19116_p6 = pnand %p19115_p13, %p19109_p0 }
  0x69   : > { %19119 = shalt.err (!%p19116_p6)
}
  0x6a   : > { %s19120_s20 = scalar_lea.vmem %s19426_s13, 4096  ;;  %s19218_s21 = smov [#allocation3]  }
  0x6b   : > { %p19121_p10 = scmp.ne.s32.totalorder %s19426_s13, %s19120_s20  ;;  %s19125_s16 = sshll.u32 %s19218_s21, 4  ;;  %s19126_s16 = int_to_ptr.vmem [resolvable:$false] %s19125_s16 }
  0x6c   : > { %s19127_s29 = scalar_lea.vmem %s19126_s16, 8192  ;;  %p19128_p12 = scmp.lt.s32.totalorder %s19426_s13, %s19126_s16 }
  0x6d   : > { %p19123_p3 = pnand %p19121_p10, %p19107_p9  ;;  %p19129_p2 = scmp.lt.s32.totalorder %s19127_s29, %s19120_s20 }
  0x6f   : > { %p19124_p7 = pneg %p19123_p3  ;;  %p19130_p1 = por %p19129_p2, %p19128_p12 }
  0x71   : > { %p19131_p4 = pnand %p19130_p1, %p19124_p7 }
  0x73   : > { %19134 = shalt.err (!%p19131_p4)
}
  0x74   : > { %18022 = dma.hbm_to_vmem [thread:$0]  (!%p19422_p11), %s19420_s10, 4096, %s19426_s13, %s19428_s17, %s19216_s14, %s19216_s14, %s19217_s22  }
  0x75   : > { %p21972_p9 = scmp.ne.s32.totalorder %s21966_s9, 0 }
  0x77   : > { %292 = sbr.rel (%p21972_p9) target bundleno = 2523 (0x9db), region = 48 }
  0x7e   : > { %s19462_s18 = sand.u32 1, %s19201_s25   ;;  %p21973_p0 = scmp.ne.s32.totalorder %s21963_s30, 0 }
  0x7f   : > { %s14069_s23 = sshll.u32 %s19462_s18, 8  ;;  %s295_s11 = scalar_lea.sflag [#allocation4], %s19462_s18 }
  0x80   : > { %s19468_s15 = scalar_lea.vmem [#allocation3], %s14069_s23 }
  0x81   : > { %19180 = dma.done.wait (%p21973_p0), %s295_s11, 4096  }
  0x82   : > { %19182 = vsyncadd (%p21973_p0), %s295_s11, 4294963200  ;;  %p21974_p11 = scmp.eq.s32.totalorder %s19284_s28, 0 }
  0x84   : > { %19184 = dma.done.wait (%p21974_p11), [#allocation7], 29696   ;;  %p21975_p8 = pmov %p21974_p11 }
  0x86   : > { %19186 = vsyncadd (%p21975_p8), [#allocation7], 4294937600  ;;  %p21976_p13 = pmov %p21975_p8 }
  0x87   : > { %p21977_p6 = pmov %p21975_p8 }
  0x88   : > { %19188 = dma.done.wait (%p21976_p13), [#allocation10], 2048  }
  0x89   : > { %19190 = vsyncadd (%p21977_p6), [#allocation10], 4294965248  ;;  %v18077_v0 = vld [vmem:[#allocation6 + $0x40] sm:$0xff]   ;;  %v18079_v2 = vld [vmem:[#allocation6 + $0x48] sm:$0xff]   ;;  %vm21934_vm7 = vcmask 1043456   ;;  %s20972_s21 = scalar_lea.vmem [#allocation11], %s14069_s23 }
  0x8a   : > { %v18078_v1 = vld [vmem:[#allocation6] sm:$0xff]   ;;  %15105 = vmatprep.subr.bf16.mxu0 %v18077_v0  ;;  %v18080_v3 = vld [vmem:[#allocation6 + $0x8] sm:$0xff]   ;;  %v18081_v4 = vld [vmem:[#allocation6 + $0x50] sm:$0xff]   ;;  %s13957_s16 = sshll.u32 %s20972_s21, 4  ;;  %s13944_s30 = scalar_lea.sflag [#allocation5], %s19462_s18  ;;  %s21876_s16 = int_to_ptr.vmem [resolvable:$true] %s13957_s16 }
  0x8b   : > { %15106 = vmatpush3.bf16.msra.mxu0 %v18078_v1  ;;  %v18082_v5 = vld [vmem:[#allocation6 + $0x10] sm:$0xff]   ;;  %v18083_v6 = vld [vmem:[#allocation6 + $0x58] sm:$0xff]   ;;  %v18085_v8 = vld [vmem:[#allocation6 + $0x60] sm:$0xff]   ;;  %s19135_s9 = scalar_lea.vmem %s21876_s16, 4096 }
  0x8c   : > { %15107 = vmatprep.subr.bf16.mxu0 %v18079_v2  ;;  %v18084_v7 = vld [vmem:[#allocation6 + $0x18] sm:$0xff]   ;;  %v18086_v9 = vld [vmem:[#allocation6 + $0x20] sm:$0xff]   ;;  %v18087_v10 = vld [vmem:[#allocation6 + $0x68] sm:$0xff]   ;;  %p19136_p10 = scmp.ne.s32.totalorder %s21876_s16, %s19135_s9 }
  0x8d   : > { %v18095_v11 = vld [vmem:[%s19468_s15 + $0x4] ss:$8 sps:$4 sm:$0xff]   ;;  %v18089_v13 = vld [vmem:[#allocation6 + $0x70] sm:$0xff]   ;;  %v18091_v15 = vld [vmem:[#allocation6 + $0x78] sm:$0xff]  }
  0x8e   : > { %v18088_v12 = vld [vmem:[#allocation6 + $0x28] sm:$0xff]   ;;  %678 = vmatprep.mubr.bf16.mxu0 %v18095_v11  ;;  %v18090_v14 = vld [vmem:[#allocation6 + $0x30] sm:$0xff]   ;;  %v18105_v16 = vld [vmem:[#allocation6 + $0x40] sm:$0xff]   ;;  %p19137_p3 = pnand %p19136_p10, %p19411_p5 }
  0x8f   : > { %15108 = vmatpush3.bf16.msra.mxu0 %v18080_v3  ;;  %v18106_v17 = vld [vmem:[#allocation6] sm:$0xff]   ;;  %15145 = vmatprep.subr.bf16.mxu1 %v18105_v16  ;;  %v18107_v18 = vld [vmem:[#allocation6 + $0x48] sm:$0xff]   ;;  %v18109_v20 = vld [vmem:[#allocation6 + $0x50] sm:$0xff]  }
  0x90   : > { %15109 = vmatprep.subr.bf16.mxu0 %v18081_v4  ;;  %15146 = vmatpush3.bf16.msra.mxu1 %v18106_v17  ;;  %v18108_v19 = vld [vmem:[#allocation6 + $0x8] sm:$0xff]   ;;  %v18092_v21 = vld [vmem:[#allocation6 + $0x38] sm:$0xff]   ;;  %v18110_v23 = vld [vmem:[#allocation6 + $0x10] sm:$0xff]   ;;  %p19138_p7 = pneg %p19137_p3 }
  0x91   : > { %15147 = vmatprep.subr.bf16.mxu1 %v18107_v18  ;;  %v18093_v22 = vld [vmem:[%s19468_s15] ss:$8 sps:$4 sm:$0xff]   ;;  %v18111_v24 = vld [vmem:[#allocation6 + $0x58] sm:$0xff]   ;;  %v18123_v31 = vld [vmem:[%s19468_s15 + $0x44] ss:$8 sps:$4 sm:$0xff]  }
  0x92   : > { %v18096_v25 = vld [vmem:[%s19468_s15 + $0x14] ss:$8 sps:$4 sm:$0xff]   ;;  %v18113_v27 = vld [vmem:[#allocation6 + $0x60] sm:$0xff]   ;;  %v18098_v28 = vld [vmem:[%s19468_s15 + $0x10] ss:$8 sps:$4 sm:$0xff]   ;;  %1067 = vmatprep.mubr.bf16.mxu1 %v18123_v31 }
  0x93   : > { %15110 = vmatpush3.bf16.msra.mxu0 %v18082_v5  ;;  %v18112_v26 = vld [vmem:[#allocation6 + $0x18] sm:$0xff]   ;;  %v18114_v29 = vld [vmem:[#allocation6 + $0x20] sm:$0xff]   ;;  %v18115_v30 = vld [vmem:[#allocation6 + $0x68] sm:$0xff]  }
  0x94   : > { %15111 = vmatprep.subr.bf16.mxu0 %v18083_v6  ;;  %15148 = vmatpush3.bf16.msra.mxu1 %v18108_v19  ;;  %v18099_v32 = vld [vmem:[%s19468_s15 + $0x24] ss:$8 sps:$4 sm:$0xff]   ;;  %v18117_v34 = vld [vmem:[#allocation6 + $0x70] sm:$0xff]   ;;  %v18101_v37 = vld [vmem:[%s19468_s15 + $0x20] ss:$8 sps:$4 sm:$0xff]  }
  0x95   : > { %15149 = vmatprep.subr.bf16.mxu1 %v18109_v20  ;;  %v18116_v33 = vld [vmem:[#allocation6 + $0x28] sm:$0xff]   ;;  %v18118_v35 = vld [vmem:[#allocation6 + $0x30] sm:$0xff]   ;;  %v18133_v36 = vld [vmem:[#allocation6 + $0x40] sm:$0xff]  }
  0x96   : > { %v18134_v38 = vld [vmem:[#allocation6] sm:$0xff]   ;;  %v18102_v39 = vld [vmem:[%s19468_s15 + $0x34] ss:$8 sps:$4 sm:$0xff]   ;;  %v18135_v40 = vld [vmem:[#allocation6 + $0x48] sm:$0xff]  }
  0x97   : > { %15112 = vmatpush3.bf16.msra.mxu0 %v18084_v7  ;;  %v18119_v41 = vld [vmem:[#allocation6 + $0x78] sm:$0xff]   ;;  %v18136_v42 = vld [vmem:[#allocation6 + $0x8] sm:$0xff]   ;;  %v18139_v44 = vld [vmem:[#allocation6 + $0x50] sm:$0xff]  }
  0x98   : > { %15113 = vmatprep.subr.bf16.mxu0 %v18085_v8  ;;  %15150 = vmatpush3.bf16.msra.mxu1 %v18110_v23  ;;  %v18120_v43 = vld [vmem:[#allocation6 + $0x38] sm:$0xff]   ;;  %v18121_v45 = vld [vmem:[%s19468_s15 + $0x40] ss:$8 sps:$4 sm:$0xff]   ;;  %v18140_v48 = vld [vmem:[#allocation6 + $0x10] sm:$0xff]  }
  0x99   : > { %15151 = vmatprep.subr.bf16.mxu1 %v18111_v24  ;;  %v18137_v46 = vld [vmem:[#allocation6 + $0x40] sm:$0xff]   ;;  %v18124_v47 = vld [vmem:[%s19468_s15 + $0x54] ss:$8 sps:$4 sm:$0xff]   ;;  %v18104_v49 = vld [vmem:[%s19468_s15 + $0x30] ss:$8 sps:$4 sm:$0xff]  }
  0x9a   : > { %v18138_v50 = vld [vmem:[#allocation6] sm:$0xff]   ;;  %v18143_v51 = vld [vmem:[#allocation6 + $0x58] sm:$0xff]   ;;  %v18141_v52 = vld [vmem:[#allocation6 + $0x48] sm:$0xff]  }
  0x9b   : > { %15114 = vmatpush3.bf16.msra.mxu0 %v18086_v9  ;;  %v18144_v53 = vld [vmem:[#allocation6 + $0x18] sm:$0xff]   ;;  %v18142_v54 = vld [vmem:[#allocation6 + $0x8] sm:$0xff]   ;;  %v18147_v55 = vld [vmem:[#allocation6 + $0x60] sm:$0xff]  }
  0x9c   : > { %15115 = vmatprep.subr.bf16.mxu0 %v18087_v10  ;;  %15152 = vmatpush3.bf16.msra.mxu1 %v18112_v26  ;;  %v18126_v56 = vld [vmem:[%s19468_s15 + $0x50] ss:$8 sps:$4 sm:$0xff]   ;;  %v18127_v58 = vld [vmem:[%s19468_s15 + $0x64] ss:$8 sps:$4 sm:$0xff]   ;;  %v18129_v2 = vld [vmem:[%s19468_s15 + $0x60] ss:$8 sps:$4 sm:$0xff]  }
  0x9d   : > { %15153 = vmatprep.subr.bf16.mxu1 %v18113_v27  ;;  %v18145_v57 = vld [vmem:[#allocation6 + $0x50] sm:$0xff]   ;;  %v18148_v59 = vld [vmem:[#allocation6 + $0x20] sm:$0xff]   ;;  %v18151_v61 = vld [vmem:[#allocation6 + $0x68] sm:$0xff]  }
  0x9e   : > { %v18146_v60 = vld [vmem:[#allocation6 + $0x10] sm:$0xff]   ;;  %v18149_v62 = vld [vmem:[#allocation6 + $0x58] sm:$0xff]   ;;  %v18152_v63 = vld [vmem:[#allocation6 + $0x28] sm:$0xff]  }
  0x9f   : > { %15116 = vmatpush3.bf16.msra.mxu0 %v18088_v12  ;;  %v18150_v0 = vld [vmem:[#allocation6 + $0x18] sm:$0xff]   ;;  %v18155_v1 = vld [vmem:[#allocation6 + $0x70] sm:$0xff]   ;;  %v18153_v3 = vld [vmem:[#allocation6 + $0x60] sm:$0xff]  }
  0xa0   : > { %15117 = vmatprep.subr.bf16.mxu0 %v18089_v13  ;;  %15154 = vmatpush3.bf16.msra.mxu1 %v18114_v29  ;;  %v18130_v4 = vld [vmem:[%s19468_s15 + $0x74] ss:$8 sps:$4 sm:$0xff]   ;;  %v18154_v6 = vld [vmem:[#allocation6 + $0x20] sm:$0xff]   ;;  %v18157_v8 = vld [vmem:[#allocation6 + $0x68] sm:$0xff]  }
  0xa1   : > { %15155 = vmatprep.subr.bf16.mxu1 %v18115_v30  ;;  %v18156_v5 = vld [vmem:[#allocation6 + $0x30] sm:$0xff]   ;;  %v18159_v7 = vld [vmem:[#allocation6 + $0x78] sm:$0xff]   ;;  %v18158_v10 = vld [vmem:[#allocation6 + $0x28] sm:$0xff]  }
  0xa2   : > { %v18160_v9 = vld [vmem:[#allocation6 + $0x38] sm:$0xff]   ;;  %v18161_v11 = vld [vmem:[#allocation6 + $0x70] sm:$0xff]   ;;  %v18165_v12 = vld [vmem:[%s19468_s15 + $0x84] ss:$8 sps:$4 sm:$0xff]  }
  0xa3   : > { %15118 = vmatpush3.bf16.msra.mxu0 %v18090_v14  ;;  %v18132_v13 = vld [vmem:[%s19468_s15 + $0x70] ss:$8 sps:$4 sm:$0xff]   ;;  %v18163_v14 = vld [vmem:[%s19468_s15 + $0x80] ss:$8 sps:$4 sm:$0xff]   ;;  %v18170_v17 = vld [vmem:[%s19468_s15 + $0xc4] ss:$8 sps:$4 sm:$0xff]  }
  0xa4   : > { %15119 = vmatprep.subr.bf16.mxu0 %v18091_v15  ;;  %15156 = vmatpush3.bf16.msra.mxu1 %v18116_v33  ;;  %v18162_v15 = vld [vmem:[#allocation6 + $0x30] sm:$0xff]   ;;  %v18166_v16 = vld [vmem:[#allocation6 + $0x78] sm:$0xff]   ;;  %v18168_v19 = vld [vmem:[%s19468_s15 + $0xc0] ss:$8 sps:$4 sm:$0xff]  }
  0xa5   : > { %15157 = vmatprep.subr.bf16.mxu1 %v18117_v34  ;;  %v18167_v18 = vld [vmem:[#allocation6 + $0x38] sm:$0xff]   ;;  %v18177_v24 = vld [vmem:[%s19468_s15 + $0xa4] ss:$8 sps:$4 sm:$0xff]  }
  0xa6   : > { %v18171_v20 = vld [vmem:[%s19468_s15 + $0x94] ss:$8 sps:$4 sm:$0xff]   ;;  %v18176_v23 = vld [vmem:[%s19468_s15 + $0xd0] ss:$8 sps:$4 sm:$0xff]   ;;  %v18186_v26 = vld [vmem:[#allocation8 + $0x380] sm:$0xff]  }
  0xa7   : > { %15120 = vmatpush3.bf16.msra.mxu0 %v18092_v21  ;;  %v18173_v21 = vld [vmem:[%s19468_s15 + $0x90] ss:$8 sps:$4 sm:$0xff]   ;;  %v18180_v27 = vld [vmem:[%s19468_s15 + $0xe4] ss:$8 sps:$4 sm:$0xff]   ;;  %v18183_v30 = vld [vmem:[%s19468_s15 + $0xb4] ss:$8 sps:$4 sm:$0xff]  }
  0xa8   : > { %15185 = vmatprep.subr.bf16.mxu0 %v18133_v36  ;;  %15158 = vmatpush3.bf16.msra.mxu1 %v18118_v35  ;;  %v18192_v29 = vld [vmem:[#allocation8 + $0x388] sm:$0xff]   ;;  %v18185_v31 = vld [vmem:[%s19468_s15 + $0xb0] ss:$8 sps:$4 sm:$0xff]   ;;  %v18187_v33 = vld [vmem:[#allocation8 + $0x340] sm:$0xff]  }
  0xa9   : > { %15159 = vmatprep.subr.bf16.mxu1 %v18119_v41  ;;  %v18188_v34 = vld [vmem:[%s19468_s15 + $0xf4] ss:$8 sps:$4 sm:$0xff]   ;;  %v18190_v36 = vld [vmem:[#allocation8 + $0x300] sm:$0xff]  }
  0xaa   : > { %679 = vmatmul.mubr.bf16.vlgmr.msra.gmra.mrb[0].mxu0 %v18093_v22  ;;  %v18174_v22 = vld [vmem:[%s19468_s15 + $0xd4] ss:$8 sps:$4 sm:$0xff]  }
  0xab   : > { %686 = vmatprep.mubr.bf16.mxu0 %v18096_v25  ;;  %15186 = vmatpush3.bf16.msra.mxu0 %v18134_v38  ;;  %v18179_v25 = vld [vmem:[%s19468_s15 + $0xa0] ss:$8 sps:$4 sm:$0xff]   ;;  %v18195_v35 = vld [vmem:[#allocation8 + $0x390] sm:$0xff]  }
  0xac   : > { %15187 = vmatprep.subr.bf16.mxu0 %v18135_v40  ;;  %15160 = vmatpush3.bf16.msra.mxu1 %v18120_v43  ;;  %v18193_v38 = vld [vmem:[#allocation8 + $0x348] sm:$0xff]   ;;  %v18196_v41 = vld [vmem:[#allocation8 + $0x350] sm:$0xff]  }
  0xad   : > { %15225 = vmatprep.subr.bf16.mxu1 %v18137_v46  ;;  %v18194_v40 = vld [vmem:[#allocation8 + $0x308] sm:$0xff]   ;;  %v18197_v43 = vld [vmem:[#allocation8 + $0x310] sm:$0xff]   ;;  %v18200_v46 = vld [vmem:[#allocation8 + $0x318] sm:$0xff]  }
  0xaf   : > { %15188 = vmatpush3.bf16.msra.mxu0 %v18136_v42  ;;  %1068 = vmatmul.mubr.bf16.vlgmr.msra.gmra.mrb[0].mxu1 %v18121_v45  ;;  %v18201_v42 = vld [vmem:[#allocation8 + $0x3a0] sm:$0xff]   ;;  %v18204_v45 = vld [vmem:[#allocation8 + $0x3a8] sm:$0xff]  }
  0xb0   : > { %15189 = vmatprep.subr.bf16.mxu0 %v18139_v44  ;;  %1075 = vmatprep.mubr.bf16.mxu1 %v18124_v47  ;;  %v18199_v44 = vld [vmem:[#allocation8 + $0x358] sm:$0xff]   ;;  %v18207_v47 = vld [vmem:[#allocation8 + $0x3b0] sm:$0xff]  }
  0xb1   : > { %15226 = vmatpush3.bf16.msra.mxu1 %v18138_v50  ;;  %v18210_v50 = vld [vmem:[#allocation8 + $0x3b8] sm:$0xff]  }
  0xb2   : > { %687 = vmatmul.mubr.bf16.gmra.mrb[4].mxu0 %v18098_v28  ;;  %15227 = vmatprep.subr.bf16.mxu1 %v18141_v52  ;;  %v18182_v28 = vld [vmem:[%s19468_s15 + $0xe0] ss:$8 sps:$4 sm:$0xff]  }
  0xb3   : > { %694 = vmatprep.mubr.bf16.mxu0 %v18099_v32  ;;  %15190 = vmatpush3.bf16.msra.mxu0 %v18140_v48  ;;  %v21943_v32 = vmov 0   ;;  %v18202_v48 = vld [vmem:[#allocation8 + $0x360] sm:$0xff]   ;;  %v18206_v52 = vld [vmem:[#allocation8 + $0x328] sm:$0xff]  }
  0xb4   : > { %15191 = vmatprep.subr.bf16.mxu0 %v18143_v51  ;;  %847 = vst [vmem:[#allocation2 + $0x10] sm:$0xf] %v21943_v32  ;;  %845 = vst [vmem:[#allocation2] sm:$0xf] %v21943_v32  ;;  %v18205_v51 = vld [vmem:[#allocation8 + $0x368] sm:$0xff]  }
  0xb5   : > { %15228 = vmatpush3.bf16.msra.mxu1 %v18142_v54  ;;  %846 = vst [vmem:[#allocation2 + $0x8] sm:$0xf] %v21943_v32  ;;  %848 = vst [vmem:[#allocation2 + $0x60] sm:$0xf0] %v21943_v32  ;;  %v18209_v54 = vld [vmem:[#allocation8 + $0x330] sm:$0xff]  }
  0xb6   : > { %15229 = vmatprep.subr.bf16.mxu1 %v18145_v57  ;;  %849 = vst [vmem:[#allocation2 + $0x68] sm:$0xf0] %v21943_v32  ;;  %850 = vst [vmem:[#allocation2 + $0x70] sm:$0xf0] %v21943_v32  ;;  %v18212_v57 = vld [vmem:[#allocation8 + $0x338] sm:$0xff]  }
  0xb7   : > { %15192 = vmatpush3.bf16.msra.mxu0 %v18144_v53  ;;  %1076 = vmatmul.mubr.bf16.gmra.mrb[4].mxu1 %v18126_v56  ;;  %1232 = vst [vmem:[#allocation2 + $0x78] sm:$0xf] %v21943_v32  ;;  %1233 = vst [vmem:[#allocation2 + $0x80] sm:$0xf] %v21943_v32  ;;  %v18208_v53 = vld [vmem:[#allocation8 + $0x370] sm:$0xff]   ;;  %v18211_v56 = vld [vmem:[#allocation8 + $0x378] sm:$0xff]  }
  0xb8   : > { %15193 = vmatprep.subr.bf16.mxu0 %v18147_v55  ;;  %1083 = vmatprep.mubr.bf16.mxu1 %v18127_v58  ;;  %1234 = vst [vmem:[#allocation2 + $0x88] sm:$0xf] %v21943_v32  ;;  %1235 = vst [vmem:[#allocation2 + $0xd8] sm:$0xf0] %v21943_v32  ;;  %v19538_v55 = vld [vmem:[#allocation8 + $0x2c0] sm:$0xff]  }
  0xb9   : > { %15230 = vmatpush3.bf16.msra.mxu1 %v18146_v60  ;;  %1236 = vst [vmem:[#allocation2 + $0xe0] sm:$0xf0] %v21943_v32  ;;  %1237 = vst [vmem:[#allocation2 + $0xe8] sm:$0xf0] %v21943_v32  ;;  %v18214_v58 = vld [vmem:[#allocation8 + $0x280] sm:$0xff]  }
  0xba   : > { %695 = vmatmul.mubr.bf16.gmra.mrb[8].mxu0 %v18101_v37  ;;  %15231 = vmatprep.subr.bf16.mxu1 %v18149_v62  ;;  %1619 = vst [vmem:[#allocation2 + $0xf0] sm:$0xf] %v21943_v32  ;;  %1620 = vst [vmem:[#allocation2 + $0xf8] sm:$0xf] %v21943_v32  ;;  %v18191_v37 = vld [vmem:[%s19468_s15 + $0xf0] ss:$8 sps:$4 sm:$0xff]  }
  0xbb   : > { %702 = vmatprep.mubr.bf16.mxu0 %v18102_v39  ;;  %15194 = vmatpush3.bf16.msra.mxu0 %v18148_v59  ;;  %1621 = vst [vmem:[#allocation2 + $0x100] sm:$0xf] %v21943_v32  ;;  %1622 = vst [vmem:[#allocation2 + $0x150] sm:$0xf0] %v21943_v32  ;;  %v18198_v39 = vld [vmem:[#allocation8 + $0x398] sm:$0xff]   ;;  %v342_v59 = vlaneseq }
  0xbc   : > { %15195 = vmatprep.subr.bf16.mxu0 %v18151_v61  ;;  %1623 = vst [vmem:[#allocation2 + $0x158] sm:$0xf0] %v21943_v32  ;;  %1624 = vst [vmem:[#allocation2 + $0x160] sm:$0xf0] %v21943_v32  ;;  %v19546_v61 = vld [vmem:[%s21924_s2] ss:$0 sm:$0xff] }
  0xbd   : > { %15232 = vmatpush3.bf16.msra.mxu1 %v18150_v0  ;;  %2006 = vst [vmem:[#allocation2 + $0x168] sm:$0xf] %v21943_v32  ;;  %2007 = vst [vmem:[#allocation2 + $0x170] sm:$0xf] %v21943_v32  ;;  %v19541_v60 = vshrl.u32 %v342_v59, 7 }
  0xbe   : > { %15233 = vmatprep.subr.bf16.mxu1 %v18153_v3  ;;  %2008 = vst [vmem:[#allocation2 + $0x178] sm:$0xf] %v21943_v32  ;;  %2009 = vst [vmem:[#allocation2 + $0x1c8] sm:$0xf0] %v21943_v32 }
  0xbf   : > { %15196 = vmatpush3.bf16.msra.mxu0 %v18152_v63  ;;  %1084 = vmatmul.mubr.bf16.gmra.mrb[8].mxu1 %v18129_v2  ;;  %2010 = vst [vmem:[#allocation2 + $0x1d0] sm:$0xf0] %v21943_v32  ;;  %2011 = vst [vmem:[#allocation2 + $0x1d8] sm:$0xf0] %v21943_v32  ;;  %v344_v63 = vadd.s32 8, %v19541_v60  ;;  %v355_v3 = vand.u32 7, %v19541_v60 }
  0xc0   : > { %15197 = vmatprep.subr.bf16.mxu0 %v18155_v1  ;;  %1091 = vmatprep.mubr.bf16.mxu1 %v18130_v4  ;;  %vm21940_vm0 = vcmp.lt.s32.totalorder %v19541_v60, 1  ;;  %vm21935_vm1 = vcmp.lt.s32.totalorder %v19541_v60, 7  ;;  %v18225_v32 = vld [vmem:[#allocation8 + $0x2e0] sm:$0xff]  }
  0xc1   : > { %15234 = vmatpush3.bf16.msra.mxu1 %v18154_v6  ;;  %v346_v6 = vadd.s32 24, %v19541_v60  ;;  %vm19562_vm2 = vcmp.ne.s32.totalorder %v355_v3, 7  ;;  %vm19674_vm15 = vcmp.ne.s32.totalorder %v355_v3, 0 }
  0xc2   : > { %703 = vmatmul.mubr.bf16.gmra.mrb[12].mxu0 %v18104_v49  ;;  %15235 = vmatprep.subr.bf16.mxu1 %v18157_v8  ;;  %v18203_v49 = vld [vmem:[#allocation8 + $0x320] sm:$0xff]  }
  0xc3   : > { %15198 = vmatpush3.bf16.msra.mxu0 %v18156_v5  ;;  %1454 = vmatprep.mubr.bf16.mxu0 %v18165_v12  ;;  %v345_v5 = vadd.s32 16, %v19541_v60 }
  0xc4   : > { %15199 = vmatprep.subr.bf16.mxu0 %v18159_v7 }
  0xc5   : > { %15236 = vmatpush3.bf16.msra.mxu1 %v18158_v10  ;;  %v369_v12 = vand.u32 7, %v345_v5 }
  0xc6   : > { %15237 = vmatprep.subr.bf16.mxu1 %v18161_v11  ;;  %v362_v11 = vand.u32 7, %v344_v63  ;;  %v21994_v63 = vmov 0 }
  0xc7   : > { %15200 = vmatpush3.bf16.msra.mxu0 %v18160_v9  ;;  %1092 = vmatmul.mubr.bf16.gmra.mrb[12].mxu1 %v18132_v13  ;;  %vm19588_vm5 = vcmp.ne.s32.totalorder %v369_v12, 0  ;;  %vm19603_vm8 = vcmp.ne.s32.totalorder %v369_v12, 7 }
  0xc8   : > { %1841 = vmatprep.mubr.bf16.mxu1 %v18170_v17  ;;  %15265 = vmatprep.subr.bf16.mxu0 %v18187_v33  ;;  %vm19567_vm3 = vcmp.ne.s32.totalorder %v362_v11, 7  ;;  %vm19584_vm4 = vcmp.ne.s32.totalorder %v362_v11, 0 }
  0xc9   : > { %15238 = vmatpush3.bf16.msra.mxu1 %v18162_v15 }
  0xca   : > { %1455 = vmatmul.mubr.bf16.vlgmr.msra.gmra.mrb[16].mxu0 %v18163_v14  ;;  %15239 = vmatprep.subr.bf16.mxu1 %v18166_v16 }
  0xcb   : > { %1462 = vmatprep.mubr.bf16.mxu0 %v18171_v20  ;;  %15266 = vmatpush3.bf16.msra.mxu0 %v18190_v36  ;;  %v21986_v36 = vmov 0 }
  0xcc   : > { %15267 = vmatprep.subr.bf16.mxu0 %v18193_v38 }
  0xcd   : > { %15240 = vmatpush3.bf16.msra.mxu1 %v18167_v18  ;;  %v376_v18 = vand.u32 7, %v346_v6 }
  0xce   : > { %16825 = vmatprep.subr.bf16.mxu1 %v18186_v26 }
  0xcf   : > { %15268 = vmatpush3.bf16.msra.mxu0 %v18194_v40  ;;  %vm19592_vm6 = vcmp.ne.s32.totalorder %v376_v18, 0  ;;  %vm19607_vm9 = vcmp.ne.s32.totalorder %v376_v18, 7 }
  0xd0   : > { %1842 = vmatmul.mubr.bf16.vlgmr.msra.gmra.mrb[16].mxu1 %v18168_v19  ;;  %15269 = vmatprep.subr.bf16.mxu0 %v18196_v41  ;;  %v21987_v36 = vsel %vm19592_vm6, 4294967295, %v21986_v36 }
  0xd1   : > { %1849 = vmatprep.mubr.bf16.mxu1 %v18174_v22  ;;  %16826 = vmatpush3.bf16.msra.mxu1 %v18186_v26 }
  0xd2   : > { %1463 = vmatmul.mubr.bf16.gmra.mrb[20].mxu0 %v18173_v21  ;;  %16827 = vmatprep.subr.bf16.mxu1 %v18192_v29 }
  0xd3   : > { %1470 = vmatprep.mubr.bf16.mxu0 %v18177_v24  ;;  %15270 = vmatpush3.bf16.msra.mxu0 %v18197_v43 }
  0xd4   : > { %15271 = vmatprep.subr.bf16.mxu0 %v18199_v44 }
  0xd5   : > { %16828 = vmatpush3.bf16.msra.mxu1 %v18192_v29 }
  0xd6   : > { %16829 = vmatprep.subr.bf16.mxu1 %v18195_v35 }
  0xd7   : > { %15272 = vmatpush3.bf16.msra.mxu0 %v18200_v46  ;;  %v19601_v46 = vadd.s32 56, %v19541_v60 }
  0xd8   : > { %1850 = vmatmul.mubr.bf16.gmra.mrb[20].mxu1 %v18176_v23  ;;  %15273 = vmatprep.subr.bf16.mxu0 %v18202_v48 }
  0xd9   : > { %1857 = vmatprep.mubr.bf16.mxu1 %v18180_v27  ;;  %16830 = vmatpush3.bf16.msra.mxu1 %v18195_v35  ;;  %v347_v27 = vadd.s32 32, %v19541_v60  ;;  %v21984_v35 = vmov 0 }
  0xda   : > { %1471 = vmatmul.mubr.bf16.gmra.mrb[24].mxu0 %v18179_v25  ;;  %16831 = vmatprep.subr.bf16.mxu1 %v18198_v39  ;;  %v21980_v25 = vmov 0  ;;  %v21985_v35 = vsel %vm19588_vm5, 4294967295, %v21984_v35 }
  0xdb   : > { %1478 = vmatprep.mubr.bf16.mxu0 %v18183_v30  ;;  %15274 = vmatpush3.bf16.msra.mxu0 %v18203_v49  ;;  %v21981_v25 = vsel %vm19567_vm3, 4294967295, %v21980_v25  ;;  %v383_v40 = vand.u32 7, %v347_v27 }
  0xdc   : > { %15275 = vmatprep.subr.bf16.mxu0 %v18205_v51 }
  0xdd   : > { %16832 = vmatpush3.bf16.msra.mxu1 %v18198_v39  ;;  %vm19619_vm10 = vcmp.ne.s32.totalorder %v383_v40, 0  ;;  %vm19652_vm12 = vcmp.ne.s32.totalorder %v383_v40, 7 }
  0xde   : > { %16833 = vmatprep.subr.bf16.mxu1 %v18201_v42 }
  0xdf   : > { %15276 = vmatpush3.bf16.msra.mxu0 %v18206_v52 }
  0xe0   : > { %1858 = vmatmul.mubr.bf16.gmra.mrb[24].mxu1 %v18182_v28  ;;  %15277 = vmatprep.subr.bf16.mxu0 %v18208_v53  ;;  %v348_v28 = vadd.s32 40, %v19541_v60 }
  0xe1   : > { %1865 = vmatprep.mubr.bf16.mxu1 %v18188_v34  ;;  %16834 = vmatpush3.bf16.msra.mxu1 %v18201_v42  ;;  %v21982_v34 = vmov 0  ;;  %v19598_v42 = vadd.s32 48, %v19541_v60 }
  0xe2   : > { %1479 = vmatmul.mubr.bf16.gmra.mrb[28].mxu0 %v18185_v31  ;;  %16835 = vmatprep.subr.bf16.mxu1 %v18204_v45  ;;  %v21983_v34 = vsel %vm19584_vm4, 4294967295, %v21982_v34  ;;  %v390_v41 = vand.u32 7, %v348_v28 }
  0xe3   : > { %15278 = vmatpush3.bf16.msra.mxu0 %v18209_v54 }
  0xe4   : > { %15279 = vmatprep.subr.bf16.mxu0 %v18211_v56  ;;  %vm19623_vm11 = vcmp.ne.s32.totalorder %v390_v41, 0  ;;  %vm19656_vm13 = vcmp.ne.s32.totalorder %v390_v41, 7 }
  0xe5   : > { %16836 = vmatpush3.bf16.msra.mxu1 %v18204_v45  ;;  %v21995_v63 = vsel %vm19623_vm11, 4294967295, %v21994_v63 }
  0xe6   : > { %16837 = vmatprep.subr.bf16.mxu1 %v18207_v47 }
  0xe7   : > { %15280 = vmatpush3.bf16.msra.mxu0 %v18212_v57 }
  0xe8   : > { %1866 = vmatmul.mubr.bf16.gmra.mrb[28].mxu1 %v18191_v37  ;;  %15317 = vmatprep.subr.bf16.mxu0 %v18214_v58 }
  0xe9   : > { %16838 = vmatpush3.bf16.msra.mxu1 %v18207_v47  ;;  %v21988_v47 = vmov 0 }
  0xea   : > { %16839 = vmatprep.subr.bf16.mxu1 %v18210_v50  ;;  %v21989_v47 = vsel %vm19603_vm8, 4294967295, %v21988_v47 }
  0xed   : > { %16840 = vmatpush3.bf16.msra.mxu1 %v18210_v50 }
  0xee   : > { %16849 = vmatprep.subr.bf16.mxu1 %v19538_v55 }
 0x17d   : > { %v15121_v62 = vpop.f32.mrb[0].mxu0 }
 0x17e   : > { %v15122_v0 = vpop.f32.mrb[1].mxu0 }
 0x17f   : > { %v15123_v1 = vadd.f32 %v15122_v0, %v15121_v62  ;;  %v15124_v2 = vpop.f32.mrb[2].mxu0 }
 0x180   : > { %v15125_v4 = vpop.f32.mrb[3].mxu0 }
 0x181   : > { %v681_v7 = vadd.f32 %v15123_v1, %v19546_v61  ;;  %v15126_v8 = vadd.f32 %v15125_v4, %v15124_v2 }
 0x182   : > { %v15161_v18 = vpop.f32.mrb[0].mxu1 }
 0x183   : > { %v19553_v9 = vmax.f32 %v681_v7, 0.0  ;;  %v684_v10 = vadd.f32 %v15126_v8, %v19546_v61 }
 0x185   : > { %v719_v13 = vrot.slane %v19553_v9, 7  ;;  %v744_v14 = vrot.slane %v19553_v9, 1  ;;  %v712_v16 = vmax.f32 %v684_v10, 0.0  ;;  %v15127_v17 = vpop.f32.mrb[4].mxu0  ;;  %v397_v10 = vand.u32 7, %v19598_v42 }
 0x186   : > { %v15128_v19 = vpop.f32.mrb[5].mxu0 }
 0x187   : > { %v720_v20 = vrot.slane %v712_v16, 7  ;;  %v745_v21 = vrot.slane %v712_v16, 1  ;;  %v770_v22 = vpack.c.bf16 %v712_v16, %v19553_v9  ;;  %v15129_v23 = vadd.f32 %v15128_v19, %v15127_v17  ;;  %v15130_v24 = vpop.f32.mrb[6].mxu0 }
 0x188   : > { %v15131_v26 = vpop.f32.mrb[7].mxu0  ;;  %vm19661_vm14 = vcmp.ne.s32.totalorder %v397_v10, 0 }
 0x189   : > { %v19577_v29 = vsel %vm21940_vm0, %v719_v13, %v720_v20  ;;  %v759_v30 = vsel %vm21935_vm1, %v744_v14, %v745_v21  ;;  %v795_v31 = vrot.slane %v770_v22, 4  ;;  %v689_v33 = vadd.f32 %v15129_v23, %v19546_v61  ;;  %v15162_v23 = vpop.f32.mrb[1].mxu1 }
 0x18a   : > { %v15132_v37 = vadd.f32 %v15131_v26, %v15130_v24  ;;  %v761_v56 = vsel %vm19562_vm2, %v759_v30, 0.0  ;;  %v404_v22 = vand.u32 7, %v19601_v46  ;;  %v737_v24 = vsel %vm19584_vm4, %v19577_v29, 0.0 }
 0x18b   : > { %831 = vst [vmem:[#allocation2 + $0x8] sm:$0xf0] %v795_v31  ;;  %v713_v38 = vmax.f32 %v689_v33, 0.0  ;;  %v15163_v33 = vadd.f32 %v15162_v23, %v15161_v18 }
 0x18c   : > { %v692_v39 = vadd.f32 %v15132_v37, %v19546_v61  ;;  %v15164_v37 = vpop.f32.mrb[2].mxu1 }
 0x18d   : > { %v721_v43 = vrot.slane %v713_v38, 7  ;;  %v746_v44 = vrot.slane %v713_v38, 1  ;;  %v15133_v45 = vpop.f32.mrb[8].mxu0 }
 0x18e   : > { %v714_v48 = vmax.f32 %v692_v39, 0.0  ;;  %v15134_v50 = vpop.f32.mrb[9].mxu0 }
 0x18f   : > { %v733_v51 = vsel %vm21940_vm0, %v720_v20, %v721_v43  ;;  %v758_v52 = vsel %vm21935_vm1, %v745_v21, %v746_v44  ;;  %v15135_v53 = vadd.f32 %v15134_v50, %v15133_v45  ;;  %v15136_v54 = vpop.f32.mrb[10].mxu0 }
 0x190   : > { %v762_v57 = vsel %vm19567_vm3, %v758_v52, 0.0  ;;  %v722_v58 = vrot.slane %v714_v48, 7  ;;  %v747_v59 = vrot.slane %v714_v48, 1  ;;  %v15137_v0 = vpop.f32.mrb[11].mxu0  ;;  %v773_v2 = vpack.c.bf16 %v714_v48, %v713_v38 }
 0x191   : > { %v19627_v1 = vpack.c.bf16 %v762_v57, %v761_v56  ;;  %v697_v4 = vadd.f32 %v15135_v53, %v19546_v61  ;;  %v15138_v5 = vadd.f32 %v15137_v0, %v15136_v54  ;;  %v738_v6 = vsel %vm19588_vm5, %v733_v51, 0.0 }
 0x192   : > { %v732_v7 = vsel %vm21940_vm0, %v721_v43, %v722_v58  ;;  %v757_v8 = vsel %vm21935_vm1, %v746_v44, %v747_v59  ;;  %v799_v16 = vrot.slane %v773_v2, 4  ;;  %v2074_v17 = vld [vmem:[#allocation2 + $0x8] sm:$0xf0]  ;;  %vm19695_vm3 = vcmp.ne.s32.totalorder %v404_v22, 7 }
 0x193   : > { %v796_v11 = vrot.slane %v19627_v1, 4  ;;  %v739_v12 = vsel %vm19592_vm6, %v732_v7, 0.0  ;;  %v715_v20 = vmax.f32 %v697_v4, 0.0  ;;  %v700_v21 = vadd.f32 %v15138_v5, %v19546_v61  ;;  %v18289_v4 = vld [vmem:[#allocation8 + $0x588] sm:$0xff]  }
 0x194   : > { %v19640_v19 = vpack.c.bf16 %v739_v12, %v738_v6  ;;  %v19650_v26 = vsel %vm21934_vm7, %v795_v31, %v799_v16  ;;  %v2146_v44 = vrot.slane %v2074_v17, 4  ;;  %v15165_v31 = vpop.f32.mrb[3].mxu1  ;;  %vm19678_vm7 = vcmp.ne.s32.totalorder %v404_v22, 0 }
 0x195   : > { %832 = vst [vmem:[#allocation2 + $0x10] sm:$0xf0] %v796_v11  ;;  %v15139_v28 = vpop.f32.mrb[12].mxu0  ;;  %834 = vst [vmem:[#allocation2 + $0x20] sm:$0xff] %v19650_v26  ;;  %v723_v38 = vrot.slane %v715_v20, 7  ;;  %v748_v39 = vrot.slane %v715_v20, 1  ;;  %v19666_v48 = vadd.f32 %v15165_v31, %v15164_v37 }
 0x196   : > { %v716_v42 = vmax.f32 %v700_v21, 0.0  ;;  %v15140_v43 = vpop.f32.mrb[13].mxu0  ;;  %v2147_v41 = vrot.slane %v19650_v26, 4  ;;  %v763_v0 = vsel %vm19603_vm8, %v757_v8, 0.0  ;;  %vm22008_vm6 = vcmp.lt.s32.totalorder %v19541_v60, 7 }
 0x197   : > { %v15141_v45 = vadd.f32 %v15140_v43, %v15139_v28  ;;  %v15142_v46 = vpop.f32.mrb[14].mxu0  ;;  %v731_v50 = vsel %vm21940_vm0, %v722_v58, %v723_v38  ;;  %v756_v51 = vsel %vm21935_vm1, %v747_v59, %v748_v39  ;;  %vm19687_vm1 = vcmp.ne.s32.totalorder %v397_v10, 7 }
 0x198   : > { %v724_v52 = vrot.slane %v716_v42, 7  ;;  %v749_v53 = vrot.slane %v716_v42, 1  ;;  %v15143_v57 = vpop.f32.mrb[15].mxu0  ;;  %v764_v58 = vsel %vm19607_vm9, %v756_v51, 0.0  ;;  %v776_v59 = vpack.c.bf16 %v716_v42, %v715_v20  ;;  %v19703_v20 = vpop.f32.mrb[4].mxu1 }
 0x199   : > { %v705_v2 = vadd.f32 %v15141_v45, %v19546_v61  ;;  %v774_v3 = vpack.c.bf16 %v764_v58, %v763_v0  ;;  %v15144_v8 = vadd.f32 %v15143_v57, %v15142_v46  ;;  %v740_v12 = vsel %vm19619_vm10, %v731_v50, 0.0 }
 0x19a   : > { %v730_v5 = vsel %vm21940_vm0, %v723_v38, %v724_v52  ;;  %v755_v6 = vsel %vm22008_vm6, %v748_v39, %v749_v53  ;;  %v805_v17 = vrot.slane %v776_v59, 4  ;;  %vm22011_vm6 = vcmask 1043456   ;;  %v15168_v38 = vpop.f32.mrb[5].mxu1 }
 0x19b   : > { %v741_v10 = vsel %vm19623_vm11, %v730_v5, 0.0  ;;  %v717_v18 = vmax.f32 %v705_v2, 0.0  ;;  %v801_v21 = vrot.slane %v774_v3, 4  ;;  %v708_v28 = vadd.f32 %v15144_v8, %v19546_v61  ;;  %vm22012_vm0 = vmmov %vm22011_vm6  ;;  %v19714_v45 = vpop.f32.mrb[6].mxu1 }
 0x19c   : > { %v19705_v23 = vpack.c.bf16 %v741_v10, %v740_v12  ;;  %v2148_v22 = vsel %vm22011_vm6, %v2146_v44, %v2147_v41  ;;  %v2075_v37 = vld [vmem:[#allocation2 + $0x10] sm:$0xf0]  ;;  %v19712_v39 = vsel %vm22012_vm0, %v799_v16, %v805_v17  ;;  %v797_v46 = vrot.slane %v19640_v19, 4  ;;  %vm22013_vm11 = vmmov %vm22012_vm0  ;;  %v19724_v16 = vpop.f32.mrb[7].mxu1 }
 0x19d   : > { %v725_v42 = vrot.slane %v717_v18, 7  ;;  %v750_v43 = vrot.slane %v717_v18, 1  ;;  %2358 = vmatprep.mubr.bf16.mxu0 %v2148_v22  ;;  %v2149_v31 = vrot.slane %v2075_v37, 4  ;;  %v19720_v50 = vsel %vm22013_vm11, %v796_v11, %v801_v21  ;;  %837 = vst [vmem:[#allocation2 + $0x38] sm:$0xff] %v19712_v39 }
 0x19e   : > { %v803_v44 = vrot.slane %v19705_v23, 4  ;;  %v718_v51 = vmax.f32 %v708_v28, 0.0  ;;  %835 = vst [vmem:[#allocation2 + $0x28] sm:$0xff] %v19720_v50  ;;  %vm22014_vm0 = vcmp.lt.s32.totalorder %v19541_v60, 1  ;;  %vm22015_vm6 = vcmp.lt.s32.totalorder %v19541_v60, 7  ;;  %v15173_v28 = vpop.f32.mrb[8].mxu1 }
 0x19f   : > { %v729_v57 = vsel %vm22014_vm0, %v724_v52, %v725_v42  ;;  %v754_v19 = vsel %vm22015_vm6, %v749_v53, %v750_v43  ;;  %v2150_v1 = vrot.slane %v19720_v50, 4  ;;  %v1070_v11 = vadd.f32 %v15163_v33, %v19546_v61  ;;  %vm22016_vm0 = vmmov %vm22013_vm11 }
 0x1a0   : > { %v765_v0 = vsel %vm19652_vm12, %v755_v6, 0.0  ;;  %v19736_v58 = vsel %vm22013_vm11, %v797_v46, %v803_v44  ;;  %v766_v59 = vsel %vm19656_vm13, %v754_v19, 0.0  ;;  %v726_v2 = vrot.slane %v718_v51, 7 }
 0x1a1   : > { %836 = vst [vmem:[#allocation2 + $0x30] sm:$0xff] %v19736_v58  ;;  %v777_v52 = vpack.c.bf16 %v766_v59, %v765_v0  ;;  %v751_v3 = vrot.slane %v718_v51, 1  ;;  %v779_v5 = vpack.c.bf16 %v718_v51, %v717_v18  ;;  %v2151_v53 = vsel %vm22016_vm0, %v2149_v31, %v2150_v1  ;;  %v15174_v31 = vpop.f32.mrb[9].mxu1 }
 0x1a2   : > { %v742_v33 = vsel %vm19661_vm14, %v729_v57, 0.0  ;;  %vm22017_vm6 = vcmp.lt.s32.totalorder %v19541_v60, 1  ;;  %16841 = vmatprep.mubr.bf16.mxu1 %v2151_v53  ;;  %vm22019_vm0 = vcmp.lt.s32.totalorder %v19541_v60, 7  ;;  %v19771_v57 = vmax.f32 %v1070_v11, 0.0 }
 0x1a3   : > { %v728_v6 = vsel %vm22017_vm6, %v725_v42, %v726_v2  ;;  %vm22018_vm11 = vmmov %vm22017_vm6  ;;  %v807_v12 = vrot.slane %v777_v52, 4  ;;  %v753_v23 = vsel %vm22019_vm0, %v750_v43, %v751_v3  ;;  %v811_v9 = vrot.slane %v779_v5, 4  ;;  %v18216_v52 = vld [vmem:[#allocation8 + $0x2c8] sm:$0xff]  }
 0x1a4   : > { %v735_v8 = vsel %vm22018_vm11, %v726_v2, %v719_v13  ;;  %v743_v18 = vsel %vm19678_vm7, %v728_v6, 0.0  ;;  %vm22020_vm6 = vmmov %vm22019_vm0  ;;  %v767_v13 = vsel %vm19687_vm1, %v753_v23, 0.0  ;;  %vm22021_vm11 = vcmask 1043456  }
 0x1a5   : > { %v736_v10 = vsel %vm19674_vm15, %v735_v8, 0.0  ;;  %v760_v22 = vsel %vm22020_vm6, %v751_v3, %v744_v14  ;;  %v778_v42 = vpack.c.bf16 %v743_v18, %v742_v33  ;;  %v19767_v51 = vsel %vm22021_vm11, %v801_v21, %v807_v12  ;;  %v15176_v14 = vpop.f32.mrb[10].mxu1  ;;  %vm22022_vm0 = vmmov %vm22021_vm11  ;;  %843 = vst [vmem:[#allocation2 + $0x68] sm:$0xf] %v811_v9 }
 0x1a6   : > { %v769_v37 = vpack.c.bf16 %v737_v24, %v736_v10  ;;  %v768_v43 = vsel %vm19695_vm3, %v760_v22, 0.0  ;;  %838 = vst [vmem:[#allocation2 + $0x40] sm:$0xff] %v19767_v51  ;;  %v2156_v29 = vrot.slane %v19767_v51, 4  ;;  %v15177_v24 = vpop.f32.mrb[11].mxu1  ;;  %v19776_v2 = vsel %vm22022_vm0, %v805_v17, %v811_v9  ;;  %vm22023_vm6 = vmmov %vm22022_vm0  ;;  %v18219_v10 = vld [vmem:[#allocation8 + $0x2d0] sm:$0xff]  }
 0x1a7   : > { %v780_v19 = vpack.c.bf16 %v768_v43, %v767_v13  ;;  %v809_v59 = vrot.slane %v778_v42, 4  ;;  %v2154_v21 = vrot.slane %v19712_v39, 4  ;;  %v1073_v11 = vadd.f32 %v19666_v48, %v19546_v61  ;;  %vm22024_vm11 = vmmov %vm22022_vm0  ;;  %840 = vst [vmem:[#allocation2 + $0x50] sm:$0xff] %v19776_v2  ;;  %v15179_v18 = vpop.f32.mrb[12].mxu1 }
 0x1a8   : > { %v794_v0 = vrot.slane %v769_v37, 4  ;;  %v15169_v3 = vadd.f32 %v15168_v38, %v19703_v20  ;;  %v2157_v17 = vsel %vm22022_vm0, %v2150_v1, %v2156_v29  ;;  %v21946_v48 = vrot.slane %v19771_v57, 7 }
 0x1a9   : > { %v19786_v53 = vsel %vm22024_vm11, %v803_v44, %v809_v59  ;;  %v813_v33 = vrot.slane %v780_v19, 4  ;;  %842 = vst [vmem:[#allocation2 + $0x60] sm:$0xf] %v809_v59  ;;  %16842 = vmatmul.mubr.bf16.vlgmr.msra.gmra.mrb[32].mxu1 %v2157_v17  ;;  %v21945_v20 = vrot.slane %v19771_v57, 1  ;;  %v1101_v38 = vmax.f32 %v1073_v11, 0.0  ;;  %vm22026_vm11 = vmmov %vm22022_vm0 }
 0x1aa   : > { %v19783_v5 = vsel %vm22023_vm6, %v794_v0, %v797_v46  ;;  %830 = vst [vmem:[#allocation2] sm:$0xf0] %v794_v0  ;;  %839 = vst [vmem:[#allocation2 + $0x48] sm:$0xff] %v19786_v53  ;;  %16850 = vmatpush3.bf16.msra.mxu1 %v19538_v55  ;;  %v1078_v44 = vadd.f32 %v15169_v3, %v19546_v61  ;;  %v15172_v1 = vadd.f32 %v19724_v16, %v19714_v45  ;;  %v15180_v45 = vpop.f32.mrb[13].mxu1 }
 0x1ab   : > { %833 = vst [vmem:[#allocation2 + $0x18] sm:$0xff] %v19783_v5  ;;  %vm22025_vm6 = vmmov %vm22022_vm0  ;;  %v15175_v6 = vadd.f32 %v15174_v31, %v15173_v28  ;;  %16851 = vmatprep.subr.bf16.mxu1 %v18216_v52  ;;  %v1109_v55 = vrot.slane %v1101_v38, 7  ;;  %v1133_v23 = vrot.slane %v1101_v38, 1  ;;  %v1157_v22 = vpack.c.bf16 %v1101_v38, %v19771_v57  ;;  %v15182_v31 = vpop.f32.mrb[14].mxu1 }
 0x1ac   : > { %v19795_v46 = vsel %vm22025_vm6, %v807_v12, %v813_v33  ;;  %844 = vst [vmem:[#allocation2 + $0x70] sm:$0xf] %v813_v33  ;;  %v2155_v12 = vsel %vm22026_vm11, %v2147_v41, %v2154_v21  ;;  %v1102_v13 = vmax.f32 %v1078_v44, 0.0  ;;  %v2144_v16 = vrot.slane %v19783_v5, 4  ;;  %v15183_v0 = vpop.f32.mrb[15].mxu1  ;;  %v18215_v33 = vld [vmem:[#allocation8 + $0x240] sm:$0xff]  }
 0x1ad   : > { %841 = vst [vmem:[#allocation2 + $0x58] sm:$0xff] %v19795_v46  ;;  %v2162_v8 = vrot.slane %v19795_v46, 4  ;;  %v1081_v37 = vadd.f32 %v15172_v1, %v19546_v61  ;;  %v15178_v42 = vadd.f32 %v15177_v24, %v15176_v14  ;;  %vm22027_vm6 = vcmp.lt.s32.totalorder %v19541_v60, 1  ;;  %v18222_v24 = vld [vmem:[#allocation8 + $0x2d8] sm:$0xff]   ;;  %v18217_v1 = vld [vmem:[#allocation8 + $0x288] sm:$0xff]  }
 0x1ae   : > { %16852 = vmatpush3.bf16.msra.mxu1 %v18216_v52  ;;  %v19816_v41 = vsel %vm22027_vm6, %v21946_v48, %v1109_v55  ;;  %vm22028_vm11 = vcmp.lt.s32.totalorder %v19541_v60, 7  ;;  %v1181_v9 = vrot.slane %v1157_v22, 4  ;;  %v1110_v19 = vrot.slane %v1102_v13, 7 }
 0x1af   : > { %v2163_v28 = vsel %vm22022_vm0, %v2156_v29, %v2162_v8  ;;  %v1146_v43 = vsel %vm22028_vm11, %v21945_v20, %v1133_v23  ;;  %16853 = vmatprep.subr.bf16.mxu1 %v18219_v10  ;;  %v21947_v14 = vrot.slane %v19736_v58, 4  ;;  %v2160_v29 = vrot.slane %v19776_v2, 4  ;;  %vm22029_vm11 = vmmov %vm22022_vm0 }
 0x1b0   : > { %16845 = vmatprep.mubr.bf16.mxu1 %v2163_v28  ;;  %v19824_v52 = vadd.f32 %v15180_v45, %v15179_v18  ;;  %v19826_v11 = vadd.f32 %v15183_v0, %v15182_v31  ;;  %v2158_v17 = vrot.slane %v19786_v53, 4  ;;  %1218 = vst [vmem:[#allocation2 + $0x80] sm:$0xf0] %v1181_v9  ;;  %v1086_v38 = vadd.f32 %v15175_v6, %v19546_v61 }
 0x1b1   : > { %v2073_v59 = vld [vmem:[#allocation2] sm:$0xf0]  ;;  %v1089_v44 = vadd.f32 %v15178_v42, %v19546_v61  ;;  %v19834_v28 = vsel %vm22022_vm0, %v2144_v16, %v21947_v14  ;;  %v1121_v18 = vsel %vm22027_vm6, %v1109_v55, %v1110_v19  ;;  %v1134_v45 = vrot.slane %v1102_v13, 1  ;;  %vm22031_vm6 = vmmov %vm22029_vm11 }
 0x1b2   : > { %v2143_v3 = vrot.slane %v2073_v59, 4  ;;  %v1103_v31 = vmax.f32 %v1081_v37, 0.0  ;;  %16854 = vmatpush3.bf16.msra.mxu1 %v18219_v10  ;;  %v1148_v6 = vsel %vm19562_vm2, %v1146_v43, 0.0  ;;  %v1126_v42 = vsel %vm19588_vm5, %v1121_v18, 0.0  ;;  %v2014_v18 = vld [vmem:[#allocation2 + $0x10] sm:$0xff] }
 0x1b3   : > { %v2078_v22 = vld [vmem:[#allocation2 + $0x70] sm:$0xf]  ;;  %16855 = vmatprep.subr.bf16.mxu1 %v18222_v24  ;;  %vm22030_vm0 = vcmp.lt.s32.totalorder %v19541_v60, 7  ;;  %v1104_v43 = vmax.f32 %v1086_v38, 0.0  ;;  %vm22034_vm5 = vcmp.lt.s32.totalorder %v19541_v60, 7 }
 0x1b4   : > { %v2145_v0 = vsel %vm22029_vm11, %v2143_v3, %v2144_v16  ;;  %v2168_v59 = vrot.slane %v2078_v22, 4  ;;  %v1145_v20 = vsel %vm22030_vm0, %v1133_v23, %v1134_v45  ;;  %v1111_v48 = vrot.slane %v1103_v31, 7  ;;  %v18218_v16 = vld [vmem:[#allocation8 + $0x248] sm:$0xff]   ;;  %v18220_v22 = vld [vmem:[#allocation8 + $0x290] sm:$0xff]  }
 0x1b5   : > { %2359 = vmatmul.mubr.bf16.vlgmr.msra.gmra.mrb[32].mxu0 %v2145_v0  ;;  %v1135_v55 = vrot.slane %v1103_v31, 1  ;;  %v1160_v14 = vpack.c.bf16 %v1103_v31, %v1102_v13  ;;  %vm22032_vm11 = vnez %v21981_v25  ;;  %v19848_v3 = vmax.f32 %v1089_v44, 0.0  ;;  %v18228_v44 = vld [vmem:[#allocation8 + $0x2e8] sm:$0xff]  }
 0x1b6   : > { %15318 = vmatpush3.bf16.msra.mxu0 %v18215_v33  ;;  %2366 = vmatprep.mubr.bf16.mxu0 %v2155_v12  ;;  %v2169_v10 = vsel %vm22031_vm6, %v2162_v8, %v2168_v59  ;;  %v1149_v37 = vsel %vm22032_vm11, %v1145_v20, 0.0  ;;  %vm22033_vm0 = vcmp.lt.s32.totalorder %v19541_v60, 1  ;;  %vm22035_vm6 = vnez %v21987_v36 }
 0x1b7   : > { %15319 = vmatprep.subr.bf16.mxu0 %v18217_v1  ;;  %16846 = vmatmul.mubr.bf16.gmra.mrb[36].mxu1 %v2169_v10  ;;  %v1158_v0 = vpack.c.bf16 %v1149_v37, %v1148_v6  ;;  %v1120_v23 = vsel %vm22033_vm0, %v1110_v19, %v1111_v48  ;;  %v1144_v12 = vsel %vm22034_vm5, %v1134_v45, %v1135_v55  ;;  %v1185_v13 = vrot.slane %v1160_v14, 4  ;;  %v18221_v14 = vld [vmem:[#allocation8 + $0x250] sm:$0xff]  }
 0x1b8   : > { %16865 = vmatprep.mubr.bf16.mxu1 %v2014_v18  ;;  %16856 = vmatpush3.bf16.msra.mxu1 %v18222_v24  ;;  %v1127_v20 = vsel %vm22035_vm6, %v1120_v23, 0.0  ;;  %v1150_v8 = vsel %vm19603_vm8, %v1144_v12, 0.0  ;;  %v1112_v33 = vrot.slane %v1104_v43, 7  ;;  %v1136_v38 = vrot.slane %v1104_v43, 1  ;;  %v18223_v24 = vld [vmem:[#allocation8 + $0x298] sm:$0xff]   ;;  %v18231_v18 = vld [vmem:[#allocation8 + $0x2f0] sm:$0xff]  }
 0x1b9   : > { %16857 = vmatprep.subr.bf16.mxu1 %v18225_v32  ;;  %v1182_v1 = vrot.slane %v1158_v0, 4  ;;  %v19858_v31 = vpack.c.bf16 %v1127_v20, %v1126_v42  ;;  %vm22036_vm0 = vcmask 1043456   ;;  %v1113_v45 = vrot.slane %v19848_v3, 7  ;;  %v2077_v42 = vld [vmem:[#allocation2 + $0x68] sm:$0xf]  ;;  %v18224_v20 = vld [vmem:[#allocation8 + $0x258] sm:$0xff]  }
 0x1ba   : > { %v1186_v19 = vsel %vm22036_vm0, %v1181_v9, %v1185_v13  ;;  %15320 = vmatpush3.bf16.msra.mxu0 %v18218_v16  ;;  %vm22037_vm5 = vcmp.lt.s32.totalorder %v19541_v60, 1  ;;  %vm22038_vm8 = vcmp.lt.s32.totalorder %v19541_v60, 7  ;;  %v1137_v10 = vrot.slane %v19848_v3, 1 }
 0x1bb   : > { %1221 = vst [vmem:[#allocation2 + $0x98] sm:$0xff] %v1186_v19  ;;  %v1119_v59 = vsel %vm22037_vm5, %v1111_v48, %v1112_v33  ;;  %v1143_v6 = vsel %vm22038_vm8, %v1135_v55, %v1136_v38  ;;  %v1163_v37 = vpack.c.bf16 %v19848_v3, %v1104_v43  ;;  %15321 = vmatprep.subr.bf16.mxu0 %v18220_v22  ;;  %1219 = vst [vmem:[#allocation2 + $0x88] sm:$0xf0] %v1182_v1 }
 0x1bc   : > { %v2161_v9 = vsel %vm22036_vm0, %v2154_v21, %v2160_v29  ;;  %v1128_v16 = vsel %vm19619_vm10, %v1119_v59, 0.0  ;;  %v1151_v48 = vsel %vm19607_vm9, %v1143_v6, 0.0  ;;  %vm22039_vm8 = vmmov %vm22037_vm5  ;;  %16858 = vmatpush3.bf16.msra.mxu1 %v18225_v32  ;;  %vm22040_vm5 = vnez %v21995_v63 }
 0x1bd   : > { %v1118_v55 = vsel %vm22039_vm8, %v1112_v33, %v1113_v45  ;;  %v19879_v43 = vpack.c.bf16 %v1151_v48, %v1150_v8  ;;  %vm22041_vm6 = vcmp.lt.s32.totalorder %v19541_v60, 7  ;;  %v19885_v22 = vrot.slane %v1163_v37, 4  ;;  %2367 = vmatmul.mubr.bf16.gmra.mrb[36].mxu0 %v19834_v28  ;;  %16859 = vmatprep.subr.bf16.mxu1 %v18228_v44  ;;  %vm22044_vm8 = vmmov %vm22036_vm0 }
 0x1be   : > { %v1129_v3 = vsel %vm22040_vm5, %v1118_v55, 0.0  ;;  %v1142_v21 = vsel %vm22041_vm6, %v1136_v38, %v1137_v10  ;;  %v1183_v0 = vrot.slane %v19858_v31, 4  ;;  %v1094_v32 = vadd.f32 %v19824_v52, %v19546_v61  ;;  %15322 = vmatpush3.bf16.msra.mxu0 %v18221_v14  ;;  %2374 = vmatprep.mubr.bf16.mxu0 %v2161_v9  ;;  %vm22042_vm6 = vmmov %vm22036_vm0  ;;  %v18226_v38 = vld [vmem:[#allocation8 + $0x2a0] sm:$0xff]   ;;  %v18234_v14 = vld [vmem:[#allocation8 + $0x2f8] sm:$0xff]  }
 0x1bf   : > { %v19889_v23 = vpack.c.bf16 %v1129_v3, %v1128_v16  ;;  %v1097_v12 = vadd.f32 %v19826_v11, %v19546_v61  ;;  %v2166_v8 = vrot.slane %v2077_v42, 4  ;;  %v1187_v33 = vrot.slane %v19879_v43, 4  ;;  %15323 = vmatprep.subr.bf16.mxu0 %v18223_v24  ;;  %v18227_v42 = vld [vmem:[#allocation8 + $0x260] sm:$0xff]   ;;  %v18229_v55 = vld [vmem:[#allocation8 + $0x2a8] sm:$0xff]   ;;  %v18235_v43 = vld [vmem:[#allocation8 + $0x2b8] sm:$0xff]  }
 0x1c0   : > { %v1192_v28 = vsel %vm22042_vm6, %v1185_v13, %v19885_v22  ;;  %v1106_v59 = vmax.f32 %v1094_v32, 0.0  ;;  %v22043_v61 = vrot.slane %v19736_v58, 4  ;;  %16860 = vmatpush3.bf16.msra.mxu1 %v18228_v44  ;;  %v1125_v11 = vsel %vm19584_vm4, %v19816_v41, 0.0  ;;  %vm22045_vm6 = vmmov %vm22036_vm0  ;;  %v2076_v3 = vld [vmem:[#allocation2 + $0x60] sm:$0xf] }
 0x1c1   : > { %v1189_v19 = vrot.slane %v19889_v23, 4  ;;  %1224 = vst [vmem:[#allocation2 + $0xb0] sm:$0xff] %v1192_v28  ;;  %v1107_v6 = vmax.f32 %v1097_v12, 0.0  ;;  %v1188_v13 = vsel %vm22044_vm8, %v1182_v1, %v1187_v33  ;;  %16861 = vmatprep.subr.bf16.mxu1 %v18231_v18  ;;  %v2167_v41 = vsel %vm22036_vm0, %v2160_v29, %v2166_v8  ;;  %v2013_v23 = vld [vmem:[#allocation2 + $0x8] sm:$0xff] }
 0x1c2   : > { %v2159_v52 = vsel %vm22036_vm0, %v22043_v61, %v2158_v17  ;;  %1222 = vst [vmem:[#allocation2 + $0xa0] sm:$0xff] %v1188_v13  ;;  %v1114_v37 = vrot.slane %v1106_v59, 7  ;;  %v1138_v9 = vrot.slane %v1106_v59, 1  ;;  %15324 = vmatpush3.bf16.msra.mxu0 %v18224_v20  ;;  %v1152_v1 = vsel %vm19652_vm12, %v1142_v21, 0.0 }
 0x1c3   : > { %v1190_v24 = vsel %vm22045_vm6, %v1183_v0, %v1189_v19  ;;  %v1115_v44 = vrot.slane %v1107_v6, 7  ;;  %v1139_v16 = vrot.slane %v1107_v6, 1  ;;  %v1166_v48 = vpack.c.bf16 %v1107_v6, %v1106_v59  ;;  %15325 = vmatprep.subr.bf16.mxu0 %v18226_v38  ;;  %v18237_v38 = vld [vmem:[#allocation8 + $0x440] sm:$0xff]  }
 0x1c4   : > { %1223 = vst [vmem:[#allocation2 + $0xa8] sm:$0xff] %v1190_v24  ;;  %vm22046_vm8 = vcmp.lt.s32.totalorder %v19541_v60, 1  ;;  %vm22047_vm6 = vcmp.lt.s32.totalorder %v19541_v60, 7  ;;  %v22049_v29 = vrot.slane %v19771_v57, 7  ;;  %16862 = vmatpush3.bf16.msra.mxu1 %v18231_v18  ;;  %v22052_v18 = vrot.slane %v19771_v57, 1  ;;  %v18230_v24 = vld [vmem:[#allocation8 + $0x268] sm:$0xff]  }
 0x1c5   : > { %v1117_v32 = vsel %vm22046_vm8, %v1113_v45, %v1114_v37  ;;  %v1141_v12 = vsel %vm22047_vm6, %v1137_v10, %v1138_v9  ;;  %vm22048_vm5 = vmmov %vm22046_vm8  ;;  %2375 = vmatmul.mubr.bf16.gmra.mrb[40].mxu0 %v2159_v52  ;;  %16863 = vmatprep.subr.bf16.mxu1 %v18234_v14  ;;  %v1197_v13 = vrot.slane %v1166_v48, 4  ;;  %v18240_v48 = vld [vmem:[#allocation8 + $0x448] sm:$0xff]   ;;  %vm22072_vm4 = vcmp.lt.s32.totalorder %v19541_v60, 1 }
 0x1c6   : > { %v1116_v20 = vsel %vm22048_vm5, %v1114_v37, %v1115_v44  ;;  %vm22050_vm0 = vmmov %vm22048_vm5  ;;  %v1130_v8 = vsel %vm19661_vm14, %v1117_v32, 0.0  ;;  %v1153_v28 = vsel %vm19656_vm13, %v1141_v12, 0.0  ;;  %15326 = vmatpush3.bf16.msra.mxu0 %v18227_v42  ;;  %2382 = vmatprep.mubr.bf16.mxu0 %v2167_v41  ;;  %v18232_v32 = vld [vmem:[#allocation8 + $0x2b0] sm:$0xff]  }
 0x1c7   : > { %v1123_v21 = vsel %vm22050_vm0, %v1115_v44, %v22049_v29  ;;  %v1131_v10 = vsel %vm19678_vm7, %v1116_v20, 0.0  ;;  %v1164_v59 = vpack.c.bf16 %v1153_v28, %v1152_v1  ;;  %vm22051_vm5 = vmmov %vm22047_vm6  ;;  %15327 = vmatprep.subr.bf16.mxu0 %v18229_v55  ;;  %vm22054_vm6 = vcmask 1043456   ;;  %1230 = vst [vmem:[#allocation2 + $0xe0] sm:$0xf] %v1197_v13  ;;  %v18233_v20 = vld [vmem:[#allocation8 + $0x270] sm:$0xff]   ;;  %v18246_v29 = vld [vmem:[#allocation8 + $0x458] sm:$0xff]  }
 0x1c8   : > { %v1124_v45 = vsel %vm19674_vm15, %v1123_v21, 0.0  ;;  %v1140_v6 = vsel %vm22051_vm5, %v1138_v9, %v1139_v16  ;;  %vm22053_vm8 = vmmov %vm22051_vm5  ;;  %v1165_v1 = vpack.c.bf16 %v1131_v10, %v1130_v8  ;;  %v1198_v57 = vsel %vm22054_vm6, %v19885_v22, %v1197_v13  ;;  %16864 = vmatpush3.bf16.msra.mxu1 %v18234_v14  ;;  %v18239_v21 = vld [vmem:[#allocation8 + $0x3c0] sm:$0xff]   ;;  %v15201_v10 = vpop.f32.mrb[16].mxu0 }
 0x1c9   : > { %v1147_v61 = vsel %vm22053_vm8, %v1139_v16, %v22052_v18  ;;  %v1154_v37 = vsel %vm19687_vm1, %v1140_v6, 0.0  ;;  %v1156_v44 = vpack.c.bf16 %v1125_v11, %v1124_v45  ;;  %v1193_v9 = vrot.slane %v1164_v59, 4  ;;  %1227 = vst [vmem:[#allocation2 + $0xc8] sm:$0xff] %v1198_v57  ;;  %16873 = vmatprep.subr.bf16.mxu1 %v18237_v38  ;;  %vm22055_vm0 = vmmov %vm22054_vm6  ;;  %v2012_v8 = vld [vmem:[#allocation2] sm:$0xff]  ;;  %v18242_v45 = vld [vmem:[#allocation8 + $0x3c8] sm:$0xff]   ;;  %v15241_v59 = vpop.f32.mrb[16].mxu1 }
 0x1ca   : > { %v1155_v52 = vsel %vm19695_vm3, %v1147_v61, 0.0  ;;  %v2164_v16 = vrot.slane %v2076_v3, 4  ;;  %v1195_v41 = vrot.slane %v1165_v1, 4  ;;  %15328 = vmatpush3.bf16.msra.mxu0 %v18230_v24  ;;  %vm22056_vm5 = vmmov %vm22055_vm0  ;;  %v18238_v3 = vld [vmem:[#allocation8 + $0x400] sm:$0xff]   ;;  %v18244_v6 = vld [vmem:[#allocation8 + $0x410] sm:$0xff]   ;;  %v15202_v18 = vpop.f32.mrb[17].mxu0 }
 0x1cb   : > { %v1167_v12 = vpack.c.bf16 %v1155_v52, %v1154_v37  ;;  %v1180_v42 = vrot.slane %v1156_v44, 4  ;;  %v19953_v11 = vsel %vm22055_vm0, %v1187_v33, %v1193_v9  ;;  %vm22057_vm8 = vmmov %vm22055_vm0  ;;  %15329 = vmatprep.subr.bf16.mxu0 %v18232_v32  ;;  %16866 = vmatmul.mubr.bf16.vlgmr.msra.gmra.mrb[32].mxu1 %v19720_v50  ;;  %v18249_v28 = vld [vmem:[#allocation8 + $0x460] sm:$0xff]   ;;  %v18245_v61 = vld [vmem:[#allocation8 + $0x3d0] sm:$0xff]   ;;  %v15204_v13 = vpop.f32.mrb[18].mxu0 }
 0x1cc   : > { %1225 = vst [vmem:[#allocation2 + $0xb8] sm:$0xff] %v19953_v11  ;;  %v1196_v14 = vsel %vm22057_vm8, %v1189_v19, %v1195_v41  ;;  %1229 = vst [vmem:[#allocation2 + $0xd8] sm:$0xf] %v1195_v41  ;;  %v2165_v31 = vsel %vm22055_vm0, %v2158_v17, %v2164_v16  ;;  %16869 = vmatprep.mubr.bf16.mxu1 %v19767_v51  ;;  %16874 = vmatpush3.bf16.msra.mxu1 %v18237_v38  ;;  %v18236_v19 = vld [vmem:[#allocation8 + $0x278] sm:$0xff]   ;;  %v18241_v17 = vld [vmem:[#allocation8 + $0x408] sm:$0xff]   ;;  %v15205_v37 = vpop.f32.mrb[19].mxu0 }
 0x1cd   : > { %v1199_v55 = vrot.slane %v1167_v12, 4  ;;  %v1184_v22 = vsel %vm22056_vm5, %v1180_v42, %v1183_v0  ;;  %1217 = vst [vmem:[#allocation2 + $0x78] sm:$0xf0] %v1180_v42  ;;  %vm22058_vm6 = vmmov %vm22055_vm0  ;;  %v18243_v0 = vld [vmem:[#allocation8 + $0x450] sm:$0xff]   ;;  %2383 = vmatmul.mubr.bf16.gmra.mrb[44].mxu0 %v2165_v31  ;;  %16875 = vmatprep.subr.bf16.mxu1 %v18240_v48  ;;  %v19974_v38 = vld [vmem:[%s21924_s2] ss:$0 sm:$0xff]  ;;  %v15206_v44 = vadd.f32 %v15205_v37, %v15204_v13  ;;  %vm22063_vm0 = vnez %v21985_v35 }
 0x1ce   : > { %1220 = vst [vmem:[#allocation2 + $0x90] sm:$0xff] %v1184_v22  ;;  %1226 = vst [vmem:[#allocation2 + $0xc0] sm:$0xff] %v1196_v14  ;;  %15330 = vmatpush3.bf16.msra.mxu0 %v18233_v20  ;;  %2632 = vmatprep.mubr.bf16.mxu0 %v2013_v23  ;;  %v18252_v24 = vld [vmem:[#allocation8 + $0x468] sm:$0xff]   ;;  %v15207_v1 = vpop.f32.mrb[20].mxu0  ;;  %v18255_v32 = vld [vmem:[#allocation8 + $0x470] sm:$0xff]   ;;  %v15242_v41 = vpop.f32.mrb[17].mxu1 }
 0x1cf   : > { %v1200_v33 = vsel %vm22058_vm6, %v1193_v9, %v1199_v55  ;;  %1231 = vst [vmem:[#allocation2 + $0xe8] sm:$0xf] %v1199_v55  ;;  %15331 = vmatprep.subr.bf16.mxu0 %v18235_v43  ;;  %v15208_v9 = vpop.f32.mrb[21].mxu0  ;;  %v1460_v57 = vadd.f32 %v15206_v44, %v19974_v38  ;;  %v18250_v31 = vld [vmem:[#allocation8 + $0x420] sm:$0xff]   ;;  %vm22059_vm5 = vcmp.lt.s32.totalorder %v19541_v60, 1  ;;  %vm22060_vm8 = vcmp.lt.s32.totalorder %v19541_v60, 7 }
 0x1d0   : > { %1228 = vst [vmem:[#allocation2 + $0xd0] sm:$0xff] %v1200_v33  ;;  %16876 = vmatpush3.bf16.msra.mxu1 %v18240_v48  ;;  %v15209_v16 = vadd.f32 %v15208_v9, %v15207_v1  ;;  %v15210_v42 = vpop.f32.mrb[22].mxu0  ;;  %v18248_v48 = vld [vmem:[#allocation8 + $0x3d8] sm:$0xff]   ;;  %v15244_v33 = vpop.f32.mrb[18].mxu1  ;;  %vm22062_vm6 = vmmov %vm22059_vm5 }
 0x1d1   : > { %16877 = vmatprep.subr.bf16.mxu1 %v18243_v0  ;;  %v1488_v22 = vmax.f32 %v1460_v57, 0.0  ;;  %v15211_v43 = vpop.f32.mrb[23].mxu0  ;;  %v20000_v57 = vld [vmem:[#allocation8 + $0x500] sm:$0xff]  }
 0x1d2   : > { %15332 = vmatpush3.bf16.msra.mxu0 %v18236_v19  ;;  %v1465_v14 = vadd.f32 %v15209_v16, %v19974_v38  ;;  %v15212_v23 = vadd.f32 %v15211_v43, %v15210_v42  ;;  %v15213_v19 = vpop.f32.mrb[24].mxu0 }
 0x1d3   : > { %15369 = vmatprep.subr.bf16.mxu0 %v18238_v3  ;;  %16870 = vmatmul.mubr.bf16.gmra.mrb[36].mxu1 %v19795_v46  ;;  %v15245_v3 = vpop.f32.mrb[19].mxu1 }
 0x1d4   : > { %16878 = vmatpush3.bf16.msra.mxu1 %v18243_v0  ;;  %16889 = vmatprep.mubr.bf16.mxu1 %v19720_v50  ;;  %v15203_v50 = vadd.f32 %v15202_v18, %v15201_v10  ;;  %v15243_v0 = vadd.f32 %v15242_v41, %v15241_v59  ;;  %v18253_v10 = vld [vmem:[#allocation8 + $0x428] sm:$0xff]   ;;  %v15246_v59 = vadd.f32 %v15245_v3, %v15244_v33 }
 0x1d5   : > { %2633 = vmatmul.mubr.bf16.vlgmr.msra.gmra.mrb[48].mxu0 %v2012_v8  ;;  %16879 = vmatprep.subr.bf16.mxu1 %v18246_v29  ;;  %v1489_v8 = vmax.f32 %v1465_v14, 0.0 }
 0x1d6   : > { %15370 = vmatpush3.bf16.msra.mxu0 %v18239_v21  ;;  %2640 = vmatprep.mubr.bf16.mxu0 %v19650_v26  ;;  %v18247_v26 = vld [vmem:[#allocation8 + $0x418] sm:$0xff]   ;;  %v1457_v52 = vadd.f32 %v15203_v50, %v19974_v38  ;;  %v1496_v21 = vrot.slane %v1488_v22, 7  ;;  %v1844_v18 = vadd.f32 %v15243_v0, %v19974_v38  ;;  %v1847_v43 = vadd.f32 %v15246_v59, %v19974_v38 }
 0x1d7   : > { %15371 = vmatprep.subr.bf16.mxu0 %v18241_v17  ;;  %v1497_v44 = vrot.slane %v1489_v8, 7  ;;  %v1521_v42 = vrot.slane %v1489_v8, 1 }
 0x1d8   : > { %16880 = vmatpush3.bf16.msra.mxu1 %v18246_v29  ;;  %v19977_v12 = vmax.f32 %v1457_v52, 0.0  ;;  %v18251_v29 = vld [vmem:[#allocation8 + $0x3e0] sm:$0xff]   ;;  %v20004_v41 = vmax.f32 %v1844_v18, 0.0 }
 0x1d9   : > { %16881 = vmatprep.subr.bf16.mxu1 %v18249_v28 }
 0x1da   : > { %15372 = vmatpush3.bf16.msra.mxu0 %v18242_v45  ;;  %v21953_v55 = vrot.slane %v19977_v12, 7  ;;  %v21952_v20 = vrot.slane %v19977_v12, 1  ;;  %v1544_v17 = vpack.c.bf16 %v1488_v22, %v19977_v12  ;;  %v15247_v45 = vpop.f32.mrb[20].mxu1  ;;  %22061 = vst [vmem:[#allocation17_spill] sm:$0xff] %v20004_v41 }
 0x1db   : > { %15373 = vmatprep.subr.bf16.mxu0 %v18244_v6  ;;  %v18258_v6 = vld [vmem:[#allocation8 + $0x478] sm:$0xff]   ;;  %v15248_v37 = vpop.f32.mrb[21].mxu1 }
 0x1dc   : > { %16882 = vmatpush3.bf16.msra.mxu1 %v18249_v28  ;;  %v15214_v28 = vpop.f32.mrb[25].mxu0  ;;  %v1568_v52 = vrot.slane %v1544_v17, 4  ;;  %v19998_v9 = vpop.f32.mrb[22].mxu1  ;;  %v18254_v17 = vld [vmem:[#allocation8 + $0x3e8] sm:$0xff]  }
 0x1dd   : > { %2641 = vmatmul.mubr.bf16.gmra.mrb[52].mxu0 %v19783_v5  ;;  %16883 = vmatprep.subr.bf16.mxu1 %v18252_v24  ;;  %v15215_v50 = vadd.f32 %v15214_v28, %v15213_v19  ;;  %v15216_v13 = vpop.f32.mrb[26].mxu0  ;;  %v21956_v19 = vrot.slane %v20004_v41, 1 }
 0x1de   : > { %15374 = vmatpush3.bf16.msra.mxu0 %v18245_v61  ;;  %2648 = vmatprep.mubr.bf16.mxu0 %v19712_v39  ;;  %v1520_v39 = vrot.slane %v1488_v22, 1  ;;  %v1468_v61 = vadd.f32 %v15212_v23, %v19974_v38  ;;  %v15217_v1 = vpop.f32.mrb[27].mxu0  ;;  %1605 = vst [vmem:[#allocation2 + $0xf8] sm:$0xf0] %v1568_v52  ;;  %v1508_v22 = vsel %vm22062_vm6, %v1496_v21, %v1497_v44  ;;  %v21957_v23 = vrot.slane %v20004_v41, 7 }
 0x1df   : > { %15375 = vmatprep.subr.bf16.mxu0 %v18247_v26  ;;  %v1473_v33 = vadd.f32 %v15215_v50, %v19974_v38  ;;  %v1513_v0 = vsel %vm22063_vm0, %v1508_v22, 0.0  ;;  %v20023_v3 = vpop.f32.mrb[28].mxu0  ;;  %v18256_v50 = vld [vmem:[#allocation8 + $0x430] sm:$0xff]   ;;  %v15249_v22 = vadd.f32 %v15248_v37, %v15247_v45  ;;  %v18264_v45 = vld [vmem:[#allocation8 + $0x508] sm:$0xff]  }
 0x1e0   : > { %16884 = vmatpush3.bf16.msra.mxu1 %v18252_v24  ;;  %v19992_v24 = vsel %vm22059_vm5, %v21953_v55, %v1496_v21  ;;  %v1533_v26 = vsel %vm22060_vm8, %v21952_v20, %v1520_v39  ;;  %v20010_v14 = vmax.f32 %v1468_v61, 0.0  ;;  %vm22064_vm5 = vmmov %vm22060_vm8  ;;  %v20033_v61 = vpop.f32.mrb[29].mxu0  ;;  %v18257_v55 = vld [vmem:[#allocation8 + $0x3f0] sm:$0xff]  }
 0x1e1   : > { %16885 = vmatprep.subr.bf16.mxu1 %v18255_v32  ;;  %v1535_v16 = vsel %vm19562_vm2, %v1533_v26, 0.0  ;;  %vm22065_vm8 = vmmov %vm22062_vm6  ;;  %v15221_v15 = vadd.f32 %v20033_v61, %v20023_v3 }
 0x1e2   : > { %15376 = vmatpush3.bf16.msra.mxu0 %v18248_v48  ;;  %v20006_v48 = vpop.f32.mrb[23].mxu1  ;;  %v1498_v28 = vrot.slane %v20010_v14, 7  ;;  %v1522_v18 = vrot.slane %v20010_v14, 1  ;;  %vm22066_vm6 = vmmov %vm22064_vm5 }
 0x1e3   : > { %15377 = vmatprep.subr.bf16.mxu0 %v18250_v31  ;;  %v20014_v31 = vpop.f32.mrb[24].mxu1 }
 0x1e4   : > { %16886 = vmatpush3.bf16.msra.mxu1 %v18255_v32  ;;  %v1532_v32 = vsel %vm22064_vm5, %v1520_v39, %v1521_v42  ;;  %v20025_v21 = vpop.f32.mrb[25].mxu1  ;;  %v1547_v39 = vpack.c.bf16 %v20010_v14, %v1489_v8  ;;  %v1507_v8 = vsel %vm22065_vm8, %v1497_v44, %v1498_v28  ;;  %vm22067_vm5 = vnez %v21987_v36 }
 0x1e5   : > { %2649 = vmatmul.mubr.bf16.gmra.mrb[56].mxu0 %v19736_v58  ;;  %16887 = vmatprep.subr.bf16.mxu1 %v18258_v6  ;;  %v1536_v58 = vsel %vm22032_vm11, %v1532_v32, 0.0  ;;  %v20035_v59 = vpop.f32.mrb[26].mxu1  ;;  %v20043_v32 = vpop.f32.mrb[30].mxu0  ;;  %vm22068_vm8 = vcmask 1043456  }
 0x1e6   : > { %15378 = vmatpush3.bf16.msra.mxu0 %v18251_v29  ;;  %2656 = vmatprep.mubr.bf16.mxu0 %v19776_v2  ;;  %v20037_v26 = vpack.c.bf16 %v1536_v58, %v1535_v16  ;;  %v20039_v29 = vmax.f32 %v1847_v43, 0.0  ;;  %v20041_v2 = vmax.f32 %v1473_v33, 0.0  ;;  %v20045_v20 = vpop.f32.mrb[27].mxu1  ;;  %v20051_v14 = vrot.slane %v1547_v39, 4  ;;  %v15223_v43 = vpop.f32.mrb[31].mxu0  ;;  %v18259_v58 = vld [vmem:[#allocation8 + $0x438] sm:$0xff]  }
 0x1e7   : > { %15379 = vmatprep.subr.bf16.mxu0 %v18253_v10  ;;  %v1531_v10 = vsel %vm22066_vm6, %v1521_v42, %v1522_v18  ;;  %v15218_v16 = vadd.f32 %v15217_v1, %v15216_v13  ;;  %v1514_v33 = vsel %vm22067_vm5, %v1507_v8, 0.0  ;;  %v20065_v39 = vpop.f32.mrb[28].mxu1  ;;  %vm22069_vm6 = vcmp.lt.s32.totalorder %v19541_v60, 1 }
 0x1e8   : > { %16888 = vmatpush3.bf16.msra.mxu1 %v18258_v6  ;;  %v21958_v37 = vrot.slane %v20037_v26, 4  ;;  %v1883_v6 = vrot.slane %v20039_v29, 7  ;;  %v20058_v44 = vpack.c.bf16 %v1514_v33, %v1513_v0  ;;  %v1573_v42 = vsel %vm22068_vm8, %v1568_v52, %v20051_v14  ;;  %v20079_v8 = vpop.f32.mrb[29].mxu1 }
 0x1e9   : > { %16897 = vmatprep.subr.bf16.mxu1 %v20000_v57  ;;  %v1907_v13 = vrot.slane %v20039_v29, 1  ;;  %v1931_v1 = vpack.c.bf16 %v20039_v29, %v20004_v41  ;;  %1608 = vst [vmem:[#allocation2 + $0x110] sm:$0xff] %v1573_v42  ;;  %v21959_v52 = vrot.slane %v20041_v2, 7  ;;  %v1852_v29 = vadd.f32 %v15249_v22, %v19974_v38  ;;  %v20094_v22 = vpop.f32.mrb[30].mxu1  ;;  %v2732_v41 = vld [vmem:[#allocation2 + $0x70] sm:$0xff] }
 0x1ea   : > { %15380 = vmatpush3.bf16.msra.mxu0 %v18254_v17  ;;  %1606 = vst [vmem:[#allocation2 + $0x100] sm:$0xf0] %v21958_v37  ;;  %v20074_v0 = vsel %vm22069_vm6, %v21957_v23, %v1883_v6  ;;  %v21960_v17 = vrot.slane %v20041_v2, 1  ;;  %vm22070_vm8 = vnez %v21989_v47  ;;  %vm22071_vm6 = vcmp.lt.s32.totalorder %v19541_v60, 7  ;;  %v20110_v23 = vpop.f32.mrb[31].mxu1 }
 0x1eb   : > { %15381 = vmatprep.subr.bf16.mxu0 %v18256_v50  ;;  %16890 = vmatmul.mubr.bf16.vlgmr.msra.gmra.mrb[32].mxu1 %v19767_v51  ;;  %v1537_v50 = vsel %vm22070_vm8, %v1531_v10, 0.0  ;;  %v1920_v33 = vsel %vm22071_vm6, %v21956_v19, %v1907_v13  ;;  %v20092_v42 = vrot.slane %v1931_v1, 4  ;;  %v20102_v10 = vsel %vm22072_vm4, %v1498_v28, %v21959_v52  ;;  %v18260_v51 = vld [vmem:[#allocation8 + $0x3f8] sm:$0xff]  }
 0x1ec   : > { %16893 = vmatprep.mubr.bf16.mxu1 %v19795_v46  ;;  %16898 = vmatpush3.bf16.msra.mxu1 %v20000_v57  ;;  %v18267_v46 = vld [vmem:[#allocation8 + $0x510] sm:$0xff]   ;;  %v1530_v1 = vsel %vm22071_vm6, %v1522_v18, %v21960_v17  ;;  %v20108_v19 = vmax.f32 %v1852_v29, 0.0  ;;  %v18262_v57 = vld [vmem:[#allocation8 + $0x4c0] sm:$0xff]   ;;  %v1922_v37 = vsel %vm19562_vm2, %v1920_v33, 0.0  ;;  %v1476_v52 = vadd.f32 %v15218_v16, %v19974_v38  ;;  %v18270_v29 = vld [vmem:[#allocation8 + $0x518] sm:$0xff]  }
 0x1ed   : > { %2657 = vmatmul.mubr.bf16.gmra.mrb[60].mxu0 %v19786_v53  ;;  %16899 = vmatprep.subr.bf16.mxu1 %v18264_v45  ;;  %v19005_v53 = vld [vmem:[#allocation2 + $0x20] sm:$0xff]  ;;  %1992 = vst [vmem:[#allocation2 + $0x170] sm:$0xf0] %v20092_v42  ;;  %v1538_v28 = vsel %vm19607_vm9, %v1530_v1, 0.0  ;;  %v15252_v18 = vadd.f32 %v20006_v48, %v19998_v9  ;;  %v15255_v9 = vadd.f32 %v20025_v21, %v20014_v31  ;;  %vm22073_vm2 = vmmov %vm22072_vm4  ;;  %v1515_v31 = vsel %vm19619_vm10, %v20102_v10, 0.0 }
 0x1ee   : > { %15382 = vmatpush3.bf16.msra.mxu0 %v18257_v55  ;;  %2958 = vmatprep.mubr.bf16.mxu0 %v19005_v53  ;;  %v20120_v55 = vpack.c.bf16 %v1538_v28, %v1537_v50  ;;  %v1884_v53 = vrot.slane %v20108_v19, 7  ;;  %v1908_v17 = vrot.slane %v20108_v19, 1  ;;  %v18263_v33 = vld [vmem:[#allocation8 + $0x480] sm:$0xff]   ;;  %v20126_v1 = vmax.f32 %v1476_v52, 0.0  ;;  %vm22074_vm4 = vmmov %vm22071_vm6  ;;  %v18265_v52 = vld [vmem:[#allocation8 + $0x4c8] sm:$0xff]  }
 0x1ef   : > { %15383 = vmatprep.subr.bf16.mxu0 %v18259_v58  ;;  %v1855_v16 = vadd.f32 %v15252_v18, %v19974_v38  ;;  %v20132_v48 = vadd.f32 %v15223_v43, %v20043_v32  ;;  %v3066_v58 = vld [vmem:[#allocation2 + $0x88] sm:$0xff]  ;;  %vm22076_vm6 = vcmask 1043456  }
 0x1f0   : > { %16900 = vmatpush3.bf16.msra.mxu1 %v18264_v45  ;;  %v1574_v50 = vrot.slane %v20120_v55, 4  ;;  %v1895_v3 = vsel %vm22073_vm2, %v1883_v6, %v1884_v53  ;;  %v1919_v61 = vsel %vm22074_vm4, %v1907_v13, %v1908_v17  ;;  %v1481_v45 = vadd.f32 %v15221_v15, %v19974_v38  ;;  %v18266_v28 = vld [vmem:[#allocation8 + $0x488] sm:$0xff]  }
 0x1f1   : > { %16901 = vmatprep.subr.bf16.mxu1 %v18267_v46  ;;  %v1923_v21 = vsel %vm22032_vm11, %v1919_v61, 0.0  ;;  %v1500_v32 = vrot.slane %v20126_v1, 7  ;;  %v1524_v43 = vrot.slane %v20126_v1, 1  ;;  %v22075_v6 = vrot.slane %v20037_v26, 4  ;;  %vm22078_vm11 = vmmov %vm22073_vm2 }
 0x1f2   : > { %15384 = vmatpush3.bf16.msra.mxu0 %v18260_v51  ;;  %v20152_v51 = vpack.c.bf16 %v1923_v21, %v1922_v37  ;;  %v1550_v10 = vpack.c.bf16 %v20126_v1, %v20041_v2  ;;  %v20156_v25 = vmax.f32 %v1855_v16, 0.0  ;;  %v22079_v26 = vrot.slane %v20041_v2, 1  ;;  %vm22080_vm2 = vmmov %vm22074_vm4  ;;  %v18268_v1 = vld [vmem:[#allocation8 + $0x4d0] sm:$0xff]  }
 0x1f3   : > { %15421 = vmatprep.subr.bf16.mxu0 %v18262_v57  ;;  %16894 = vmatmul.mubr.bf16.gmra.mrb[36].mxu1 %v2732_v41  ;;  %v1575_v13 = vsel %vm22076_vm6, %v22075_v6, %v1574_v50  ;;  %v22077_v57 = vrot.slane %v20041_v2, 7  ;;  %v20166_v18 = vmax.f32 %v1481_v45, 0.0  ;;  %v1860_v15 = vadd.f32 %v15255_v9, %v19974_v38  ;;  %v19006_v45 = vld [vmem:[#allocation2 + $0x38] sm:$0xff] }
 0x1f4   : > { %16902 = vmatpush3.bf16.msra.mxu1 %v18267_v46  ;;  %16913 = vmatprep.mubr.bf16.mxu1 %v3066_v58  ;;  %1609 = vst [vmem:[#allocation2 + $0x118] sm:$0xff] %v1575_v13  ;;  %v1529_v37 = vsel %vm22080_vm2, %v22079_v26, %v1524_v43  ;;  %v18273_v46 = vld [vmem:[#allocation8 + $0x520] sm:$0xff]   ;;  %v1900_v16 = vsel %vm22063_vm0, %v1895_v3, 0.0  ;;  %v1956_v58 = vrot.slane %v20152_v51, 4  ;;  %vm22081_vm4 = vnez %v21995_v63  ;;  %v18276_v3 = vld [vmem:[#allocation8 + $0x528] sm:$0xff]   ;;  %vm22082_vm0 = vmmov %vm22076_vm6 }
 0x1f5   : > { %v1505_v41 = vsel %vm22078_vm11, %v22077_v57, %v1500_v32  ;;  %2959 = vmatmul.mubr.bf16.vlgmr.msra.gmra.mrb[64].mxu0 %v19783_v5  ;;  %16903 = vmatprep.subr.bf16.mxu1 %v18270_v29  ;;  %v20175_v61 = vrot.slane %v1550_v10, 4  ;;  %v1885_v5 = vrot.slane %v20156_v25, 7  ;;  %v1909_v9 = vrot.slane %v20156_v25, 1  ;;  %vm22083_vm6 = vmmov %vm22078_vm11 }
 0x1f6   : > { %v1516_v2 = vsel %vm22081_vm4, %v1505_v41, 0.0  ;;  %15422 = vmatpush3.bf16.msra.mxu0 %v18263_v33  ;;  %2966 = vmatprep.mubr.bf16.mxu0 %v19006_v45  ;;  %v1934_v35 = vpack.c.bf16 %v20156_v25, %v20108_v19  ;;  %1993 = vst [vmem:[#allocation2 + $0x178] sm:$0xf0] %v1956_v58  ;;  %v1501_v6 = vrot.slane %v20166_v18, 7  ;;  %v20190_v13 = vmax.f32 %v1860_v15, 0.0  ;;  %vm22084_vm11 = vmmov %vm22080_vm2  ;;  %v18271_v15 = vld [vmem:[#allocation8 + $0x4d8] sm:$0xff]  }
 0x1f7   : > { %v20177_v21 = vpack.c.bf16 %v1516_v2, %v1515_v31  ;;  %15423 = vmatprep.subr.bf16.mxu0 %v18265_v52  ;;  %v1579_v33 = vsel %vm22082_vm0, %v20051_v14, %v20175_v61  ;;  %v1525_v31 = vrot.slane %v20166_v18, 1  ;;  %v1894_v19 = vsel %vm22083_vm6, %v1884_v53, %v1885_v5  ;;  %vm22085_vm2 = vmmov %vm22083_vm6  ;;  %v18269_v53 = vld [vmem:[#allocation8 + $0x490] sm:$0xff]  }
 0x1f8   : > { %16904 = vmatpush3.bf16.msra.mxu1 %v18270_v29  ;;  %1611 = vst [vmem:[#allocation2 + $0x128] sm:$0xff] %v1579_v33  ;;  %v1918_v52 = vsel %vm22084_vm11, %v1908_v17, %v1909_v9  ;;  %v20197_v25 = vrot.slane %v1934_v35, 4  ;;  %v1539_v14 = vsel %vm19652_vm12, %v1529_v37, 0.0  ;;  %v1901_v57 = vsel %vm22067_vm5, %v1894_v19, 0.0  ;;  %vm22086_vm0 = vmmov %vm22084_vm11  ;;  %v19007_v33 = vld [vmem:[#allocation2 + $0x30] sm:$0xff] }
 0x1f9   : > { %v1576_v10 = vrot.slane %v20177_v21, 4  ;;  %16905 = vmatprep.subr.bf16.mxu1 %v18273_v46  ;;  %v20207_v29 = vsel %vm22085_vm2, %v1500_v32, %v1501_v6  ;;  %v1528_v17 = vsel %vm22086_vm0, %v1524_v43, %v1525_v31  ;;  %v22087_v41 = vrot.slane %v20058_v44, 4  ;;  %v18279_v19 = vld [vmem:[#allocation8 + $0x530] sm:$0xff]   ;;  %vm22091_vm11 = vmmov %vm22086_vm0 }
 0x1fa   : > { %15424 = vmatpush3.bf16.msra.mxu0 %v18266_v28  ;;  %vm22088_vm6 = vcmask 1043456   ;;  %v1924_v26 = vsel %vm22070_vm8, %v1918_v52, 0.0  ;;  %v20220_v37 = vpack.c.bf16 %v1901_v57, %v1900_v16  ;;  %v1540_v43 = vsel %vm19656_vm13, %v1528_v17, 0.0  ;;  %v18272_v16 = vld [vmem:[#allocation8 + $0x498] sm:$0xff]   ;;  %vm22090_vm8 = vmmov %vm22085_vm2 }
 0x1fb   : > { %v1577_v36 = vsel %vm22088_vm6, %v22087_v41, %v1576_v10  ;;  %vm22089_vm5 = vmmov %vm22088_vm6  ;;  %15425 = vmatprep.subr.bf16.mxu0 %v18268_v1  ;;  %v1886_v28 = vrot.slane %v20190_v13, 7  ;;  %v1910_v2 = vrot.slane %v20190_v13, 1  ;;  %v1484_v47 = vadd.f32 %v20132_v48, %v19974_v38 }
 0x1fc   : > { %v1960_v32 = vsel %vm22089_vm5, %v20092_v42, %v20197_v25  ;;  %1610 = vst [vmem:[#allocation2 + $0x120] sm:$0xff] %v1577_v36  ;;  %16906 = vmatpush3.bf16.msra.mxu1 %v18273_v46  ;;  %v1517_v42 = vsel %vm19661_vm14, %v20207_v29, 0.0  ;;  %v20234_v1 = vpack.c.bf16 %v1540_v43, %v1539_v14  ;;  %v15258_v45 = vadd.f32 %v20045_v20, %v20035_v59  ;;  %v19008_v59 = vld [vmem:[#allocation2 + $0x50] sm:$0xff]  ;;  %vm22092_vm2 = vmmov %vm22089_vm5  ;;  %v18282_v36 = vld [vmem:[#allocation8 + $0x538] sm:$0xff]  }
 0x1fd   : > { %1995 = vst [vmem:[#allocation2 + $0x188] sm:$0xff] %v1960_v32  ;;  %v15261_v35 = vadd.f32 %v20079_v8, %v20065_v39  ;;  %2967 = vmatmul.mubr.bf16.gmra.mrb[68].mxu0 %v19007_v33  ;;  %16907 = vmatprep.subr.bf16.mxu1 %v18276_v3  ;;  %v20244_v48 = vsel %vm22090_vm8, %v1885_v5, %v1886_v28  ;;  %v1494_v52 = vmax.f32 %v1484_v47, 0.0  ;;  %v18274_v39 = vld [vmem:[#allocation8 + $0x4e0] sm:$0xff]   ;;  %v22094_v55 = vrot.slane %v19977_v12, 7  ;;  %vm22095_vm0 = vmmov %vm22090_vm8 }
 0x1fe   : > { %v1917_v46 = vsel %vm22091_vm11, %v1909_v9, %v1910_v2  ;;  %v15264_v20 = vadd.f32 %v20110_v23, %v20094_v22  ;;  %15426 = vmatpush3.bf16.msra.mxu0 %v18269_v53  ;;  %2974 = vmatprep.mubr.bf16.mxu0 %v19008_v59  ;;  %v1580_v8 = vrot.slane %v20234_v1, 4  ;;  %v1902_v5 = vsel %vm19619_vm10, %v20244_v48, 0.0  ;;  %vm22096_vm6 = vmmov %vm22091_vm11  ;;  %v18275_v32 = vld [vmem:[#allocation8 + $0x4a0] sm:$0xff]  }
 0x1ff   : > { %v1925_v14 = vsel %vm19607_vm9, %v1917_v46, 0.0  ;;  %v1863_v57 = vadd.f32 %v15258_v45, %v19974_v38  ;;  %15427 = vmatprep.subr.bf16.mxu0 %v18271_v15  ;;  %v1502_v29 = vrot.slane %v1494_v52, 7  ;;  %v1526_v23 = vrot.slane %v1494_v52, 1  ;;  %vm22093_vm9 = vmmov %vm22090_vm8  ;;  %v18278_v46 = vld [vmem:[#allocation8 + $0x4a8] sm:$0xff]   ;;  %v20352_v1 = vld [vmem:[#allocation2 + $0xa0] sm:$0xff] }
 0x200   : > { %v20259_v9 = vpack.c.bf16 %v1925_v14, %v1924_v26  ;;  %v1553_v22 = vpack.c.bf16 %v1494_v52, %v20166_v18  ;;  %16908 = vmatpush3.bf16.msra.mxu1 %v18276_v3  ;;  %v1581_v17 = vsel %vm22092_vm2, %v1574_v50, %v1580_v8  ;;  %v1868_v49 = vadd.f32 %v15261_v35, %v19974_v38  ;;  %vm22098_vm5 = vmmov %vm22096_vm6  ;;  %v18277_v18 = vld [vmem:[#allocation8 + $0x4e8] sm:$0xff]   ;;  %v20307_v52 = vld [vmem:[#allocation8 + $0x5c0] sm:$0xff]  }
 0x201   : > { %v20267_v53 = vmax.f32 %v1863_v57, 0.0  ;;  %v20271_v41 = vadd.f32 %v15264_v20, %v19974_v38  ;;  %16909 = vmatprep.subr.bf16.mxu1 %v18279_v19  ;;  %1612 = vst [vmem:[#allocation2 + $0x130] sm:$0xff] %v1581_v17  ;;  %v1503_v3 = vsel %vm22093_vm9, %v1501_v6, %v1502_v29  ;;  %v1510_v50 = vsel %vm22095_vm0, %v1502_v29, %v22094_v55  ;;  %vm22099_vm8 = vmmov %vm22092_vm2  ;;  %v20309_v20 = vld [vmem:[#allocation2 + $0x88] sm:$0xf0] }
 0x202   : > { %v1961_v26 = vrot.slane %v20259_v9, 4  ;;  %v1527_v38 = vsel %vm22096_vm6, %v1525_v31, %v1526_v23  ;;  %15428 = vmatpush3.bf16.msra.mxu0 %v18272_v16  ;;  %v1511_v15 = vsel %vm19674_vm15, %v1510_v50, 0.0  ;;  %v1518_v43 = vsel %vm19678_vm7, %v1503_v3, 0.0  ;;  %v19009_v14 = vld [vmem:[#allocation2 + $0x48] sm:$0xff]  ;;  %vm22102_vm9 = vmmov %vm22095_vm0 }
 0x203   : > { %v22097_v6 = vrot.slane %v19977_v12, 1  ;;  %v1541_v45 = vsel %vm19687_vm1, %v1527_v38, 0.0  ;;  %15429 = vmatprep.subr.bf16.mxu0 %v18274_v39  ;;  %vm22100_vm11 = vnez %v21983_v34  ;;  %v1552_v33 = vpack.c.bf16 %v1518_v43, %v1517_v42  ;;  %v2731_v57 = vld [vmem:[#allocation2 + $0x68] sm:$0xff]  ;;  %vm22103_vm0 = vmmov %vm22098_vm5  ;;  %v18283_v43 = vld [vmem:[#allocation8 + $0x4f8] sm:$0xff]  }
 0x204   : > { %v1962_v31 = vsel %vm22099_vm8, %v1956_v58, %v1961_v26  ;;  %v22101_v12 = vsel %vm22100_vm11, %v19992_v24, 0.0  ;;  %16910 = vmatpush3.bf16.msra.mxu1 %v18279_v19  ;;  %v1584_v51 = vrot.slane %v1553_v22, 4  ;;  %v1887_v58 = vrot.slane %v20267_v53, 7  ;;  %vm22105_vm6 = vmmov %vm22092_vm2 }
 0x205   : > { %v1534_v47 = vsel %vm22098_vm5, %v1526_v23, %v22097_v6  ;;  %v1543_v35 = vpack.c.bf16 %v22101_v12, %v1511_v15  ;;  %1996 = vst [vmem:[#allocation2 + $0x190] sm:$0xff] %v1962_v31  ;;  %v1911_v39 = vrot.slane %v20267_v53, 1  ;;  %2975 = vmatmul.mubr.bf16.gmra.mrb[72].mxu0 %v19009_v14  ;;  %16911 = vmatprep.subr.bf16.mxu1 %v18282_v36  ;;  %v1582_v29 = vrot.slane %v1552_v33, 4  ;;  %v18280_v23 = vld [vmem:[#allocation8 + $0x4f0] sm:$0xff]   ;;  %vm22106_vm5 = vmmov %vm22092_vm2  ;;  %v22112_v33 = vld [vmem:[#allocation17_spill] sm:$0xff] }
 0x206   : > { %v1542_v16 = vsel %vm19695_vm3, %v1534_v47, 0.0  ;;  %v1937_v42 = vpack.c.bf16 %v20267_v53, %v20190_v13  ;;  %v20315_v19 = vmax.f32 %v1868_v49, 0.0  ;;  %15430 = vmatpush3.bf16.msra.mxu0 %v18275_v32  ;;  %2982 = vmatprep.mubr.bf16.mxu0 %v2731_v57  ;;  %v1585_v22 = vsel %vm22092_vm2, %v20175_v61, %v1584_v51  ;;  %1617 = vst [vmem:[#allocation2 + $0x158] sm:$0xf] %v1584_v51  ;;  %v20327_v49 = vld [vmem:[#allocation8 + $0x5c8] sm:$0xff]   ;;  %vm22107_vm8 = vmmov %vm22092_vm2  ;;  %v18291_v31 = vld [vmem:[#allocation8 + $0x5d0] sm:$0xff]  }
 0x207   : > { %v1554_v59 = vpack.c.bf16 %v1542_v16, %v1541_v45  ;;  %v1567_v24 = vrot.slane %v1543_v35, 4  ;;  %v1892_v3 = vsel %vm22102_vm9, %v1886_v28, %v1887_v58  ;;  %v1916_v53 = vsel %vm22103_vm0, %v1910_v2, %v1911_v39  ;;  %15431 = vmatprep.subr.bf16.mxu0 %v18277_v18  ;;  %1614 = vst [vmem:[#allocation2 + $0x140] sm:$0xff] %v1585_v22  ;;  %v18281_v28 = vld [vmem:[#allocation8 + $0x4b0] sm:$0xff]   ;;  %vm22108_vm10 = vmmov %vm22092_vm2  ;;  %v2730_v45 = vld [vmem:[#allocation2 + $0x60] sm:$0xff] }
 0x208   : > { %v1957_v55 = vrot.slane %v20220_v37, 4  ;;  %v22104_v50 = vrot.slane %v20058_v44, 4  ;;  %v1583_v38 = vsel %vm22106_vm5, %v1576_v10, %v1582_v29  ;;  %1616 = vst [vmem:[#allocation2 + $0x150] sm:$0xf] %v1582_v29  ;;  %v1903_v13 = vsel %vm22081_vm4, %v1892_v3, 0.0  ;;  %16912 = vmatpush3.bf16.msra.mxu1 %v18282_v36  ;;  %vm22109_vm4 = vmmov %vm22102_vm9  ;;  %v3065_v18 = vld [vmem:[#allocation2 + $0x80] sm:$0xff] }
 0x209   : > { %v1586_v17 = vrot.slane %v1554_v59, 4  ;;  %1604 = vst [vmem:[#allocation2 + $0xf0] sm:$0xf0] %v1567_v24  ;;  %1613 = vst [vmem:[#allocation2 + $0x138] sm:$0xff] %v1583_v38  ;;  %v20345_v44 = vpack.c.bf16 %v1903_v13, %v1902_v5  ;;  %v20347_v21 = vrot.slane %v1937_v42, 4  ;;  %v1888_v63 = vrot.slane %v20315_v19, 7  ;;  %16921 = vmatprep.subr.bf16.mxu1 %v20307_v52 }
 0x20a   : > { %v1571_v61 = vsel %vm22105_vm6, %v1567_v24, %v22104_v50  ;;  %v3492_v10 = vrot.slane %v20309_v20, 4  ;;  %v1912_v36 = vrot.slane %v20315_v19, 1  ;;  %v1881_v62 = vmax.f32 %v20271_v41, 0.0  ;;  %15432 = vmatpush3.bf16.msra.mxu0 %v18278_v46  ;;  %vm22114_vm9 = vmmov %vm22109_vm4  ;;  %v3064_v50 = vld [vmem:[#allocation2 + $0x78] sm:$0xff]  ;;  %v18297_v38 = vld [vmem:[#allocation8 + $0x5e0] sm:$0xff]  }
 0x20b   : > { %v1587_v2 = vsel %vm22107_vm8, %v1580_v8, %v1586_v17  ;;  %1607 = vst [vmem:[#allocation2 + $0x108] sm:$0xff] %v1571_v61  ;;  %1618 = vst [vmem:[#allocation2 + $0x160] sm:$0xf] %v1586_v17  ;;  %v3493_v8 = vrot.slane %v20352_v1, 4  ;;  %v1926_v48 = vsel %vm19652_vm12, %v1916_v53, 0.0  ;;  %v1963_v5 = vrot.slane %v20345_v44, 4  ;;  %15433 = vmatprep.subr.bf16.mxu0 %v18280_v23  ;;  %16914 = vmatmul.mubr.bf16.vlgmr.msra.gmra.mrb[32].mxu1 %v20352_v1 }
 0x20c   : > { %1615 = vst [vmem:[#allocation2 + $0x148] sm:$0xff] %v1587_v2  ;;  %v1966_v32 = vsel %vm22108_vm10, %v20197_v25, %v20347_v21  ;;  %v1891_v15 = vsel %vm22109_vm4, %v1887_v58, %v1888_v63  ;;  %v1899_v41 = vsel %vm22100_vm11, %v20074_v0, 0.0  ;;  %vm22110_vm12 = vmmov %vm22103_vm0  ;;  %v1889_v6 = vrot.slane %v1881_v62, 7  ;;  %v18284_v25 = vld [vmem:[#allocation8 + $0x4b8] sm:$0xff]   ;;  %16917 = vmatprep.mubr.bf16.mxu1 %v19953_v11  ;;  %16922 = vmatpush3.bf16.msra.mxu1 %v20307_v52  ;;  %v18287_v17 = vld [vmem:[#allocation8 + $0x540] sm:$0xff]  }
 0x20d   : > { %1998 = vst [vmem:[#allocation2 + $0x1a0] sm:$0xff] %v1966_v32  ;;  %v1915_v27 = vsel %vm22110_vm12, %v1911_v39, %v1912_v36  ;;  %v1913_v47 = vrot.slane %v1881_v62, 1  ;;  %v1964_v34 = vsel %vm22092_vm2, %v1957_v55, %v1963_v5  ;;  %v1904_v0 = vsel %vm19661_vm14, %v1891_v15, 0.0  ;;  %2983 = vmatmul.mubr.bf16.gmra.mrb[76].mxu0 %v2730_v45  ;;  %16923 = vmatprep.subr.bf16.mxu1 %v20327_v49  ;;  %vm22111_vm11 = vmmov %vm22109_vm4  ;;  %v18286_v39 = vld [vmem:[#allocation8 + $0x580] sm:$0xff]   ;;  %v18290_v61 = vld [vmem:[#allocation8 + $0x548] sm:$0xff]  }
 0x20e   : > { %v1927_v16 = vsel %vm19656_vm13, %v1915_v27, 0.0  ;;  %v1940_v12 = vpack.c.bf16 %v1881_v62, %v20315_v19  ;;  %1997 = vst [vmem:[#allocation2 + $0x198] sm:$0xff] %v1964_v34  ;;  %v1890_v35 = vsel %vm22111_vm11, %v1888_v63, %v1889_v6  ;;  %v22113_v46 = vrot.slane %v22112_v33, 7  ;;  %15434 = vmatpush3.bf16.msra.mxu0 %v18281_v28  ;;  %3301 = vmatprep.mubr.bf16.mxu0 %v3065_v18  ;;  %vm22115_vm13 = vmmov %vm22103_vm0  ;;  %v18294_v19 = vld [vmem:[#allocation8 + $0x5d8] sm:$0xff]   ;;  %v18292_v37 = vld [vmem:[#allocation8 + $0x590] sm:$0xff]  }
 0x20f   : > { %v1938_v11 = vpack.c.bf16 %v1927_v16, %v1926_v48  ;;  %v1905_v40 = vsel %vm19678_vm7, %v1890_v35, 0.0  ;;  %v1914_v59 = vsel %vm22115_vm13, %v1912_v36, %v1913_v47  ;;  %v22116_v51 = vrot.slane %v22112_v33, 1  ;;  %vm22117_vm14 = vmmov %vm22103_vm0  ;;  %15435 = vmatprep.subr.bf16.mxu0 %v18283_v43  ;;  %v20425_v20 = vld [vmem:[#allocation2 + $0x98] sm:$0xff]  ;;  %v18293_v2 = vld [vmem:[#allocation8 + $0x550] sm:$0xff]  }
 0x210   : > { %v1897_v52 = vsel %vm22114_vm9, %v1889_v6, %v22113_v46  ;;  %v1928_v57 = vsel %vm19687_vm1, %v1914_v59, 0.0  ;;  %16924 = vmatpush3.bf16.msra.mxu1 %v20327_v49  ;;  %v1939_v56 = vpack.c.bf16 %v1905_v40, %v1904_v0  ;;  %v1971_v42 = vrot.slane %v1940_v12, 4  ;;  %vm22118_vm7 = vmmov %vm22092_vm2  ;;  %v20410_v49 = vld [vmem:[#allocation2 + $0xd0] sm:$0xff]  ;;  %v18295_v44 = vld [vmem:[#allocation8 + $0x598] sm:$0xff]  }
 0x211   : > { %v1898_v30 = vsel %vm19674_vm15, %v1897_v52, 0.0  ;;  %v1921_v58 = vsel %vm22117_vm14, %v1913_v47, %v22116_v51  ;;  %v1967_v14 = vrot.slane %v1938_v11, 4  ;;  %16925 = vmatprep.subr.bf16.mxu1 %v18291_v31  ;;  %vm22119_vm1 = vmmov %vm22092_vm2  ;;  %v18303_v63 = vld [vmem:[#allocation8 + $0x5f0] sm:$0xff]   ;;  %v18298_v36 = vld [vmem:[#allocation8 + $0x5a0] sm:$0xff]   ;;  %v3505_v34 = vrot.slane %v20410_v49, 4 }
 0x212   : > { %v1929_v54 = vsel %vm19695_vm3, %v1921_v58, 0.0  ;;  %v1930_v24 = vpack.c.bf16 %v1899_v41, %v1898_v30  ;;  %15436 = vmatpush3.bf16.msra.mxu0 %v18284_v25  ;;  %v1969_v3 = vrot.slane %v1939_v56, 4  ;;  %v1972_v7 = vsel %vm22119_vm1, %v20347_v21, %v1971_v42  ;;  %2004 = vst [vmem:[#allocation2 + $0x1d0] sm:$0xf] %v1971_v42  ;;  %vm22120_vm3 = vmmov %vm22119_vm1  ;;  %v18296_v21 = vld [vmem:[#allocation8 + $0x558] sm:$0xff]   ;;  %v20431_v62 = vld [vmem:[#allocation2 + $0xb0] sm:$0xff] }
 0x213   : > { %v1941_v29 = vpack.c.bf16 %v1929_v54, %v1928_v57  ;;  %v1968_v23 = vsel %vm22118_vm7, %v1961_v26, %v1967_v14  ;;  %15473 = vmatprep.subr.bf16.mxu0 %v18286_v39  ;;  %16918 = vmatmul.mubr.bf16.gmra.mrb[36].mxu1 %v20410_v49  ;;  %v3494_v9 = vsel %vm22120_vm3, %v3492_v10, %v3493_v8  ;;  %vm22121_vm15 = vmmov %vm22119_vm1  ;;  %v20428_v10 = vld [vmem:[#allocation2 + $0x90] sm:$0xff]  ;;  %v18306_v48 = vld [vmem:[#allocation8 + $0x5f8] sm:$0xff]   ;;  %v3497_v59 = vrot.slane %v20431_v62, 4 }
 0x214   : > { %v1954_v22 = vrot.slane %v1930_v24, 4  ;;  %1999 = vst [vmem:[#allocation2 + $0x1a8] sm:$0xff] %v1968_v23  ;;  %2001 = vst [vmem:[#allocation2 + $0x1b8] sm:$0xff] %v1972_v7  ;;  %16926 = vmatpush3.bf16.msra.mxu1 %v18291_v31  ;;  %16937 = vmatprep.mubr.bf16.mxu1 %v3494_v9  ;;  %v18301_v32 = vld [vmem:[#allocation8 + $0x5a8] sm:$0xff]   ;;  %v3408_v15 = vld [vmem:[#allocation2 + $0x80] sm:$0xf0] }
 0x215   : > { %v1973_v53 = vrot.slane %v1941_v29, 4  ;;  %vm22122_vm0 = vmmov %vm22119_vm1  ;;  %2003 = vst [vmem:[#allocation2 + $0x1c8] sm:$0xf] %v1969_v3  ;;  %3302 = vmatmul.mubr.bf16.vlgmr.msra.gmra.mrb[80].mxu0 %v3064_v50  ;;  %16927 = vmatprep.subr.bf16.mxu1 %v18294_v19  ;;  %v18309_v43 = vld [vmem:[#allocation8 + $0x680] sm:$0xff]   ;;  %v20434_v41 = vld [vmem:[#allocation2 + $0xa8] sm:$0xff]  ;;  %v3489_v25 = vrot.slane %v3408_v15, 4 }
 0x216   : > { %v1958_v26 = vsel %vm22121_vm15, %v1954_v22, %v1957_v55  ;;  %1991 = vst [vmem:[#allocation2 + $0x168] sm:$0xf0] %v1954_v22  ;;  %v1970_v13 = vsel %vm22122_vm0, %v1963_v5, %v1969_v3  ;;  %vm22123_vm6 = vmmov %vm22122_vm0  ;;  %15474 = vmatpush3.bf16.msra.mxu0 %v18287_v17  ;;  %3309 = vmatprep.mubr.bf16.mxu0 %v20425_v20  ;;  %v18300_v55 = vld [vmem:[#allocation8 + $0x5e8] sm:$0xff]   ;;  %v18299_v5 = vld [vmem:[#allocation8 + $0x560] sm:$0xff]   ;;  %v3490_v31 = vrot.slane %v20425_v20, 4  ;;  %v3487_v40 = vrot.slane %v20428_v10, 4 }
 0x217   : > { %v1974_v28 = vsel %vm22123_vm6, %v1967_v14, %v1973_v53  ;;  %1994 = vst [vmem:[#allocation2 + $0x180] sm:$0xff] %v1958_v26  ;;  %2005 = vst [vmem:[#allocation2 + $0x1d8] sm:$0xf] %v1973_v53  ;;  %15475 = vmatprep.subr.bf16.mxu0 %v18289_v4  ;;  %v20437_v27 = vld [vmem:[#allocation2 + $0xc8] sm:$0xff]  ;;  %v18304_v47 = vld [vmem:[#allocation8 + $0x5b0] sm:$0xff]  }
 0x218   : > { %2000 = vst [vmem:[#allocation2 + $0x1b0] sm:$0xff] %v1970_v13  ;;  %2002 = vst [vmem:[#allocation2 + $0x1c0] sm:$0xff] %v1974_v28  ;;  %16928 = vmatpush3.bf16.msra.mxu1 %v18294_v19  ;;  %v18302_v6 = vld [vmem:[#allocation8 + $0x568] sm:$0xff]   ;;  %v20440_v45 = vld [vmem:[#allocation2 + $0xb8] sm:$0xff]  ;;  %v3495_v19 = vrot.slane %v20434_v41, 4  ;;  %v3503_v23 = vrot.slane %v20437_v27, 4 }
 0x219   : > { %16929 = vmatprep.subr.bf16.mxu1 %v18297_v38  ;;  %v3499_v18 = vrot.slane %v20440_v45, 4  ;;  %v18312_v0 = vld [vmem:[#allocation8 + $0x688] sm:$0xff]   ;;  %v3407_v16 = vld [vmem:[#allocation2 + $0x78] sm:$0xf0]  ;;  %v18305_v11 = vld [vmem:[#allocation8 + $0x570] sm:$0xff]  }
 0x21a   : > { %15476 = vmatpush3.bf16.msra.mxu0 %v18290_v61  ;;  %v3421_v12 = vld [vmem:[#allocation2 + $0xe8] sm:$0xf]  ;;  %vm22124_vm5 = vmmov %vm22122_vm0  ;;  %v18307_v33 = vld [vmem:[#allocation8 + $0x5b8] sm:$0xff]   ;;  %v3486_v30 = vrot.slane %v3407_v16, 4 }
 0x21b   : > { %15477 = vmatprep.subr.bf16.mxu0 %v18292_v37  ;;  %v3500_v35 = vsel %vm22124_vm5, %v3493_v8, %v3499_v18  ;;  %vm22125_vm8 = vmmov %vm22122_vm0  ;;  %v18308_v52 = vld [vmem:[#allocation8 + $0x578] sm:$0xff]   ;;  %v3511_v51 = vrot.slane %v3421_v12, 4  ;;  %v18315_v58 = vld [vmem:[#allocation8 + $0x690] sm:$0xff]  }
 0x21c   : > { %16930 = vmatpush3.bf16.msra.mxu1 %v18297_v38  ;;  %v3506_v46 = vsel %vm22125_vm8, %v3499_v18, %v3505_v34  ;;  %v20451_v39 = vld [vmem:[#allocation2 + $0xc0] sm:$0xff]  ;;  %vm22126_vm10 = vmmov %vm22122_vm0  ;;  %v18318_v57 = vld [vmem:[#allocation8 + $0x698] sm:$0xff]  }
 0x21d   : > { %3310 = vmatmul.mubr.bf16.gmra.mrb[84].mxu0 %v20428_v10  ;;  %16931 = vmatprep.subr.bf16.mxu1 %v18300_v55  ;;  %v3491_v8 = vsel %vm22126_vm10, %v3489_v25, %v3490_v31  ;;  %v18310_v14 = vld [vmem:[#allocation8 + $0x640] sm:$0xff]   ;;  %v18313_v24 = vld [vmem:[#allocation8 + $0x648] sm:$0xff]   ;;  %vm22127_vm4 = vmmov %vm22122_vm0  ;;  %v3501_v9 = vrot.slane %v20451_v39, 4 }
 0x21e   : > { %15478 = vmatpush3.bf16.msra.mxu0 %v18293_v2  ;;  %3317 = vmatprep.mubr.bf16.mxu0 %v20431_v62  ;;  %v18311_v54 = vld [vmem:[#allocation8 + $0x600] sm:$0xff]   ;;  %v3512_v56 = vsel %vm22127_vm4, %v3505_v34, %v3511_v51  ;;  %vm22128_vm12 = vmmov %vm22122_vm0  ;;  %v18314_v42 = vld [vmem:[#allocation8 + $0x608] sm:$0xff]  }
 0x21f   : > { %15479 = vmatprep.subr.bf16.mxu0 %v18295_v44  ;;  %v3488_v29 = vsel %vm22128_vm12, %v3486_v30, %v3487_v40  ;;  %v18321_v22 = vld [vmem:[#allocation8 + $0x6a0] sm:$0xff]   ;;  %vm22129_vm2 = vmmov %vm22122_vm0  ;;  %v18316_v4 = vld [vmem:[#allocation8 + $0x650] sm:$0xff]  }
 0x220   : > { %16932 = vmatpush3.bf16.msra.mxu1 %v18300_v55  ;;  %v3498_v17 = vsel %vm22129_vm2, %v3490_v31, %v3497_v59  ;;  %v3420_v3 = vld [vmem:[#allocation2 + $0xe0] sm:$0xf]  ;;  %v18324_v7 = vld [vmem:[#allocation8 + $0x6a8] sm:$0xff]   ;;  %v18317_v53 = vld [vmem:[#allocation8 + $0x610] sm:$0xff]  }
 0x221   : > { %16933 = vmatprep.subr.bf16.mxu1 %v18303_v63  ;;  %v3509_v26 = vrot.slane %v3420_v3, 4  ;;  %v18327_v50 = vld [vmem:[#allocation8 + $0x6b0] sm:$0xff]   ;;  %vm22130_vm11 = vmmov %vm22122_vm0  ;;  %v18320_v38 = vld [vmem:[#allocation8 + $0x618] sm:$0xff]  }
 0x222   : > { %15480 = vmatpush3.bf16.msra.mxu0 %v18296_v21  ;;  %v3496_v61 = vsel %vm22130_vm11, %v3487_v40, %v3495_v19  ;;  %vm22131_vm9 = vmmov %vm22122_vm0  ;;  %v18322_v28 = vld [vmem:[#allocation8 + $0x660] sm:$0xff]   ;;  %v18330_v37 = vld [vmem:[#allocation8 + $0x6b8] sm:$0xff]  }
 0x223   : > { %15481 = vmatprep.subr.bf16.mxu0 %v18298_v36  ;;  %v3504_v13 = vsel %vm22131_vm9, %v3497_v59, %v3503_v23  ;;  %v18323_v55 = vld [vmem:[#allocation8 + $0x620] sm:$0xff]   ;;  %v3419_v2 = vld [vmem:[#allocation2 + $0xd8] sm:$0xf]  ;;  %v18325_v44 = vld [vmem:[#allocation8 + $0x668] sm:$0xff]  }
 0x224   : > { %16934 = vmatpush3.bf16.msra.mxu1 %v18303_v63  ;;  %vm22132_vm13 = vmmov %vm22122_vm0  ;;  %v18326_v63 = vld [vmem:[#allocation8 + $0x628] sm:$0xff]   ;;  %v18333_v36 = vld [vmem:[#allocation8 + $0x100] sm:$0xff]  }
 0x225   : > { %3318 = vmatmul.mubr.bf16.gmra.mrb[88].mxu0 %v20434_v41  ;;  %16935 = vmatprep.subr.bf16.mxu1 %v18306_v48  ;;  %v3502_v21 = vsel %vm22132_vm13, %v3495_v19, %v3501_v9  ;;  %vm22133_vm14 = vmmov %vm22122_vm0  ;;  %v18334_v15 = vld [vmem:[#allocation8 + $0xc0] sm:$0xff]   ;;  %v4522_v25 = vld [vmem:[#allocation2 + $0x8] sm:$0xf0] }
 0x226   : > { %15482 = vmatpush3.bf16.msra.mxu0 %v18299_v5  ;;  %3325 = vmatprep.mubr.bf16.mxu0 %v20437_v27  ;;  %v18328_v5 = vld [vmem:[#allocation8 + $0x670] sm:$0xff]   ;;  %v20466_v18 = vld [vmem:[#allocation2 + $0x20] sm:$0xff]  ;;  %v18336_v31 = vld [vmem:[#allocation8 + $0xc8] sm:$0xff]  }
 0x227   : > { %15483 = vmatprep.subr.bf16.mxu0 %v18301_v32  ;;  %v3507_v32 = vrot.slane %v3419_v2, 4  ;;  %vm22134_vm7 = vmmov %vm22122_vm0  ;;  %v18332_v16 = vld [vmem:[#allocation8 + $0x638] sm:$0xff]   ;;  %v18338_v12 = vld [vmem:[#allocation8 + $0xd0] sm:$0xff]  }
 0x228   : > { %16936 = vmatpush3.bf16.msra.mxu1 %v18306_v48  ;;  %v3510_v48 = vsel %vm22133_vm14, %v3503_v23, %v3509_v26  ;;  %vm22135_vm1 = vmmov %vm22122_vm0  ;;  %v18343_v30 = vld [vmem:[#allocation8 + $0x128] sm:$0xff]   ;;  %v18345_v59 = vld [vmem:[#allocation8 + $0x130] sm:$0xff]  }
 0x229   : > { %16945 = vmatprep.subr.bf16.mxu1 %v18309_v43  ;;  %v3508_v34 = vsel %vm22134_vm7, %v3501_v9, %v3507_v32  ;;  %v18344_v40 = vld [vmem:[#allocation8 + $0xe8] sm:$0xff]   ;;  %v18346_v51 = vld [vmem:[#allocation8 + $0xf0] sm:$0xff]   ;;  %v3807_v19 = vld [vmem:[#allocation2 + $0xd8] sm:$0xff] }
 0x22a   : > { %15484 = vmatpush3.bf16.msra.mxu0 %v18302_v6  ;;  %v18331_v6 = vld [vmem:[#allocation8 + $0x678] sm:$0xff]   ;;  %vm22136_vm3 = vmmov %vm22122_vm0  ;;  %v20494_v26 = vld [vmem:[#allocation2 + $0x48] sm:$0xff] }
 0x22b   : > { %15485 = vmatprep.subr.bf16.mxu0 %v18304_v47  ;;  %16938 = vmatmul.mubr.bf16.vlgmr.msra.gmra.mrb[32].mxu1 %v3500_v35  ;;  %v18335_v47 = vld [vmem:[#allocation8 + $0x108] sm:$0xff]   ;;  %v4595_v35 = vrot.slane %v20466_v18, 4  ;;  %vm22137_vm15 = vmmov %vm22122_vm0  ;;  %v18355_v9 = vld [vmem:[#allocation8 + $0x58] sm:$0xff]  }
 0x22c   : > { %16941 = vmatprep.mubr.bf16.mxu1 %v3506_v46  ;;  %16946 = vmatpush3.bf16.msra.mxu1 %v18309_v43  ;;  %v18329_v43 = vld [vmem:[#allocation8 + $0x630] sm:$0xff]   ;;  %v18340_v46 = vld [vmem:[#allocation8 + $0xd8] sm:$0xff]   ;;  %vm22139_vm6 = vmmov %vm22122_vm0 }
 0x22d   : > { %3326 = vmatmul.mubr.bf16.gmra.mrb[92].mxu0 %v20451_v39  ;;  %16947 = vmatprep.subr.bf16.mxu1 %v18312_v0  ;;  %v18358_v2 = vld [vmem:[#allocation8 + $0x20] sm:$0xff]   ;;  %vm22140_vm5 = vmmov %vm22122_vm0 }
 0x22e   : > { %15486 = vmatpush3.bf16.msra.mxu0 %v18305_v11  ;;  %3701 = vmatprep.mubr.bf16.mxu0 %v3491_v8  ;;  %v4594_v11 = vrot.slane %v4522_v25, 4  ;;  %v4521_v8 = vld [vmem:[#allocation2] sm:$0xf0]  ;;  %vm22141_vm8 = vmmov %vm22122_vm0  ;;  %v18364_v25 = vld [vmem:[#allocation8 + $0x38] sm:$0xff]  }
 0x22f   : > { %15487 = vmatprep.subr.bf16.mxu0 %v18307_v33  ;;  %v18339_v33 = vld [vmem:[#allocation8 + $0x118] sm:$0xff]   ;;  %vm22142_vm10 = vmmov %vm22122_vm0 }
 0x230   : > { %16948 = vmatpush3.bf16.msra.mxu1 %v18312_v0  ;;  %v18337_v0 = vld [vmem:[#allocation8 + $0x110] sm:$0xff]   ;;  %vm22143_vm4 = vmmov %vm22122_vm0 }
 0x231   : > { %16949 = vmatprep.subr.bf16.mxu1 %v18315_v58  ;;  %vm22144_vm12 = vmmov %vm22122_vm0 }
 0x232   : > { %15488 = vmatpush3.bf16.msra.mxu0 %v18308_v52  ;;  %v18341_v52 = vld [vmem:[#allocation8 + $0x120] sm:$0xff]   ;;  %vm22145_vm2 = vmmov %vm22122_vm0 }
 0x233   : > { %15525 = vmatprep.subr.bf16.mxu0 %v18310_v14  ;;  %16942 = vmatmul.mubr.bf16.gmra.mrb[36].mxu1 %v3512_v56  ;;  %v20480_v14 = vld [vmem:[#allocation2 + $0x38] sm:$0xff]  ;;  %vm22146_vm11 = vmmov %vm22122_vm0 }
 0x234   : > { %16950 = vmatpush3.bf16.msra.mxu1 %v18315_v58  ;;  %16961 = vmatprep.mubr.bf16.mxu1 %v20352_v1  ;;  %v18319_v1 = vld [vmem:[#allocation8 + $0x658] sm:$0xff]   ;;  %v4602_v56 = vrot.slane %v20480_v14, 4  ;;  %vm22147_vm9 = vmmov %vm22122_vm0 }
 0x235   : > { %3702 = vmatmul.mubr.bf16.vlgmr.msra.gmra.mrb[96].mxu0 %v3488_v29  ;;  %16951 = vmatprep.subr.bf16.mxu1 %v18318_v57  ;;  %v18347_v58 = vld [vmem:[#allocation8 + $0x138] sm:$0xff]   ;;  %v18351_v29 = vld [vmem:[#allocation8 + $0x48] sm:$0xff]   ;;  %vm22148_vm13 = vmmov %vm22122_vm0 }
 0x236   : > { %15526 = vmatpush3.bf16.msra.mxu0 %v18311_v54  ;;  %3709 = vmatprep.mubr.bf16.mxu0 %v3498_v17  ;;  %v18349_v54 = vld [vmem:[#allocation8 + $0x40] sm:$0xff]   ;;  %v20489_v17 = vld [vmem:[#allocation2 + $0x30] sm:$0xff]  ;;  %vm22149_vm14 = vmmov %vm22122_vm0 }
 0x237   : > { %15527 = vmatprep.subr.bf16.mxu0 %v18313_v24  ;;  %v18350_v24 = vld [vmem:[#allocation8] sm:$0xff]   ;;  %vm22150_vm7 = vmmov %vm22122_vm0 }
 0x238   : > { %16952 = vmatpush3.bf16.msra.mxu1 %v18318_v57  ;;  %v3808_v57 = vld [vmem:[#allocation2 + $0xe0] sm:$0xff] }
 0x239   : > { %16953 = vmatprep.subr.bf16.mxu1 %v18321_v22 }
 0x23a   : > { %15528 = vmatpush3.bf16.msra.mxu0 %v18314_v42  ;;  %v20485_v42 = vld [vmem:[#allocation2 + $0x50] sm:$0xff] }
 0x23b   : > { %15529 = vmatprep.subr.bf16.mxu0 %v18316_v4  ;;  %v18353_v4 = vld [vmem:[#allocation8 + $0x50] sm:$0xff]   ;;  %v4608_v3 = vrot.slane %v20485_v42, 4 }
 0x23c   : > { %16954 = vmatpush3.bf16.msra.mxu1 %v18321_v22  ;;  %v18352_v22 = vld [vmem:[#allocation8 + $0x8] sm:$0xff]  }
 0x23d   : > { %3710 = vmatmul.mubr.bf16.gmra.mrb[100].mxu0 %v3496_v61  ;;  %16955 = vmatprep.subr.bf16.mxu1 %v18324_v7 }
 0x23e   : > { %15530 = vmatpush3.bf16.msra.mxu0 %v18317_v53  ;;  %3717 = vmatprep.mubr.bf16.mxu0 %v3504_v13  ;;  %v4600_v53 = vrot.slane %v20489_v17, 4  ;;  %v4609_v13 = vsel %vm22139_vm6, %v4602_v56, %v4608_v3  ;;  %vm22154_vm6 = vmmov %vm22122_vm0 }
 0x23f   : > { %15531 = vmatprep.subr.bf16.mxu0 %v18319_v1  ;;  %v18354_v1 = vld [vmem:[#allocation8 + $0x10] sm:$0xff]  }
 0x240   : > { %16956 = vmatpush3.bf16.msra.mxu1 %v18324_v7  ;;  %v22138_v7 = vmov 0  }
 0x241   : > { %16957 = vmatprep.subr.bf16.mxu1 %v18327_v50 }
 0x242   : > { %15532 = vmatpush3.bf16.msra.mxu0 %v18320_v38  ;;  %v18356_v38 = vld [vmem:[#allocation8 + $0x18] sm:$0xff]  }
 0x243   : > { %15533 = vmatprep.subr.bf16.mxu0 %v18322_v28  ;;  %v18357_v28 = vld [vmem:[#allocation8 + $0x60] sm:$0xff]  }
 0x244   : > { %16958 = vmatpush3.bf16.msra.mxu1 %v18327_v50  ;;  %v4525_v50 = vld [vmem:[#allocation2 + $0x68] sm:$0xf] }
 0x245   : > { %3718 = vmatmul.mubr.bf16.gmra.mrb[104].mxu0 %v3502_v21  ;;  %16959 = vmatprep.subr.bf16.mxu1 %v18330_v37 }
 0x246   : > { %15534 = vmatpush3.bf16.msra.mxu0 %v18323_v55  ;;  %3725 = vmatprep.mubr.bf16.mxu0 %v3510_v48  ;;  %v4614_v55 = vrot.slane %v4525_v50, 4  ;;  %v18360_v48 = vld [vmem:[#allocation8 + $0x28] sm:$0xff]  }
 0x247   : > { %15535 = vmatprep.subr.bf16.mxu0 %v18325_v44  ;;  %v18359_v44 = vld [vmem:[#allocation8 + $0x68] sm:$0xff]  }
 0x248   : > { %16960 = vmatpush3.bf16.msra.mxu1 %v18330_v37  ;;  %v4606_v37 = vrot.slane %v20494_v26, 4  ;;  %v18442_v50 = vld [vmem:[#allocation9 + $0x20] ss:$8 sps:$4 sm:$0xff]  }
 0x249   : > { %15577 = vmatprep.subr.bf16.mxu1 %v18333_v36  ;;  %v4524_v36 = vld [vmem:[#allocation2 + $0x60] sm:$0xf] }
 0x24a   : > { %15536 = vmatpush3.bf16.msra.mxu0 %v18326_v63  ;;  %v4607_v21 = vsel %vm22140_vm5, %v4600_v53, %v4606_v37  ;;  %v4615_v63 = vsel %vm22141_vm8, %v4608_v3, %v4614_v55  ;;  %v4612_v32 = vrot.slane %v4524_v36, 4  ;;  %v18381_v36 = vld [vmem:[#allocation8 + $0x280] sm:$0xff]   ;;  %vm22155_vm5 = vmmov %vm22122_vm0 }
 0x24b   : > { %15537 = vmatprep.subr.bf16.mxu0 %v18328_v5  ;;  %16962 = vmatmul.mubr.bf16.vlgmr.msra.gmra.mrb[32].mxu1 %v20440_v45  ;;  %v3809_v45 = vld [vmem:[#allocation2 + $0xe8] sm:$0xff]  ;;  %v18361_v5 = vld [vmem:[#allocation8 + $0x70] sm:$0xff]   ;;  %vm22156_vm8 = vmmov %vm22122_vm0 }
 0x24c   : > { %16965 = vmatprep.mubr.bf16.mxu1 %v20410_v49  ;;  %15578 = vmatpush3.bf16.msra.mxu1 %v18334_v15  ;;  %v4596_v49 = vsel %vm22135_vm1, %v4594_v11, %v4595_v35  ;;  %v18362_v15 = vld [vmem:[#allocation8 + $0x30] sm:$0xff]   ;;  %vm22151_vm1 = vmmov %vm22122_vm0 }
 0x24d   : > { %3726 = vmatmul.mubr.bf16.gmra.mrb[108].mxu0 %v3508_v34  ;;  %15579 = vmatprep.subr.bf16.mxu1 %v18335_v47  ;;  %v4613_v47 = vsel %vm22142_vm10, %v4606_v37, %v4612_v32  ;;  %v18379_v37 = vld [vmem:[#allocation8 + $0x1f8] sm:$0xff]   ;;  %v18452_v32 = vld [vmem:[#allocation9 + $0x40] ss:$8 sps:$4 sm:$0xff]   ;;  %vm22157_vm10 = vmmov %vm22122_vm0 }
 0x24e   : > { %15538 = vmatpush3.bf16.msra.mxu0 %v18329_v43  ;;  %4035 = vmatprep.mubr.bf16.mxu0 %v20425_v20  ;;  %v18342_v20 = vld [vmem:[#allocation8 + $0xe0] sm:$0xff]   ;;  %v18363_v43 = vld [vmem:[#allocation8 + $0x78] sm:$0xff]  }
 0x24f   : > { %15539 = vmatprep.subr.bf16.mxu0 %v18331_v6  ;;  %v4462_v6 = vld [vmem:[#allocation2 + $0x8] sm:$0xff] }
 0x250   : > { %15580 = vmatpush3.bf16.msra.mxu1 %v18336_v31  ;;  %v18365_v31 = vld [vmem:[#allocation8 + $0x1c0] sm:$0xff]  }
 0x251   : > { %15581 = vmatprep.subr.bf16.mxu1 %v18337_v0  ;;  %v18366_v0 = vld [vmem:[#allocation8 + $0x180] sm:$0xff]  }
 0x252   : > { %15540 = vmatpush3.bf16.msra.mxu0 %v18332_v16 }
 0x253   : > { %16966 = vmatmul.mubr.bf16.gmra.mrb[36].mxu1 %v3809_v45 }
 0x254   : > { %15582 = vmatpush3.bf16.msra.mxu1 %v18338_v12  ;;  %4806 = vmatprep.mubr.bf16.mxu1 %v4596_v49  ;;  %v18367_v12 = vld [vmem:[#allocation8 + $0x1c8] sm:$0xff]  }
 0x255   : > { %4036 = vmatmul.mubr.bf16.vlgmr.msra.gmra.mrb[112].mxu0 %v20428_v10  ;;  %15583 = vmatprep.subr.bf16.mxu1 %v18339_v33  ;;  %v20478_v10 = vld [vmem:[#allocation2 + $0x18] sm:$0xff]  ;;  %v4461_v33 = vld [vmem:[#allocation2] sm:$0xff] }
 0x256   : > { %4043 = vmatprep.mubr.bf16.mxu0 %v20431_v62  ;;  %v18348_v62 = vld [vmem:[#allocation8 + $0xf8] sm:$0xff]  }
 0x258   : > { %15584 = vmatpush3.bf16.msra.mxu1 %v18340_v46  ;;  %v18368_v46 = vld [vmem:[#allocation8 + $0x188] sm:$0xff]  }
 0x259   : > { %15585 = vmatprep.subr.bf16.mxu1 %v18341_v52  ;;  %v18369_v52 = vld [vmem:[#allocation8 + $0x1d0] sm:$0xff]  }
 0x25c   : > { %15586 = vmatpush3.bf16.msra.mxu1 %v18342_v20 }
 0x25d   : > { %4044 = vmatmul.mubr.bf16.gmra.mrb[116].mxu0 %v20434_v41  ;;  %15587 = vmatprep.subr.bf16.mxu1 %v18343_v30  ;;  %v4591_v41 = vrot.slane %v4521_v8, 4  ;;  %v18370_v30 = vld [vmem:[#allocation8 + $0x190] sm:$0xff]  }
 0x25e   : > { %4051 = vmatprep.mubr.bf16.mxu0 %v20437_v27  ;;  %v4592_v27 = vrot.slane %v20478_v10, 4 }
 0x260   : > { %15588 = vmatpush3.bf16.msra.mxu1 %v18344_v40  ;;  %v4593_v23 = vsel %vm22136_vm3, %v4591_v41, %v4592_v27  ;;  %v4601_v61 = vsel %vm22122_vm0, %v4592_v27, %v4600_v53  ;;  %v18432_v41 = vld [vmem:[#allocation9] ss:$8 sps:$4 sm:$0xff]   ;;  %v18434_v27 = vld [vmem:[#allocation9 + $0x4] ss:$8 sps:$4 sm:$0xff]   ;;  %v18377_v53 = vld [vmem:[#allocation8 + $0x1f0] sm:$0xff]  }
 0x261   : > { %15589 = vmatprep.subr.bf16.mxu1 %v18345_v59  ;;  %v18371_v59 = vld [vmem:[#allocation8 + $0x1d8] sm:$0xff]   ;;  %4276 = vmatprep.subr.bf16.mxu0 %v18434_v27  ;;  %v18390_v27 = vld [vmem:[#allocation8 + $0x260] sm:$0xff]   ;;  %vm22152_vm3 = vmmov %vm22122_vm0 }
 0x262   : > { %4277 = vmatpush1.bf16.msra.mxu0 %v18432_v41 }
 0x264   : > { %15590 = vmatpush3.bf16.msra.mxu1 %v18346_v51 }
 0x265   : > { %4052 = vmatmul.mubr.bf16.gmra.mrb[120].mxu0 %v20451_v39  ;;  %15591 = vmatprep.subr.bf16.mxu1 %v18347_v58  ;;  %v4603_v39 = vsel %vm22137_vm15, %v4595_v35, %v4602_v56  ;;  %v18374_v56 = vld [vmem:[#allocation8 + $0x1a0] sm:$0xff]   ;;  %vm22153_vm15 = vmmov %vm22122_vm0 }
 0x266   : > { %4059 = vmatprep.mubr.bf16.mxu0 %v3808_v57 }
 0x268   : > { %15592 = vmatpush3.bf16.msra.mxu1 %v18348_v62  ;;  %v18372_v62 = vld [vmem:[#allocation8 + $0x198] sm:$0xff]  }
 0x269   : > { %15629 = vmatprep.subr.bf16.mxu1 %v18349_v54  ;;  %v18373_v54 = vld [vmem:[#allocation8 + $0x1e0] sm:$0xff]  }
 0x26b   : > { %4807 = vmatmul.mubr.bf16.vlgmr.msra.gmra.mrb[40].mxu1 %v4593_v23 }
 0x26c   : > { %4814 = vmatprep.mubr.bf16.mxu1 %v4603_v39  ;;  %15630 = vmatpush3.bf16.msra.mxu1 %v18350_v24 }
 0x26d   : > { %4060 = vmatmul.mubr.bf16.gmra.mrb[124].mxu0 %v3807_v19  ;;  %15631 = vmatprep.subr.bf16.mxu1 %v18351_v29  ;;  %v18375_v19 = vld [vmem:[#allocation8 + $0x1e8] sm:$0xff]  }
 0x26e   : > { %4308 = vmatprep.mubr.bf16.mxu0 %v22138_v7 }
 0x270   : > { %15632 = vmatpush3.bf16.msra.mxu1 %v18352_v22 }
 0x271   : > { %15633 = vmatprep.subr.bf16.mxu1 %v18353_v4  ;;  %v18376_v4 = vld [vmem:[#allocation8 + $0x1a8] sm:$0xff]  }
 0x273   : > { %4815 = vmatmul.mubr.bf16.gmra.mrb[44].mxu1 %v4601_v61  ;;  %v18444_v61 = vld [vmem:[#allocation9 + $0x24] ss:$8 sps:$4 sm:$0xff]  }
 0x274   : > { %4822 = vmatprep.mubr.bf16.mxu1 %v4609_v13  ;;  %15634 = vmatpush3.bf16.msra.mxu1 %v18354_v1  ;;  %v18437_v1 = vld [vmem:[#allocation9 + $0x10] ss:$8 sps:$4 sm:$0xff]  }
 0x275   : > { %15635 = vmatprep.subr.bf16.mxu1 %v18355_v9  ;;  %v18439_v9 = vld [vmem:[#allocation9 + $0x14] ss:$8 sps:$4 sm:$0xff]  }
 0x276   : > { %v18378_v13 = vld [vmem:[#allocation8 + $0x1b0] sm:$0xff]   ;;  %4278 = vmatprep.subr.bf16.mxu0 %v18439_v9 }
 0x277   : > { %4279 = vmatpush1.bf16.msra.mxu0 %v18437_v1 }
 0x278   : > { %15636 = vmatpush3.bf16.msra.mxu1 %v18356_v38  ;;  %4280 = vmatprep.subr.bf16.mxu0 %v18444_v61 }
 0x279   : > { %15637 = vmatprep.subr.bf16.mxu1 %v18357_v28 }
 0x27b   : > { %4823 = vmatmul.mubr.bf16.gmra.mrb[48].mxu1 %v4607_v21  ;;  %v18380_v21 = vld [vmem:[#allocation8 + $0x1b8] sm:$0xff]   ;;  %4281 = vmatpush1.bf16.msra.mxu0 %v18442_v50  ;;  %v18472_v50 = vld [vmem:[#allocation8 + $0x140] sm:$0xff]  }
 0x27c   : > { %4830 = vmatprep.mubr.bf16.mxu1 %v4615_v63  ;;  %15638 = vmatpush3.bf16.msra.mxu1 %v18358_v2 }
 0x27d   : > { %15639 = vmatprep.subr.bf16.mxu1 %v18359_v44 }
 0x280   : > { %15640 = vmatpush3.bf16.msra.mxu1 %v18360_v48  ;;  %v18447_v48 = vld [vmem:[#allocation9 + $0x30] ss:$8 sps:$4 sm:$0xff]  }
 0x281   : > { %15641 = vmatprep.subr.bf16.mxu1 %v18361_v5  ;;  %v18449_v5 = vld [vmem:[#allocation9 + $0x34] ss:$8 sps:$4 sm:$0xff]  }
 0x282   : > { %4282 = vmatprep.subr.bf16.mxu0 %v18449_v5 }
 0x283   : > { %4831 = vmatmul.mubr.bf16.gmra.mrb[52].mxu1 %v4613_v47  ;;  %4283 = vmatpush1.bf16.msra.mxu0 %v18447_v48 }
 0x284   : > { %15642 = vmatpush3.bf16.msra.mxu1 %v18362_v15  ;;  %5080 = vmatprep.mubr.bf16.mxu1 %v4462_v6  ;;  %v18454_v15 = vld [vmem:[#allocation9 + $0x44] ss:$8 sps:$4 sm:$0xff]  }
 0x285   : > { %15643 = vmatprep.subr.bf16.mxu1 %v18363_v43  ;;  %v18382_v6 = vld [vmem:[#allocation8 + $0x240] sm:$0xff]   ;;  %4284 = vmatprep.subr.bf16.mxu0 %v18454_v15 }
 0x286   : > { %v18398_v15 = vld [vmem:[#allocation8 + $0x300] sm:$0xff]  }
 0x287   : > { %4285 = vmatpush1.bf16.msra.mxu0 %v18452_v32 }
 0x288   : > { %v15281_v34 = vpop.f32.mrb[32].mxu0  ;;  %15644 = vmatpush3.bf16.msra.mxu1 %v18364_v25  ;;  %v18383_v25 = vld [vmem:[#allocation8 + $0x288] sm:$0xff]  }
 0x289   : > { %v15282_v16 = vpop.f32.mrb[33].mxu0  ;;  %15681 = vmatprep.subr.bf16.mxu1 %v18365_v31 }
 0x28a   : > { %v20502_v11 = vadd.f32 %v15282_v16, %v15281_v34  ;;  %v15284_v35 = vpop.f32.mrb[34].mxu0  ;;  %v18385_v16 = vld [vmem:[#allocation8 + $0x290] sm:$0xff]  }
 0x28b   : > { %v15285_v45 = vpop.f32.mrb[35].mxu0  ;;  %5081 = vmatmul.mubr.bf16.vlgmr.msra.gmra.mrb[56].mxu1 %v4461_v33 }
 0x28c   : > { %v20504_v49 = vadd.f32 %v15285_v45, %v15284_v35  ;;  %5088 = vmatprep.mubr.bf16.mxu1 %v20466_v18  ;;  %15682 = vmatpush3.bf16.msra.mxu1 %v18366_v0  ;;  %v18384_v0 = vld [vmem:[#allocation8 + $0x248] sm:$0xff]  }
 0x28d   : > { %15683 = vmatprep.subr.bf16.mxu1 %v18367_v12 }
 0x290   : > { %v15287_v20 = vpop.f32.mrb[36].mxu0  ;;  %15684 = vmatpush3.bf16.msra.mxu1 %v18368_v46  ;;  %v18386_v46 = vld [vmem:[#allocation8 + $0x250] sm:$0xff]  }
 0x291   : > { %v15288_v40 = vpop.f32.mrb[37].mxu0  ;;  %15685 = vmatprep.subr.bf16.mxu1 %v18369_v52 }
 0x292   : > { %v20507_v51 = vadd.f32 %v15288_v40, %v15287_v20  ;;  %v15290_v58 = vpop.f32.mrb[38].mxu0  ;;  %v18387_v20 = vld [vmem:[#allocation8 + $0x298] sm:$0xff]  }
 0x293   : > { %v15291_v8 = vpop.f32.mrb[39].mxu0  ;;  %5089 = vmatmul.mubr.bf16.gmra.mrb[60].mxu1 %v20478_v10 }
 0x294   : > { %v20510_v57 = vadd.f32 %v15291_v8, %v15290_v58  ;;  %5096 = vmatprep.mubr.bf16.mxu1 %v20480_v14  ;;  %15686 = vmatpush3.bf16.msra.mxu1 %v18370_v30  ;;  %v18457_v8 = vld [vmem:[#allocation9 + $0x50] ss:$8 sps:$4 sm:$0xff]  }
 0x295   : > { %15687 = vmatprep.subr.bf16.mxu1 %v18371_v59 }
 0x298   : > { %v15293_v24 = vpop.f32.mrb[40].mxu0  ;;  %15688 = vmatpush3.bf16.msra.mxu1 %v18372_v62  ;;  %v18459_v62 = vld [vmem:[#allocation9 + $0x54] ss:$8 sps:$4 sm:$0xff]  }
 0x299   : > { %v15294_v29 = vpop.f32.mrb[41].mxu0  ;;  %15689 = vmatprep.subr.bf16.mxu1 %v18373_v54  ;;  %v18464_v54 = vld [vmem:[#allocation9 + $0x64] ss:$8 sps:$4 sm:$0xff]   ;;  %4286 = vmatprep.subr.bf16.mxu0 %v18459_v62 }
 0x29a   : > { %v20513_v23 = vadd.f32 %v15294_v29, %v15293_v24  ;;  %v15296_v22 = vpop.f32.mrb[42].mxu0  ;;  %v5179_v24 = vld [vmem:[#allocation2 + $0x68] sm:$0xff]  ;;  %4287 = vmatpush1.bf16.msra.mxu0 %v18457_v8  ;;  %v18405_v8 = vld [vmem:[#allocation8 + $0x360] sm:$0xff]  }
 0x29b   : > { %v15297_v39 = vpop.f32.mrb[43].mxu0  ;;  %5097 = vmatmul.mubr.bf16.gmra.mrb[64].mxu1 %v20489_v17  ;;  %4288 = vmatprep.subr.bf16.mxu0 %v18464_v54  ;;  %v18406_v54 = vld [vmem:[#allocation8 + $0x320] sm:$0xff]  }
 0x29c   : > { %v20516_v3 = vadd.f32 %v15297_v39, %v15296_v22  ;;  %5104 = vmatprep.mubr.bf16.mxu1 %v20485_v42  ;;  %15690 = vmatpush3.bf16.msra.mxu1 %v18374_v56  ;;  %v18462_v56 = vld [vmem:[#allocation9 + $0x60] ss:$8 sps:$4 sm:$0xff]   ;;  %v18469_v22 = vld [vmem:[#allocation9 + $0x74] ss:$8 sps:$4 sm:$0xff]  }
 0x29d   : > { %15691 = vmatprep.subr.bf16.mxu1 %v18375_v19  ;;  %v18393_v39 = vld [vmem:[#allocation8 + $0x2b0] sm:$0xff]  }
 0x29e   : > { %4289 = vmatpush1.bf16.msra.mxu0 %v18462_v56 }
 0x29f   : > { %4290 = vmatprep.subr.bf16.mxu0 %v18469_v22 }
 0x2a0   : > { %v15299_v38 = vpop.f32.mrb[44].mxu0  ;;  %15692 = vmatpush3.bf16.msra.mxu1 %v18376_v4  ;;  %v18467_v4 = vld [vmem:[#allocation9 + $0x70] ss:$8 sps:$4 sm:$0xff]  }
 0x2a1   : > { %v15300_v28 = vpop.f32.mrb[45].mxu0  ;;  %15693 = vmatprep.subr.bf16.mxu1 %v18377_v53 }
 0x2a2   : > { %v20519_v55 = vadd.f32 %v15300_v28, %v15299_v38  ;;  %v15302_v2 = vpop.f32.mrb[46].mxu0  ;;  %v5178_v38 = vld [vmem:[#allocation2 + $0x60] sm:$0xff]  ;;  %4291 = vmatpush1.bf16.msra.mxu0 %v18467_v4 }
 0x2a3   : > { %v15303_v44 = vpop.f32.mrb[47].mxu0  ;;  %5105 = vmatmul.mubr.bf16.gmra.mrb[68].mxu1 %v20494_v26  ;;  %v5513_v28 = vld [vmem:[#allocation2 + $0x80] sm:$0xff]  ;;  %16969 = vmatprep.subr.bf16.mxu0 %v18472_v50 }
 0x2a4   : > { %v20522_v63 = vadd.f32 %v15303_v44, %v15302_v2  ;;  %15694 = vmatpush3.bf16.msra.mxu1 %v18378_v13  ;;  %5406 = vmatprep.mubr.bf16.mxu1 %v20466_v18  ;;  %v18394_v13 = vld [vmem:[#allocation8 + $0x270] sm:$0xff]  }
 0x2a5   : > { %15695 = vmatprep.subr.bf16.mxu1 %v18379_v37  ;;  %v18395_v37 = vld [vmem:[#allocation8 + $0x2b8] sm:$0xff]  }
 0x2a8   : > { %v15333_v43 = vpop.f32.mrb[48].mxu0  ;;  %15696 = vmatpush3.bf16.msra.mxu1 %v18380_v21 }
 0x2a9   : > { %v15334_v47 = vpop.f32.mrb[49].mxu0  ;;  %15733 = vmatprep.subr.bf16.mxu1 %v18381_v36 }
 0x2aa   : > { %v15335_v31 = vadd.f32 %v15334_v47, %v15333_v43  ;;  %v15336_v34 = vpop.f32.mrb[50].mxu0  ;;  %v18399_v47 = vld [vmem:[#allocation8 + $0x348] sm:$0xff]  }
 0x2ab   : > { %v15337_v18 = vpop.f32.mrb[51].mxu0  ;;  %5407 = vmatmul.mubr.bf16.vlgmr.msra.gmra.mrb[72].mxu1 %v20478_v10 }
 0x2ac   : > { %v15338_v12 = vadd.f32 %v15337_v18, %v15336_v34  ;;  %5414 = vmatprep.mubr.bf16.mxu1 %v20480_v14  ;;  %15734 = vmatpush3.bf16.msra.mxu1 %v18382_v6  ;;  %v20528_v35 = vadd.f32 %v15335_v31, %v20502_v11  ;;  %v18388_v14 = vld [vmem:[#allocation8 + $0x258] sm:$0xff]   ;;  %v18389_v11 = vld [vmem:[#allocation8 + $0x2a0] sm:$0xff]  }
 0x2ad   : > { %15735 = vmatprep.subr.bf16.mxu1 %v18383_v25  ;;  %v20554_v6 = vld [vmem:[#allocation2 + $0x98] sm:$0xff] }
 0x2ae   : > { %v20531_v33 = vadd.f32 %v15338_v12, %v20504_v49  ;;  %v5512_v34 = vld [vmem:[#allocation2 + $0x78] sm:$0xff]  ;;  %v5936_v50 = vrot.slane %v20554_v6, 4 }
 0x2b0   : > { %v15339_v45 = vpop.f32.mrb[52].mxu0  ;;  %15736 = vmatpush3.bf16.msra.mxu1 %v18384_v0  ;;  %v18400_v0 = vld [vmem:[#allocation8 + $0x308] sm:$0xff]  }
 0x2b1   : > { %v15340_v52 = vpop.f32.mrb[53].mxu0  ;;  %15737 = vmatprep.subr.bf16.mxu1 %v18385_v16 }
 0x2b2   : > { %v15341_v10 = vadd.f32 %v15340_v52, %v15339_v45  ;;  %v15342_v30 = vpop.f32.mrb[54].mxu0  ;;  %v18402_v45 = vld [vmem:[#allocation8 + $0x310] sm:$0xff]  }
 0x2b3   : > { %v15343_v40 = vpop.f32.mrb[55].mxu0  ;;  %5415 = vmatmul.mubr.bf16.gmra.mrb[76].mxu1 %v20489_v17 }
 0x2b4   : > { %v15344_v59 = vadd.f32 %v15343_v40, %v15342_v30  ;;  %5422 = vmatprep.mubr.bf16.mxu1 %v20485_v42  ;;  %15738 = vmatpush3.bf16.msra.mxu1 %v18386_v46  ;;  %v20536_v49 = vadd.f32 %v15341_v10, %v20507_v51  ;;  %v18391_v42 = vld [vmem:[#allocation8 + $0x2a8] sm:$0xff]   ;;  %v20565_v10 = vld [vmem:[#allocation2 + $0xb0] sm:$0xff] }
 0x2b5   : > { %15739 = vmatprep.subr.bf16.mxu1 %v18387_v20  ;;  %v18392_v51 = vld [vmem:[#allocation8 + $0x268] sm:$0xff]   ;;  %v20563_v20 = vld [vmem:[#allocation2 + $0x90] sm:$0xff] }
 0x2b6   : > { %v20539_v58 = vadd.f32 %v15344_v59, %v20510_v57 }
 0x2b8   : > { %v15345_v41 = vpop.f32.mrb[56].mxu0  ;;  %15740 = vmatpush3.bf16.msra.mxu1 %v18388_v14  ;;  %v18404_v14 = vld [vmem:[#allocation8 + $0x318] sm:$0xff]  }
 0x2b9   : > { %v15346_v17 = vpop.f32.mrb[57].mxu0  ;;  %15741 = vmatprep.subr.bf16.mxu1 %v18389_v11 }
 0x2ba   : > { %v15348_v29 = vpop.f32.mrb[58].mxu0  ;;  %v15347_v19 = vadd.f32 %v15346_v17, %v15345_v41  ;;  %v5855_v17 = vld [vmem:[#allocation2 + $0x80] sm:$0xf0] }
 0x2bb   : > { %v15349_v57 = vpop.f32.mrb[59].mxu0  ;;  %5423 = vmatmul.mubr.bf16.gmra.mrb[80].mxu1 %v20494_v26 }
 0x2bc   : > { %5430 = vmatprep.mubr.bf16.mxu1 %v5179_v24  ;;  %15742 = vmatpush3.bf16.msra.mxu1 %v18390_v27  ;;  %v20543_v53 = vadd.f32 %v15347_v19, %v20513_v23  ;;  %v15350_v1 = vadd.f32 %v15349_v57, %v15348_v29  ;;  %v18396_v23 = vld [vmem:[#allocation8 + $0x278] sm:$0xff]   ;;  %v20575_v27 = vld [vmem:[#allocation2 + $0xa8] sm:$0xff]  ;;  %v18409_v57 = vld [vmem:[#allocation8 + $0x370] sm:$0xff]  }
 0x2bd   : > { %15743 = vmatprep.subr.bf16.mxu1 %v18391_v42  ;;  %v20577_v42 = vld [vmem:[#allocation2 + $0xc8] sm:$0xff] }
 0x2be   : > { %v20546_v9 = vadd.f32 %v15350_v1, %v20516_v3  ;;  %v18397_v3 = vld [vmem:[#allocation8 + $0x340] sm:$0xff]   ;;  %v18410_v1 = vld [vmem:[#allocation8 + $0x330] sm:$0xff]  }
 0x2c0   : > { %v15351_v61 = vpop.f32.mrb[60].mxu0  ;;  %15744 = vmatpush3.bf16.msra.mxu1 %v18392_v51  ;;  %v18408_v51 = vld [vmem:[#allocation8 + $0x328] sm:$0xff]  }
 0x2c1   : > { %v15352_v26 = vpop.f32.mrb[61].mxu0  ;;  %15745 = vmatprep.subr.bf16.mxu1 %v18393_v39  ;;  %v5935_v39 = vrot.slane %v5855_v17, 4 }
 0x2c2   : > { %v15354_v2 = vpop.f32.mrb[62].mxu0  ;;  %v15353_v44 = vadd.f32 %v15352_v26, %v15351_v61  ;;  %v5854_v26 = vld [vmem:[#allocation2 + $0x78] sm:$0xf0] }
 0x2c3   : > { %v15355_v21 = vpop.f32.mrb[63].mxu0  ;;  %5431 = vmatmul.mubr.bf16.gmra.mrb[84].mxu1 %v5178_v38  ;;  %v20588_v38 = vld [vmem:[#allocation2 + $0xc0] sm:$0xff] }
 0x2c4   : > { %15746 = vmatpush3.bf16.msra.mxu1 %v18394_v13  ;;  %5748 = vmatprep.mubr.bf16.mxu1 %v5513_v28  ;;  %v20549_v36 = vadd.f32 %v15353_v44, %v20519_v55  ;;  %v15356_v48 = vadd.f32 %v15355_v21, %v15354_v2  ;;  %v18412_v2 = vld [vmem:[#allocation8 + $0x338] sm:$0xff]  }
 0x2c5   : > { %15747 = vmatprep.subr.bf16.mxu1 %v18395_v37 }
 0x2c6   : > { %v20552_v5 = vadd.f32 %v15356_v48, %v20522_v63  ;;  %v18401_v63 = vld [vmem:[#allocation8 + $0x350] sm:$0xff]   ;;  %v18413_v48 = vld [vmem:[#allocation8 + $0x400] sm:$0xff]  }
 0x2c8   : > { %v15385_v32 = vpop.f32.mrb[64].mxu0  ;;  %15748 = vmatpush3.bf16.msra.mxu1 %v18396_v23 }
 0x2c9   : > { %v15386_v43 = vpop.f32.mrb[65].mxu0  ;;  %15785 = vmatprep.subr.bf16.mxu1 %v18397_v3  ;;  %v5932_v3 = vrot.slane %v5854_v26, 4 }
 0x2ca   : > { %v15387_v25 = vadd.f32 %v15386_v43, %v15385_v32  ;;  %v15388_v31 = vpop.f32.mrb[66].mxu0  ;;  %v5943_v32 = vrot.slane %v20565_v10, 4  ;;  %v5933_v43 = vrot.slane %v20563_v20, 4 }
 0x2cb   : > { %v15389_v18 = vpop.f32.mrb[67].mxu0  ;;  %5749 = vmatmul.mubr.bf16.vlgmr.msra.gmra.mrb[88].mxu1 %v5512_v34 }
 0x2cc   : > { %v20557_v55 = vadd.f32 %v20528_v35, %v15387_v25  ;;  %v15390_v16 = vadd.f32 %v15389_v18, %v15388_v31  ;;  %5756 = vmatprep.mubr.bf16.mxu1 %v20554_v6  ;;  %15786 = vmatpush3.bf16.msra.mxu1 %v18398_v15  ;;  %v18403_v35 = vld [vmem:[#allocation8 + $0x358] sm:$0xff]   ;;  %v5934_v18 = vsel %vm22144_vm12, %v5932_v3, %v5933_v43  ;;  %vm22159_vm12 = vmmov %vm22122_vm0 }
 0x2cd   : > { %15787 = vmatprep.subr.bf16.mxu1 %v18399_v47  ;;  %v18414_v47 = vld [vmem:[#allocation8 + $0x3c0] sm:$0xff]  }
 0x2ce   : > { %v20561_v12 = vadd.f32 %v20531_v33, %v15390_v16  ;;  %v18416_v16 = vld [vmem:[#allocation8 + $0x3c8] sm:$0xff]  }
 0x2d0   : > { %v15391_v46 = vpop.f32.mrb[68].mxu0  ;;  %15788 = vmatpush3.bf16.msra.mxu1 %v18400_v0 }
 0x2d1   : > { %v15392_v52 = vpop.f32.mrb[69].mxu0  ;;  %15789 = vmatprep.subr.bf16.mxu1 %v18401_v63 }
 0x2d2   : > { %v15393_v30 = vadd.f32 %v15392_v52, %v15391_v46  ;;  %v15394_v40 = vpop.f32.mrb[70].mxu0  ;;  %v5941_v52 = vrot.slane %v20575_v27, 4 }
 0x2d3   : > { %v15395_v59 = vpop.f32.mrb[71].mxu0  ;;  %5757 = vmatmul.mubr.bf16.gmra.mrb[92].mxu1 %v20563_v20 }
 0x2d4   : > { %v20569_v11 = vadd.f32 %v20536_v49, %v15393_v30  ;;  %v15396_v33 = vadd.f32 %v15395_v59, %v15394_v40  ;;  %5764 = vmatprep.mubr.bf16.mxu1 %v20565_v10  ;;  %15790 = vmatpush3.bf16.msra.mxu1 %v18402_v45  ;;  %v18407_v49 = vld [vmem:[#allocation8 + $0x368] sm:$0xff]   ;;  %v5944_v45 = vsel %vm22145_vm2, %v5936_v50, %v5943_v32  ;;  %v5949_v40 = vrot.slane %v20577_v42, 4  ;;  %vm22160_vm2 = vmmov %vm22122_vm0 }
 0x2d5   : > { %15791 = vmatprep.subr.bf16.mxu1 %v18403_v35  ;;  %v18417_v35 = vld [vmem:[#allocation8 + $0x410] sm:$0xff]   ;;  %v5942_v17 = vsel %vm22146_vm11, %v5933_v43, %v5941_v52  ;;  %vm22161_vm11 = vmmov %vm22122_vm0 }
 0x2d6   : > { %v20573_v62 = vadd.f32 %v20539_v58, %v15396_v33 }
 0x2d8   : > { %v15397_v41 = vpop.f32.mrb[72].mxu0  ;;  %15792 = vmatpush3.bf16.msra.mxu1 %v18404_v14  ;;  %v18418_v14 = vld [vmem:[#allocation8 + $0x3d0] sm:$0xff]  }
 0x2d9   : > { %v15398_v24 = vpop.f32.mrb[73].mxu0  ;;  %15793 = vmatprep.subr.bf16.mxu1 %v18405_v8  ;;  %v18419_v8 = vld [vmem:[#allocation8 + $0x418] sm:$0xff]  }
 0x2da   : > { %v15399_v56 = vadd.f32 %v15398_v24, %v15397_v41  ;;  %v15400_v29 = vpop.f32.mrb[74].mxu0  ;;  %v18420_v24 = vld [vmem:[#allocation8 + $0x3d8] sm:$0xff]  }
 0x2db   : > { %v15401_v19 = vpop.f32.mrb[75].mxu0  ;;  %5765 = vmatmul.mubr.bf16.gmra.mrb[96].mxu1 %v20575_v27 }
 0x2dc   : > { %v20581_v58 = vadd.f32 %v20543_v53, %v15399_v56  ;;  %v15402_v22 = vadd.f32 %v15401_v19, %v15400_v29  ;;  %5772 = vmatprep.mubr.bf16.mxu1 %v20577_v42  ;;  %15794 = vmatpush3.bf16.msra.mxu1 %v18406_v54  ;;  %v18411_v53 = vld [vmem:[#allocation8 + $0x378] sm:$0xff]   ;;  %v18421_v29 = vld [vmem:[#allocation8 + $0x420] sm:$0xff]  }
 0x2dd   : > { %15795 = vmatprep.subr.bf16.mxu1 %v18407_v49  ;;  %v5867_v49 = vld [vmem:[#allocation2 + $0xe0] sm:$0xf] }
 0x2de   : > { %v20585_v4 = vadd.f32 %v20546_v9, %v15402_v22  ;;  %v5937_v9 = vsel %vm22143_vm4, %v5935_v39, %v5936_v50  ;;  %vm22158_vm4 = vmmov %vm22122_vm0 }
 0x2e0   : > { %v15403_v61 = vpop.f32.mrb[76].mxu0  ;;  %15796 = vmatpush3.bf16.msra.mxu1 %v18408_v51 }
 0x2e1   : > { %v15404_v13 = vpop.f32.mrb[77].mxu0  ;;  %15797 = vmatprep.subr.bf16.mxu1 %v18409_v57  ;;  %v5955_v57 = vrot.slane %v5867_v49, 4  ;;  %v18446_v49 = vld [vmem:[#allocation8 + $0x4e0] sm:$0xff]  }
 0x2e2   : > { %v15405_v28 = vadd.f32 %v15404_v13, %v15403_v61  ;;  %v15406_v37 = vpop.f32.mrb[78].mxu0  ;;  %v18423_v61 = vld [vmem:[#allocation8 + $0x428] sm:$0xff]  }
 0x2e3   : > { %v15407_v23 = vpop.f32.mrb[79].mxu0  ;;  %5773 = vmatmul.mubr.bf16.gmra.mrb[100].mxu1 %v20588_v38 }
 0x2e4   : > { %v20593_v44 = vadd.f32 %v20549_v36, %v15405_v28  ;;  %v15408_v21 = vadd.f32 %v15407_v23, %v15406_v37  ;;  %15798 = vmatpush3.bf16.msra.mxu1 %v18410_v1  ;;  %6147 = vmatprep.mubr.bf16.mxu1 %v5937_v9  ;;  %v18415_v36 = vld [vmem:[#allocation8 + $0x408] sm:$0xff]   ;;  %v18422_v1 = vld [vmem:[#allocation8 + $0x3e0] sm:$0xff]   ;;  %v5956_v28 = vsel %vm22149_vm14, %v5949_v40, %v5955_v57  ;;  %v5866_v37 = vld [vmem:[#allocation2 + $0xd8] sm:$0xf] }
 0x2e5   : > { %15799 = vmatprep.subr.bf16.mxu1 %v18411_v53  ;;  %v18424_v23 = vld [vmem:[#allocation8 + $0x3e8] sm:$0xff]   ;;  %v18425_v9 = vld [vmem:[#allocation8 + $0x430] sm:$0xff]   ;;  %v5953_v3 = vrot.slane %v5866_v37, 4  ;;  %v6254_v57 = vld [vmem:[#allocation2 + $0xe0] sm:$0xff] }
 0x2e6   : > { %v20597_v15 = vadd.f32 %v20552_v5, %v15408_v21  ;;  %v18460_v37 = vld [vmem:[#allocation8 + $0x4b0] sm:$0xff]   ;;  %vm22164_vm14 = vmmov %vm22122_vm0 }
 0x2e8   : > { %v15437_v25 = vpop.f32.mrb[80].mxu0  ;;  %15800 = vmatpush3.bf16.msra.mxu1 %v18412_v2 }
 0x2e9   : > { %v15438_v31 = vpop.f32.mrb[81].mxu0  ;;  %15837 = vmatprep.subr.bf16.mxu1 %v18413_v48 }
 0x2ea   : > { %v15439_v34 = vadd.f32 %v15438_v31, %v15437_v25  ;;  %v15440_v0 = vpop.f32.mrb[82].mxu0 }
 0x2eb   : > { %v15441_v63 = vpop.f32.mrb[83].mxu0  ;;  %6148 = vmatmul.mubr.bf16.vlgmr.msra.gmra.mrb[104].mxu1 %v5934_v18 }
 0x2ec   : > { %v20603_v5 = vadd.f32 %v20557_v55, %v15439_v34  ;;  %v15442_v46 = vadd.f32 %v15441_v63, %v15440_v0  ;;  %6155 = vmatprep.mubr.bf16.mxu1 %v5944_v45  ;;  %15838 = vmatpush3.bf16.msra.mxu1 %v18414_v47  ;;  %v5947_v55 = vrot.slane %v20588_v38, 4  ;;  %v18427_v47 = vld [vmem:[#allocation8 + $0x438] sm:$0xff]   ;;  %v18430_v45 = vld [vmem:[#allocation8 + $0x480] sm:$0xff]  }
 0x2ed   : > { %15839 = vmatprep.subr.bf16.mxu1 %v18415_v36  ;;  %v18428_v34 = vld [vmem:[#allocation8 + $0x3f8] sm:$0xff]  }
 0x2ee   : > { %v20607_v30 = vadd.f32 %v20561_v12, %v15442_v46  ;;  %v5950_v12 = vsel %vm22147_vm9, %v5943_v32, %v5949_v40  ;;  %v5948_v26 = vsel %vm22148_vm13, %v5941_v52, %v5947_v55  ;;  %v18426_v32 = vld [vmem:[#allocation8 + $0x3f0] sm:$0xff]   ;;  %v18431_v52 = vld [vmem:[#allocation8 + $0x4c8] sm:$0xff]   ;;  %vm22162_vm9 = vmmov %vm22122_vm0 }
 0x2ef   : > { %vm22163_vm13 = vmmov %vm22122_vm0 }
 0x2f0   : > { %v15443_v59 = vpop.f32.mrb[84].mxu0  ;;  %15840 = vmatpush3.bf16.msra.mxu1 %v18416_v16 }
 0x2f1   : > { %v15444_v33 = vpop.f32.mrb[85].mxu0  ;;  %15841 = vmatprep.subr.bf16.mxu1 %v18417_v35 }
 0x2f2   : > { %v15445_v54 = vadd.f32 %v15444_v33, %v15443_v59  ;;  %v15446_v41 = vpop.f32.mrb[86].mxu0 }
 0x2f3   : > { %v15447_v56 = vpop.f32.mrb[87].mxu0  ;;  %6156 = vmatmul.mubr.bf16.gmra.mrb[108].mxu1 %v5942_v17 }
 0x2f4   : > { %v20614_v51 = vadd.f32 %v20569_v11, %v15445_v54  ;;  %v15448_v19 = vadd.f32 %v15447_v56, %v15446_v41  ;;  %6163 = vmatprep.mubr.bf16.mxu1 %v5950_v12  ;;  %15842 = vmatpush3.bf16.msra.mxu1 %v18418_v14  ;;  %v18441_v41 = vld [vmem:[#allocation8 + $0x4d8] sm:$0xff]  }
 0x2f5   : > { %15843 = vmatprep.subr.bf16.mxu1 %v18419_v8 }
 0x2f6   : > { %v20617_v22 = vadd.f32 %v20573_v62, %v15448_v19 }
 0x2f8   : > { %v15449_v39 = vpop.f32.mrb[88].mxu0  ;;  %15844 = vmatpush3.bf16.msra.mxu1 %v18420_v24 }
 0x2f9   : > { %v15450_v50 = vpop.f32.mrb[89].mxu0  ;;  %15845 = vmatprep.subr.bf16.mxu1 %v18421_v29  ;;  %v18450_v29 = vld [vmem:[#allocation8 + $0x4a0] sm:$0xff]  }
 0x2fa   : > { %v15451_v13 = vadd.f32 %v15450_v50, %v15449_v39  ;;  %v15452_v53 = vpop.f32.mrb[90].mxu0 }
 0x2fb   : > { %v15453_v11 = vpop.f32.mrb[91].mxu0  ;;  %6164 = vmatmul.mubr.bf16.gmra.mrb[112].mxu1 %v5948_v26 }
 0x2fc   : > { %v20622_v2 = vadd.f32 %v20581_v58, %v15451_v13  ;;  %v15454_v62 = vadd.f32 %v15453_v11, %v15452_v53  ;;  %6171 = vmatprep.mubr.bf16.mxu1 %v5956_v28  ;;  %15846 = vmatpush3.bf16.msra.mxu1 %v18422_v1  ;;  %v5954_v58 = vsel %vm22150_vm7, %v5947_v55, %v5953_v3  ;;  %v18440_v55 = vld [vmem:[#allocation8 + $0x490] sm:$0xff]   ;;  %v18455_v1 = vld [vmem:[#allocation8 + $0x4a8] sm:$0xff]   ;;  %vm22165_vm7 = vmmov %vm22122_vm0 }
 0x2fd   : > { %15847 = vmatprep.subr.bf16.mxu1 %v18423_v61 }
 0x2fe   : > { %v20625_v21 = vadd.f32 %v20585_v4, %v15454_v62  ;;  %v18429_v4 = vld [vmem:[#allocation8 + $0x4c0] sm:$0xff]  }
 0x300   : > { %v15455_v48 = vpop.f32.mrb[92].mxu0  ;;  %15848 = vmatpush3.bf16.msra.mxu1 %v18424_v23  ;;  %v6253_v23 = vld [vmem:[#allocation2 + $0xd8] sm:$0xff] }
 0x301   : > { %v15456_v43 = vpop.f32.mrb[93].mxu0  ;;  %15849 = vmatprep.subr.bf16.mxu1 %v18425_v9 }
 0x302   : > { %v15457_v25 = vadd.f32 %v15456_v43, %v15455_v48  ;;  %v15458_v31 = vpop.f32.mrb[94].mxu0  ;;  %v6587_v48 = vld [vmem:[#allocation2 + $0xf8] sm:$0xff] }
 0x303   : > { %v15459_v36 = vpop.f32.mrb[95].mxu0  ;;  %6172 = vmatmul.mubr.bf16.gmra.mrb[116].mxu1 %v5954_v58 }
 0x304   : > { %v20629_v0 = vadd.f32 %v20593_v44, %v15457_v25  ;;  %v15460_v18 = vadd.f32 %v15459_v36, %v15458_v31  ;;  %15850 = vmatpush3.bf16.msra.mxu1 %v18426_v32  ;;  %6480 = vmatprep.mubr.bf16.mxu1 %v20554_v6  ;;  %v18435_v44 = vld [vmem:[#allocation8 + $0x488] sm:$0xff]   ;;  %v18466_v25 = vld [vmem:[#allocation8 + $0x580] sm:$0xff]  }
 0x305   : > { %15851 = vmatprep.subr.bf16.mxu1 %v18427_v47 }
 0x306   : > { %v20633_v16 = vadd.f32 %v20597_v15, %v15460_v18  ;;  %v18436_v15 = vld [vmem:[#allocation8 + $0x4d0] sm:$0xff]  }
 0x308   : > { %v15489_v63 = vpop.f32.mrb[96].mxu0  ;;  %15852 = vmatpush3.bf16.msra.mxu1 %v18428_v34  ;;  %v18470_v34 = vld [vmem:[#allocation8 + $0x540] sm:$0xff]  }
 0x309   : > { %v15490_v46 = vpop.f32.mrb[97].mxu0  ;;  %15889 = vmatprep.subr.bf16.mxu1 %v18429_v4 }
 0x30a   : > { %v15491_v35 = vadd.f32 %v15490_v46, %v15489_v63  ;;  %v15492_v40 = vpop.f32.mrb[98].mxu0  ;;  %v18471_v46 = vld [vmem:[#allocation8 + $0x588] sm:$0xff]  }
 0x30b   : > { %v15493_v14 = vpop.f32.mrb[99].mxu0  ;;  %6481 = vmatmul.mubr.bf16.vlgmr.msra.gmra.mrb[120].mxu1 %v20563_v20 }
 0x30c   : > { %v20637_v59 = vadd.f32 %v20603_v5, %v15491_v35  ;;  %v15494_v6 = vadd.f32 %v15493_v14, %v15492_v40  ;;  %6488 = vmatprep.mubr.bf16.mxu1 %v20565_v10  ;;  %15890 = vmatpush3.bf16.msra.mxu1 %v18430_v45  ;;  %v20676_v45 = vld [vmem:[#allocation2 + $0x110] sm:$0xff]  ;;  %v20681_v40 = vld [vmem:[%s21926_s4] ss:$0 sm:$0xff] }
 0x30d   : > { %15891 = vmatprep.subr.bf16.mxu1 %v18431_v52 }
 0x30e   : > { %v20641_v33 = vadd.f32 %v20607_v30, %v15494_v6  ;;  %v18445_v30 = vld [vmem:[#allocation8 + $0x498] sm:$0xff]  }
 0x310   : > { %v15495_v8 = vpop.f32.mrb[100].mxu0  ;;  %15892 = vmatpush3.bf16.msra.mxu1 %v18435_v44  ;;  %v18473_v44 = vld [vmem:[#allocation8 + $0x548] sm:$0xff]  }
 0x311   : > { %v15496_v54 = vpop.f32.mrb[101].mxu0  ;;  %15893 = vmatprep.subr.bf16.mxu1 %v18436_v15 }
 0x312   : > { %v15497_v20 = vadd.f32 %v15496_v54, %v15495_v8  ;;  %v15498_v17 = vpop.f32.mrb[102].mxu0  ;;  %v18474_v8 = vld [vmem:[#allocation8 + $0x590] sm:$0xff]  }
 0x313   : > { %v15499_v24 = vpop.f32.mrb[103].mxu0  ;;  %6489 = vmatmul.mubr.bf16.gmra.mrb[124].mxu1 %v20575_v27  ;;  %v18451_v27 = vld [vmem:[#allocation8 + $0x4e8] sm:$0xff]  }
 0x314   : > { %v20645_v5 = vadd.f32 %v20614_v51, %v15497_v20  ;;  %v15500_v10 = vadd.f32 %v15499_v24, %v15498_v17  ;;  %6496 = vmatprep.mubr.bf16.mxu1 %v20577_v42  ;;  %15894 = vmatpush3.bf16.msra.mxu1 %v18440_v55  ;;  %v18456_v42 = vld [vmem:[#allocation8 + $0x4f0] sm:$0xff]  }
 0x315   : > { %15895 = vmatprep.subr.bf16.mxu1 %v18441_v41  ;;  %v18476_v24 = vld [vmem:[#allocation8 + $0x550] sm:$0xff]  }
 0x316   : > { %v20649_v56 = vadd.f32 %v20617_v22, %v15500_v10 }
 0x318   : > { %v15501_v12 = vpop.f32.mrb[104].mxu0  ;;  %15896 = vmatpush3.bf16.msra.mxu1 %v18445_v30  ;;  %v20687_v30 = vld [vmem:[#allocation2 + $0x128] sm:$0xff] }
 0x319   : > { %v15502_v19 = vpop.f32.mrb[105].mxu0  ;;  %15897 = vmatprep.subr.bf16.mxu1 %v18446_v49 }
 0x31a   : > { %v15503_v39 = vadd.f32 %v15502_v19, %v15501_v12  ;;  %v15504_v51 = vpop.f32.mrb[106].mxu0  ;;  %v20690_v19 = vld [vmem:[#allocation2 + $0x108] sm:$0xff] }
 0x31b   : > { %v15505_v50 = vpop.f32.mrb[107].mxu0  ;;  %6497 = vmatmul.mubr.bf16.gmra.mrb[128].mxu1 %v20588_v38 }
 0x31c   : > { %v20653_v61 = vadd.f32 %v20622_v2, %v15503_v39  ;;  %v15506_v13 = vadd.f32 %v15505_v50, %v15504_v51  ;;  %6504 = vmatprep.mubr.bf16.mxu1 %v6254_v57  ;;  %15898 = vmatpush3.bf16.msra.mxu1 %v18450_v29  ;;  %v18461_v2 = vld [vmem:[#allocation8 + $0x4f8] sm:$0xff]   ;;  %v20692_v57 = vld [vmem:[#allocation2 + $0x28] sm:$0xff] }
 0x31d   : > { %15899 = vmatprep.subr.bf16.mxu1 %v18451_v27  ;;  %v18479_v39 = vld [vmem:[#allocation8 + $0x558] sm:$0xff]  }
 0x31e   : > { %v20656_v22 = vadd.f32 %v20625_v21, %v15506_v13  ;;  %v20658_v53 = vpop.f32.mrb[32].mxu1  ;;  %v18465_v21 = vld [vmem:[#allocation8 + $0x4b8] sm:$0xff]   ;;  %v18475_v13 = vld [vmem:[#allocation8 + $0x148] sm:$0xff]  }
 0x31f   : > { %v4102_v26 = vpop.f32.mrb[33].mxu1 }
 0x320   : > { %v15507_v11 = vpop.f32.mrb[108].mxu0  ;;  %v20660_v28 = vpop.f32.mrb[34].mxu1  ;;  %15900 = vmatpush3.bf16.msra.mxu1 %v18455_v1 }
 0x321   : > { %v15508_v38 = vpop.f32.mrb[109].mxu0  ;;  %v4105_v62 = vpop.f32.mrb[35].mxu1  ;;  %15901 = vmatprep.subr.bf16.mxu1 %v18456_v42 }
 0x322   : > { %v15509_v9 = vadd.f32 %v15508_v38, %v15507_v11  ;;  %v15510_v3 = vpop.f32.mrb[110].mxu0  ;;  %v18480_v38 = vld [vmem:[#allocation8 + $0x5a0] sm:$0xff]  }
 0x323   : > { %v15511_v32 = vpop.f32.mrb[111].mxu0  ;;  %6505 = vmatmul.mubr.bf16.gmra.mrb[132].mxu1 %v6253_v23 }
 0x324   : > { %v20663_v43 = vadd.f32 %v20629_v0, %v15509_v9  ;;  %v15512_v47 = vadd.f32 %v15511_v32, %v15510_v3  ;;  %15902 = vmatpush3.bf16.msra.mxu1 %v18460_v37  ;;  %6822 = vmatprep.mubr.bf16.mxu1 %v6587_v48  ;;  %v20705_v3 = vld [vmem:[#allocation2 + $0x120] sm:$0xff] }
 0x325   : > { %15903 = vmatprep.subr.bf16.mxu1 %v18461_v2  ;;  %v18482_v48 = vld [vmem:[#allocation8 + $0x560] sm:$0xff]  }
 0x326   : > { %v20666_v31 = vadd.f32 %v20633_v16, %v15512_v47  ;;  %v20668_v58 = vpop.f32.mrb[36].mxu1  ;;  %v6586_v16 = vld [vmem:[#allocation2 + $0xf0] sm:$0xff]  ;;  %v19019_v32 = vld [vmem:[#allocation8 + $0x140] sm:$0xff]  }
 0x327   : > { %v20670_v36 = vpop.f32.mrb[37].mxu1 }
 0x328   : > { %v15541_v18 = vpop.f32.mrb[112].mxu0  ;;  %v20672_v4 = vpop.f32.mrb[38].mxu1  ;;  %15904 = vmatpush3.bf16.msra.mxu1 %v18465_v21  ;;  %v18483_v21 = vld [vmem:[#allocation8 + $0x5a8] sm:$0xff]  }
 0x329   : > { %v15542_v63 = vpop.f32.mrb[113].mxu0  ;;  %v20674_v0 = vpop.f32.mrb[39].mxu1  ;;  %15941 = vmatprep.subr.bf16.mxu1 %v18466_v25 }
 0x32a   : > { %v15543_v52 = vadd.f32 %v15542_v63, %v15541_v18  ;;  %v15544_v35 = vpop.f32.mrb[114].mxu0  ;;  %v6929_v18 = vld [vmem:[#allocation2 + $0xf8] sm:$0xf0] }
 0x32b   : > { %v15545_v14 = vpop.f32.mrb[115].mxu0  ;;  %6823 = vmatmul.mubr.bf16.vlgmr.msra.gmra.mrb[136].mxu1 %v6586_v16 }
 0x32c   : > { %v17555_v6 = vadd.f32 %v20637_v59, %v15543_v52  ;;  %v15546_v15 = vadd.f32 %v15545_v14, %v15544_v35  ;;  %6830 = vmatprep.mubr.bf16.mxu1 %v20676_v45  ;;  %15942 = vmatpush3.bf16.msra.mxu1 %v18470_v34  ;;  %v18477_v59 = vld [vmem:[#allocation8 + $0x598] sm:$0xff]  }
 0x32d   : > { %15943 = vmatprep.subr.bf16.mxu1 %v18471_v46  ;;  %v18485_v46 = vld [vmem:[#allocation8 + $0x568] sm:$0xff]  }
 0x32e   : > { %v17556_v55 = vadd.f32 %v17555_v6, %v4102_v26  ;;  %v17567_v54 = vadd.f32 %v20641_v33, %v15546_v15  ;;  %v20694_v33 = vld [vmem:[#allocation2 + $0x40] sm:$0xff]  ;;  %v18481_v6 = vld [vmem:[#allocation8 + $0x158] sm:$0xff]   ;;  %v7010_v15 = vrot.slane %v20676_v45, 4 }
 0x32f   : > { %v4604_v23 = vrot.slane %v20694_v33, 4 }
 0x330   : > { %v4148_v41 = vadd.f32 %v17556_v55, %v20681_v40  ;;  %v17568_v20 = vadd.f32 %v17567_v54, %v4105_v62  ;;  %v15547_v17 = vpop.f32.mrb[116].mxu0  ;;  %15944 = vmatpush3.bf16.msra.mxu1 %v18473_v44  ;;  %v4598_v62 = vrot.slane %v20692_v57, 4  ;;  %v20714_v44 = vld [vmem:[#allocation2 + $0xf0] sm:$0xf0] }
 0x331   : > { %v15548_v10 = vpop.f32.mrb[117].mxu0  ;;  %15945 = vmatprep.subr.bf16.mxu1 %v18474_v8 }
 0x332   : > { %v4149_v49 = vadd.f32 %v17568_v20, %v20681_v40  ;;  %v15549_v12 = vadd.f32 %v15548_v10, %v15547_v17  ;;  %v15550_v29 = vpop.f32.mrb[118].mxu0  ;;  %v4156_v51 = vmax.f32 %v4148_v41, 0.0  ;;  %v18486_v41 = vld [vmem:[#allocation8 + $0x5b0] sm:$0xff]   ;;  %v7009_v17 = vrot.slane %v6929_v18, 4 }
 0x333   : > { %v15551_v27 = vpop.f32.mrb[119].mxu0  ;;  %6831 = vmatmul.mubr.bf16.gmra.mrb[140].mxu1 %v20690_v19 }
 0x334   : > { %v4157_v1 = vmax.f32 %v4149_v49, 0.0  ;;  %v17549_v50 = vadd.f32 %v20645_v5, %v15549_v12  ;;  %v15552_v42 = vadd.f32 %v15551_v27, %v15550_v29  ;;  %6838 = vmatprep.mubr.bf16.mxu1 %v20687_v30  ;;  %15946 = vmatpush3.bf16.msra.mxu1 %v18476_v24  ;;  %v20723_v29 = vld [vmem:[#allocation2 + $0x138] sm:$0xff] }
 0x335   : > { %15947 = vmatprep.subr.bf16.mxu1 %v18477_v59 }
 0x336   : > { %v4164_v26 = vpack.c.bf16 %v4157_v1, %v4156_v51  ;;  %v17550_v11 = vadd.f32 %v17549_v50, %v20658_v53  ;;  %v17561_v37 = vadd.f32 %v20649_v56, %v15552_v42  ;;  %v20708_v56 = vld [vmem:[#allocation2 + $0x140] sm:$0xff]  ;;  %v7006_v51 = vrot.slane %v20714_v44, 4  ;;  %v18490_v44 = vld [vmem:[#allocation8 + $0x170] sm:$0xff]  }
 0x337   : > { %v18484_v50 = vld [vmem:[#allocation8 + $0x160] sm:$0xff]  }
 0x338   : > { %v17562_v2 = vadd.f32 %v17561_v37, %v20660_v28  ;;  %v15553_v9 = vpop.f32.mrb[120].mxu0  ;;  %4309 = vmatmul.mubr.bf16.vlgmr.msra.gmra.mrb[128].mxu0 %v4164_v26  ;;  %15948 = vmatpush3.bf16.msra.mxu1 %v18479_v39  ;;  %v4150_v5 = vadd.f32 %v17550_v11, %v20681_v40  ;;  %v18478_v28 = vld [vmem:[#allocation8 + $0x150] sm:$0xff]   ;;  %v18489_v39 = vld [vmem:[#allocation8 + $0x5b8] sm:$0xff]   ;;  %v7011_v11 = vsel %vm22151_vm1, %v7009_v17, %v7010_v15  ;;  %vm22166_vm1 = vmmov %vm22122_vm0 }
 0x339   : > { %16970 = vmatpush3.bf16.msra.mxu0 %v19019_v32  ;;  %v15554_v53 = vpop.f32.mrb[121].mxu0  ;;  %4318 = vmatprep.mubr.bf16.mxu0 %v22138_v7  ;;  %v18491_v37 = vld [vmem:[#allocation8 + $0x578] sm:$0xff]   ;;  %v7007_v32 = vrot.slane %v20690_v19, 4 }
 0x33a   : > { %v15555_v47 = vadd.f32 %v15554_v53, %v15553_v9  ;;  %v15556_v25 = vpop.f32.mrb[122].mxu0  ;;  %16971 = vmatprep.subr.bf16.mxu0 %v18475_v13  ;;  %v4151_v34 = vadd.f32 %v17562_v2, %v20681_v40  ;;  %15949 = vmatprep.subr.bf16.mxu1 %v18480_v38  ;;  %v4158_v16 = vmax.f32 %v4150_v5, 0.0  ;;  %v20736_v53 = vld [vmem:[#allocation2 + $0x58] sm:$0xff] }
 0x33b   : > { %v15557_v63 = vpop.f32.mrb[123].mxu0  ;;  %6839 = vmatmul.mubr.bf16.gmra.mrb[144].mxu1 %v20705_v3 }
 0x33c   : > { %v17579_v52 = vadd.f32 %v20653_v61, %v15555_v47  ;;  %v15558_v35 = vadd.f32 %v15557_v63, %v15556_v25  ;;  %v4159_v14 = vmax.f32 %v4151_v34, 0.0  ;;  %6846 = vmatprep.mubr.bf16.mxu1 %v20708_v56  ;;  %15950 = vmatpush3.bf16.msra.mxu1 %v18482_v48  ;;  %v18487_v48 = vld [vmem:[#allocation8 + $0x168] sm:$0xff]   ;;  %v18492_v34 = vld [vmem:[#allocation8 + $0x640] sm:$0xff]   ;;  %v7017_v63 = vrot.slane %v20687_v30, 4 }
 0x33d   : > { %16972 = vmatpush3.bf16.msra.mxu0 %v18475_v13  ;;  %15951 = vmatprep.subr.bf16.mxu1 %v18483_v21 }
 0x33e   : > { %v17580_v8 = vadd.f32 %v17579_v52, %v20670_v36  ;;  %v17591_v55 = vadd.f32 %v20656_v22, %v15558_v35  ;;  %16973 = vmatprep.subr.bf16.mxu0 %v18478_v28  ;;  %v4165_v54 = vpack.c.bf16 %v4159_v14, %v4158_v16  ;;  %v15593_v61 = vpop.f32.mrb[40].mxu1  ;;  %v18488_v36 = vld [vmem:[#allocation8 + $0x570] sm:$0xff]   ;;  %v18495_v14 = vld [vmem:[#allocation8 + $0x648] sm:$0xff]  }
 0x33f   : > { %v15594_v20 = vpop.f32.mrb[41].mxu1 }
 0x340   : > { %v17592_v24 = vadd.f32 %v17591_v55, %v20674_v0  ;;  %v15559_v10 = vpop.f32.mrb[124].mxu0  ;;  %4319 = vmatmul.mubr.bf16.gmra.mrb[132].mxu0 %v4165_v54  ;;  %v20720_v59 = vadd.f32 %v15594_v20, %v15593_v61  ;;  %v15596_v49 = vpop.f32.mrb[42].mxu1  ;;  %15952 = vmatpush3.bf16.msra.mxu1 %v18485_v46  ;;  %v4152_v12 = vadd.f32 %v17580_v8, %v20681_v40  ;;  %v4610_v55 = vrot.slane %v20736_v53, 4 }
 0x341   : > { %16974 = vmatpush3.bf16.msra.mxu0 %v18478_v28  ;;  %v15560_v22 = vpop.f32.mrb[125].mxu0  ;;  %4328 = vmatprep.mubr.bf16.mxu0 %v22138_v7  ;;  %v15597_v27 = vpop.f32.mrb[43].mxu1  ;;  %v7018_v61 = vsel %vm22153_vm15, %v7010_v15, %v7017_v63  ;;  %vm22168_vm15 = vmmov %vm22122_vm0 }
 0x342   : > { %v15561_v0 = vadd.f32 %v15560_v22, %v15559_v10  ;;  %v15562_v1 = vpop.f32.mrb[126].mxu0  ;;  %16975 = vmatprep.subr.bf16.mxu0 %v18481_v6  ;;  %v4153_v42 = vadd.f32 %v17592_v24, %v20681_v40  ;;  %v20728_v13 = vadd.f32 %v15597_v27, %v15596_v49  ;;  %15953 = vmatprep.subr.bf16.mxu1 %v18486_v41  ;;  %v4160_v9 = vmax.f32 %v4152_v12, 0.0  ;;  %v18497_v41 = vld [vmem:[#allocation8 + $0x608] sm:$0xff]   ;;  %v18498_v12 = vld [vmem:[#allocation8 + $0x650] sm:$0xff]  }
 0x343   : > { %v15563_v26 = vpop.f32.mrb[127].mxu0  ;;  %6847 = vmatmul.mubr.bf16.gmra.mrb[148].mxu1 %v20723_v29  ;;  %v7015_v24 = vrot.slane %v20705_v3, 4  ;;  %v7023_v22 = vrot.slane %v20708_v56, 4  ;;  %v20756_v27 = vld [vmem:[#allocation2 + $0x70] sm:$0xf] }
 0x344   : > { %v17573_v38 = vadd.f32 %v20663_v43, %v15561_v0  ;;  %v15564_v2 = vadd.f32 %v15563_v26, %v15562_v1  ;;  %v4161_v5 = vmax.f32 %v4153_v42, 0.0  ;;  %15954 = vmatpush3.bf16.msra.mxu1 %v18488_v36  ;;  %7221 = vmatprep.mubr.bf16.mxu1 %v7011_v11  ;;  %v4523_v43 = vld [vmem:[#allocation2 + $0x10] sm:$0xf0]  ;;  %v18496_v0 = vld [vmem:[#allocation8 + $0x80] sm:$0xff]   ;;  %v18501_v42 = vld [vmem:[#allocation8 + $0x658] sm:$0xff]  }
 0x345   : > { %16976 = vmatpush3.bf16.msra.mxu0 %v18481_v6  ;;  %15955 = vmatprep.subr.bf16.mxu1 %v18489_v39  ;;  %v4597_v54 = vrot.slane %v4523_v43, 4  ;;  %v18500_v1 = vld [vmem:[#allocation8 + $0x610] sm:$0xff]   ;;  %v7016_v11 = vsel %vm22154_vm6, %v7007_v32, %v7015_v24  ;;  %v4611_v43 = vsel %vm22157_vm10, %v4604_v23, %v4610_v55  ;;  %vm22169_vm6 = vmmov %vm22122_vm0 }
 0x346   : > { %v17574_v21 = vadd.f32 %v17573_v38, %v20668_v58  ;;  %v17585_v47 = vadd.f32 %v20666_v31, %v15564_v2  ;;  %16977 = vmatprep.subr.bf16.mxu0 %v18484_v50  ;;  %v4166_v25 = vpack.c.bf16 %v4161_v5, %v4160_v9  ;;  %v15599_v28 = vpop.f32.mrb[44].mxu1  ;;  %v18494_v58 = vld [vmem:[#allocation8 + $0x600] sm:$0xff]   ;;  %v7024_v38 = vsel %vm22155_vm5, %v7017_v63, %v7023_v22  ;;  %v18503_v2 = vld [vmem:[#allocation8 + $0x618] sm:$0xff]   ;;  %v18499_v5 = vld [vmem:[#allocation8 + $0x88] sm:$0xff]  }
 0x347   : > { %v15600_v18 = vpop.f32.mrb[45].mxu1  ;;  %v4599_v15 = vsel %vm22122_vm0, %v4597_v54, %v4598_v62  ;;  %v4616_v9 = vrot.slane %v20756_v27, 4  ;;  %v18502_v63 = vld [vmem:[#allocation8 + $0x90] sm:$0xff]   ;;  %v18515_v27 = vld [vmem:[#allocation8 + $0x638] sm:$0xff]   ;;  %vm22170_vm5 = vmmov %vm22122_vm0 }
 0x348   : > { %v17586_v46 = vadd.f32 %v17585_v47, %v20672_v4  ;;  %4329 = vmatmul.mubr.bf16.gmra.mrb[136].mxu0 %v4166_v25  ;;  %v20742_v52 = vadd.f32 %v15600_v18, %v15599_v28  ;;  %v15602_v35 = vpop.f32.mrb[46].mxu1  ;;  %15956 = vmatpush3.bf16.msra.mxu1 %v18491_v37  ;;  %v4154_v16 = vadd.f32 %v17574_v21, %v20681_v40  ;;  %v6941_v37 = vld [vmem:[#allocation2 + $0x158] sm:$0xf]  ;;  %v18504_v47 = vld [vmem:[#allocation8 + $0x660] sm:$0xff]   ;;  %v18510_v54 = vld [vmem:[#allocation8 + $0x670] sm:$0xff]  }
 0x349   : > { %16978 = vmatpush3.bf16.msra.mxu0 %v18484_v50  ;;  %4338 = vmatprep.mubr.bf16.mxu0 %v22138_v7  ;;  %v15603_v31 = vpop.f32.mrb[47].mxu1  ;;  %v7008_v4 = vsel %vm22152_vm3, %v7006_v51, %v7007_v32  ;;  %v4605_v32 = vsel %vm22156_vm8, %v4598_v62, %v4604_v23  ;;  %v7029_v28 = vrot.slane %v6941_v37, 4  ;;  %v18507_v62 = vld [vmem:[#allocation8 + $0x668] sm:$0xff]   ;;  %vm22167_vm3 = vmmov %vm22122_vm0 }
 0x34a   : > { %16979 = vmatprep.subr.bf16.mxu0 %v18487_v48  ;;  %v4155_v6 = vadd.f32 %v17586_v46, %v20681_v40  ;;  %v20747_v8 = vadd.f32 %v15603_v31, %v15602_v35  ;;  %15993 = vmatprep.subr.bf16.mxu1 %v18492_v34  ;;  %v4162_v20 = vmax.f32 %v4154_v16, 0.0  ;;  %v18493_v40 = vld [vmem:[#allocation8 + $0x178] sm:$0xff]   ;;  %v18506_v46 = vld [vmem:[#allocation8 + $0x620] sm:$0xff]   ;;  %v6940_v35 = vld [vmem:[#allocation2 + $0x150] sm:$0xf] }
 0x34b   : > { %7222 = vmatmul.mubr.bf16.vlgmr.msra.gmra.mrb[152].mxu1 %v7008_v4  ;;  %v7030_v23 = vsel %vm22159_vm12, %v7023_v22, %v7029_v28  ;;  %vm22171_vm8 = vmmov %vm22122_vm0 }
 0x34c   : > { %v4163_v17 = vmax.f32 %v4155_v6, 0.0  ;;  %7229 = vmatprep.mubr.bf16.mxu1 %v7018_v61  ;;  %15994 = vmatpush3.bf16.msra.mxu1 %v18494_v58  ;;  %v7027_v6 = vrot.slane %v6940_v35, 4  ;;  %v4617_v61 = vsel %vm22160_vm2, %v4610_v55, %v4616_v9  ;;  %vm22172_vm10 = vmmov %vm22122_vm0 }
 0x34d   : > { %16980 = vmatpush3.bf16.msra.mxu0 %v18487_v48  ;;  %15995 = vmatprep.subr.bf16.mxu1 %v18495_v14  ;;  %v7021_v48 = vrot.slane %v20723_v29, 4  ;;  %v18509_v14 = vld [vmem:[#allocation8 + $0x628] sm:$0xff]   ;;  %vm22174_vm12 = vmmov %vm22122_vm0 }
 0x34e   : > { %16981 = vmatprep.subr.bf16.mxu0 %v18490_v44  ;;  %v4167_v10 = vpack.c.bf16 %v4163_v17, %v4162_v20  ;;  %v15605_v49 = vpop.f32.mrb[48].mxu1  ;;  %vm22175_vm2 = vmmov %vm22122_vm0 }
 0x34f   : > { %v15606_v36 = vpop.f32.mrb[49].mxu1  ;;  %v7022_v31 = vsel %vm22158_vm4, %v7015_v24, %v7021_v48  ;;  %v18508_v24 = vld [vmem:[#allocation8 + $0xa0] sm:$0xff]   ;;  %v7028_v22 = vsel %vm22161_vm11, %v7021_v48, %v7027_v6  ;;  %vm22173_vm4 = vmmov %vm22122_vm0 }
 0x350   : > { %4339 = vmatmul.mubr.bf16.gmra.mrb[140].mxu0 %v4167_v10  ;;  %v20761_v39 = vadd.f32 %v15606_v36, %v15605_v49  ;;  %v15608_v51 = vpop.f32.mrb[50].mxu1  ;;  %15996 = vmatpush3.bf16.msra.mxu1 %v18497_v41  ;;  %v4463_v41 = vld [vmem:[#allocation2 + $0x10] sm:$0xff]  ;;  %vm22176_vm11 = vmmov %vm22122_vm0 }
 0x351   : > { %16982 = vmatpush3.bf16.msra.mxu0 %v18490_v44  ;;  %16985 = vmatprep.mubr.bf16.mxu0 %v4599_v15  ;;  %v15609_v50 = vpop.f32.mrb[51].mxu1  ;;  %v18505_v44 = vld [vmem:[#allocation8 + $0x98] sm:$0xff]   ;;  %v18512_v10 = vld [vmem:[#allocation8 + $0x630] sm:$0xff]  }
 0x352   : > { %16983 = vmatprep.subr.bf16.mxu0 %v18493_v40  ;;  %v20763_v26 = vadd.f32 %v15609_v50, %v15608_v51  ;;  %15997 = vmatprep.subr.bf16.mxu1 %v18498_v12  ;;  %v18513_v12 = vld [vmem:[#allocation8 + $0x678] sm:$0xff]   ;;  %v18511_v51 = vld [vmem:[#allocation8 + $0xa8] sm:$0xff]  }
 0x353   : > { %7230 = vmatmul.mubr.bf16.gmra.mrb[156].mxu1 %v7016_v11  ;;  %v18514_v11 = vld [vmem:[#allocation8 + $0xb0] sm:$0xff]  }
 0x354   : > { %7237 = vmatprep.mubr.bf16.mxu1 %v7024_v38  ;;  %15998 = vmatpush3.bf16.msra.mxu1 %v18500_v1 }
 0x355   : > { %16984 = vmatpush3.bf16.msra.mxu0 %v18493_v40  ;;  %15999 = vmatprep.subr.bf16.mxu1 %v18501_v42 }
 0x356   : > { %16993 = vmatprep.subr.bf16.mxu0 %v18496_v0  ;;  %v15611_v21 = vpop.f32.mrb[52].mxu1 }
 0x357   : > { %v15612_v25 = vpop.f32.mrb[53].mxu1 }
 0x358   : > { %16986 = vmatmul.mubr.bf16.vlgmr.msra.gmra.mrb[144].mxu0 %v4605_v32  ;;  %v20779_v34 = vadd.f32 %v15612_v25, %v15611_v21  ;;  %v15614_v18 = vpop.f32.mrb[54].mxu1  ;;  %16000 = vmatpush3.bf16.msra.mxu1 %v18503_v2  ;;  %v18517_v21 = vld [vmem:[#allocation8 + $0x200] sm:$0xff]  }
 0x359   : > { %16994 = vmatpush3.bf16.msra.mxu0 %v18496_v0  ;;  %16989 = vmatprep.mubr.bf16.mxu0 %v4611_v43  ;;  %v15615_v16 = vpop.f32.mrb[55].mxu1 }
 0x35a   : > { %16995 = vmatprep.subr.bf16.mxu0 %v18499_v5  ;;  %v20781_v58 = vadd.f32 %v15615_v16, %v15614_v18  ;;  %16001 = vmatprep.subr.bf16.mxu1 %v18504_v47 }
 0x35b   : > { %7238 = vmatmul.mubr.bf16.gmra.mrb[160].mxu1 %v7022_v31  ;;  %v7327_v31 = vld [vmem:[#allocation2 + $0x150] sm:$0xff] }
 0x35c   : > { %7245 = vmatprep.mubr.bf16.mxu1 %v7030_v23  ;;  %16002 = vmatpush3.bf16.msra.mxu1 %v18506_v46  ;;  %v18520_v46 = vld [vmem:[#allocation8 + $0x218] sm:$0xff]  }
 0x35d   : > { %16996 = vmatpush3.bf16.msra.mxu0 %v18499_v5  ;;  %16003 = vmatprep.subr.bf16.mxu1 %v18507_v62 }
 0x35e   : > { %16997 = vmatprep.subr.bf16.mxu0 %v18502_v63  ;;  %v15645_v4 = vpop.f32.mrb[56].mxu1 }
 0x35f   : > { %v15646_v20 = vpop.f32.mrb[57].mxu1 }
 0x360   : > { %16990 = vmatmul.mubr.bf16.gmra.mrb[148].mxu0 %v4617_v61  ;;  %v15647_v17 = vadd.f32 %v15646_v20, %v15645_v4  ;;  %v15648_v40 = vpop.f32.mrb[58].mxu1  ;;  %16004 = vmatpush3.bf16.msra.mxu1 %v18509_v14  ;;  %v18523_v20 = vld [vmem:[#allocation8 + $0x230] sm:$0xff]  }
 0x361   : > { %16998 = vmatpush3.bf16.msra.mxu0 %v18502_v63  ;;  %17009 = vmatprep.mubr.bf16.mxu0 %v4463_v41  ;;  %v15649_v49 = vpop.f32.mrb[59].mxu1 }
 0x362   : > { %16999 = vmatprep.subr.bf16.mxu0 %v18505_v44  ;;  %v15650_v36 = vadd.f32 %v15649_v49, %v15648_v40  ;;  %16005 = vmatprep.subr.bf16.mxu1 %v18510_v54  ;;  %v20790_v55 = vadd.f32 %v15647_v17, %v20720_v59 }
 0x363   : > { %7246 = vmatmul.mubr.bf16.gmra.mrb[164].mxu1 %v7028_v22  ;;  %v18525_v22 = vld [vmem:[#allocation8 + $0x2c0] sm:$0xff]  }
 0x364   : > { %16006 = vmatpush3.bf16.msra.mxu1 %v18512_v10  ;;  %7554 = vmatprep.mubr.bf16.mxu1 %v20676_v45  ;;  %v20794_v15 = vadd.f32 %v15650_v36, %v20728_v13  ;;  %v18516_v13 = vld [vmem:[#allocation8 + $0xb8] sm:$0xff]  }
 0x365   : > { %17000 = vmatpush3.bf16.msra.mxu0 %v18505_v44  ;;  %16007 = vmatprep.subr.bf16.mxu1 %v18513_v12  ;;  %v18522_v44 = vld [vmem:[#allocation8 + $0x228] sm:$0xff]  }
 0x366   : > { %17001 = vmatprep.subr.bf16.mxu0 %v18508_v24  ;;  %v15651_v0 = vpop.f32.mrb[60].mxu1 }
 0x367   : > { %v15652_v1 = vpop.f32.mrb[61].mxu1 }
 0x368   : > { %v15653_v50 = vadd.f32 %v15652_v1, %v15651_v0  ;;  %v15654_v42 = vpop.f32.mrb[62].mxu1  ;;  %16008 = vmatpush3.bf16.msra.mxu1 %v18515_v27  ;;  %v18526_v0 = vld [vmem:[#allocation8 + $0x2c8] sm:$0xff]  }
 0x369   : > { %17002 = vmatpush3.bf16.msra.mxu0 %v18508_v24  ;;  %v15655_v59 = vpop.f32.mrb[63].mxu1  ;;  %v18524_v24 = vld [vmem:[#allocation8 + $0x238] sm:$0xff]  }
 0x36a   : > { %17003 = vmatprep.subr.bf16.mxu0 %v18511_v51  ;;  %v15656_v37 = vadd.f32 %v15655_v59, %v15654_v42  ;;  %v20797_v38 = vadd.f32 %v15653_v50, %v20742_v52  ;;  %v19020_v42 = vld [vmem:[#allocation2 + $0x40] sm:$0xff] }
 0x36b   : > { %7555 = vmatmul.mubr.bf16.vlgmr.msra.gmra.mrb[168].mxu1 %v20690_v19 }
 0x36c   : > { %7562 = vmatprep.mubr.bf16.mxu1 %v20687_v30  ;;  %v20802_v45 = vadd.f32 %v15656_v37, %v20747_v8  ;;  %v18518_v8 = vld [vmem:[#allocation8 + $0x208] sm:$0xff]   ;;  %v18527_v37 = vld [vmem:[#allocation8 + $0x2d0] sm:$0xff]  }
 0x36d   : > { %17004 = vmatpush3.bf16.msra.mxu0 %v18511_v51 }
 0x36e   : > { %17005 = vmatprep.subr.bf16.mxu0 %v18514_v11  ;;  %v15657_v2 = vpop.f32.mrb[64].mxu1 }
 0x36f   : > { %v15658_v9 = vpop.f32.mrb[65].mxu1 }
 0x370   : > { %v15659_v5 = vadd.f32 %v15658_v9, %v15657_v2  ;;  %v15660_v48 = vpop.f32.mrb[66].mxu1  ;;  %v18528_v9 = vld [vmem:[#allocation8 + $0x2d8] sm:$0xff]  }
 0x371   : > { %17006 = vmatpush3.bf16.msra.mxu0 %v18514_v11  ;;  %v15661_v47 = vpop.f32.mrb[67].mxu1 }
 0x372   : > { %17007 = vmatprep.subr.bf16.mxu0 %v18516_v13  ;;  %v20805_v52 = vadd.f32 %v15659_v5, %v20761_v39  ;;  %v15662_v19 = vadd.f32 %v15661_v47, %v15660_v48  ;;  %v18519_v39 = vld [vmem:[#allocation8 + $0x210] sm:$0xff]   ;;  %v5514_v47 = vld [vmem:[#allocation2 + $0x88] sm:$0xff] }
 0x373   : > { %7563 = vmatmul.mubr.bf16.gmra.mrb[172].mxu1 %v20705_v3  ;;  %v7328_v3 = vld [vmem:[#allocation2 + $0x158] sm:$0xff]  ;;  %v5180_v48 = vld [vmem:[#allocation2 + $0x70] sm:$0xff] }
 0x374   : > { %v20809_v30 = vadd.f32 %v15662_v19, %v20763_v26  ;;  %7570 = vmatprep.mubr.bf16.mxu1 %v20708_v56 }
 0x375   : > { %17008 = vmatpush3.bf16.msra.mxu0 %v18516_v13 }
 0x376   : > { %17017 = vmatprep.subr.bf16.mxu0 %v18517_v21  ;;  %v15663_v32 = vpop.f32.mrb[68].mxu1 }
 0x377   : > { %v15664_v25 = vpop.f32.mrb[69].mxu1 }
 0x378   : > { %17010 = vmatmul.mubr.bf16.vlgmr.msra.gmra.mrb[144].mxu0 %v20692_v57  ;;  %v15665_v28 = vadd.f32 %v15664_v25, %v15663_v32  ;;  %v15666_v43 = vpop.f32.mrb[70].mxu1 }
 0x379   : > { %17013 = vmatprep.mubr.bf16.mxu0 %v20694_v33  ;;  %17018 = vmatpush3.bf16.msra.mxu0 %v18517_v21  ;;  %v15667_v18 = vpop.f32.mrb[71].mxu1 }
 0x37a   : > { %17019 = vmatprep.subr.bf16.mxu0 %v18518_v8  ;;  %v20815_v26 = vadd.f32 %v15665_v28, %v20779_v34  ;;  %v15668_v56 = vadd.f32 %v15667_v18, %v15666_v43  ;;  %v18521_v34 = vld [vmem:[#allocation8 + $0x220] sm:$0xff]   ;;  %v18530_v28 = vld [vmem:[#allocation8 + $0x2e8] sm:$0xff]  }
 0x37b   : > { %7571 = vmatmul.mubr.bf16.gmra.mrb[176].mxu1 %v20723_v29 }
 0x37c   : > { %v20819_v63 = vadd.f32 %v15668_v56, %v20781_v58  ;;  %7578 = vmatprep.mubr.bf16.mxu1 %v7328_v3 }
 0x37d   : > { %17020 = vmatpush3.bf16.msra.mxu0 %v18518_v8  ;;  %v18529_v8 = vld [vmem:[#allocation8 + $0x2e0] sm:$0xff]  }
 0x37e   : > { %17021 = vmatprep.subr.bf16.mxu0 %v18519_v39  ;;  %v15697_v35 = vpop.f32.mrb[72].mxu1 }
 0x37f   : > { %v15698_v33 = vpop.f32.mrb[73].mxu1 }
 0x380   : > { %17014 = vmatmul.mubr.bf16.gmra.mrb[148].mxu0 %v20736_v53  ;;  %v15699_v16 = vadd.f32 %v15698_v33, %v15697_v35  ;;  %v15700_v62 = vpop.f32.mrb[74].mxu1  ;;  %v18532_v33 = vld [vmem:[#allocation8 + $0x2f8] sm:$0xff]  }
 0x381   : > { %17022 = vmatpush3.bf16.msra.mxu0 %v18519_v39  ;;  %17033 = vmatprep.mubr.bf16.mxu0 %v20692_v57  ;;  %v15701_v23 = vpop.f32.mrb[75].mxu1 }
 0x382   : > { %17023 = vmatprep.subr.bf16.mxu0 %v18520_v46  ;;  %v20824_v29 = vadd.f32 %v20790_v55, %v15699_v16  ;;  %v15702_v58 = vadd.f32 %v15701_v23, %v15700_v62  ;;  %v18533_v23 = vld [vmem:[#allocation8 + $0x380] sm:$0xff]  }
 0x383   : > { %7579 = vmatmul.mubr.bf16.gmra.mrb[180].mxu1 %v7327_v31 }
 0x384   : > { %v20827_v14 = vadd.f32 %v20794_v15, %v15702_v58  ;;  %7827 = vmatprep.mubr.bf16.mxu1 %v22138_v7 }
 0x385   : > { %17024 = vmatpush3.bf16.msra.mxu0 %v18520_v46 }
 0x386   : > { %17025 = vmatprep.subr.bf16.mxu0 %v18521_v34  ;;  %v15703_v6 = vpop.f32.mrb[76].mxu1 }
 0x387   : > { %v15704_v4 = vpop.f32.mrb[77].mxu1 }
 0x388   : > { %v15705_v54 = vadd.f32 %v15704_v4, %v15703_v6  ;;  %v15706_v57 = vpop.f32.mrb[78].mxu1  ;;  %v18534_v6 = vld [vmem:[#allocation8 + $0x388] sm:$0xff]  }
 0x389   : > { %17026 = vmatpush3.bf16.msra.mxu0 %v18521_v34  ;;  %v15707_v61 = vpop.f32.mrb[79].mxu1 }
 0x38a   : > { %17027 = vmatprep.subr.bf16.mxu0 %v18522_v44  ;;  %v20831_v41 = vadd.f32 %v20797_v38, %v15705_v54  ;;  %v15708_v17 = vadd.f32 %v15707_v61, %v15706_v57  ;;  %v20867_v54 = vld [vmem:[#allocation2 + $0xa0] sm:$0xff]  ;;  %v5856_v61 = vld [vmem:[#allocation2 + $0x88] sm:$0xf0] }
 0x38c   : > { %v20834_v40 = vadd.f32 %v20802_v45, %v15708_v17 }
 0x38d   : > { %17028 = vmatpush3.bf16.msra.mxu0 %v18522_v44 }
 0x38e   : > { %17029 = vmatprep.subr.bf16.mxu0 %v18523_v20  ;;  %v15709_v10 = vpop.f32.mrb[80].mxu1 }
 0x38f   : > { %v15710_v49 = vpop.f32.mrb[81].mxu1 }
 0x390   : > { %v15711_v12 = vadd.f32 %v15710_v49, %v15709_v10  ;;  %v15712_v36 = vpop.f32.mrb[82].mxu1 }
 0x391   : > { %17030 = vmatpush3.bf16.msra.mxu0 %v18523_v20  ;;  %v15713_v27 = vpop.f32.mrb[83].mxu1 }
 0x392   : > { %17031 = vmatprep.subr.bf16.mxu0 %v18524_v24  ;;  %v20837_v55 = vadd.f32 %v20805_v52, %v15711_v12  ;;  %v15714_v15 = vadd.f32 %v15713_v27, %v15712_v36  ;;  %v5938_v36 = vrot.slane %v5856_v61, 4  ;;  %v18536_v27 = vld [vmem:[#allocation8 + $0x398] sm:$0xff]  }
 0x394   : > { %v20840_v51 = vadd.f32 %v20809_v30, %v15714_v15  ;;  %v20880_v15 = vld [vmem:[#allocation2 + $0xd0] sm:$0xff] }
 0x395   : > { %17032 = vmatpush3.bf16.msra.mxu0 %v18524_v24 }
 0x396   : > { %17041 = vmatprep.subr.bf16.mxu0 %v18525_v22  ;;  %v15715_v1 = vpop.f32.mrb[84].mxu1 }
 0x397   : > { %v15716_v50 = vpop.f32.mrb[85].mxu1 }
 0x398   : > { %17034 = vmatmul.mubr.bf16.vlgmr.msra.gmra.mrb[144].mxu0 %v19020_v42  ;;  %v15717_v11 = vadd.f32 %v15716_v50, %v15715_v1  ;;  %v15718_v59 = vpop.f32.mrb[86].mxu1 }
 0x399   : > { %17037 = vmatprep.mubr.bf16.mxu0 %v20736_v53  ;;  %17042 = vmatpush3.bf16.msra.mxu0 %v18525_v22  ;;  %v15719_v38 = vpop.f32.mrb[87].mxu1  ;;  %v5939_v22 = vrot.slane %v20867_v54, 4 }
 0x39a   : > { %17043 = vmatprep.subr.bf16.mxu0 %v18526_v0  ;;  %v20844_v45 = vadd.f32 %v20815_v26, %v15717_v11  ;;  %v15720_v13 = vadd.f32 %v15719_v38, %v15718_v59  ;;  %v18531_v26 = vld [vmem:[#allocation8 + $0x2f0] sm:$0xff]   ;;  %v18537_v59 = vld [vmem:[#allocation8 + $0x3a0] sm:$0xff]  }
 0x39c   : > { %v20847_v2 = vadd.f32 %v20819_v63, %v15720_v13 }
 0x39d   : > { %17044 = vmatpush3.bf16.msra.mxu0 %v18526_v0  ;;  %v5940_v0 = vsel %vm22162_vm9, %v5938_v36, %v5939_v22  ;;  %vm22177_vm9 = vmmov %vm22122_vm0 }
 0x39e   : > { %17045 = vmatprep.subr.bf16.mxu0 %v18527_v37  ;;  %v15749_v5 = vpop.f32.mrb[88].mxu1 }
 0x39f   : > { %v15750_v21 = vpop.f32.mrb[89].mxu1 }
 0x3a0   : > { %17038 = vmatmul.mubr.bf16.gmra.mrb[148].mxu0 %v5180_v48  ;;  %v15751_v53 = vadd.f32 %v15750_v21, %v15749_v5  ;;  %v15752_v52 = vpop.f32.mrb[90].mxu1 }
 0x3a1   : > { %17046 = vmatpush3.bf16.msra.mxu0 %v18527_v37  ;;  %17057 = vmatprep.mubr.bf16.mxu0 %v5514_v47  ;;  %v15753_v19 = vpop.f32.mrb[91].mxu1  ;;  %v18539_v47 = vld [vmem:[#allocation8 + $0x3b0] sm:$0xff]  }
 0x3a2   : > { %17047 = vmatprep.subr.bf16.mxu0 %v18528_v9  ;;  %v20850_v30 = vadd.f32 %v20824_v29, %v15751_v53  ;;  %v15754_v32 = vadd.f32 %v15753_v19, %v15752_v52  ;;  %v18540_v19 = vld [vmem:[#allocation8 + $0x3b8] sm:$0xff]  }
 0x3a4   : > { %v20853_v25 = vadd.f32 %v20827_v14, %v15754_v32 }
 0x3a5   : > { %17048 = vmatpush3.bf16.msra.mxu0 %v18528_v9 }
 0x3a6   : > { %17049 = vmatprep.subr.bf16.mxu0 %v18529_v8  ;;  %v15755_v43 = vpop.f32.mrb[92].mxu1 }
 0x3a7   : > { %v15756_v39 = vpop.f32.mrb[93].mxu1 }
 0x3a8   : > { %v15757_v18 = vadd.f32 %v15756_v39, %v15755_v43  ;;  %v15758_v3 = vpop.f32.mrb[94].mxu1  ;;  %v18541_v39 = vld [vmem:[#allocation8 + $0x440] sm:$0xff]  }
 0x3a9   : > { %17050 = vmatpush3.bf16.msra.mxu0 %v18529_v8  ;;  %v15759_v56 = vpop.f32.mrb[95].mxu1 }
 0x3aa   : > { %17051 = vmatprep.subr.bf16.mxu0 %v18530_v28  ;;  %v20856_v63 = vadd.f32 %v20831_v41, %v15757_v18  ;;  %v15760_v46 = vadd.f32 %v15759_v56, %v15758_v3  ;;  %v20870_v41 = vld [vmem:[#allocation2 + $0xb8] sm:$0xff]  ;;  %v5951_v56 = vrot.slane %v20880_v15, 4 }
 0x3ab   : > { %v5945_v3 = vrot.slane %v20870_v41, 4 }
 0x3ac   : > { %v20859_v35 = vadd.f32 %v20834_v40, %v15760_v46  ;;  %v18535_v40 = vld [vmem:[#allocation8 + $0x390] sm:$0xff]  }
 0x3ad   : > { %17052 = vmatpush3.bf16.msra.mxu0 %v18530_v28 }
 0x3ae   : > { %17053 = vmatprep.subr.bf16.mxu0 %v18531_v26  ;;  %v15761_v16 = vpop.f32.mrb[96].mxu1 }
 0x3af   : > { %v15762_v62 = vpop.f32.mrb[97].mxu1 }
 0x3b0   : > { %v15763_v31 = vadd.f32 %v15762_v62, %v15761_v16  ;;  %v15764_v34 = vpop.f32.mrb[98].mxu1  ;;  %v5952_v16 = vsel %vm22164_vm14, %v5945_v3, %v5951_v56  ;;  %vm22179_vm14 = vmmov %vm22122_vm0 }
 0x3b1   : > { %17054 = vmatpush3.bf16.msra.mxu0 %v18531_v26  ;;  %v15765_v29 = vpop.f32.mrb[99].mxu1 }
 0x3b2   : > { %17055 = vmatprep.subr.bf16.mxu0 %v18532_v33  ;;  %v20862_v58 = vadd.f32 %v20837_v55, %v15763_v31  ;;  %v15766_v14 = vadd.f32 %v15765_v29, %v15764_v34  ;;  %v5868_v34 = vld [vmem:[#allocation2 + $0xe8] sm:$0xf] }
 0x3b4   : > { %v20865_v44 = vadd.f32 %v20840_v51, %v15766_v14 }
 0x3b5   : > { %17056 = vmatpush3.bf16.msra.mxu0 %v18532_v33 }
 0x3b6   : > { %17065 = vmatprep.subr.bf16.mxu0 %v18533_v23  ;;  %v15767_v4 = vpop.f32.mrb[100].mxu1 }
 0x3b7   : > { %v15768_v57 = vpop.f32.mrb[101].mxu1 }
 0x3b8   : > { %17058 = vmatmul.mubr.bf16.vlgmr.msra.gmra.mrb[144].mxu0 %v20867_v54  ;;  %v15769_v20 = vadd.f32 %v15768_v57, %v15767_v4  ;;  %v15770_v17 = vpop.f32.mrb[102].mxu1  ;;  %v18544_v4 = vld [vmem:[#allocation8 + $0x458] sm:$0xff]  }
 0x3b9   : > { %17061 = vmatprep.mubr.bf16.mxu0 %v20870_v41  ;;  %17066 = vmatpush3.bf16.msra.mxu0 %v18533_v23  ;;  %v15771_v24 = vpop.f32.mrb[103].mxu1 }
 0x3ba   : > { %17067 = vmatprep.subr.bf16.mxu0 %v18534_v6  ;;  %v20874_v10 = vadd.f32 %v20844_v45, %v15769_v20  ;;  %v15772_v49 = vadd.f32 %v15771_v24, %v15770_v17  ;;  %v18538_v45 = vld [vmem:[#allocation8 + $0x3a8] sm:$0xff]  }
 0x3bc   : > { %v20877_v12 = vadd.f32 %v20847_v2, %v15772_v49  ;;  %v18545_v49 = vld [vmem:[#allocation8 + $0x460] sm:$0xff]  }
 0x3bd   : > { %17068 = vmatpush3.bf16.msra.mxu0 %v18534_v6 }
 0x3be   : > { %17069 = vmatprep.subr.bf16.mxu0 %v18535_v40  ;;  %v15801_v55 = vpop.f32.mrb[104].mxu1 }
 0x3bf   : > { %v15802_v51 = vpop.f32.mrb[105].mxu1 }
 0x3c0   : > { %17062 = vmatmul.mubr.bf16.gmra.mrb[148].mxu0 %v20880_v15  ;;  %v15803_v1 = vadd.f32 %v15802_v51, %v15801_v55  ;;  %v15804_v50 = vpop.f32.mrb[106].mxu1 }
 0x3c1   : > { %17070 = vmatpush3.bf16.msra.mxu0 %v18535_v40  ;;  %17081 = vmatprep.mubr.bf16.mxu0 %v5940_v0  ;;  %v15805_v42 = vpop.f32.mrb[107].mxu1 }
 0x3c2   : > { %17071 = vmatprep.subr.bf16.mxu0 %v18536_v27  ;;  %v20885_v11 = vadd.f32 %v20850_v30, %v15803_v1  ;;  %v15806_v37 = vadd.f32 %v15805_v42, %v15804_v50  ;;  %v18547_v50 = vld [vmem:[#allocation8 + $0x470] sm:$0xff]  }
 0x3c4   : > { %v20888_v38 = vadd.f32 %v20853_v25, %v15806_v37 }
 0x3c5   : > { %17072 = vmatpush3.bf16.msra.mxu0 %v18536_v27 }
 0x3c6   : > { %17073 = vmatprep.subr.bf16.mxu0 %v18537_v59  ;;  %v15807_v13 = vpop.f32.mrb[108].mxu1 }
 0x3c7   : > { %v15808_v2 = vpop.f32.mrb[109].mxu1 }
 0x3c8   : > { %v15809_v9 = vadd.f32 %v15808_v2, %v15807_v13  ;;  %v15810_v5 = vpop.f32.mrb[110].mxu1 }
 0x3c9   : > { %17074 = vmatpush3.bf16.msra.mxu0 %v18537_v59  ;;  %v15811_v48 = vpop.f32.mrb[111].mxu1  ;;  %v18548_v59 = vld [vmem:[#allocation8 + $0x478] sm:$0xff]  }
 0x3ca   : > { %17075 = vmatprep.subr.bf16.mxu0 %v18538_v45  ;;  %v20891_v21 = vadd.f32 %v20856_v63, %v15809_v9  ;;  %v15812_v53 = vadd.f32 %v15811_v48, %v15810_v5  ;;  %v18542_v63 = vld [vmem:[#allocation8 + $0x448] sm:$0xff]   ;;  %v18549_v5 = vld [vmem:[#allocation8 + $0x500] sm:$0xff]  }
 0x3cc   : > { %v20894_v52 = vadd.f32 %v20859_v35, %v15812_v53  ;;  %v5946_v35 = vsel %vm22163_vm13, %v5939_v22, %v5945_v3  ;;  %v18546_v22 = vld [vmem:[#allocation8 + $0x468] sm:$0xff]   ;;  %vm22178_vm13 = vmmov %vm22122_vm0 }
 0x3cd   : > { %17076 = vmatpush3.bf16.msra.mxu0 %v18538_v45  ;;  %v6255_v3 = vld [vmem:[#allocation2 + $0xe8] sm:$0xff] }
 0x3ce   : > { %17077 = vmatprep.subr.bf16.mxu0 %v18539_v47  ;;  %v15813_v30 = vpop.f32.mrb[112].mxu1 }
 0x3cf   : > { %v15814_v8 = vpop.f32.mrb[113].mxu1 }
 0x3d0   : > { %v15815_v32 = vadd.f32 %v15814_v8, %v15813_v30  ;;  %v15816_v25 = vpop.f32.mrb[114].mxu1 }
 0x3d1   : > { %17078 = vmatpush3.bf16.msra.mxu0 %v18539_v47  ;;  %v15817_v28 = vpop.f32.mrb[115].mxu1  ;;  %v18550_v47 = vld [vmem:[#allocation8 + $0x508] sm:$0xff]  }
 0x3d2   : > { %17079 = vmatprep.subr.bf16.mxu0 %v18540_v19  ;;  %v20897_v43 = vadd.f32 %v20862_v58, %v15815_v32  ;;  %v15818_v18 = vadd.f32 %v15817_v28, %v15816_v25  ;;  %v18543_v58 = vld [vmem:[#allocation8 + $0x450] sm:$0xff]  }
 0x3d3   : > { %v18551_v25 = vld [vmem:[#allocation8 + $0x510] sm:$0xff]  }
 0x3d4   : > { %v20901_v26 = vadd.f32 %v20865_v44, %v15818_v18  ;;  %v5957_v44 = vrot.slane %v5868_v34, 4  ;;  %v20941_v34 = vsub.s32 1, %v19541_v60 }
 0x3d5   : > { %17080 = vmatpush3.bf16.msra.mxu0 %v18540_v19 }
 0x3d6   : > { %17089 = vmatprep.subr.bf16.mxu0 %v18541_v39  ;;  %v15819_v46 = vpop.f32.mrb[116].mxu1  ;;  %v5958_v61 = vsel %vm22165_vm7, %v5951_v56, %v5957_v44  ;;  %vm22180_vm7 = vmmov %vm22122_vm0 }
 0x3d7   : > { %v15820_v33 = vpop.f32.mrb[117].mxu1 }
 0x3d8   : > { %17082 = vmatmul.mubr.bf16.vlgmr.msra.gmra.mrb[144].mxu0 %v5946_v35  ;;  %v15821_v62 = vadd.f32 %v15820_v33, %v15819_v46  ;;  %v15822_v31 = vpop.f32.mrb[118].mxu1  ;;  %v18553_v35 = vld [vmem:[#allocation8 + $0x520] sm:$0xff]  }
 0x3d9   : > { %17085 = vmatprep.mubr.bf16.mxu0 %v5952_v16  ;;  %17090 = vmatpush3.bf16.msra.mxu0 %v18541_v39  ;;  %v15823_v23 = vpop.f32.mrb[119].mxu1  ;;  %v18552_v39 = vld [vmem:[#allocation8 + $0x518] sm:$0xff]  }
 0x3da   : > { %17091 = vmatprep.subr.bf16.mxu0 %v18542_v63  ;;  %v17632_v29 = vadd.f32 %v20874_v10, %v15821_v62  ;;  %v15824_v14 = vadd.f32 %v15823_v23, %v15822_v31  ;;  %v20935_v62 = vsub.s32 0, %v19541_v60  ;;  %v4184_v31 = vld [vmem:[%s21928_s6] sm:$0x3]  ;;  %v18554_v23 = vld [vmem:[#allocation8 + $0x528] sm:$0xff]  }
 0x3dc   : > { %v17650_v6 = vadd.f32 %v20877_v12, %v15824_v14  ;;  %v20945_v44 = vrot.slane %v4184_v31, %v20935_v62 }
 0x3dd   : > { %17092 = vmatpush3.bf16.msra.mxu0 %v18542_v63 }
 0x3de   : > { %17093 = vmatprep.subr.bf16.mxu0 %v18543_v58  ;;  %v15853_v57 = vpop.f32.mrb[120].mxu1 }
 0x3df   : > { %v15854_v20 = vpop.f32.mrb[121].mxu1 }
 0x3e0   : > { %17086 = vmatmul.mubr.bf16.gmra.mrb[148].mxu0 %v5958_v61  ;;  %v15855_v17 = vadd.f32 %v15854_v20, %v15853_v57  ;;  %v15856_v40 = vpop.f32.mrb[122].mxu1  ;;  %v20948_v57 = vrot.slane %v4184_v31, %v20941_v34  ;;  %v4350_v61 = vld [vmem:[%s19468_s15 + $0x8] sm:$0xff] }
 0x3e1   : > { %17094 = vmatpush3.bf16.msra.mxu0 %v18543_v58  ;;  %17105 = vmatprep.mubr.bf16.mxu0 %v20867_v54  ;;  %v15857_v24 = vpop.f32.mrb[123].mxu1  ;;  %v4349_v58 = vld [vmem:[%s19468_s15] sm:$0xff] }
 0x3e2   : > { %17095 = vmatprep.subr.bf16.mxu0 %v18544_v4  ;;  %v17606_v10 = vadd.f32 %v20885_v11, %v15855_v17  ;;  %v15858_v36 = vadd.f32 %v15857_v24, %v15856_v40  ;;  %v4357_v17 = vunpack.c.l.bf16 %v4349_v58  ;;  %v18555_v40 = vld [vmem:[#allocation8 + $0x530] sm:$0xff]  }
 0x3e4   : > { %v17624_v12 = vadd.f32 %v20888_v38, %v15858_v36 }
 0x3e5   : > { %17096 = vmatpush3.bf16.msra.mxu0 %v18544_v4 }
 0x3e6   : > { %17097 = vmatprep.subr.bf16.mxu0 %v18545_v49  ;;  %v15859_v27 = vpop.f32.mrb[124].mxu1 }
 0x3e7   : > { %v15860_v55 = vpop.f32.mrb[125].mxu1 }
 0x3e8   : > { %v15861_v51 = vadd.f32 %v15860_v55, %v15859_v27  ;;  %v15862_v0 = vpop.f32.mrb[126].mxu1 }
 0x3e9   : > { %17098 = vmatpush3.bf16.msra.mxu0 %v18545_v49  ;;  %v15863_v1 = vpop.f32.mrb[127].mxu1  ;;  %v4358_v49 = vunpack.c.h.bf16 %v4349_v58 }
 0x3ea   : > { %17099 = vmatprep.subr.bf16.mxu0 %v18546_v22  ;;  %v20913_v54 = vadd.f32 %v20891_v21, %v15861_v51  ;;  %v15864_v42 = vadd.f32 %v15863_v1, %v15862_v0  ;;  %v4360_v0 = vunpack.c.h.bf16 %v4350_v61 }
 0x3ec   : > { %v20916_v11 = vadd.f32 %v20894_v52, %v15864_v42  ;;  %v18556_v42 = vld [vmem:[#allocation8 + $0x538] sm:$0xff]  }
 0x3ed   : > { %17100 = vmatpush3.bf16.msra.mxu0 %v18546_v22  ;;  %v4359_v22 = vunpack.c.l.bf16 %v4350_v61 }
 0x3ee   : > { %17101 = vmatprep.subr.bf16.mxu0 %v18547_v50  ;;  %v15865_v37 = vpop.f32.mrb[128].mxu1 }
 0x3ef   : > { %v15866_v38 = vpop.f32.mrb[129].mxu1 }
 0x3f0   : > { %v15867_v45 = vadd.f32 %v15866_v38, %v15865_v37  ;;  %v15868_v13 = vpop.f32.mrb[130].mxu1 }
 0x3f1   : > { %17102 = vmatpush3.bf16.msra.mxu0 %v18547_v50  ;;  %v15869_v2 = vpop.f32.mrb[131].mxu1 }
 0x3f2   : > { %17103 = vmatprep.subr.bf16.mxu0 %v18548_v59  ;;  %v20919_v9 = vadd.f32 %v20897_v43, %v15867_v45  ;;  %v15870_v48 = vadd.f32 %v15869_v2, %v15868_v13  ;;  %v4351_v45 = vld [vmem:[%s19468_s15 + $0x10] sm:$0xff] }
 0x3f4   : > { %v20922_v21 = vadd.f32 %v20901_v26, %v15870_v48 }
 0x3f5   : > { %17104 = vmatpush3.bf16.msra.mxu0 %v18548_v59 }
 0x3f6   : > { %17113 = vmatprep.subr.bf16.mxu0 %v18549_v5  ;;  %v15871_v53 = vpop.f32.mrb[132].mxu1 }
 0x3f7   : > { %v15872_v52 = vpop.f32.mrb[133].mxu1 }
 0x3f8   : > { %17106 = vmatmul.mubr.bf16.vlgmr.msra.gmra.mrb[144].mxu0 %v20870_v41  ;;  %v15873_v19 = vadd.f32 %v15872_v52, %v15871_v53  ;;  %v15874_v30 = vpop.f32.mrb[134].mxu1  ;;  %v6588_v41 = vld [vmem:[#allocation2 + $0x100] sm:$0xff]  ;;  %v4352_v52 = vld [vmem:[%s19468_s15 + $0x18] sm:$0xff] }
 0x3f9   : > { %17109 = vmatprep.mubr.bf16.mxu0 %v20880_v15  ;;  %17114 = vmatpush3.bf16.msra.mxu0 %v18549_v5  ;;  %v15875_v8 = vpop.f32.mrb[135].mxu1 }
 0x3fa   : > { %17115 = vmatprep.subr.bf16.mxu0 %v18550_v47  ;;  %v20926_v32 = vadd.f32 %v17632_v29, %v15873_v19  ;;  %v15876_v28 = vadd.f32 %v15875_v8, %v15874_v30  ;;  %v4361_v8 = vunpack.c.l.bf16 %v4351_v45 }
 0x3fc   : > { %v20928_v43 = vadd.f32 %v17650_v6, %v15876_v28  ;;  %v18557_v28 = vld [vmem:[#allocation8 + $0x5c0] sm:$0xff]  }
 0x3fd   : > { %17116 = vmatpush3.bf16.msra.mxu0 %v18550_v47 }
 0x3fe   : > { %17117 = vmatprep.subr.bf16.mxu0 %v18551_v25  ;;  %v15905_v18 = vpop.f32.mrb[136].mxu1 }
 0x3ff   : > { %v15906_v26 = vpop.f32.mrb[137].mxu1 }
 0x400   : > { %17110 = vmatmul.mubr.bf16.gmra.mrb[148].mxu0 %v6255_v3  ;;  %v15907_v56 = vadd.f32 %v15906_v26, %v15905_v18  ;;  %v15908_v63 = vpop.f32.mrb[138].mxu1 }
 0x401   : > { %17118 = vmatpush3.bf16.msra.mxu0 %v18551_v25  ;;  %17129 = vmatprep.mubr.bf16.mxu0 %v6588_v41  ;;  %v15909_v15 = vpop.f32.mrb[139].mxu1  ;;  %v4362_v41 = vunpack.c.h.bf16 %v4351_v45 }
 0x402   : > { %17119 = vmatprep.subr.bf16.mxu0 %v18552_v39  ;;  %v20930_v46 = vadd.f32 %v17606_v10, %v15907_v56  ;;  %v15910_v33 = vadd.f32 %v15909_v15, %v15908_v63  ;;  %v4363_v15 = vunpack.c.l.bf16 %v4352_v52 }
 0x404   : > { %v20932_v16 = vadd.f32 %v17624_v12, %v15910_v33 }
 0x405   : > { %17120 = vmatpush3.bf16.msra.mxu0 %v18552_v39 }
 0x406   : > { %17121 = vmatprep.subr.bf16.mxu0 %v18553_v35  ;;  %v15911_v29 = vpop.f32.mrb[140].mxu1 }
 0x407   : > { %v15912_v14 = vpop.f32.mrb[141].mxu1 }
 0x408   : > { %v15913_v6 = vadd.f32 %v15912_v14, %v15911_v29  ;;  %v15914_v4 = vpop.f32.mrb[142].mxu1 }
 0x409   : > { %17122 = vmatpush3.bf16.msra.mxu0 %v18553_v35  ;;  %v15915_v20 = vpop.f32.mrb[143].mxu1 }
 0x40a   : > { %17123 = vmatprep.subr.bf16.mxu0 %v18554_v23  ;;  %v20952_v60 = vadd.f32 %v20913_v54, %v15913_v6  ;;  %v15916_v24 = vadd.f32 %v15915_v20, %v15914_v4  ;;  %v20979_v20 = vld [vmem:[#allocation2 + $0x118] sm:$0xff] }
 0x40b   : > { %v4310_v10 = vpop.f32.mrb[128].mxu0 }
 0x40c   : > { %v4311_v36 = vadd.f32 %v4310_v10, %v20945_v44  ;;  %v4312_v12 = vpop.f32.mrb[129].mxu0  ;;  %v20956_v27 = vadd.f32 %v20916_v11, %v15916_v24 }
 0x40d   : > { %v4313_v55 = vadd.f32 %v4312_v12, %v20948_v57  ;;  %17124 = vmatpush3.bf16.msra.mxu0 %v18554_v23  ;;  %v4314_v51 = vpop.f32.mrb[130].mxu0  ;;  %v4364_v23 = vunpack.c.h.bf16 %v4352_v52  ;;  %v7013_v52 = vrot.slane %v20979_v20, 4 }
 0x40e   : > { %v4373_v1 = vadd.f32 %v4357_v17, %v4311_v36  ;;  %v4315_v54 = vadd.f32 %v4314_v51, %v20945_v44  ;;  %v4316_v50 = vpop.f32.mrb[131].mxu0  ;;  %17125 = vmatprep.subr.bf16.mxu0 %v18555_v40  ;;  %v15917_v59 = vpop.f32.mrb[144].mxu1  ;;  %v4353_v17 = vld [vmem:[%s19468_s15 + $0x20] sm:$0xff] }
 0x40f   : > { %v4374_v37 = vadd.f32 %v4358_v49, %v4313_v55  ;;  %v4317_v38 = vadd.f32 %v4316_v50, %v20948_v57  ;;  %v15918_v13 = vpop.f32.mrb[145].mxu1  ;;  %v20983_v49 = vld [vmem:[#allocation2 + $0x130] sm:$0xff]  ;;  %v4365_v50 = vunpack.c.l.bf16 %v4353_v17 }
 0x410   : > { %v4389_v11 = vmax.f32 %v4373_v1, 0.0  ;;  %v4375_v2 = vadd.f32 %v4359_v22, %v4315_v54  ;;  %v15919_v5 = vadd.f32 %v15918_v13, %v15917_v59  ;;  %v15920_v48 = vpop.f32.mrb[146].mxu1  ;;  %v6930_v22 = vld [vmem:[#allocation2 + $0x100] sm:$0xf0]  ;;  %v18559_v59 = vld [vmem:[#allocation8 + $0x5d0] sm:$0xff]  }
 0x411   : > { %v4390_v47 = vmax.f32 %v4374_v37, 0.0  ;;  %v4376_v53 = vadd.f32 %v4360_v0, %v4317_v38  ;;  %17126 = vmatpush3.bf16.msra.mxu0 %v18555_v40  ;;  %v15921_v19 = vpop.f32.mrb[147].mxu1  ;;  %v4354_v0 = vld [vmem:[%s19468_s15 + $0x28] sm:$0xff] }
 0x412   : > { %v4391_v30 = vmax.f32 %v4375_v2, 0.0  ;;  %17127 = vmatprep.subr.bf16.mxu0 %v18556_v42  ;;  %v20964_v25 = vadd.f32 %v20919_v9, %v15919_v5  ;;  %v15922_v39 = vadd.f32 %v15921_v19, %v15920_v48  ;;  %v7012_v2 = vrot.slane %v6930_v22, 4 }
 0x413   : > { %v15072_v18 = vpack.c.bf16 %v4390_v47, %v4389_v11  ;;  %v4392_v3 = vmax.f32 %v4376_v53, 0.0  ;;  %v4320_v26 = vpop.f32.mrb[132].mxu0  ;;  %v4366_v11 = vunpack.c.h.bf16 %v4353_v17  ;;  %v4367_v47 = vunpack.c.l.bf16 %v4354_v0 }
 0x414   : > { %v4321_v56 = vadd.f32 %v4320_v26, %v20945_v44  ;;  %v4322_v63 = vpop.f32.mrb[133].mxu0  ;;  %v20968_v35 = vadd.f32 %v20922_v21, %v15922_v39  ;;  %v18558_v21 = vld [vmem:[#allocation8 + $0x5c8] sm:$0xff]  }
 0x415   : > { %4453 = vst [vmem:[%s20972_s21] sm:$0xff] %v15072_v18  ;;  %v15073_v9 = vpack.c.bf16 %v4392_v3, %v4391_v30  ;;  %v4323_v33 = vadd.f32 %v4322_v63, %v20948_v57  ;;  %17128 = vmatpush3.bf16.msra.mxu0 %v18556_v42  ;;  %v4324_v31 = vpop.f32.mrb[134].mxu0  ;;  %v18560_v3 = vld [vmem:[#allocation8 + $0x5d8] sm:$0xff]   ;;  %v4355_v63 = vld [vmem:[%s19468_s15 + $0x30] sm:$0xff] }
 0x416   : > { %v4377_v29 = vadd.f32 %v4361_v8, %v4321_v56  ;;  %v4325_v58 = vadd.f32 %v4324_v31, %v20945_v44  ;;  %v4326_v14 = vpop.f32.mrb[135].mxu0  ;;  %17137 = vmatprep.subr.bf16.mxu0 %v18557_v28  ;;  %v15923_v6 = vpop.f32.mrb[148].mxu1  ;;  %v4368_v8 = vunpack.c.h.bf16 %v4354_v0  ;;  %v21000_v56 = vld [vmem:[#allocation2 + $0x148] sm:$0xff]  ;;  %v7014_v31 = vsel %vm22166_vm1, %v7012_v2, %v7013_v52  ;;  %vm22181_vm1 = vmmov %vm22122_vm0 }
 0x417   : > { %4454 = vst [vmem:[%s20972_s21 + $0x8] sm:$0xff] %v15073_v9  ;;  %v4378_v4 = vadd.f32 %v4362_v41, %v4323_v33  ;;  %v4327_v61 = vadd.f32 %v4326_v14, %v20948_v57  ;;  %v15924_v40 = vpop.f32.mrb[149].mxu1  ;;  %v4370_v22 = vunpack.c.h.bf16 %v4355_v63 }
 0x418   : > { %v4393_v24 = vmax.f32 %v4377_v29, 0.0  ;;  %v4379_v10 = vadd.f32 %v4363_v15, %v4325_v58  ;;  %17130 = vmatmul.mubr.bf16.vlgmr.msra.gmra.mrb[144].mxu0 %v20979_v20  ;;  %v15925_v36 = vadd.f32 %v15924_v40, %v15923_v6  ;;  %v15926_v12 = vpop.f32.mrb[150].mxu1  ;;  %v18561_v40 = vld [vmem:[#allocation8 + $0x5e0] sm:$0xff]  }
 0x419   : > { %v4394_v55 = vmax.f32 %v4378_v4, 0.0  ;;  %v4380_v51 = vadd.f32 %v4364_v23, %v4327_v61  ;;  %17133 = vmatprep.mubr.bf16.mxu0 %v20983_v49  ;;  %17138 = vmatpush3.bf16.msra.mxu0 %v18557_v28  ;;  %v15927_v1 = vpop.f32.mrb[151].mxu1  ;;  %v4369_v61 = vunpack.c.l.bf16 %v4355_v63  ;;  %v18564_v63 = vld [vmem:[#allocation8 + $0x5f8] sm:$0xff]  }
 0x41a   : > { %v4395_v54 = vmax.f32 %v4379_v10, 0.0  ;;  %17139 = vmatprep.subr.bf16.mxu0 %v18558_v21  ;;  %v20988_v42 = vadd.f32 %v20926_v32, %v15925_v36  ;;  %v15928_v37 = vadd.f32 %v15927_v1, %v15926_v12 }
 0x41b   : > { %v15074_v38 = vpack.c.bf16 %v4394_v55, %v4393_v24  ;;  %v4396_v45 = vmax.f32 %v4380_v51, 0.0  ;;  %v4330_v13 = vpop.f32.mrb[136].mxu0 }
 0x41c   : > { %v4331_v5 = vadd.f32 %v4330_v13, %v20945_v44  ;;  %v4332_v48 = vpop.f32.mrb[137].mxu0  ;;  %v20992_v53 = vadd.f32 %v20928_v43, %v15928_v37  ;;  %v18562_v13 = vld [vmem:[#allocation8 + $0x5e8] sm:$0xff]  }
 0x41d   : > { %4455 = vst [vmem:[%s20972_s21 + $0x10] sm:$0xff] %v15074_v38  ;;  %v15075_v32 = vpack.c.bf16 %v4396_v45, %v4395_v54  ;;  %v4333_v19 = vadd.f32 %v4332_v48, %v20948_v57  ;;  %17140 = vmatpush3.bf16.msra.mxu0 %v18558_v21  ;;  %v4334_v30 = vpop.f32.mrb[138].mxu0  ;;  %v4356_v21 = vld [vmem:[%s19468_s15 + $0x38] sm:$0xff] }
 0x41e   : > { %v4381_v28 = vadd.f32 %v4365_v50, %v4331_v5  ;;  %v4335_v39 = vadd.f32 %v4334_v30, %v20945_v44  ;;  %v4336_v18 = vpop.f32.mrb[139].mxu0  ;;  %17141 = vmatprep.subr.bf16.mxu0 %v18559_v59  ;;  %v15957_v26 = vpop.f32.mrb[152].mxu1  ;;  %v4371_v0 = vunpack.c.l.bf16 %v4356_v21 }
 0x41f   : > { %4456 = vst [vmem:[%s20972_s21 + $0x18] sm:$0xff] %v15075_v32  ;;  %v4382_v43 = vadd.f32 %v4366_v11, %v4333_v19  ;;  %v4337_v41 = vadd.f32 %v4336_v18, %v20948_v57  ;;  %v15958_v15 = vpop.f32.mrb[153].mxu1  ;;  %v18563_v18 = vld [vmem:[#allocation8 + $0x5f0] sm:$0xff]  }
 0x420   : > { %v4397_v9 = vmax.f32 %v4381_v28, 0.0  ;;  %v4383_v33 = vadd.f32 %v4367_v47, %v4335_v39  ;;  %17134 = vmatmul.mubr.bf16.gmra.mrb[148].mxu0 %v21000_v56  ;;  %v15959_v23 = vadd.f32 %v15958_v15, %v15957_v26  ;;  %v15960_v29 = vpop.f32.mrb[154].mxu1 }
 0x421   : > { %v4398_v58 = vmax.f32 %v4382_v43, 0.0  ;;  %v4384_v14 = vadd.f32 %v4368_v8, %v4337_v41  ;;  %17142 = vmatpush3.bf16.msra.mxu0 %v18559_v59  ;;  %17153 = vmatprep.mubr.bf16.mxu0 %v7014_v31  ;;  %v15961_v6 = vpop.f32.mrb[155].mxu1  ;;  %v4372_v59 = vunpack.c.h.bf16 %v4356_v21  ;;  %v7025_v21 = vrot.slane %v21000_v56, 4 }
 0x422   : > { %v4399_v4 = vmax.f32 %v4383_v33, 0.0  ;;  %17143 = vmatprep.subr.bf16.mxu0 %v18560_v3  ;;  %v21009_v17 = vadd.f32 %v20930_v46, %v15959_v23  ;;  %v15962_v24 = vadd.f32 %v15961_v6, %v15960_v29  ;;  %v18565_v29 = vld [vmem:[#allocation8 + $0x680] sm:$0xff]   ;;  %v18566_v6 = vld [vmem:[#allocation8 + $0x688] sm:$0xff]  }
 0x423   : > { %v15076_v10 = vpack.c.bf16 %v4398_v58, %v4397_v9  ;;  %v4400_v36 = vmax.f32 %v4384_v14, 0.0  ;;  %v4340_v12 = vpop.f32.mrb[140].mxu0 }
 0x424   : > { %v4341_v55 = vadd.f32 %v4340_v12, %v20945_v44  ;;  %v4342_v51 = vpop.f32.mrb[141].mxu0  ;;  %v21013_v1 = vadd.f32 %v20932_v16, %v15962_v24 }
 0x425   : > { %4457 = vst [vmem:[%s20972_s21 + $0x20] sm:$0xff] %v15076_v10  ;;  %v15077_v54 = vpack.c.bf16 %v4400_v36, %v4399_v4  ;;  %v4343_v50 = vadd.f32 %v4342_v51, %v20948_v57  ;;  %17144 = vmatpush3.bf16.msra.mxu0 %v18560_v3  ;;  %v4344_v46 = vpop.f32.mrb[142].mxu0  ;;  %v6942_v36 = vld [vmem:[#allocation2 + $0x160] sm:$0xf] }
 0x426   : > { %v4385_v37 = vadd.f32 %v4369_v61, %v4341_v55  ;;  %v4345_v38 = vadd.f32 %v4344_v46, %v20945_v44  ;;  %v4346_v45 = vpop.f32.mrb[143].mxu0  ;;  %17145 = vmatprep.subr.bf16.mxu0 %v18561_v40  ;;  %v15963_v11 = vpop.f32.mrb[156].mxu1  ;;  %v7031_v51 = vrot.slane %v6942_v36, 4  ;;  %v18583_v36 = vld [vmem:[#allocation8 + $0x128] sm:$0xff]  }
 0x427   : > { %4458 = vst [vmem:[%s20972_s21 + $0x28] sm:$0xff] %v15077_v54  ;;  %v4386_v2 = vadd.f32 %v4370_v22, %v4343_v50  ;;  %v4347_v5 = vadd.f32 %v4346_v45, %v20948_v57  ;;  %v15964_v16 = vpop.f32.mrb[157].mxu1  ;;  %v18567_v22 = vld [vmem:[#allocation8 + $0x690] sm:$0xff]  }
 0x428   : > { %v4401_v48 = vmax.f32 %v4385_v37, 0.0  ;;  %v4387_v47 = vadd.f32 %v4371_v0, %v4345_v38  ;;  %v15965_v32 = vadd.f32 %v15964_v16, %v15963_v11  ;;  %v15966_v19 = vpop.f32.mrb[158].mxu1  ;;  %v7032_v50 = vsel %vm22122_vm0, %v7025_v21, %v7031_v51  ;;  %v18569_v38 = vld [vmem:[#allocation8 + $0x6a0] sm:$0xff]   ;;  %v18570_v11 = vld [vmem:[#allocation8 + $0x6a8] sm:$0xff]   ;;  %v21078_v51 = vld [vmem:[#allocation2 + $0x90] sm:$0xff] }
 0x429   : > { %v4402_v30 = vmax.f32 %v4386_v2, 0.0  ;;  %v4388_v8 = vadd.f32 %v4372_v59, %v4347_v5  ;;  %17146 = vmatpush3.bf16.msra.mxu0 %v18561_v40  ;;  %v15967_v28 = vpop.f32.mrb[159].mxu1 }
 0x42a   : > { %v4403_v44 = vmax.f32 %v4387_v47, 0.0  ;;  %17147 = vmatprep.subr.bf16.mxu0 %v18562_v13  ;;  %v21021_v39 = vadd.f32 %v20952_v60, %v15965_v32  ;;  %v15968_v3 = vadd.f32 %v15967_v28, %v15966_v19 }
 0x42b   : > { %v15078_v26 = vpack.c.bf16 %v4402_v30, %v4401_v48  ;;  %v4404_v57 = vmax.f32 %v4388_v8, 0.0 }
 0x42c   : > { %v21024_v43 = vadd.f32 %v20956_v27, %v15968_v3  ;;  %v7019_v27 = vrot.slane %v20983_v49, 4  ;;  %v18573_v3 = vld [vmem:[#allocation8 + $0x100] sm:$0xff]  }
 0x42d   : > { %4459 = vst [vmem:[%s20972_s21 + $0x30] sm:$0xff] %v15078_v26  ;;  %v15079_v41 = vpack.c.bf16 %v4404_v57, %v4403_v44  ;;  %17148 = vmatpush3.bf16.msra.mxu0 %v18562_v13 }
 0x42e   : > { %17149 = vmatprep.subr.bf16.mxu0 %v18563_v18  ;;  %v15969_v15 = vpop.f32.mrb[160].mxu1  ;;  %v7020_v61 = vsel %vm22167_vm3, %v7013_v52, %v7019_v27  ;;  %v18568_v52 = vld [vmem:[#allocation8 + $0x698] sm:$0xff]   ;;  %vm22182_vm3 = vmmov %vm22122_vm0 }
 0x42f   : > { %4460 = vst [vmem:[%s20972_s21 + $0x38] sm:$0xff] %v15079_v41  ;;  %v15970_v9 = vpop.f32.mrb[161].mxu1  ;;  %v18575_v41 = vld [vmem:[#allocation8 + $0x108] sm:$0xff]  }
 0x430   : > { %v15971_v33 = vadd.f32 %v15970_v9, %v15969_v15  ;;  %v15972_v31 = vpop.f32.mrb[162].mxu1 }
 0x431   : > { %17150 = vmatpush3.bf16.msra.mxu0 %v18563_v18  ;;  %v15973_v60 = vpop.f32.mrb[163].mxu1 }
 0x432   : > { %17151 = vmatprep.subr.bf16.mxu0 %v18564_v63  ;;  %v21029_v23 = vadd.f32 %v20964_v25, %v15971_v33  ;;  %v15974_v58 = vadd.f32 %v15973_v60, %v15972_v31  ;;  %v7026_v25 = vsel %vm22168_vm15, %v7019_v27, %v7025_v21  ;;  %v18576_v31 = vld [vmem:[#allocation8 + $0xc8] sm:$0xff]   ;;  %vm22183_vm15 = vmmov %vm22122_vm0 }
 0x434   : > { %v21033_v14 = vadd.f32 %v20968_v35, %v15974_v58  ;;  %v18577_v58 = vld [vmem:[#allocation8 + $0x110] sm:$0xff]  }
 0x435   : > { %17152 = vmatpush3.bf16.msra.mxu0 %v18564_v63 }
 0x436   : > { %17161 = vmatprep.subr.bf16.mxu0 %v18565_v29  ;;  %v15975_v4 = vpop.f32.mrb[164].mxu1 }
 0x437   : > { %v15976_v40 = vpop.f32.mrb[165].mxu1 }
 0x438   : > { %17154 = vmatmul.mubr.bf16.vlgmr.msra.gmra.mrb[144].mxu0 %v7020_v61  ;;  %v15977_v24 = vadd.f32 %v15976_v40, %v15975_v4  ;;  %v15978_v10 = vpop.f32.mrb[166].mxu1  ;;  %v18579_v4 = vld [vmem:[#allocation8 + $0x118] sm:$0xff]   ;;  %v7329_v61 = vld [vmem:[#allocation2 + $0x160] sm:$0xff] }
 0x439   : > { %17157 = vmatprep.mubr.bf16.mxu0 %v7026_v25  ;;  %17162 = vmatpush3.bf16.msra.mxu0 %v18565_v29  ;;  %v15979_v35 = vpop.f32.mrb[167].mxu1  ;;  %v8042_v29 = vld [vmem:[#allocation2 + $0x80] sm:$0xf0]  ;;  %v18580_v25 = vld [vmem:[#allocation8 + $0xd8] sm:$0xff]  }
 0x43a   : > { %17163 = vmatprep.subr.bf16.mxu0 %v18566_v6  ;;  %v21041_v12 = vadd.f32 %v20988_v42, %v15977_v24  ;;  %v15980_v55 = vadd.f32 %v15979_v35, %v15978_v10  ;;  %v8113_v21 = vrot.slane %v8042_v29, 4  ;;  %v18581_v24 = vld [vmem:[#allocation8 + $0x120] sm:$0xff]   ;;  %v18584_v35 = vld [vmem:[#allocation8 + $0xe8] sm:$0xff]  }
 0x43b   : > { %v18582_v10 = vld [vmem:[#allocation8 + $0xe0] sm:$0xff]  }
 0x43c   : > { %v21044_v0 = vadd.f32 %v20992_v53, %v15980_v55  ;;  %v18587_v55 = vld [vmem:[#allocation8 + $0x138] sm:$0xff]  }
 0x43d   : > { %17164 = vmatpush3.bf16.msra.mxu0 %v18566_v6 }
 0x43e   : > { %17165 = vmatprep.subr.bf16.mxu0 %v18567_v22  ;;  %v16009_v54 = vpop.f32.mrb[168].mxu1 }
 0x43f   : > { %v16010_v46 = vpop.f32.mrb[169].mxu1 }
 0x440   : > { %17158 = vmatmul.mubr.bf16.gmra.mrb[148].mxu0 %v7032_v50  ;;  %v16011_v59 = vadd.f32 %v16010_v46, %v16009_v54  ;;  %v16012_v37 = vpop.f32.mrb[170].mxu1  ;;  %v21080_v54 = vld [vmem:[#allocation2 + $0xb0] sm:$0xff]  ;;  %v18589_v50 = vld [vmem:[#allocation8 + $0x40] sm:$0xff]  }
 0x441   : > { %17166 = vmatpush3.bf16.msra.mxu0 %v18567_v22  ;;  %17177 = vmatprep.mubr.bf16.mxu0 %v20979_v20  ;;  %v16013_v42 = vpop.f32.mrb[171].mxu1  ;;  %v18571_v20 = vld [vmem:[#allocation8 + $0x6b0] sm:$0xff]  }
 0x442   : > { %17167 = vmatprep.subr.bf16.mxu0 %v18568_v52  ;;  %v16014_v45 = vadd.f32 %v16013_v42, %v16012_v37  ;;  %v21049_v53 = vadd.f32 %v21009_v17, %v16011_v59  ;;  %v18586_v22 = vld [vmem:[#allocation8 + $0xf0] sm:$0xff]   ;;  %v8111_v59 = vrot.slane %v21078_v51, 4  ;;  %v8121_v37 = vrot.slane %v21080_v54, 4  ;;  %v18590_v42 = vld [vmem:[#allocation8] sm:$0xff]  }
 0x444   : > { %v21052_v13 = vadd.f32 %v21013_v1, %v16014_v45  ;;  %v18572_v1 = vld [vmem:[#allocation8 + $0x6b8] sm:$0xff]  }
 0x445   : > { %17168 = vmatpush3.bf16.msra.mxu0 %v18568_v52  ;;  %v18588_v52 = vld [vmem:[#allocation8 + $0xf8] sm:$0xff]  }
 0x446   : > { %17169 = vmatprep.subr.bf16.mxu0 %v18569_v38  ;;  %v16015_v2 = vpop.f32.mrb[172].mxu1 }
 0x447   : > { %v16016_v5 = vpop.f32.mrb[173].mxu1 }
 0x448   : > { %v16017_v16 = vadd.f32 %v16016_v5, %v16015_v2  ;;  %v16018_v48 = vpop.f32.mrb[174].mxu1  ;;  %v21086_v2 = vld [vmem:[#allocation2 + $0xa8] sm:$0xff] }
 0x449   : > { %17170 = vmatpush3.bf16.msra.mxu0 %v18569_v38  ;;  %v16019_v47 = vpop.f32.mrb[175].mxu1  ;;  %v18591_v38 = vld [vmem:[#allocation8 + $0x48] sm:$0xff]  }
 0x44a   : > { %17171 = vmatprep.subr.bf16.mxu0 %v18570_v11  ;;  %v16020_v32 = vadd.f32 %v16019_v47, %v16018_v48  ;;  %v21055_v19 = vadd.f32 %v21021_v39, %v16017_v16  ;;  %v18592_v5 = vld [vmem:[#allocation8 + $0x8] sm:$0xff]   ;;  %v18593_v48 = vld [vmem:[#allocation8 + $0x50] sm:$0xff]   ;;  %v8119_v47 = vrot.slane %v21086_v2, 4 }
 0x44b   : > { %v21088_v16 = vld [vmem:[#allocation2 + $0xc8] sm:$0xff] }
 0x44c   : > { %v21058_v17 = vadd.f32 %v21024_v43, %v16020_v32  ;;  %v18574_v43 = vld [vmem:[#allocation8 + $0xc0] sm:$0xff]   ;;  %v18594_v32 = vld [vmem:[#allocation8 + $0x10] sm:$0xff]  }
 0x44d   : > { %17172 = vmatpush3.bf16.msra.mxu0 %v18570_v11 }
 0x44e   : > { %17173 = vmatprep.subr.bf16.mxu0 %v18571_v20  ;;  %v16021_v30 = vpop.f32.mrb[176].mxu1 }
 0x44f   : > { %v16022_v8 = vpop.f32.mrb[177].mxu1 }
 0x450   : > { %v16023_v28 = vadd.f32 %v16022_v8, %v16021_v30  ;;  %v16024_v44 = vpop.f32.mrb[178].mxu1  ;;  %v8120_v30 = vsel %vm22172_vm10, %v8111_v59, %v8119_v47  ;;  %vm22187_vm10 = vmmov %vm22122_vm0 }
 0x451   : > { %17174 = vmatpush3.bf16.msra.mxu0 %v18571_v20  ;;  %v16025_v18 = vpop.f32.mrb[179].mxu1  ;;  %v8127_v20 = vrot.slane %v21088_v16, 4 }
 0x452   : > { %17175 = vmatprep.subr.bf16.mxu0 %v18572_v1  ;;  %v16026_v26 = vadd.f32 %v16025_v18, %v16024_v44  ;;  %v21061_v57 = vadd.f32 %v21029_v23, %v16023_v28  ;;  %v21068_v23 = vld [vmem:[#allocation2 + $0x98] sm:$0xff]  ;;  %v21094_v28 = vld [vmem:[#allocation2 + $0xc0] sm:$0xff] }
 0x453   : > { %v8114_v6 = vrot.slane %v21068_v23, 4  ;;  %v8128_v8 = vsel %vm22173_vm4, %v8121_v37, %v8127_v20  ;;  %v18596_v44 = vld [vmem:[#allocation8 + $0x18] sm:$0xff]   ;;  %v8045_v18 = vld [vmem:[#allocation2 + $0xe0] sm:$0xf]  ;;  %vm22188_vm4 = vmmov %vm22122_vm0 }
 0x454   : > { %v21064_v39 = vadd.f32 %v21033_v14, %v16026_v26  ;;  %v8125_v26 = vrot.slane %v21094_v28, 4 }
 0x455   : > { %17176 = vmatpush3.bf16.msra.mxu0 %v18572_v1  ;;  %v8115_v40 = vsel %vm22169_vm6, %v8113_v21, %v8114_v6  ;;  %v8122_v11 = vsel %vm22171_vm8, %v8114_v6, %v8121_v37  ;;  %v18595_v1 = vld [vmem:[#allocation8 + $0x58] sm:$0xff]   ;;  %v7982_v6 = vld [vmem:[#allocation2 + $0x80] sm:$0xff]  ;;  %vm22184_vm6 = vmmov %vm22122_vm0 }
 0x456   : > { %16045 = vmatprep.subr.bf16.mxu0 %v18573_v3  ;;  %v16027_v63 = vpop.f32.mrb[180].mxu1  ;;  %v18597_v3 = vld [vmem:[#allocation8 + $0x60] sm:$0xff]   ;;  %v18686_v37 = vld [vmem:[#allocation9 + $0x34] ss:$8 sps:$4 sm:$0xff]   ;;  %vm22186_vm8 = vmmov %vm22122_vm0 }
 0x457   : > { %v16028_v15 = vpop.f32.mrb[181].mxu1 }
 0x458   : > { %17178 = vmatmul.mubr.bf16.vlgmr.msra.gmra.mrb[144].mxu0 %v20983_v49  ;;  %v16029_v9 = vadd.f32 %v16028_v15, %v16027_v63  ;;  %v16030_v33 = vpop.f32.mrb[182].mxu1  ;;  %v18599_v63 = vld [vmem:[#allocation8 + $0x68] sm:$0xff]   ;;  %v8126_v15 = vsel %vm22174_vm12, %v8119_v47, %v8125_v26  ;;  %v18694_v47 = vld [vmem:[#allocation9 + $0x50] ss:$8 sps:$4 sm:$0xff]   ;;  %vm22189_vm12 = vmmov %vm22122_vm0 }
 0x459   : > { %17181 = vmatprep.mubr.bf16.mxu0 %v21000_v56  ;;  %16046 = vmatpush3.bf16.msra.mxu0 %v18574_v43  ;;  %v16031_v60 = vpop.f32.mrb[183].mxu1  ;;  %v18578_v56 = vld [vmem:[#allocation8 + $0xd0] sm:$0xff]   ;;  %v8133_v43 = vrot.slane %v8045_v18, 4  ;;  %v18622_v18 = vld [vmem:[#allocation8 + $0x240] sm:$0xff]  }
 0x45a   : > { %16047 = vmatprep.subr.bf16.mxu0 %v18575_v41  ;;  %v16032_v27 = vadd.f32 %v16031_v60, %v16030_v33  ;;  %v21071_v14 = vadd.f32 %v21041_v12, %v16029_v9  ;;  %v18585_v12 = vld [vmem:[#allocation8 + $0x130] sm:$0xff]   ;;  %v18598_v41 = vld [vmem:[#allocation8 + $0x20] sm:$0xff]   ;;  %v8044_v33 = vld [vmem:[#allocation2 + $0xd8] sm:$0xf] }
 0x45b   : > { %v8134_v9 = vsel %vm22175_vm2, %v8127_v20, %v8133_v43  ;;  %v18601_v60 = vld [vmem:[#allocation8 + $0x70] sm:$0xff]   ;;  %v8131_v29 = vrot.slane %v8044_v33, 4  ;;  %v18623_v43 = vld [vmem:[#allocation8 + $0x288] sm:$0xff]   ;;  %vm22190_vm2 = vmmov %vm22122_vm0 }
 0x45c   : > { %v21075_v49 = vadd.f32 %v21044_v0, %v16032_v27  ;;  %v8041_v0 = vld [vmem:[#allocation2 + $0x78] sm:$0xf0]  ;;  %v18626_v33 = vld [vmem:[#allocation8 + $0x250] sm:$0xff]  }
 0x45d   : > { %16048 = vmatpush3.bf16.msra.mxu0 %v18576_v31  ;;  %v8110_v46 = vrot.slane %v8041_v0, 4  ;;  %v18600_v31 = vld [vmem:[#allocation8 + $0x28] sm:$0xff]   ;;  %v18603_v27 = vld [vmem:[#allocation8 + $0x78] sm:$0xff]   ;;  %v8132_v21 = vsel %vm22176_vm11, %v8125_v26, %v8131_v29  ;;  %vm22191_vm11 = vmmov %vm22122_vm0 }
 0x45e   : > { %16049 = vmatprep.subr.bf16.mxu0 %v18577_v58  ;;  %v18602_v58 = vld [vmem:[#allocation8 + $0x30] sm:$0xff]   ;;  %v18679_v0 = vld [vmem:[#allocation9 + $0x20] ss:$8 sps:$4 sm:$0xff]   ;;  %v18701_v26 = vld [vmem:[#allocation9 + $0x64] ss:$8 sps:$4 sm:$0xff]  }
 0x45f   : > { %v8112_v45 = vsel %vm22170_vm5, %v8110_v46, %v8111_v59  ;;  %v18612_v46 = vld [vmem:[#allocation8 + $0x198] sm:$0xff]   ;;  %v18631_v29 = vld [vmem:[#allocation8 + $0x2a8] sm:$0xff]   ;;  %vm22185_vm5 = vmmov %vm22122_vm0 }
 0x460   : > { %17182 = vmatmul.mubr.bf16.gmra.mrb[148].mxu0 %v7329_v61  ;;  %v18606_v61 = vld [vmem:[#allocation8 + $0x180] sm:$0xff]   ;;  %v18684_v59 = vld [vmem:[#allocation9 + $0x30] ss:$8 sps:$4 sm:$0xff]   ;;  %v18696_v20 = vld [vmem:[#allocation9 + $0x54] ss:$8 sps:$4 sm:$0xff]  }
 0x461   : > { %16050 = vmatpush3.bf16.msra.mxu0 %v18578_v56  ;;  %8325 = vmatprep.mubr.bf16.mxu0 %v8115_v40  ;;  %v18604_v56 = vld [vmem:[#allocation8 + $0x38] sm:$0xff]   ;;  %v18669_v40 = vld [vmem:[#allocation9] ss:$8 sps:$4 sm:$0xff]  }
 0x462   : > { %16051 = vmatprep.subr.bf16.mxu0 %v18579_v4  ;;  %v18605_v4 = vld [vmem:[#allocation8 + $0x1c0] sm:$0xff]  }
 0x465   : > { %16052 = vmatpush3.bf16.msra.mxu0 %v18580_v25  ;;  %v18671_v25 = vld [vmem:[#allocation9 + $0x4] ss:$8 sps:$4 sm:$0xff]  }
 0x466   : > { %16053 = vmatprep.subr.bf16.mxu0 %v18581_v24  ;;  %v18607_v24 = vld [vmem:[#allocation8 + $0x1c8] sm:$0xff]   ;;  %7795 = vmatprep.subr.bf16.mxu1 %v18671_v25  ;;  %v9030_v25 = vld [vmem:[#allocation2 + $0xf0] sm:$0xff] }
 0x467   : > { %7796 = vmatpush1.bf16.msra.mxu1 %v18669_v40  ;;  %v18639_v40 = vld [vmem:[#allocation8 + $0x348] sm:$0xff]  }
 0x469   : > { %16054 = vmatpush3.bf16.msra.mxu0 %v18582_v10  ;;  %v7981_v10 = vld [vmem:[#allocation2 + $0x78] sm:$0xff] }
 0x46a   : > { %16055 = vmatprep.subr.bf16.mxu0 %v18583_v36  ;;  %v18608_v36 = vld [vmem:[#allocation8 + $0x188] sm:$0xff]  }
 0x46d   : > { %16056 = vmatpush3.bf16.msra.mxu0 %v18584_v35  ;;  %v18674_v35 = vld [vmem:[#allocation9 + $0x10] ss:$8 sps:$4 sm:$0xff]  }
 0x46e   : > { %16057 = vmatprep.subr.bf16.mxu0 %v18585_v12  ;;  %v18676_v12 = vld [vmem:[#allocation9 + $0x14] ss:$8 sps:$4 sm:$0xff]  }
 0x46f   : > { %7797 = vmatprep.subr.bf16.mxu1 %v18676_v12  ;;  %v18643_v12 = vld [vmem:[#allocation8 + $0x358] sm:$0xff]  }
 0x470   : > { %7798 = vmatpush1.bf16.msra.mxu1 %v18674_v35  ;;  %v18642_v35 = vld [vmem:[#allocation8 + $0x310] sm:$0xff]  }
 0x471   : > { %16058 = vmatpush3.bf16.msra.mxu0 %v18586_v22  ;;  %v18609_v22 = vld [vmem:[#allocation8 + $0x1d0] sm:$0xff]  }
 0x472   : > { %16059 = vmatprep.subr.bf16.mxu0 %v18587_v55  ;;  %v18610_v55 = vld [vmem:[#allocation8 + $0x190] sm:$0xff]  }
 0x475   : > { %16060 = vmatpush3.bf16.msra.mxu0 %v18588_v52  ;;  %v18681_v52 = vld [vmem:[#allocation9 + $0x24] ss:$8 sps:$4 sm:$0xff]  }
 0x476   : > { %16097 = vmatprep.subr.bf16.mxu0 %v18589_v50  ;;  %v18611_v50 = vld [vmem:[#allocation8 + $0x1d8] sm:$0xff]   ;;  %7799 = vmatprep.subr.bf16.mxu1 %v18681_v52  ;;  %v18645_v52 = vld [vmem:[#allocation8 + $0x360] sm:$0xff]  }
 0x477   : > { %7800 = vmatpush1.bf16.msra.mxu1 %v18679_v0  ;;  %v18644_v0 = vld [vmem:[#allocation8 + $0x318] sm:$0xff]  }
 0x478   : > { %8326 = vmatmul.mubr.bf16.vlgmr.msra.gmra.mrb[152].mxu0 %v8112_v45  ;;  %7801 = vmatprep.subr.bf16.mxu1 %v18686_v37  ;;  %v18689_v45 = vld [vmem:[#allocation9 + $0x40] ss:$8 sps:$4 sm:$0xff]  }
 0x479   : > { %8333 = vmatprep.mubr.bf16.mxu0 %v8122_v11  ;;  %16098 = vmatpush3.bf16.msra.mxu0 %v18590_v42  ;;  %v18613_v42 = vld [vmem:[#allocation8 + $0x1e0] sm:$0xff]  }
 0x47a   : > { %16099 = vmatprep.subr.bf16.mxu0 %v18591_v38  ;;  %v18614_v38 = vld [vmem:[#allocation8 + $0x1a0] sm:$0xff]  }
 0x47b   : > { %7802 = vmatpush1.bf16.msra.mxu1 %v18684_v59  ;;  %v18691_v11 = vld [vmem:[#allocation9 + $0x44] ss:$8 sps:$4 sm:$0xff]  }
 0x47c   : > { %7803 = vmatprep.subr.bf16.mxu1 %v18691_v11  ;;  %v21124_v59 = vld [vmem:[#allocation2 + $0x120] sm:$0xff] }
 0x47d   : > { %16100 = vmatpush3.bf16.msra.mxu0 %v18592_v5  ;;  %v18615_v5 = vld [vmem:[#allocation8 + $0x1e8] sm:$0xff]   ;;  %v21127_v37 = vld [vmem:[#allocation2 + $0x140] sm:$0xff] }
 0x47e   : > { %16101 = vmatprep.subr.bf16.mxu0 %v18593_v48  ;;  %v18616_v48 = vld [vmem:[#allocation8 + $0x1a8] sm:$0xff]  }
 0x47f   : > { %7804 = vmatpush1.bf16.msra.mxu1 %v18689_v45  ;;  %v18649_v45 = vld [vmem:[#allocation8 + $0x370] sm:$0xff]  }
 0x480   : > { %8334 = vmatmul.mubr.bf16.gmra.mrb[156].mxu0 %v8120_v30  ;;  %7805 = vmatprep.subr.bf16.mxu1 %v18696_v20  ;;  %v18619_v30 = vld [vmem:[#allocation8 + $0x1f8] sm:$0xff]  }
 0x481   : > { %8341 = vmatprep.mubr.bf16.mxu0 %v8128_v8  ;;  %16102 = vmatpush3.bf16.msra.mxu0 %v18594_v32  ;;  %v18617_v32 = vld [vmem:[#allocation8 + $0x1f0] sm:$0xff]   ;;  %v18620_v8 = vld [vmem:[#allocation8 + $0x1b8] sm:$0xff]  }
 0x482   : > { %16103 = vmatprep.subr.bf16.mxu0 %v18595_v1  ;;  %v18618_v1 = vld [vmem:[#allocation8 + $0x1b0] sm:$0xff]   ;;  %v21131_v20 = vld [vmem:[#allocation2 + $0x138] sm:$0xff] }
 0x483   : > { %7806 = vmatpush1.bf16.msra.mxu1 %v18694_v47  ;;  %v18651_v47 = vld [vmem:[#allocation8 + $0x378] sm:$0xff]  }
 0x484   : > { %7807 = vmatprep.subr.bf16.mxu1 %v18701_v26  ;;  %v18654_v26 = vld [vmem:[#allocation8 + $0x3c0] sm:$0xff]  }
 0x485   : > { %16104 = vmatpush3.bf16.msra.mxu0 %v18596_v44  ;;  %v18621_v44 = vld [vmem:[#allocation8 + $0x280] sm:$0xff]  }
 0x486   : > { %16105 = vmatprep.subr.bf16.mxu0 %v18597_v3  ;;  %v18699_v3 = vld [vmem:[#allocation9 + $0x60] ss:$8 sps:$4 sm:$0xff]  }
 0x487   : > { %7808 = vmatpush1.bf16.msra.mxu1 %v18699_v3 }
 0x488   : > { %8342 = vmatmul.mubr.bf16.gmra.mrb[160].mxu0 %v8126_v15  ;;  %v18624_v15 = vld [vmem:[#allocation8 + $0x248] sm:$0xff]  }
 0x489   : > { %8349 = vmatprep.mubr.bf16.mxu0 %v8134_v9  ;;  %16106 = vmatpush3.bf16.msra.mxu0 %v18598_v41  ;;  %v18706_v41 = vld [vmem:[#allocation9 + $0x74] ss:$8 sps:$4 sm:$0xff]   ;;  %v21109_v9 = vld [vmem:[#allocation8 + $0x140] sm:$0xff]  }
 0x48a   : > { %16107 = vmatprep.subr.bf16.mxu0 %v18599_v63  ;;  %v18704_v63 = vld [vmem:[#allocation9 + $0x70] ss:$8 sps:$4 sm:$0xff]   ;;  %7809 = vmatprep.subr.bf16.mxu1 %v18706_v41 }
 0x48b   : > { %7810 = vmatpush1.bf16.msra.mxu1 %v18704_v63 }
 0x48c   : > { %17185 = vmatprep.subr.bf16.mxu1 %v21109_v9 }
 0x48d   : > { %16108 = vmatpush3.bf16.msra.mxu0 %v18600_v31  ;;  %v18627_v31 = vld [vmem:[#allocation8 + $0x298] sm:$0xff]  }
 0x48e   : > { %16109 = vmatprep.subr.bf16.mxu0 %v18601_v60  ;;  %v18630_v60 = vld [vmem:[#allocation8 + $0x260] sm:$0xff]  }
 0x490   : > { %8350 = vmatmul.mubr.bf16.gmra.mrb[164].mxu0 %v8132_v21  ;;  %v18633_v21 = vld [vmem:[#allocation8 + $0x2b0] sm:$0xff]  }
 0x491   : > { %16110 = vmatpush3.bf16.msra.mxu0 %v18602_v58  ;;  %8599 = vmatprep.mubr.bf16.mxu0 %v7982_v6  ;;  %v8698_v58 = vld [vmem:[#allocation2 + $0xe0] sm:$0xff]  ;;  %v8697_v6 = vld [vmem:[#allocation2 + $0xd8] sm:$0xff] }
 0x492   : > { %16111 = vmatprep.subr.bf16.mxu0 %v18603_v27  ;;  %v18632_v27 = vld [vmem:[#allocation8 + $0x268] sm:$0xff]  }
 0x495   : > { %16112 = vmatpush3.bf16.msra.mxu0 %v18604_v56  ;;  %v9031_v56 = vld [vmem:[#allocation2 + $0xf8] sm:$0xff] }
 0x496   : > { %16149 = vmatprep.subr.bf16.mxu0 %v18605_v4  ;;  %v18636_v4 = vld [vmem:[#allocation8 + $0x278] sm:$0xff]  }
 0x498   : > { %8600 = vmatmul.mubr.bf16.vlgmr.msra.gmra.mrb[168].mxu0 %v7981_v10  ;;  %v18640_v10 = vld [vmem:[#allocation8 + $0x308] sm:$0xff]  }
 0x499   : > { %8607 = vmatprep.mubr.bf16.mxu0 %v21068_v23  ;;  %16150 = vmatpush3.bf16.msra.mxu0 %v18606_v61  ;;  %v18637_v61 = vld [vmem:[#allocation8 + $0x340] sm:$0xff]  }
 0x49a   : > { %16151 = vmatprep.subr.bf16.mxu0 %v18607_v24  ;;  %v21115_v24 = vld [vmem:[#allocation2 + $0x110] sm:$0xff] }
 0x49d   : > { %16152 = vmatpush3.bf16.msra.mxu0 %v18608_v36  ;;  %v18641_v36 = vld [vmem:[#allocation8 + $0x350] sm:$0xff]  }
 0x49e   : > { %16153 = vmatprep.subr.bf16.mxu0 %v18609_v22  ;;  %v21118_v22 = vld [vmem:[#allocation2 + $0x108] sm:$0xff] }
 0x4a0   : > { %8608 = vmatmul.mubr.bf16.gmra.mrb[172].mxu0 %v21078_v51 }
 0x4a1   : > { %8615 = vmatprep.mubr.bf16.mxu0 %v21080_v54  ;;  %16154 = vmatpush3.bf16.msra.mxu0 %v18610_v55  ;;  %v21121_v55 = vld [vmem:[#allocation2 + $0x128] sm:$0xff] }
 0x4a2   : > { %16155 = vmatprep.subr.bf16.mxu0 %v18611_v50  ;;  %v18646_v50 = vld [vmem:[#allocation8 + $0x320] sm:$0xff]   ;;  %v9461_v3 = vrot.slane %v21121_v55, 4 }
 0x4a5   : > { %16156 = vmatpush3.bf16.msra.mxu0 %v18612_v46  ;;  %v18647_v46 = vld [vmem:[#allocation8 + $0x368] sm:$0xff]  }
 0x4a6   : > { %16157 = vmatprep.subr.bf16.mxu0 %v18613_v42  ;;  %v18648_v42 = vld [vmem:[#allocation8 + $0x328] sm:$0xff]  }
 0x4a8   : > { %8616 = vmatmul.mubr.bf16.gmra.mrb[176].mxu0 %v21086_v2 }
 0x4a9   : > { %8623 = vmatprep.mubr.bf16.mxu0 %v21088_v16  ;;  %16158 = vmatpush3.bf16.msra.mxu0 %v18614_v38  ;;  %v9373_v38 = vld [vmem:[#allocation2 + $0xf8] sm:$0xf0] }
 0x4aa   : > { %16159 = vmatprep.subr.bf16.mxu0 %v18615_v5  ;;  %v9453_v11 = vrot.slane %v9373_v38, 4  ;;  %v9454_v5 = vrot.slane %v21115_v24, 4  ;;  %v18682_v38 = vld [vmem:[#allocation8 + $0x4d0] sm:$0xff]  }
 0x4ac   : > { %v9462_v63 = vsel %vm22179_vm14, %v9454_v5, %v9461_v3  ;;  %vm22194_vm14 = vmmov %vm22122_vm0 }
 0x4ad   : > { %16160 = vmatpush3.bf16.msra.mxu0 %v18616_v48  ;;  %v18650_v48 = vld [vmem:[#allocation8 + $0x330] sm:$0xff]  }
 0x4ae   : > { %16161 = vmatprep.subr.bf16.mxu0 %v18617_v32  ;;  %v9455_v32 = vsel %vm22177_vm9, %v9453_v11, %v9454_v5  ;;  %v18687_v11 = vld [vmem:[#allocation8 + $0x4d8] sm:$0xff]   ;;  %v18692_v5 = vld [vmem:[#allocation8 + $0x4e0] sm:$0xff]   ;;  %vm22192_vm9 = vmmov %vm22122_vm0 }
 0x4b0   : > { %8624 = vmatmul.mubr.bf16.gmra.mrb[180].mxu0 %v21094_v28 }
 0x4b1   : > { %16162 = vmatpush3.bf16.msra.mxu0 %v18618_v1  ;;  %8924 = vmatprep.mubr.bf16.mxu0 %v21068_v23  ;;  %v18625_v23 = vld [vmem:[#allocation8 + $0x290] sm:$0xff]  }
 0x4b2   : > { %16163 = vmatprep.subr.bf16.mxu0 %v18619_v30  ;;  %v9372_v1 = vld [vmem:[#allocation2 + $0xf0] sm:$0xf0]  ;;  %v18652_v30 = vld [vmem:[#allocation8 + $0x338] sm:$0xff]  }
 0x4b5   : > { %16164 = vmatpush3.bf16.msra.mxu0 %v18620_v8  ;;  %v18653_v8 = vld [vmem:[#allocation8 + $0x400] sm:$0xff]  }
 0x4b6   : > { %16201 = vmatprep.subr.bf16.mxu0 %v18621_v44  ;;  %v9450_v44 = vrot.slane %v9372_v1, 4 }
 0x4b8   : > { %8925 = vmatmul.mubr.bf16.vlgmr.msra.gmra.mrb[184].mxu0 %v21078_v51  ;;  %v18628_v51 = vld [vmem:[#allocation8 + $0x258] sm:$0xff]  }
 0x4b9   : > { %8932 = vmatprep.mubr.bf16.mxu0 %v21080_v54  ;;  %16202 = vmatpush3.bf16.msra.mxu0 %v18622_v18  ;;  %v18629_v54 = vld [vmem:[#allocation8 + $0x2a0] sm:$0xff]   ;;  %v9451_v18 = vrot.slane %v21118_v22, 4 }
 0x4ba   : > { %16203 = vmatprep.subr.bf16.mxu0 %v18623_v43  ;;  %v18655_v43 = vld [vmem:[#allocation8 + $0x408] sm:$0xff]  }
 0x4bb   : > { %v9452_v41 = vsel %vm22178_vm13, %v9450_v44, %v9451_v18  ;;  %vm22193_vm13 = vmmov %vm22122_vm0 }
 0x4bd   : > { %16204 = vmatpush3.bf16.msra.mxu0 %v18624_v15  ;;  %v18656_v15 = vld [vmem:[#allocation8 + $0x3c8] sm:$0xff]  }
 0x4be   : > { %16205 = vmatprep.subr.bf16.mxu0 %v18625_v23  ;;  %v18657_v23 = vld [vmem:[#allocation8 + $0x410] sm:$0xff]  }
 0x4c0   : > { %8933 = vmatmul.mubr.bf16.gmra.mrb[188].mxu0 %v21086_v2  ;;  %v18634_v2 = vld [vmem:[#allocation8 + $0x270] sm:$0xff]  }
 0x4c1   : > { %8940 = vmatprep.mubr.bf16.mxu0 %v21088_v16  ;;  %16206 = vmatpush3.bf16.msra.mxu0 %v18626_v33  ;;  %v18635_v16 = vld [vmem:[#allocation8 + $0x2b8] sm:$0xff]   ;;  %v9459_v33 = vrot.slane %v21124_v59, 4 }
 0x4c2   : > { %16207 = vmatprep.subr.bf16.mxu0 %v18627_v31  ;;  %v9467_v31 = vrot.slane %v21127_v37, 4 }
 0x4c5   : > { %16208 = vmatpush3.bf16.msra.mxu0 %v18628_v51  ;;  %v18658_v51 = vld [vmem:[#allocation8 + $0x3d0] sm:$0xff]  }
 0x4c6   : > { %16209 = vmatprep.subr.bf16.mxu0 %v18629_v54  ;;  %v18659_v54 = vld [vmem:[#allocation8 + $0x418] sm:$0xff]  }
 0x4c8   : > { %8941 = vmatmul.mubr.bf16.gmra.mrb[192].mxu0 %v21094_v28  ;;  %v18638_v28 = vld [vmem:[#allocation8 + $0x300] sm:$0xff]  }
 0x4c9   : > { %8948 = vmatprep.mubr.bf16.mxu0 %v8698_v58  ;;  %16210 = vmatpush3.bf16.msra.mxu0 %v18630_v60  ;;  %v9460_v60 = vsel %vm22180_vm7, %v9451_v18, %v9459_v33  ;;  %v18660_v58 = vld [vmem:[#allocation8 + $0x3d8] sm:$0xff]   ;;  %v18703_v18 = vld [vmem:[#allocation8 + $0x4b0] sm:$0xff]   ;;  %vm22195_vm7 = vmmov %vm22122_vm0 }
 0x4ca   : > { %16211 = vmatprep.subr.bf16.mxu0 %v18631_v29  ;;  %v9468_v29 = vsel %vm22181_vm1, %v9461_v3, %v9467_v31  ;;  %vm22196_vm1 = vmmov %vm22122_vm0 }
 0x4cd   : > { %16212 = vmatpush3.bf16.msra.mxu0 %v18632_v27  ;;  %v9385_v27 = vld [vmem:[#allocation2 + $0x158] sm:$0xf] }
 0x4ce   : > { %16213 = vmatprep.subr.bf16.mxu0 %v18633_v21  ;;  %v18661_v21 = vld [vmem:[#allocation8 + $0x420] sm:$0xff]  }
 0x4d0   : > { %8949 = vmatmul.mubr.bf16.gmra.mrb[196].mxu0 %v8697_v6  ;;  %v18662_v6 = vld [vmem:[#allocation8 + $0x3e0] sm:$0xff]  }
 0x4d1   : > { %16214 = vmatpush3.bf16.msra.mxu0 %v18634_v2  ;;  %9266 = vmatprep.mubr.bf16.mxu0 %v9031_v56  ;;  %v9465_v2 = vrot.slane %v21131_v20, 4  ;;  %v18663_v56 = vld [vmem:[#allocation8 + $0x428] sm:$0xff]  }
 0x4d2   : > { %16215 = vmatprep.subr.bf16.mxu0 %v18635_v16  ;;  %v9473_v16 = vrot.slane %v9385_v27, 4 }
 0x4d5   : > { %16216 = vmatpush3.bf16.msra.mxu0 %v18636_v4  ;;  %v9466_v4 = vsel %vm22182_vm3, %v9459_v33, %v9465_v2  ;;  %v10105_v33 = vld [vmem:[#allocation2 + $0x170] sm:$0xff]  ;;  %vm22197_vm3 = vmmov %vm22122_vm0 }
 0x4d6   : > { %16253 = vmatprep.subr.bf16.mxu0 %v18637_v61  ;;  %v9474_v61 = vsel %vm22183_vm15, %v9467_v31, %v9473_v16  ;;  %vm22198_vm15 = vmmov %vm22122_vm0 }
 0x4d8   : > { %9267 = vmatmul.mubr.bf16.vlgmr.msra.gmra.mrb[200].mxu0 %v9030_v25  ;;  %v18665_v25 = vld [vmem:[#allocation8 + $0x430] sm:$0xff]  }
 0x4d9   : > { %9274 = vmatprep.mubr.bf16.mxu0 %v21115_v24  ;;  %16254 = vmatpush3.bf16.msra.mxu0 %v18638_v28  ;;  %v9384_v28 = vld [vmem:[#allocation2 + $0x150] sm:$0xf] }
 0x4da   : > { %16255 = vmatprep.subr.bf16.mxu0 %v18639_v40  ;;  %v18664_v40 = vld [vmem:[#allocation8 + $0x3e8] sm:$0xff]  }
 0x4dd   : > { %16256 = vmatpush3.bf16.msra.mxu0 %v18640_v10  ;;  %v9471_v10 = vrot.slane %v9384_v28, 4  ;;  %v18712_v28 = vld [vmem:[#allocation8 + $0x148] sm:$0xff]  }
 0x4de   : > { %16257 = vmatprep.subr.bf16.mxu0 %v18641_v36  ;;  %v18666_v36 = vld [vmem:[#allocation8 + $0x3f0] sm:$0xff]  }
 0x4e0   : > { %9275 = vmatmul.mubr.bf16.gmra.mrb[204].mxu0 %v21118_v22 }
 0x4e1   : > { %9282 = vmatprep.mubr.bf16.mxu0 %v21121_v55  ;;  %16258 = vmatpush3.bf16.msra.mxu0 %v18642_v35  ;;  %v18667_v35 = vld [vmem:[#allocation8 + $0x438] sm:$0xff]  }
 0x4e2   : > { %16259 = vmatprep.subr.bf16.mxu0 %v18643_v12  ;;  %v9472_v12 = vsel %vm22122_vm0, %v9465_v2, %v9471_v10 }
 0x4e5   : > { %16260 = vmatpush3.bf16.msra.mxu0 %v18644_v0  ;;  %v18668_v0 = vld [vmem:[#allocation8 + $0x3f8] sm:$0xff]  }
 0x4e6   : > { %16261 = vmatprep.subr.bf16.mxu0 %v18645_v52  ;;  %v18672_v52 = vld [vmem:[#allocation8 + $0x4c0] sm:$0xff]  }
 0x4e8   : > { %9283 = vmatmul.mubr.bf16.gmra.mrb[208].mxu0 %v21124_v59 }
 0x4e9   : > { %9290 = vmatprep.mubr.bf16.mxu0 %v21127_v37  ;;  %16262 = vmatpush3.bf16.msra.mxu0 %v18646_v50  ;;  %v18673_v50 = vld [vmem:[#allocation8 + $0x480] sm:$0xff]  }
 0x4ea   : > { %16263 = vmatprep.subr.bf16.mxu0 %v18647_v46  ;;  %v18677_v46 = vld [vmem:[#allocation8 + $0x4c8] sm:$0xff]  }
 0x4ed   : > { %16264 = vmatpush3.bf16.msra.mxu0 %v18648_v42  ;;  %v18678_v42 = vld [vmem:[#allocation8 + $0x488] sm:$0xff]  }
 0x4ee   : > { %16265 = vmatprep.subr.bf16.mxu0 %v18649_v45  ;;  %v18683_v45 = vld [vmem:[#allocation8 + $0x490] sm:$0xff]  }
 0x4f0   : > { %9291 = vmatmul.mubr.bf16.gmra.mrb[212].mxu0 %v21131_v20 }
 0x4f1   : > { %16266 = vmatpush3.bf16.msra.mxu0 %v18650_v48  ;;  %9665 = vmatprep.mubr.bf16.mxu0 %v9455_v32  ;;  %v9772_v48 = vld [vmem:[#allocation2 + $0x158] sm:$0xff]  ;;  %v18702_v32 = vld [vmem:[#allocation8 + $0x4f0] sm:$0xff]  }
 0x4f2   : > { %16267 = vmatprep.subr.bf16.mxu0 %v18651_v47  ;;  %v18698_v47 = vld [vmem:[#allocation8 + $0x4a8] sm:$0xff]  }
 0x4f5   : > { %16268 = vmatpush3.bf16.msra.mxu0 %v18652_v30 }
 0x4f6   : > { %16305 = vmatprep.subr.bf16.mxu0 %v18653_v8 }
 0x4f8   : > { %9666 = vmatmul.mubr.bf16.vlgmr.msra.gmra.mrb[216].mxu0 %v9452_v41 }
 0x4f9   : > { %9673 = vmatprep.mubr.bf16.mxu0 %v9462_v63  ;;  %16306 = vmatpush3.bf16.msra.mxu0 %v18654_v26 }
 0x4fa   : > { %16307 = vmatprep.subr.bf16.mxu0 %v18655_v43  ;;  %v18707_v43 = vld [vmem:[#allocation8 + $0x4f8] sm:$0xff]  }
 0x4fd   : > { %16308 = vmatpush3.bf16.msra.mxu0 %v18656_v15  ;;  %v9771_v15 = vld [vmem:[#allocation2 + $0x150] sm:$0xff] }
 0x4fe   : > { %16309 = vmatprep.subr.bf16.mxu0 %v18657_v23 }
 0x500   : > { %9674 = vmatmul.mubr.bf16.gmra.mrb[220].mxu0 %v9460_v60 }
 0x501   : > { %9681 = vmatprep.mubr.bf16.mxu0 %v9468_v29  ;;  %16310 = vmatpush3.bf16.msra.mxu0 %v18658_v51 }
 0x502   : > { %16311 = vmatprep.subr.bf16.mxu0 %v18659_v54  ;;  %v18710_v54 = vld [vmem:[#allocation8 + $0x580] sm:$0xff]  }
 0x505   : > { %16312 = vmatpush3.bf16.msra.mxu0 %v18660_v58 }
 0x506   : > { %16313 = vmatprep.subr.bf16.mxu0 %v18661_v21 }
 0x508   : > { %9682 = vmatmul.mubr.bf16.gmra.mrb[224].mxu0 %v9466_v4 }
 0x509   : > { %9689 = vmatprep.mubr.bf16.mxu0 %v9474_v61  ;;  %16314 = vmatpush3.bf16.msra.mxu0 %v18662_v6  ;;  %v18711_v6 = vld [vmem:[#allocation8 + $0x540] sm:$0xff]  }
 0x50a   : > { %16315 = vmatprep.subr.bf16.mxu0 %v18663_v56 }
 0x50d   : > { %16316 = vmatpush3.bf16.msra.mxu0 %v18664_v40  ;;  %v18713_v40 = vld [vmem:[#allocation8 + $0x588] sm:$0xff]  }
 0x50e   : > { %16317 = vmatprep.subr.bf16.mxu0 %v18665_v25 }
 0x510   : > { %9690 = vmatmul.mubr.bf16.gmra.mrb[228].mxu0 %v9472_v12  ;;  %v18715_v12 = vld [vmem:[#allocation8 + $0x150] sm:$0xff]  }
 0x511   : > { %16318 = vmatpush3.bf16.msra.mxu0 %v18666_v36  ;;  %9998 = vmatprep.mubr.bf16.mxu0 %v21115_v24  ;;  %v18688_v24 = vld [vmem:[#allocation8 + $0x498] sm:$0xff]  }
 0x512   : > { %16319 = vmatprep.subr.bf16.mxu0 %v18667_v35 }
 0x515   : > { %16320 = vmatpush3.bf16.msra.mxu0 %v18668_v0 }
 0x516   : > { %16357 = vmatprep.subr.bf16.mxu0 %v18672_v52 }
 0x518   : > { %9999 = vmatmul.mubr.bf16.vlgmr.msra.gmra.mrb[232].mxu0 %v21118_v22  ;;  %v18693_v22 = vld [vmem:[#allocation8 + $0x4a0] sm:$0xff]  }
 0x519   : > { %10006 = vmatprep.mubr.bf16.mxu0 %v21121_v55  ;;  %16358 = vmatpush3.bf16.msra.mxu0 %v18673_v50  ;;  %v18697_v55 = vld [vmem:[#allocation8 + $0x4e8] sm:$0xff]   ;;  %v18716_v50 = vld [vmem:[#allocation8 + $0x590] sm:$0xff]  }
 0x51a   : > { %16359 = vmatprep.subr.bf16.mxu0 %v18677_v46 }
 0x51d   : > { %16360 = vmatpush3.bf16.msra.mxu0 %v18678_v42  ;;  %v18717_v42 = vld [vmem:[#allocation8 + $0x550] sm:$0xff]  }
 0x51e   : > { %16361 = vmatprep.subr.bf16.mxu0 %v18682_v38 }
 0x520   : > { %10007 = vmatmul.mubr.bf16.gmra.mrb[236].mxu0 %v21124_v59  ;;  %v14583_v59 = vld [vmem:[%s21926_s4] ss:$0 sm:$0xff] }
 0x521   : > { %10014 = vmatprep.mubr.bf16.mxu0 %v21127_v37  ;;  %16362 = vmatpush3.bf16.msra.mxu0 %v18683_v45  ;;  %v18718_v45 = vld [vmem:[#allocation8 + $0x158] sm:$0xff]  }
 0x522   : > { %16363 = vmatprep.subr.bf16.mxu0 %v18687_v11  ;;  %v18719_v11 = vld [vmem:[#allocation8 + $0x598] sm:$0xff]  }
 0x525   : > { %16364 = vmatpush3.bf16.msra.mxu0 %v18688_v24  ;;  %v21169_v24 = vld [vmem:[#allocation2 + $0x180] sm:$0xff] }
 0x526   : > { %16365 = vmatprep.subr.bf16.mxu0 %v18692_v5  ;;  %v21172_v5 = vld [vmem:[#allocation2 + $0x1a0] sm:$0xff] }
 0x528   : > { %10015 = vmatmul.mubr.bf16.gmra.mrb[240].mxu0 %v21131_v20 }
 0x529   : > { %10022 = vmatprep.mubr.bf16.mxu0 %v9772_v48  ;;  %16366 = vmatpush3.bf16.msra.mxu0 %v18693_v22  ;;  %v18720_v22 = vld [vmem:[#allocation8 + $0x558] sm:$0xff]   ;;  %v18722_v48 = vld [vmem:[#allocation8 + $0x5a0] sm:$0xff]  }
 0x52a   : > { %16367 = vmatprep.subr.bf16.mxu0 %v18697_v55  ;;  %v18721_v55 = vld [vmem:[#allocation8 + $0x160] sm:$0xff]  }
 0x52b   : > { %v17179_v1 = vpop.f32.mrb[144].mxu0 }
 0x52c   : > { %v17601_v37 = vadd.f32 %v21055_v19, %v17179_v1  ;;  %v7621_v30 = vpop.f32.mrb[145].mxu0  ;;  %v18725_v1 = vld [vmem:[#allocation8 + $0x5a8] sm:$0xff]  }
 0x52d   : > { %v17610_v8 = vadd.f32 %v21049_v53, %v7621_v30  ;;  %v17180_v44 = vpop.f32.mrb[146].mxu0  ;;  %16368 = vmatpush3.bf16.msra.mxu0 %v18698_v47  ;;  %v18708_v53 = vld [vmem:[#allocation8 + $0x4b8] sm:$0xff]   ;;  %v18723_v47 = vld [vmem:[#allocation8 + $0x560] sm:$0xff]  }
 0x52e   : > { %v7669_v20 = vadd.f32 %v17601_v37, %v14583_v59  ;;  %v17619_v3 = vadd.f32 %v21058_v17, %v17180_v44  ;;  %v7624_v26 = vpop.f32.mrb[147].mxu0  ;;  %16369 = vmatprep.subr.bf16.mxu0 %v18702_v32  ;;  %v18724_v32 = vld [vmem:[#allocation8 + $0x168] sm:$0xff]   ;;  %v21179_v37 = vld [vmem:[#allocation2 + $0x1b8] sm:$0xff]  ;;  %v21181_v30 = vld [vmem:[#allocation2 + $0xa0] sm:$0xff] }
 0x52f   : > { %v7667_v41 = vadd.f32 %v17610_v8, %v14583_v59  ;;  %v17628_v63 = vadd.f32 %v21052_v13, %v7624_v26  ;;  %v8043_v8 = vld [vmem:[#allocation2 + $0x88] sm:$0xf0] }
 0x530   : > { %v7670_v23 = vadd.f32 %v17619_v3, %v14583_v59  ;;  %10023 = vmatmul.mubr.bf16.gmra.mrb[244].mxu0 %v9771_v15  ;;  %v7677_v31 = vmax.f32 %v7669_v20, 0.0  ;;  %v18726_v44 = vld [vmem:[#allocation8 + $0x568] sm:$0xff]   ;;  %v18728_v20 = vld [vmem:[#allocation8 + $0x5b0] sm:$0xff]  }
 0x531   : > { %v7668_v19 = vadd.f32 %v17628_v63, %v14583_v59  ;;  %16370 = vmatpush3.bf16.msra.mxu0 %v18703_v18  ;;  %10340 = vmatprep.mubr.bf16.mxu0 %v10105_v33  ;;  %v7675_v60 = vmax.f32 %v7667_v41, 0.0  ;;  %v18727_v18 = vld [vmem:[#allocation8 + $0x170] sm:$0xff]   ;;  %v8117_v41 = vrot.slane %v21181_v30, 4 }
 0x532   : > { %v7678_v51 = vmax.f32 %v7670_v23, 0.0  ;;  %16371 = vmatprep.subr.bf16.mxu0 %v18707_v43  ;;  %v10447_v3 = vld [vmem:[#allocation2 + $0x170] sm:$0xf0]  ;;  %v8116_v43 = vrot.slane %v8043_v8, 4  ;;  %v10541_v8 = vrot.slane %v21179_v37, 4 }
 0x533   : > { %v7676_v17 = vmax.f32 %v7668_v19, 0.0  ;;  %v17183_v29 = vpop.f32.mrb[148].mxu0  ;;  %v10527_v33 = vrot.slane %v10447_v3, 4  ;;  %v18741_v3 = vld [vmem:[#allocation8 + $0x610] sm:$0xff]  }
 0x534   : > { %v17637_v58 = vadd.f32 %v21071_v14, %v17183_v29  ;;  %v7637_v27 = vpop.f32.mrb[149].mxu0  ;;  %v7684_v21 = vpack.c.bf16 %v7678_v51, %v7677_v31  ;;  %v10104_v14 = vld [vmem:[#allocation2 + $0x168] sm:$0xff]  ;;  %v18729_v51 = vld [vmem:[#allocation8 + $0x570] sm:$0xff]   ;;  %v21192_v29 = vld [vmem:[#allocation2 + $0xb8] sm:$0xff] }
 0x535   : > { %v7683_v13 = vpack.c.bf16 %v7676_v17, %v7675_v60  ;;  %v17646_v2 = vadd.f32 %v21061_v57, %v7637_v27  ;;  %v17184_v16 = vpop.f32.mrb[150].mxu0  ;;  %16372 = vmatpush3.bf16.msra.mxu0 %v18708_v53  ;;  %v21165_v57 = vld [vmem:[#allocation2 + $0x188] sm:$0xff]  ;;  %v18730_v53 = vld [vmem:[#allocation8 + $0x178] sm:$0xff]   ;;  %v8118_v60 = vsel %vm22184_vm6, %v8116_v43, %v8117_v41  ;;  %v21196_v27 = vld [vmem:[#allocation2 + $0xd0] sm:$0xff] }
 0x536   : > { %v7673_v56 = vadd.f32 %v17637_v58, %v14583_v59  ;;  %v17655_v4 = vadd.f32 %v21075_v49, %v17184_v16  ;;  %v7640_v61 = vpop.f32.mrb[151].mxu0  ;;  %16409 = vmatprep.subr.bf16.mxu0 %v18710_v54  ;;  %v18714_v49 = vld [vmem:[#allocation8 + $0x548] sm:$0xff]   ;;  %v10528_v19 = vrot.slane %v21165_v57, 4  ;;  %v18731_v17 = vld [vmem:[#allocation8 + $0x5b8] sm:$0xff]   ;;  %v21194_v58 = vld [vmem:[#allocation2 + $0x1b0] sm:$0xff] }
 0x537   : > { %v7671_v25 = vadd.f32 %v17646_v2, %v14583_v59  ;;  %v17664_v10 = vadd.f32 %v21064_v39, %v7640_v61  ;;  %7828 = vmatmul.mubr.bf16.vlgmr.msra.gmra.mrb[184].mxu1 %v7683_v13  ;;  %v18733_v13 = vld [vmem:[#allocation8 + $0x80] sm:$0xff]   ;;  %v10446_v2 = vld [vmem:[#allocation2 + $0x168] sm:$0xf0]  ;;  %v18732_v16 = vld [vmem:[#allocation8 + $0x578] sm:$0xff]  }
 0x538   : > { %v7674_v36 = vadd.f32 %v17655_v4, %v14583_v59  ;;  %17186 = vmatpush3.bf16.msra.mxu1 %v21109_v9  ;;  %10341 = vmatmul.mubr.bf16.vlgmr.msra.gmra.mrb[248].mxu0 %v10104_v14  ;;  %v7681_v0 = vmax.f32 %v7673_v56, 0.0  ;;  %v8129_v4 = vrot.slane %v21196_v27, 4  ;;  %v18734_v61 = vld [vmem:[#allocation8 + $0x640] sm:$0xff]   ;;  %v7983_v43 = vld [vmem:[#allocation2 + $0x88] sm:$0xff]  ;;  %vm22199_vm6 = vmmov %vm22122_vm0 }
 0x539   : > { %v7672_v35 = vadd.f32 %v17664_v10, %v14583_v59  ;;  %10348 = vmatprep.mubr.bf16.mxu0 %v21165_v57  ;;  %16410 = vmatpush3.bf16.msra.mxu0 %v18711_v6  ;;  %v7679_v39 = vmax.f32 %v7671_v25, 0.0  ;;  %v21176_v59 = vld [vmem:[#allocation2 + $0x198] sm:$0xff]  ;;  %v8123_v6 = vrot.slane %v21192_v29, 4  ;;  %v10525_v25 = vrot.slane %v21169_v24, 4 }
 0x53a   : > { %v7682_v52 = vmax.f32 %v7674_v36, 0.0  ;;  %17187 = vmatprep.subr.bf16.mxu1 %v18712_v28  ;;  %16411 = vmatprep.subr.bf16.mxu0 %v18713_v40  ;;  %v10524_v40 = vrot.slane %v10446_v2, 4  ;;  %v10535_v36 = vrot.slane %v21172_v5, 4 }
 0x53b   : > { %v7680_v46 = vmax.f32 %v7672_v35, 0.0  ;;  %7837 = vmatprep.mubr.bf16.mxu1 %v22138_v7  ;;  %v18736_v35 = vld [vmem:[#allocation8 + $0x88] sm:$0xff]  }
 0x53c   : > { %17188 = vmatpush3.bf16.msra.mxu1 %v18712_v28  ;;  %v7686_v9 = vpack.c.bf16 %v7682_v52, %v7681_v0  ;;  %v18735_v0 = vld [vmem:[#allocation8 + $0x600] sm:$0xff]  }
 0x53d   : > { %16412 = vmatpush3.bf16.msra.mxu0 %v18714_v49  ;;  %17189 = vmatprep.subr.bf16.mxu1 %v18715_v12  ;;  %v7685_v38 = vpack.c.bf16 %v7680_v46, %v7679_v39  ;;  %v18737_v39 = vld [vmem:[#allocation8 + $0x648] sm:$0xff]  }
 0x53e   : > { %16413 = vmatprep.subr.bf16.mxu0 %v18716_v50  ;;  %v8130_v50 = vsel %vm22187_vm10, %v8123_v6, %v8129_v4  ;;  %v8046_v46 = vld [vmem:[#allocation2 + $0xe8] sm:$0xf]  ;;  %vm22202_vm10 = vmmov %vm22122_vm0 }
 0x53f   : > { %7838 = vmatmul.mubr.bf16.gmra.mrb[188].mxu1 %v7684_v21  ;;  %v10529_v21 = vsel %vm22185_vm5, %v10527_v33, %v10528_v19  ;;  %v18745_v33 = vld [vmem:[#allocation8 + $0xa0] sm:$0xff]   ;;  %vm22200_vm5 = vmmov %vm22122_vm0 }
 0x540   : > { %17190 = vmatpush3.bf16.msra.mxu1 %v18715_v12  ;;  %10349 = vmatmul.mubr.bf16.gmra.mrb[252].mxu0 %v21169_v24  ;;  %v8124_v12 = vsel %vm22186_vm8, %v8117_v41, %v8123_v6  ;;  %v18743_v41 = vld [vmem:[#allocation8 + $0x658] sm:$0xff]   ;;  %vm22201_vm8 = vmmov %vm22122_vm0 }
 0x541   : > { %10356 = vmatprep.mubr.bf16.mxu0 %v21172_v5  ;;  %16414 = vmatpush3.bf16.msra.mxu0 %v18717_v42  ;;  %v10536_v42 = vsel %vm22189_vm12, %v10528_v19, %v10535_v36  ;;  %v18744_v19 = vld [vmem:[#allocation8 + $0x618] sm:$0xff]   ;;  %vm22204_vm12 = vmmov %vm22122_vm0 }
 0x542   : > { %17191 = vmatprep.subr.bf16.mxu1 %v18718_v45  ;;  %16415 = vmatprep.subr.bf16.mxu0 %v18719_v11  ;;  %v8135_v11 = vrot.slane %v8046_v46, 4  ;;  %v18754_v46 = vld [vmem:[#allocation8 + $0xb8] sm:$0xff]  }
 0x543   : > { %7847 = vmatprep.mubr.bf16.mxu1 %v22138_v7 }
 0x544   : > { %17192 = vmatpush3.bf16.msra.mxu1 %v18718_v45  ;;  %v18738_v45 = vld [vmem:[#allocation8 + $0x608] sm:$0xff]  }
 0x545   : > { %16416 = vmatpush3.bf16.msra.mxu0 %v18720_v22  ;;  %17193 = vmatprep.subr.bf16.mxu1 %v18721_v55 }
 0x546   : > { %16417 = vmatprep.subr.bf16.mxu0 %v18722_v48 }
 0x547   : > { %7848 = vmatmul.mubr.bf16.gmra.mrb[192].mxu1 %v7685_v38  ;;  %v18739_v38 = vld [vmem:[#allocation8 + $0x90] sm:$0xff]  }
 0x548   : > { %17194 = vmatpush3.bf16.msra.mxu1 %v18721_v55  ;;  %10357 = vmatmul.mubr.bf16.gmra.mrb[0].mxu0 %v21176_v59  ;;  %v18740_v55 = vld [vmem:[#allocation8 + $0x650] sm:$0xff]  }
 0x549   : > { %10364 = vmatprep.mubr.bf16.mxu0 %v21179_v37  ;;  %16418 = vmatpush3.bf16.msra.mxu0 %v18723_v47  ;;  %v10533_v47 = vrot.slane %v21176_v59, 4 }
 0x54a   : > { %17195 = vmatprep.subr.bf16.mxu1 %v18724_v32  ;;  %16419 = vmatprep.subr.bf16.mxu0 %v18725_v1 }
 0x54b   : > { %v16061_v26 = vpop.f32.mrb[152].mxu0  ;;  %7857 = vmatprep.mubr.bf16.mxu1 %v22138_v7 }
 0x54c   : > { %17196 = vmatpush3.bf16.msra.mxu1 %v18724_v32  ;;  %v16062_v63 = vpop.f32.mrb[153].mxu0 }
 0x54d   : > { %v21186_v15 = vadd.f32 %v16062_v63, %v16061_v26  ;;  %v16064_v23 = vpop.f32.mrb[154].mxu0  ;;  %16420 = vmatpush3.bf16.msra.mxu0 %v18726_v44  ;;  %17197 = vmatprep.subr.bf16.mxu1 %v18727_v18  ;;  %v18742_v44 = vld [vmem:[#allocation8 + $0x98] sm:$0xff]   ;;  %v10534_v63 = vsel %vm22191_vm11, %v10525_v25, %v10533_v47  ;;  %vm22206_vm11 = vmmov %vm22122_vm0 }
 0x54e   : > { %v16065_v31 = vpop.f32.mrb[155].mxu0  ;;  %16421 = vmatprep.subr.bf16.mxu0 %v18728_v20  ;;  %v8136_v20 = vsel %vm22190_vm2, %v8129_v4, %v8135_v11  ;;  %v18755_v11 = vld [vmem:[#allocation8 + $0x678] sm:$0xff]   ;;  %vm22205_vm2 = vmmov %vm22122_vm0 }
 0x54f   : > { %v21189_v54 = vadd.f32 %v16065_v31, %v16064_v23  ;;  %7858 = vmatmul.mubr.bf16.gmra.mrb[196].mxu1 %v7686_v9  ;;  %v10526_v9 = vsel %vm22188_vm4, %v10524_v40, %v10525_v25  ;;  %v10542_v23 = vsel %vm22192_vm9, %v10535_v36, %v10541_v8  ;;  %v18751_v25 = vld [vmem:[#allocation8 + $0xb0] sm:$0xff]   ;;  %v18750_v36 = vld [vmem:[#allocation8 + $0x628] sm:$0xff]   ;;  %vm22203_vm4 = vmmov %vm22122_vm0 }
 0x550   : > { %17198 = vmatpush3.bf16.msra.mxu1 %v18727_v18  ;;  %17201 = vmatprep.mubr.bf16.mxu1 %v8118_v60  ;;  %vm22207_vm9 = vmmov %vm22122_vm0 }
 0x551   : > { %10365 = vmatmul.mubr.bf16.gmra.mrb[4].mxu0 %v21194_v58  ;;  %17199 = vmatprep.subr.bf16.mxu1 %v18730_v53 }
 0x552   : > { %16422 = vmatpush3.bf16.msra.mxu0 %v18729_v51  ;;  %10739 = vmatprep.mubr.bf16.mxu0 %v10529_v21  ;;  %v18746_v51 = vld [vmem:[#allocation8 + $0x660] sm:$0xff]  }
 0x553   : > { %v16067_v56 = vpop.f32.mrb[156].mxu0  ;;  %16423 = vmatprep.subr.bf16.mxu0 %v18731_v17  ;;  %v10539_v17 = vrot.slane %v21194_v58, 4 }
 0x554   : > { %17200 = vmatpush3.bf16.msra.mxu1 %v18730_v53  ;;  %v16068_v28 = vpop.f32.mrb[157].mxu0  ;;  %v10459_v53 = vld [vmem:[#allocation2 + $0x1d0] sm:$0xf] }
 0x555   : > { %v21203_v10 = vadd.f32 %v16068_v28, %v16067_v56  ;;  %v16070_v14 = vpop.f32.mrb[158].mxu0  ;;  %17209 = vmatprep.subr.bf16.mxu1 %v18733_v13  ;;  %v10547_v2 = vrot.slane %v10459_v53, 4  ;;  %v18747_v56 = vld [vmem:[#allocation8 + $0x620] sm:$0xff]   ;;  %v10540_v28 = vsel %vm22193_vm13, %v10533_v47, %v10539_v17  ;;  %v18756_v47 = vld [vmem:[#allocation8 + $0x638] sm:$0xff]   ;;  %vm22208_vm13 = vmmov %vm22122_vm0 }
 0x556   : > { %16424 = vmatpush3.bf16.msra.mxu0 %v18732_v16  ;;  %v16071_v49 = vpop.f32.mrb[159].mxu0  ;;  %v18748_v16 = vld [vmem:[#allocation8 + $0xa8] sm:$0xff]  }
 0x557   : > { %v21207_v52 = vadd.f32 %v16071_v49, %v16070_v14  ;;  %17202 = vmatmul.mubr.bf16.vlgmr.msra.gmra.mrb[200].mxu1 %v8124_v12  ;;  %16461 = vmatprep.subr.bf16.mxu0 %v18734_v61  ;;  %v18749_v61 = vld [vmem:[#allocation8 + $0x668] sm:$0xff]   ;;  %v10548_v40 = vsel %vm22194_vm14, %v10541_v8, %v10547_v2  ;;  %v18752_v49 = vld [vmem:[#allocation8 + $0x670] sm:$0xff]   ;;  %vm22209_vm14 = vmmov %vm22122_vm0 }
 0x558   : > { %17210 = vmatpush3.bf16.msra.mxu1 %v18733_v13  ;;  %17205 = vmatprep.mubr.bf16.mxu1 %v8130_v50  ;;  %v10458_v14 = vld [vmem:[#allocation2 + $0x1c8] sm:$0xf] }
 0x559   : > { %10740 = vmatmul.mubr.bf16.vlgmr.msra.gmra.mrb[8].mxu0 %v10526_v9  ;;  %17211 = vmatprep.subr.bf16.mxu1 %v18736_v35 }
 0x55a   : > { %10747 = vmatprep.mubr.bf16.mxu0 %v10536_v42  ;;  %16462 = vmatpush3.bf16.msra.mxu0 %v18735_v0  ;;  %v10545_v0 = vrot.slane %v10458_v14, 4  ;;  %v18753_v42 = vld [vmem:[#allocation8 + $0x630] sm:$0xff]   ;;  %v18765_v14 = vld [vmem:[#allocation8 + $0x2c0] sm:$0xff]  }
 0x55b   : > { %v16073_v22 = vpop.f32.mrb[160].mxu0  ;;  %16463 = vmatprep.subr.bf16.mxu0 %v18737_v39 }
 0x55c   : > { %17212 = vmatpush3.bf16.msra.mxu1 %v18736_v35  ;;  %v16074_v48 = vpop.f32.mrb[161].mxu0 }
 0x55d   : > { %v21213_v32 = vadd.f32 %v16074_v48, %v16073_v22  ;;  %v16076_v1 = vpop.f32.mrb[162].mxu0  ;;  %17213 = vmatprep.subr.bf16.mxu1 %v18739_v38  ;;  %v10546_v22 = vsel %vm22195_vm7, %v10539_v17, %v10545_v0  ;;  %v18757_v48 = vld [vmem:[#allocation8 + $0x200] sm:$0xff]   ;;  %v18762_v17 = vld [vmem:[#allocation8 + $0x228] sm:$0xff]   ;;  %vm22210_vm7 = vmmov %vm22122_vm0 }
 0x55e   : > { %16464 = vmatpush3.bf16.msra.mxu0 %v18738_v45  ;;  %v16077_v18 = vpop.f32.mrb[163].mxu0  ;;  %v18766_v0 = vld [vmem:[#allocation8 + $0x2c8] sm:$0xff]  }
 0x55f   : > { %v21217_v26 = vadd.f32 %v16077_v18, %v16076_v1  ;;  %17206 = vmatmul.mubr.bf16.gmra.mrb[204].mxu1 %v8136_v20  ;;  %16465 = vmatprep.subr.bf16.mxu0 %v18740_v55  ;;  %v18758_v18 = vld [vmem:[#allocation8 + $0x208] sm:$0xff]  }
 0x560   : > { %17214 = vmatpush3.bf16.msra.mxu1 %v18739_v38  ;;  %17225 = vmatprep.mubr.bf16.mxu1 %v7983_v43  ;;  %v18759_v43 = vld [vmem:[#allocation8 + $0x210] sm:$0xff]  }
 0x561   : > { %10748 = vmatmul.mubr.bf16.gmra.mrb[12].mxu0 %v10534_v63  ;;  %17215 = vmatprep.subr.bf16.mxu1 %v18742_v44 }
 0x562   : > { %10755 = vmatprep.mubr.bf16.mxu0 %v10542_v23  ;;  %16466 = vmatpush3.bf16.msra.mxu0 %v18741_v3 }
 0x563   : > { %v16079_v31 = vpop.f32.mrb[164].mxu0  ;;  %16467 = vmatprep.subr.bf16.mxu0 %v18743_v41 }
 0x564   : > { %17216 = vmatpush3.bf16.msra.mxu1 %v18742_v44  ;;  %v16080_v60 = vpop.f32.mrb[165].mxu0 }
 0x565   : > { %v21222_v21 = vadd.f32 %v16080_v60, %v16079_v31  ;;  %v16082_v13 = vpop.f32.mrb[166].mxu0  ;;  %17217 = vmatprep.subr.bf16.mxu1 %v18745_v33 }
 0x566   : > { %16468 = vmatpush3.bf16.msra.mxu0 %v18744_v19  ;;  %v16083_v6 = vpop.f32.mrb[167].mxu0 }
 0x567   : > { %v21224_v4 = vadd.f32 %v16083_v6, %v16082_v13  ;;  %16469 = vmatprep.subr.bf16.mxu0 %v18746_v51 }
 0x568   : > { %17218 = vmatpush3.bf16.msra.mxu1 %v18745_v33  ;;  %v18760_v33 = vld [vmem:[#allocation8 + $0x218] sm:$0xff]  }
 0x569   : > { %10756 = vmatmul.mubr.bf16.gmra.mrb[16].mxu0 %v10540_v28  ;;  %17219 = vmatprep.subr.bf16.mxu1 %v18748_v16  ;;  %v18764_v28 = vld [vmem:[#allocation8 + $0x238] sm:$0xff]  }
 0x56a   : > { %10763 = vmatprep.mubr.bf16.mxu0 %v10548_v40  ;;  %16470 = vmatpush3.bf16.msra.mxu0 %v18747_v56 }
 0x56b   : > { %v16113_v35 = vpop.f32.mrb[168].mxu0  ;;  %16471 = vmatprep.subr.bf16.mxu0 %v18749_v61 }
 0x56c   : > { %17220 = vmatpush3.bf16.msra.mxu1 %v18748_v16  ;;  %v16114_v12 = vpop.f32.mrb[169].mxu0 }
 0x56d   : > { %v16115_v50 = vadd.f32 %v16114_v12, %v16113_v35  ;;  %v16116_v39 = vpop.f32.mrb[170].mxu0  ;;  %17221 = vmatprep.subr.bf16.mxu1 %v18751_v25 }
 0x56e   : > { %16472 = vmatpush3.bf16.msra.mxu0 %v18750_v36  ;;  %v16117_v9 = vpop.f32.mrb[171].mxu0 }
 0x56f   : > { %v21229_v38 = vadd.f32 %v16115_v50, %v21186_v15  ;;  %v16118_v45 = vadd.f32 %v16117_v9, %v16116_v39  ;;  %16473 = vmatprep.subr.bf16.mxu0 %v18752_v49 }
 0x570   : > { %17222 = vmatpush3.bf16.msra.mxu1 %v18751_v25 }
 0x571   : > { %v21233_v55 = vadd.f32 %v16118_v45, %v21189_v54  ;;  %10764 = vmatmul.mubr.bf16.gmra.mrb[20].mxu0 %v10546_v22  ;;  %17223 = vmatprep.subr.bf16.mxu1 %v18754_v46 }
 0x572   : > { %16474 = vmatpush3.bf16.msra.mxu0 %v18753_v42  ;;  %11072 = vmatprep.mubr.bf16.mxu0 %v21165_v57  ;;  %v18767_v42 = vld [vmem:[#allocation8 + $0x2d0] sm:$0xff]  }
 0x573   : > { %v16119_v1 = vpop.f32.mrb[172].mxu0  ;;  %16475 = vmatprep.subr.bf16.mxu0 %v18755_v11 }
 0x574   : > { %17224 = vmatpush3.bf16.msra.mxu1 %v18754_v46  ;;  %v16120_v15 = vpop.f32.mrb[173].mxu0 }
 0x575   : > { %v16121_v8 = vadd.f32 %v16120_v15, %v16119_v1  ;;  %v16122_v44 = vpop.f32.mrb[174].mxu0  ;;  %17233 = vmatprep.subr.bf16.mxu1 %v18757_v48 }
 0x576   : > { %16476 = vmatpush3.bf16.msra.mxu0 %v18756_v47  ;;  %v16123_v20 = vpop.f32.mrb[175].mxu0  ;;  %v8699_v47 = vld [vmem:[#allocation2 + $0xe8] sm:$0xff] }
 0x577   : > { %v21237_v54 = vadd.f32 %v16121_v8, %v21203_v10  ;;  %v16124_v3 = vadd.f32 %v16123_v20, %v16122_v44  ;;  %17226 = vmatmul.mubr.bf16.vlgmr.msra.gmra.mrb[200].mxu1 %v21181_v30  ;;  %v18769_v8 = vld [vmem:[#allocation8 + $0x2e0] sm:$0xff]  }
 0x578   : > { %17229 = vmatprep.mubr.bf16.mxu1 %v21192_v29  ;;  %17234 = vmatpush3.bf16.msra.mxu1 %v18757_v48 }
 0x579   : > { %v21242_v57 = vadd.f32 %v16124_v3, %v21207_v52  ;;  %11073 = vmatmul.mubr.bf16.vlgmr.msra.gmra.mrb[24].mxu0 %v21169_v24  ;;  %17235 = vmatprep.subr.bf16.mxu1 %v18758_v18  ;;  %v18770_v3 = vld [vmem:[#allocation8 + $0x2e8] sm:$0xff]  }
 0x57a   : > { %11080 = vmatprep.mubr.bf16.mxu0 %v21172_v5  ;;  %v18761_v5 = vld [vmem:[#allocation8 + $0x220] sm:$0xff]  }
 0x57b   : > { %v16125_v41 = vpop.f32.mrb[176].mxu0 }
 0x57c   : > { %17236 = vmatpush3.bf16.msra.mxu1 %v18758_v18  ;;  %v16126_v63 = vpop.f32.mrb[177].mxu0 }
 0x57d   : > { %v16127_v10 = vadd.f32 %v16126_v63, %v16125_v41  ;;  %v16128_v23 = vpop.f32.mrb[178].mxu0  ;;  %17237 = vmatprep.subr.bf16.mxu1 %v18759_v43 }
 0x57e   : > { %v16129_v19 = vpop.f32.mrb[179].mxu0 }
 0x57f   : > { %v21247_v53 = vadd.f32 %v16127_v10, %v21213_v32  ;;  %v16130_v31 = vadd.f32 %v16129_v19, %v16128_v23  ;;  %17230 = vmatmul.mubr.bf16.gmra.mrb[204].mxu1 %v21196_v27  ;;  %v18771_v10 = vld [vmem:[#allocation8 + $0x2f0] sm:$0xff]  }
 0x580   : > { %17238 = vmatpush3.bf16.msra.mxu1 %v18759_v43  ;;  %17249 = vmatprep.mubr.bf16.mxu1 %v21181_v30 }
 0x581   : > { %v21252_v24 = vadd.f32 %v16130_v31, %v21217_v26  ;;  %11081 = vmatmul.mubr.bf16.gmra.mrb[28].mxu0 %v21176_v59  ;;  %17239 = vmatprep.subr.bf16.mxu1 %v18760_v33  ;;  %v10846_v59 = vld [vmem:[#allocation2 + $0x1d0] sm:$0xff]  ;;  %v18772_v31 = vld [vmem:[#allocation8 + $0x2f8] sm:$0xff]  }
 0x582   : > { %11088 = vmatprep.mubr.bf16.mxu0 %v21179_v37  ;;  %v18763_v37 = vld [vmem:[#allocation8 + $0x230] sm:$0xff]  }
 0x583   : > { %v16131_v52 = vpop.f32.mrb[180].mxu0 }
 0x584   : > { %17240 = vmatpush3.bf16.msra.mxu1 %v18760_v33  ;;  %v16132_v51 = vpop.f32.mrb[181].mxu0 }
 0x585   : > { %v16133_v32 = vadd.f32 %v16132_v51, %v16131_v52  ;;  %v16134_v60 = vpop.f32.mrb[182].mxu0  ;;  %17241 = vmatprep.subr.bf16.mxu1 %v18761_v5 }
 0x586   : > { %v16135_v13 = vpop.f32.mrb[183].mxu0 }
 0x587   : > { %v21257_v2 = vadd.f32 %v16133_v32, %v21222_v21  ;;  %v16136_v30 = vadd.f32 %v16135_v13, %v16134_v60  ;;  %v18773_v32 = vld [vmem:[#allocation8 + $0x380] sm:$0xff]  }
 0x588   : > { %17242 = vmatpush3.bf16.msra.mxu1 %v18761_v5 }
 0x589   : > { %v21260_v26 = vadd.f32 %v16136_v30, %v21224_v4  ;;  %11089 = vmatmul.mubr.bf16.gmra.mrb[32].mxu0 %v21194_v58  ;;  %17243 = vmatprep.subr.bf16.mxu1 %v18762_v17  ;;  %v10845_v4 = vld [vmem:[#allocation2 + $0x1c8] sm:$0xff] }
 0x58a   : > { %11096 = vmatprep.mubr.bf16.mxu0 %v10846_v59  ;;  %v18774_v30 = vld [vmem:[#allocation8 + $0x388] sm:$0xff]   ;;  %v21296_v59 = vld [vmem:[#allocation2 + $0x118] sm:$0xff] }
 0x58b   : > { %v16165_v16 = vpop.f32.mrb[184].mxu0 }
 0x58c   : > { %17244 = vmatpush3.bf16.msra.mxu1 %v18762_v17  ;;  %v16166_v6 = vpop.f32.mrb[185].mxu0 }
 0x58d   : > { %v16167_v56 = vadd.f32 %v16166_v6, %v16165_v16  ;;  %v16168_v61 = vpop.f32.mrb[186].mxu0  ;;  %17245 = vmatprep.subr.bf16.mxu1 %v18763_v37  ;;  %v21302_v6 = vld [vmem:[#allocation2 + $0x130] sm:$0xff] }
 0x58e   : > { %v16169_v21 = vpop.f32.mrb[187].mxu0 }
 0x58f   : > { %v21264_v40 = vadd.f32 %v21229_v38, %v16167_v56  ;;  %v16170_v25 = vadd.f32 %v16169_v21, %v16168_v61  ;;  %v9374_v56 = vld [vmem:[#allocation2 + $0x100] sm:$0xf0] }
 0x590   : > { %17246 = vmatpush3.bf16.msra.mxu1 %v18763_v37 }
 0x591   : > { %v21267_v58 = vadd.f32 %v21233_v55, %v16170_v25  ;;  %11097 = vmatmul.mubr.bf16.gmra.mrb[36].mxu0 %v10845_v4  ;;  %17247 = vmatprep.subr.bf16.mxu1 %v18764_v28  ;;  %v18768_v55 = vld [vmem:[#allocation8 + $0x2d8] sm:$0xff]   ;;  %v9457_v25 = vrot.slane %v21296_v59, 4 }
 0x592   : > { %11345 = vmatprep.mubr.bf16.mxu0 %v22138_v7 }
 0x593   : > { %v16171_v36 = vpop.f32.mrb[188].mxu0 }
 0x594   : > { %17248 = vmatpush3.bf16.msra.mxu1 %v18764_v28  ;;  %v16172_v35 = vpop.f32.mrb[189].mxu0  ;;  %v18775_v28 = vld [vmem:[#allocation8 + $0x390] sm:$0xff]  }
 0x595   : > { %v16173_v49 = vadd.f32 %v16172_v35, %v16171_v36  ;;  %v16174_v12 = vpop.f32.mrb[190].mxu0  ;;  %17257 = vmatprep.subr.bf16.mxu1 %v18765_v14  ;;  %v18776_v36 = vld [vmem:[#allocation8 + $0x398] sm:$0xff]  }
 0x596   : > { %v16175_v50 = vpop.f32.mrb[191].mxu0 }
 0x597   : > { %v21271_v39 = vadd.f32 %v21237_v54, %v16173_v49  ;;  %v16176_v46 = vadd.f32 %v16175_v50, %v16174_v12  ;;  %17250 = vmatmul.mubr.bf16.vlgmr.msra.gmra.mrb[200].mxu1 %v21192_v29  ;;  %v21309_v49 = vld [vmem:[#allocation2 + $0x148] sm:$0xff] }
 0x598   : > { %17253 = vmatprep.mubr.bf16.mxu1 %v21196_v27  ;;  %17258 = vmatpush3.bf16.msra.mxu1 %v18765_v14  ;;  %v9032_v27 = vld [vmem:[#allocation2 + $0x100] sm:$0xff] }
 0x599   : > { %v21276_v9 = vadd.f32 %v21242_v57, %v16176_v46  ;;  %17259 = vmatprep.subr.bf16.mxu1 %v18766_v0  ;;  %v18777_v46 = vld [vmem:[#allocation8 + $0x3a0] sm:$0xff]  }
 0x59b   : > { %v16177_v38 = vpop.f32.mrb[192].mxu0 }
 0x59c   : > { %17260 = vmatpush3.bf16.msra.mxu1 %v18766_v0  ;;  %v16178_v45 = vpop.f32.mrb[193].mxu0 }
 0x59d   : > { %v16179_v11 = vadd.f32 %v16178_v45, %v16177_v38  ;;  %v16180_v22 = vpop.f32.mrb[194].mxu0  ;;  %17261 = vmatprep.subr.bf16.mxu1 %v18767_v42 }
 0x59e   : > { %v16181_v48 = vpop.f32.mrb[195].mxu0 }
 0x59f   : > { %v21279_v1 = vadd.f32 %v21247_v53, %v16179_v11  ;;  %v16182_v29 = vadd.f32 %v16181_v48, %v16180_v22  ;;  %17254 = vmatmul.mubr.bf16.gmra.mrb[204].mxu1 %v8699_v47  ;;  %v18778_v11 = vld [vmem:[#allocation8 + $0x3a8] sm:$0xff]  }
 0x5a0   : > { %17262 = vmatpush3.bf16.msra.mxu1 %v18767_v42  ;;  %17273 = vmatprep.mubr.bf16.mxu1 %v9032_v27 }
 0x5a1   : > { %v21282_v15 = vadd.f32 %v21252_v24, %v16182_v29  ;;  %17263 = vmatprep.subr.bf16.mxu1 %v18768_v55 }
 0x5a3   : > { %v16183_v44 = vpop.f32.mrb[196].mxu0 }
 0x5a4   : > { %17264 = vmatpush3.bf16.msra.mxu1 %v18768_v55  ;;  %v16184_v18 = vpop.f32.mrb[197].mxu0 }
 0x5a5   : > { %v16185_v20 = vadd.f32 %v16184_v18, %v16183_v44  ;;  %v16186_v54 = vpop.f32.mrb[198].mxu0  ;;  %17265 = vmatprep.subr.bf16.mxu1 %v18769_v8  ;;  %v18780_v44 = vld [vmem:[#allocation8 + $0x3b8] sm:$0xff]  }
 0x5a6   : > { %v16187_v57 = vpop.f32.mrb[199].mxu0 }
 0x5a7   : > { %v21285_v43 = vadd.f32 %v21257_v2, %v16185_v20  ;;  %v16188_v41 = vadd.f32 %v16187_v57, %v16186_v54  ;;  %v18781_v57 = vld [vmem:[#allocation8 + $0x440] sm:$0xff]  }
 0x5a8   : > { %17266 = vmatpush3.bf16.msra.mxu1 %v18769_v8 }
 0x5a9   : > { %v21288_v63 = vadd.f32 %v21260_v26, %v16188_v41  ;;  %17267 = vmatprep.subr.bf16.mxu1 %v18770_v3 }
 0x5ab   : > { %v16217_v23 = vpop.f32.mrb[200].mxu0 }
 0x5ac   : > { %17268 = vmatpush3.bf16.msra.mxu1 %v18770_v3  ;;  %v16218_v33 = vpop.f32.mrb[201].mxu0 }
 0x5ad   : > { %v16219_v19 = vadd.f32 %v16218_v33, %v16217_v23  ;;  %v16220_v53 = vpop.f32.mrb[202].mxu0  ;;  %17269 = vmatprep.subr.bf16.mxu1 %v18771_v10 }
 0x5ae   : > { %v16221_v24 = vpop.f32.mrb[203].mxu0 }
 0x5af   : > { %v21291_v5 = vadd.f32 %v21264_v40, %v16219_v19  ;;  %v16222_v52 = vadd.f32 %v16221_v24, %v16220_v53  ;;  %v9456_v40 = vrot.slane %v9374_v56, 4  ;;  %v18782_v19 = vld [vmem:[#allocation8 + $0x448] sm:$0xff]  }
 0x5b0   : > { %17270 = vmatpush3.bf16.msra.mxu1 %v18771_v10 }
 0x5b1   : > { %v21294_v51 = vadd.f32 %v21267_v58, %v16222_v52  ;;  %17271 = vmatprep.subr.bf16.mxu1 %v18772_v31  ;;  %v9458_v50 = vsel %vm22196_vm1, %v9456_v40, %v9457_v25  ;;  %v18785_v40 = vld [vmem:[#allocation8 + $0x460] sm:$0xff]   ;;  %vm22211_vm1 = vmmov %vm22122_vm0 }
 0x5b3   : > { %v16223_v60 = vpop.f32.mrb[204].mxu0 }
 0x5b4   : > { %17272 = vmatpush3.bf16.msra.mxu1 %v18772_v31  ;;  %v16224_v17 = vpop.f32.mrb[205].mxu0 }
 0x5b5   : > { %v16225_v13 = vadd.f32 %v16224_v17, %v16223_v60  ;;  %v16226_v2 = vpop.f32.mrb[206].mxu0  ;;  %17281 = vmatprep.subr.bf16.mxu1 %v18773_v32  ;;  %v18783_v60 = vld [vmem:[#allocation8 + $0x450] sm:$0xff]  }
 0x5b6   : > { %v16227_v26 = vpop.f32.mrb[207].mxu0 }
 0x5b7   : > { %v21299_v37 = vadd.f32 %v21271_v39, %v16225_v13  ;;  %v16228_v16 = vadd.f32 %v16227_v26, %v16226_v2  ;;  %17274 = vmatmul.mubr.bf16.vlgmr.msra.gmra.mrb[200].mxu1 %v21296_v59 }
 0x5b8   : > { %17277 = vmatprep.mubr.bf16.mxu1 %v21302_v6  ;;  %17282 = vmatpush3.bf16.msra.mxu1 %v18773_v32 }
 0x5b9   : > { %v21306_v61 = vadd.f32 %v21276_v9, %v16228_v16  ;;  %17283 = vmatprep.subr.bf16.mxu1 %v18774_v30 }
 0x5bb   : > { %v16229_v21 = vpop.f32.mrb[208].mxu0 }
 0x5bc   : > { %17284 = vmatpush3.bf16.msra.mxu1 %v18774_v30  ;;  %v16230_v4 = vpop.f32.mrb[209].mxu0 }
 0x5bd   : > { %v16231_v58 = vadd.f32 %v16230_v4, %v16229_v21  ;;  %v16232_v14 = vpop.f32.mrb[210].mxu0  ;;  %17285 = vmatprep.subr.bf16.mxu1 %v18775_v28 }
 0x5be   : > { %v16233_v35 = vpop.f32.mrb[211].mxu0 }
 0x5bf   : > { %v21312_v12 = vadd.f32 %v21279_v1, %v16231_v58  ;;  %v16234_v0 = vadd.f32 %v16233_v35, %v16232_v14  ;;  %17278 = vmatmul.mubr.bf16.gmra.mrb[204].mxu1 %v21309_v49  ;;  %v18779_v1 = vld [vmem:[#allocation8 + $0x3b0] sm:$0xff]  }
 0x5c0   : > { %17286 = vmatpush3.bf16.msra.mxu1 %v18775_v28  ;;  %17297 = vmatprep.mubr.bf16.mxu1 %v9458_v50 }
 0x5c1   : > { %v21317_v39 = vadd.f32 %v21282_v15, %v16234_v0  ;;  %17287 = vmatprep.subr.bf16.mxu1 %v18776_v36 }
 0x5c3   : > { %v16235_v9 = vpop.f32.mrb[212].mxu0 }
 0x5c4   : > { %17288 = vmatpush3.bf16.msra.mxu1 %v18776_v36  ;;  %v16236_v42 = vpop.f32.mrb[213].mxu0  ;;  %v18786_v36 = vld [vmem:[#allocation8 + $0x468] sm:$0xff]  }
 0x5c5   : > { %v16237_v38 = vadd.f32 %v16236_v42, %v16235_v9  ;;  %v16238_v45 = vpop.f32.mrb[214].mxu0  ;;  %17289 = vmatprep.subr.bf16.mxu1 %v18777_v46 }
 0x5c6   : > { %v16239_v22 = vpop.f32.mrb[215].mxu0 }
 0x5c7   : > { %v21320_v55 = vadd.f32 %v21285_v43, %v16237_v38  ;;  %v16240_v48 = vadd.f32 %v16239_v22, %v16238_v45  ;;  %v9463_v43 = vrot.slane %v21302_v6, 4  ;;  %v18788_v38 = vld [vmem:[#allocation8 + $0x478] sm:$0xff]  }
 0x5c8   : > { %17290 = vmatpush3.bf16.msra.mxu1 %v18777_v46 }
 0x5c9   : > { %v21323_v47 = vadd.f32 %v21288_v63, %v16240_v48  ;;  %17291 = vmatprep.subr.bf16.mxu1 %v18778_v11  ;;  %v9469_v63 = vrot.slane %v21309_v49, 4  ;;  %v9464_v31 = vsel %vm22197_vm3, %v9457_v25, %v9463_v43  ;;  %v18789_v48 = vld [vmem:[#allocation8 + $0x500] sm:$0xff]   ;;  %vm22212_vm3 = vmmov %vm22122_vm0 }
 0x5cb   : > { %v16269_v29 = vpop.f32.mrb[216].mxu0  ;;  %v9470_v52 = vsel %vm22198_vm15, %v9463_v43, %v9469_v63  ;;  %vm22213_vm15 = vmmov %vm22122_vm0 }
 0x5cc   : > { %17292 = vmatpush3.bf16.msra.mxu1 %v18778_v11  ;;  %v16270_v27 = vpop.f32.mrb[217].mxu0 }
 0x5cd   : > { %v16271_v15 = vadd.f32 %v16270_v27, %v16269_v29  ;;  %v16272_v8 = vpop.f32.mrb[218].mxu0  ;;  %17293 = vmatprep.subr.bf16.mxu1 %v18779_v1 }
 0x5ce   : > { %v16273_v18 = vpop.f32.mrb[219].mxu0 }
 0x5cf   : > { %v21326_v20 = vadd.f32 %v21291_v5, %v16271_v15  ;;  %v16274_v54 = vadd.f32 %v16273_v18, %v16272_v8  ;;  %v18790_v15 = vld [vmem:[#allocation8 + $0x508] sm:$0xff]  }
 0x5d0   : > { %17294 = vmatpush3.bf16.msra.mxu1 %v18779_v1 }
 0x5d1   : > { %v21329_v3 = vadd.f32 %v21294_v51, %v16274_v54  ;;  %17295 = vmatprep.subr.bf16.mxu1 %v18780_v44  ;;  %v9386_v51 = vld [vmem:[#allocation2 + $0x160] sm:$0xf]  ;;  %v18791_v54 = vld [vmem:[#allocation8 + $0x510] sm:$0xff]  }
 0x5d2   : > { %v9475_v17 = vrot.slane %v9386_v51, 4 }
 0x5d3   : > { %v16275_v41 = vpop.f32.mrb[220].mxu0 }
 0x5d4   : > { %17296 = vmatpush3.bf16.msra.mxu1 %v18780_v44  ;;  %v16276_v10 = vpop.f32.mrb[221].mxu0  ;;  %v9476_v56 = vsel %vm22122_vm0, %v9469_v63, %v9475_v17  ;;  %v18792_v63 = vld [vmem:[#allocation8 + $0x518] sm:$0xff]   ;;  %v14600_v17 = vld [vmem:[%s19468_s15 + $0x40] sm:$0xff] }
 0x5d5   : > { %v16277_v23 = vadd.f32 %v16276_v10, %v16275_v41  ;;  %v16278_v33 = vpop.f32.mrb[222].mxu0  ;;  %17305 = vmatprep.subr.bf16.mxu1 %v18781_v57 }
 0x5d6   : > { %v16279_v53 = vpop.f32.mrb[223].mxu0 }
 0x5d7   : > { %v21335_v24 = vadd.f32 %v21299_v37, %v16277_v23  ;;  %v16280_v5 = vadd.f32 %v16279_v53, %v16278_v33  ;;  %17298 = vmatmul.mubr.bf16.vlgmr.msra.gmra.mrb[200].mxu1 %v9464_v31  ;;  %v18784_v37 = vld [vmem:[#allocation8 + $0x458] sm:$0xff]   ;;  %v9773_v23 = vld [vmem:[#allocation2 + $0x160] sm:$0xff] }
 0x5d8   : > { %17301 = vmatprep.mubr.bf16.mxu1 %v9470_v52  ;;  %17306 = vmatpush3.bf16.msra.mxu1 %v18781_v57  ;;  %v18793_v53 = vld [vmem:[#allocation8 + $0x520] sm:$0xff]  }
 0x5d9   : > { %v17686_v32 = vadd.f32 %v21306_v61, %v16280_v5  ;;  %17307 = vmatprep.subr.bf16.mxu1 %v18782_v19  ;;  %v7703_v5 = vld [vmem:[%s21928_s6] sm:$0x3] }
 0x5db   : > { %v16281_v13 = vpop.f32.mrb[224].mxu0 }
 0x5dc   : > { %17308 = vmatpush3.bf16.msra.mxu1 %v18782_v19  ;;  %v16282_v2 = vpop.f32.mrb[225].mxu0 }
 0x5dd   : > { %v16283_v30 = vadd.f32 %v16282_v2, %v16281_v13  ;;  %v16284_v26 = vpop.f32.mrb[226].mxu0  ;;  %17309 = vmatprep.subr.bf16.mxu1 %v18783_v60 }
 0x5de   : > { %v16285_v16 = vpop.f32.mrb[227].mxu0 }
 0x5df   : > { %v17713_v28 = vadd.f32 %v21312_v12, %v16283_v30  ;;  %v16286_v21 = vadd.f32 %v16285_v16, %v16284_v26  ;;  %17302 = vmatmul.mubr.bf16.gmra.mrb[204].mxu1 %v9476_v56  ;;  %v21374_v30 = vrot.slane %v7703_v5, %v20935_v62  ;;  %v21377_v26 = vrot.slane %v7703_v5, %v20941_v34 }
 0x5e0   : > { %17310 = vmatpush3.bf16.msra.mxu1 %v18783_v60  ;;  %17321 = vmatprep.mubr.bf16.mxu1 %v21296_v59  ;;  %v18787_v59 = vld [vmem:[#allocation8 + $0x470] sm:$0xff]   ;;  %v7876_v56 = vunpack.c.l.bf16 %v14600_v17 }
 0x5e1   : > { %v17731_v61 = vadd.f32 %v21317_v39, %v16286_v21  ;;  %17311 = vmatprep.subr.bf16.mxu1 %v18784_v37 }
 0x5e3   : > { %v16287_v25 = vpop.f32.mrb[228].mxu0 }
 0x5e4   : > { %17312 = vmatpush3.bf16.msra.mxu1 %v18784_v37  ;;  %v16288_v4 = vpop.f32.mrb[229].mxu0  ;;  %v14601_v37 = vld [vmem:[%s19468_s15 + $0x48] sm:$0xff] }
 0x5e5   : > { %v16289_v58 = vadd.f32 %v16288_v4, %v16287_v25  ;;  %v16290_v14 = vpop.f32.mrb[230].mxu0  ;;  %17313 = vmatprep.subr.bf16.mxu1 %v18785_v40 }
 0x5e6   : > { %v16291_v35 = vpop.f32.mrb[231].mxu0 }
 0x5e7   : > { %v21344_v0 = vadd.f32 %v21320_v55, %v16289_v58  ;;  %v16292_v12 = vadd.f32 %v16291_v35, %v16290_v14  ;;  %v7878_v58 = vunpack.c.l.bf16 %v14601_v37 }
 0x5e8   : > { %17314 = vmatpush3.bf16.msra.mxu1 %v18785_v40 }
 0x5e9   : > { %v21347_v50 = vadd.f32 %v21323_v47, %v16292_v12  ;;  %17315 = vmatprep.subr.bf16.mxu1 %v18786_v36 }
 0x5eb   : > { %v16321_v39 = vpop.f32.mrb[232].mxu0 }
 0x5ec   : > { %17316 = vmatpush3.bf16.msra.mxu1 %v18786_v36  ;;  %v16322_v46 = vpop.f32.mrb[233].mxu0 }
 0x5ed   : > { %v16323_v9 = vadd.f32 %v16322_v46, %v16321_v39  ;;  %v16324_v42 = vpop.f32.mrb[234].mxu0  ;;  %17317 = vmatprep.subr.bf16.mxu1 %v18787_v59 }
 0x5ee   : > { %v16325_v45 = vpop.f32.mrb[235].mxu0 }
 0x5ef   : > { %v21350_v11 = vadd.f32 %v21326_v20, %v16323_v9  ;;  %v16326_v22 = vadd.f32 %v16325_v45, %v16324_v42  ;;  %v18796_v9 = vld [vmem:[#allocation8 + $0x538] sm:$0xff]  }
 0x5f0   : > { %17318 = vmatpush3.bf16.msra.mxu1 %v18787_v59 }
 0x5f1   : > { %v21353_v55 = vadd.f32 %v21329_v3, %v16326_v22  ;;  %17319 = vmatprep.subr.bf16.mxu1 %v18788_v38  ;;  %v14602_v22 = vld [vmem:[%s19468_s15 + $0x50] sm:$0xff] }
 0x5f3   : > { %v16327_v47 = vpop.f32.mrb[236].mxu0 }
 0x5f4   : > { %17320 = vmatpush3.bf16.msra.mxu1 %v18788_v38  ;;  %v16328_v1 = vpop.f32.mrb[237].mxu0 }
 0x5f5   : > { %v16329_v29 = vadd.f32 %v16328_v1, %v16327_v47  ;;  %v16330_v27 = vpop.f32.mrb[238].mxu0  ;;  %17329 = vmatprep.subr.bf16.mxu1 %v18789_v48 }
 0x5f6   : > { %v16331_v8 = vpop.f32.mrb[239].mxu0 }
 0x5f7   : > { %v21356_v44 = vadd.f32 %v21335_v24, %v16329_v29  ;;  %v16332_v18 = vadd.f32 %v16331_v8, %v16330_v27  ;;  %17322 = vmatmul.mubr.bf16.vlgmr.msra.gmra.mrb[200].mxu1 %v21302_v6  ;;  %v10106_v6 = vld [vmem:[#allocation2 + $0x178] sm:$0xff] }
 0x5f8   : > { %17325 = vmatprep.mubr.bf16.mxu1 %v21309_v49  ;;  %17330 = vmatpush3.bf16.msra.mxu1 %v18789_v48  ;;  %v14603_v8 = vld [vmem:[%s19468_s15 + $0x58] sm:$0xff] }
 0x5f9   : > { %v21360_v20 = vadd.f32 %v17686_v32, %v16332_v18  ;;  %17331 = vmatprep.subr.bf16.mxu1 %v18790_v15  ;;  %v18794_v32 = vld [vmem:[#allocation8 + $0x528] sm:$0xff]   ;;  %v7883_v5 = vunpack.c.h.bf16 %v14603_v8 }
 0x5fb   : > { %v16333_v3 = vpop.f32.mrb[240].mxu0 }
 0x5fc   : > { %17332 = vmatpush3.bf16.msra.mxu1 %v18790_v15  ;;  %v16334_v57 = vpop.f32.mrb[241].mxu0 }
 0x5fd   : > { %v16335_v43 = vadd.f32 %v16334_v57, %v16333_v3  ;;  %v16336_v41 = vpop.f32.mrb[242].mxu0  ;;  %17333 = vmatprep.subr.bf16.mxu1 %v18791_v54  ;;  %v7880_v3 = vunpack.c.l.bf16 %v14602_v22  ;;  %v18797_v57 = vld [vmem:[#allocation8 + $0x5c0] sm:$0xff]  }
 0x5fe   : > { %v16337_v10 = vpop.f32.mrb[243].mxu0 }
 0x5ff   : > { %v21362_v33 = vadd.f32 %v17713_v28, %v16335_v43  ;;  %v16338_v19 = vadd.f32 %v16337_v10, %v16336_v41  ;;  %17326 = vmatmul.mubr.bf16.gmra.mrb[204].mxu1 %v9773_v23  ;;  %v18795_v28 = vld [vmem:[#allocation8 + $0x530] sm:$0xff]   ;;  %v7881_v10 = vunpack.c.h.bf16 %v14602_v22 }
 0x600   : > { %17334 = vmatpush3.bf16.msra.mxu1 %v18791_v54  ;;  %17345 = vmatprep.mubr.bf16.mxu1 %v10106_v6  ;;  %v7882_v6 = vunpack.c.l.bf16 %v14603_v8 }
 0x601   : > { %v21364_v49 = vadd.f32 %v17731_v61, %v16338_v19  ;;  %17335 = vmatprep.subr.bf16.mxu1 %v18792_v63  ;;  %v7877_v61 = vunpack.c.h.bf16 %v14600_v17 }
 0x603   : > { %v16339_v31 = vpop.f32.mrb[244].mxu0 }
 0x604   : > { %17336 = vmatpush3.bf16.msra.mxu1 %v18792_v63  ;;  %v16340_v24 = vpop.f32.mrb[245].mxu0 }
 0x605   : > { %v16341_v52 = vadd.f32 %v16340_v24, %v16339_v31  ;;  %v16342_v51 = vpop.f32.mrb[246].mxu0  ;;  %17337 = vmatprep.subr.bf16.mxu1 %v18793_v53 }
 0x606   : > { %v16343_v60 = vpop.f32.mrb[247].mxu0 }
 0x607   : > { %v21371_v13 = vadd.f32 %v21344_v0, %v16341_v52  ;;  %v16344_v2 = vadd.f32 %v16343_v60, %v16342_v51  ;;  %v7879_v0 = vunpack.c.h.bf16 %v14601_v37 }
 0x608   : > { %17338 = vmatpush3.bf16.msra.mxu1 %v18793_v53 }
 0x609   : > { %v21381_v16 = vadd.f32 %v21347_v50, %v16344_v2  ;;  %17339 = vmatprep.subr.bf16.mxu1 %v18794_v32  ;;  %v18798_v2 = vld [vmem:[#allocation8 + $0x5c8] sm:$0xff]  }
 0x60a   : > { %v7829_v21 = vpop.f32.mrb[184].mxu1 }
 0x60b   : > { %v7830_v40 = vadd.f32 %v7829_v21, %v21374_v30  ;;  %v7831_v25 = vpop.f32.mrb[185].mxu1  ;;  %v16373_v4 = vpop.f32.mrb[248].mxu0  ;;  %v21401_v21 = vld [vmem:[#allocation2 + $0x190] sm:$0xff] }
 0x60c   : > { %v7832_v14 = vadd.f32 %v7831_v25, %v21377_v26  ;;  %17340 = vmatpush3.bf16.msra.mxu1 %v18794_v32  ;;  %v7833_v36 = vpop.f32.mrb[186].mxu1  ;;  %v16374_v35 = vpop.f32.mrb[249].mxu0 }
 0x60d   : > { %v7892_v12 = vadd.f32 %v7876_v56, %v7830_v40  ;;  %v7834_v50 = vadd.f32 %v7833_v36, %v21374_v30  ;;  %v16375_v59 = vadd.f32 %v16374_v35, %v16373_v4  ;;  %v7835_v39 = vpop.f32.mrb[187].mxu1  ;;  %v16376_v46 = vpop.f32.mrb[250].mxu0  ;;  %17341 = vmatprep.subr.bf16.mxu1 %v18795_v28  ;;  %v10448_v36 = vld [vmem:[#allocation2 + $0x178] sm:$0xf0] }
 0x60e   : > { %v7893_v42 = vadd.f32 %v7877_v61, %v7832_v14  ;;  %v7836_v38 = vadd.f32 %v7835_v39, %v21377_v26  ;;  %v16377_v45 = vpop.f32.mrb[251].mxu0  ;;  %v14604_v61 = vld [vmem:[%s19468_s15 + $0x60] sm:$0xff]  ;;  %v21408_v14 = vld [vmem:[#allocation2 + $0x1a8] sm:$0xff]  ;;  %v10530_v22 = vrot.slane %v10448_v36, 4 }
 0x60f   : > { %v7908_v48 = vmax.f32 %v7892_v12, 0.0  ;;  %v7894_v47 = vadd.f32 %v7878_v58, %v7834_v50  ;;  %v21389_v1 = vadd.f32 %v21350_v11, %v16375_v59  ;;  %v16378_v29 = vadd.f32 %v16377_v45, %v16376_v46  ;;  %v14605_v12 = vld [vmem:[%s19468_s15 + $0x68] sm:$0xff] }
 0x610   : > { %v7909_v27 = vmax.f32 %v7893_v42, 0.0  ;;  %v7895_v15 = vadd.f32 %v7879_v0, %v7836_v38  ;;  %17342 = vmatpush3.bf16.msra.mxu1 %v18795_v28  ;;  %v7884_v39 = vunpack.c.l.bf16 %v14604_v61  ;;  %v10531_v46 = vrot.slane %v21401_v21, 4 }
 0x611   : > { %v7910_v18 = vmax.f32 %v7894_v47, 0.0  ;;  %v21393_v54 = vadd.f32 %v21353_v55, %v16378_v29  ;;  %17343 = vmatprep.subr.bf16.mxu1 %v18796_v9  ;;  %v7885_v45 = vunpack.c.h.bf16 %v14604_v61 }
 0x612   : > { %v15080_v43 = vpack.c.bf16 %v7909_v27, %v7908_v48  ;;  %v7911_v41 = vmax.f32 %v7895_v15, 0.0  ;;  %v7839_v63 = vpop.f32.mrb[188].mxu1  ;;  %v7886_v27 = vunpack.c.l.bf16 %v14605_v12 }
 0x613   : > { %v7840_v11 = vadd.f32 %v7839_v63, %v21374_v30  ;;  %v7841_v23 = vpop.f32.mrb[189].mxu1  ;;  %v16379_v19 = vpop.f32.mrb[252].mxu0 }
 0x614   : > { %14616 = vst [vmem:[%s20972_s21 + $0x40] sm:$0xff] %v15080_v43  ;;  %v15081_v53 = vpack.c.bf16 %v7911_v41, %v7910_v18  ;;  %v7842_v31 = vadd.f32 %v7841_v23, %v21377_v26  ;;  %17344 = vmatpush3.bf16.msra.mxu1 %v18796_v9  ;;  %v7843_v55 = vpop.f32.mrb[190].mxu1  ;;  %v16380_v24 = vpop.f32.mrb[253].mxu0 }
 0x615   : > { %v7896_v52 = vadd.f32 %v7880_v3, %v7840_v11  ;;  %v7844_v51 = vadd.f32 %v7843_v55, %v21374_v30  ;;  %v16381_v32 = vadd.f32 %v16380_v24, %v16379_v19  ;;  %v7845_v60 = vpop.f32.mrb[191].mxu1  ;;  %v16382_v17 = vpop.f32.mrb[254].mxu0  ;;  %17353 = vmatprep.subr.bf16.mxu1 %v18797_v57  ;;  %v7887_v3 = vunpack.c.h.bf16 %v14605_v12  ;;  %v18800_v11 = vld [vmem:[#allocation8 + $0x5d8] sm:$0xff]   ;;  %v14606_v55 = vld [vmem:[%s19468_s15 + $0x70] sm:$0xff] }
 0x616   : > { %14617 = vst [vmem:[%s20972_s21 + $0x48] sm:$0xff] %v15081_v53  ;;  %v7897_v37 = vadd.f32 %v7881_v10, %v7842_v31  ;;  %v7846_v56 = vadd.f32 %v7845_v60, %v21377_v26  ;;  %v16383_v28 = vpop.f32.mrb[255].mxu0  ;;  %v21422_v53 = vld [vmem:[#allocation2 + $0x1c0] sm:$0xff]  ;;  %v10532_v31 = vsel %vm22199_vm6, %v10530_v22, %v10531_v46  ;;  %vm22214_vm6 = vmmov %vm22122_vm0 }
 0x617   : > { %v7912_v40 = vmax.f32 %v7896_v52, 0.0  ;;  %v7898_v25 = vadd.f32 %v7882_v6, %v7844_v51  ;;  %v21405_v4 = vadd.f32 %v21356_v44, %v16381_v32  ;;  %v16384_v58 = vadd.f32 %v16383_v28, %v16382_v17  ;;  %17346 = vmatmul.mubr.bf16.vlgmr.msra.gmra.mrb[200].mxu1 %v21401_v21  ;;  %v18799_v44 = vld [vmem:[#allocation8 + $0x5d0] sm:$0xff]   ;;  %v14607_v17 = vld [vmem:[%s19468_s15 + $0x78] sm:$0xff]  ;;  %v18801_v28 = vld [vmem:[#allocation8 + $0x5e0] sm:$0xff]  }
 0x618   : > { %v7913_v35 = vmax.f32 %v7897_v37, 0.0  ;;  %v7899_v0 = vadd.f32 %v7883_v5, %v7846_v56  ;;  %17349 = vmatprep.mubr.bf16.mxu1 %v21408_v14  ;;  %17354 = vmatpush3.bf16.msra.mxu1 %v18797_v57  ;;  %v7888_v56 = vunpack.c.l.bf16 %v14606_v55 }
 0x619   : > { %v7914_v50 = vmax.f32 %v7898_v25, 0.0  ;;  %v21413_v59 = vadd.f32 %v21360_v20, %v16384_v58  ;;  %17355 = vmatprep.subr.bf16.mxu1 %v18798_v2  ;;  %v7889_v25 = vunpack.c.h.bf16 %v14606_v55 }
 0x61a   : > { %v15082_v9 = vpack.c.bf16 %v7913_v35, %v7912_v40  ;;  %v7915_v42 = vmax.f32 %v7899_v0, 0.0  ;;  %v7849_v38 = vpop.f32.mrb[192].mxu1  ;;  %v7890_v35 = vunpack.c.l.bf16 %v14607_v17 }
 0x61b   : > { %v7850_v48 = vadd.f32 %v7849_v38, %v21374_v30  ;;  %v7851_v47 = vpop.f32.mrb[193].mxu1  ;;  %v16385_v29 = vpop.f32.mrb[0].mxu0 }
 0x61c   : > { %14618 = vst [vmem:[%s20972_s21 + $0x50] sm:$0xff] %v15082_v9  ;;  %v15083_v15 = vpack.c.bf16 %v7915_v42, %v7914_v50  ;;  %v7852_v20 = vadd.f32 %v7851_v47, %v21377_v26  ;;  %17356 = vmatpush3.bf16.msra.mxu1 %v18798_v2  ;;  %v7853_v8 = vpop.f32.mrb[194].mxu1  ;;  %v16386_v18 = vpop.f32.mrb[1].mxu0 }
 0x61d   : > { %v7900_v57 = vadd.f32 %v7884_v39, %v7850_v48  ;;  %v7854_v43 = vadd.f32 %v7853_v8, %v21374_v30  ;;  %v16387_v41 = vadd.f32 %v16386_v18, %v16385_v29  ;;  %v7855_v63 = vpop.f32.mrb[195].mxu1  ;;  %v16388_v10 = vpop.f32.mrb[2].mxu0  ;;  %17357 = vmatprep.subr.bf16.mxu1 %v18799_v44  ;;  %v7891_v39 = vunpack.c.h.bf16 %v14607_v17 }
 0x61e   : > { %14619 = vst [vmem:[%s20972_s21 + $0x58] sm:$0xff] %v15083_v15  ;;  %v7901_v23 = vadd.f32 %v7885_v45, %v7852_v20  ;;  %v7856_v19 = vadd.f32 %v7855_v63, %v21377_v26  ;;  %v16389_v6 = vpop.f32.mrb[3].mxu0  ;;  %v18802_v45 = vld [vmem:[#allocation8 + $0x5e8] sm:$0xff]  }
 0x61f   : > { %v7916_v24 = vmax.f32 %v7900_v57, 0.0  ;;  %v7902_v5 = vadd.f32 %v7886_v27, %v7854_v43  ;;  %v21429_v52 = vadd.f32 %v21362_v33, %v16387_v41  ;;  %v16390_v51 = vadd.f32 %v16389_v6, %v16388_v10  ;;  %17350 = vmatmul.mubr.bf16.gmra.mrb[204].mxu1 %v21422_v53  ;;  %v18803_v43 = vld [vmem:[#allocation8 + $0x5f0] sm:$0xff]  }
 0x620   : > { %v7917_v32 = vmax.f32 %v7901_v23, 0.0  ;;  %v7903_v60 = vadd.f32 %v7887_v3, %v7856_v19  ;;  %17358 = vmatpush3.bf16.msra.mxu1 %v18799_v44  ;;  %17369 = vmatprep.mubr.bf16.mxu1 %v10532_v31 }
 0x621   : > { %v7918_v2 = vmax.f32 %v7902_v5, 0.0  ;;  %v21434_v37 = vadd.f32 %v21364_v49, %v16390_v51  ;;  %17359 = vmatprep.subr.bf16.mxu1 %v18800_v11  ;;  %v18805_v5 = vld [vmem:[#allocation8 + $0x680] sm:$0xff]   ;;  %v10537_v51 = vrot.slane %v21408_v14, 4 }
 0x622   : > { %v15084_v61 = vpack.c.bf16 %v7917_v32, %v7916_v24  ;;  %v7919_v40 = vmax.f32 %v7903_v60, 0.0  ;;  %v7859_v33 = vpop.f32.mrb[196].mxu1  ;;  %v10543_v32 = vrot.slane %v21422_v53, 4 }
 0x623   : > { %v7860_v58 = vadd.f32 %v7859_v33, %v21374_v30  ;;  %v7861_v36 = vpop.f32.mrb[197].mxu1 }
 0x624   : > { %14620 = vst [vmem:[%s20972_s21 + $0x60] sm:$0xff] %v15084_v61  ;;  %v15085_v0 = vpack.c.bf16 %v7919_v40, %v7918_v2  ;;  %v7862_v12 = vadd.f32 %v7861_v36, %v21377_v26  ;;  %v16391_v50 = vpop.f32.mrb[4].mxu0  ;;  %17360 = vmatpush3.bf16.msra.mxu1 %v18800_v11  ;;  %v7863_v49 = vpop.f32.mrb[198].mxu1  ;;  %v18806_v2 = vld [vmem:[#allocation8 + $0x688] sm:$0xff]   ;;  %v10460_v40 = vld [vmem:[#allocation2 + $0x1d8] sm:$0xf] }
 0x625   : > { %v7904_v44 = vadd.f32 %v7888_v56, %v7860_v58  ;;  %v7864_v9 = vadd.f32 %v7863_v49, %v21374_v30  ;;  %v16392_v42 = vpop.f32.mrb[5].mxu0  ;;  %v7865_v38 = vpop.f32.mrb[199].mxu1  ;;  %17361 = vmatprep.subr.bf16.mxu1 %v18801_v28  ;;  %v18807_v58 = vld [vmem:[#allocation8 + $0x690] sm:$0xff]  }
 0x626   : > { %14621 = vst [vmem:[%s20972_s21 + $0x68] sm:$0xff] %v15085_v0  ;;  %v7905_v22 = vadd.f32 %v7889_v25, %v7862_v12  ;;  %v16393_v48 = vadd.f32 %v16392_v42, %v16391_v50  ;;  %v7866_v47 = vadd.f32 %v7865_v38, %v21377_v26  ;;  %v16394_v29 = vpop.f32.mrb[6].mxu0  ;;  %v18808_v12 = vld [vmem:[#allocation8 + $0x698] sm:$0xff]  }
 0x627   : > { %v7920_v27 = vmax.f32 %v7904_v44, 0.0  ;;  %v7906_v15 = vadd.f32 %v7890_v35, %v7864_v9  ;;  %v16395_v20 = vpop.f32.mrb[7].mxu0  ;;  %v10549_v35 = vrot.slane %v10460_v40, 4  ;;  %v18820_v40 = vld [vmem:[#allocation8 + $0xd8] sm:$0xff]  }
 0x628   : > { %v7921_v8 = vmax.f32 %v7905_v22, 0.0  ;;  %v21443_v18 = vadd.f32 %v21371_v13, %v16393_v48  ;;  %v7907_v3 = vadd.f32 %v7891_v39, %v7866_v47  ;;  %v16396_v30 = vadd.f32 %v16395_v20, %v16394_v29  ;;  %17362 = vmatpush3.bf16.msra.mxu1 %v18801_v28  ;;  %v18804_v13 = vld [vmem:[#allocation8 + $0x5f8] sm:$0xff]   ;;  %v18810_v22 = vld [vmem:[#allocation8 + $0x6a8] sm:$0xff]  }
 0x629   : > { %v7922_v57 = vmax.f32 %v7906_v15, 0.0  ;;  %17363 = vmatprep.subr.bf16.mxu1 %v18802_v45  ;;  %v10550_v39 = vsel %vm22202_vm10, %v10543_v32, %v10549_v35  ;;  %v18822_v35 = vld [vmem:[#allocation8 + $0xe0] sm:$0xff]   ;;  %vm22217_vm10 = vmmov %vm22122_vm0 }
 0x62a   : > { %v15086_v41 = vpack.c.bf16 %v7921_v8, %v7920_v27  ;;  %v7923_v63 = vmax.f32 %v7907_v3, 0.0  ;;  %v21446_v26 = vadd.f32 %v21381_v16, %v16396_v30  ;;  %v18812_v8 = vld [vmem:[#allocation8 + $0x6b8] sm:$0xff]  }
 0x62c   : > { %14622 = vst [vmem:[%s20972_s21 + $0x70] sm:$0xff] %v15086_v41  ;;  %v15087_v10 = vpack.c.bf16 %v7923_v63, %v7922_v57  ;;  %v16425_v11 = vpop.f32.mrb[8].mxu0  ;;  %17364 = vmatpush3.bf16.msra.mxu1 %v18802_v45  ;;  %v18814_v63 = vld [vmem:[#allocation8 + $0xc0] sm:$0xff]  }
 0x62d   : > { %v16426_v23 = vpop.f32.mrb[9].mxu0  ;;  %17365 = vmatprep.subr.bf16.mxu1 %v18803_v43 }
 0x62e   : > { %14623 = vst [vmem:[%s20972_s21 + $0x78] sm:$0xff] %v15087_v10  ;;  %v16427_v19 = vadd.f32 %v16426_v23, %v16425_v11  ;;  %v16428_v6 = vpop.f32.mrb[10].mxu0 }
 0x62f   : > { %v16429_v31 = vpop.f32.mrb[11].mxu0 }
 0x630   : > { %v21451_v55 = vadd.f32 %v21389_v1, %v16427_v19  ;;  %v16430_v24 = vadd.f32 %v16429_v31, %v16428_v6  ;;  %17366 = vmatpush3.bf16.msra.mxu1 %v18803_v43  ;;  %v10538_v1 = vsel %vm22200_vm5, %v10531_v46, %v10537_v51  ;;  %v18816_v6 = vld [vmem:[#allocation8 + $0xc8] sm:$0xff]   ;;  %v21492_v31 = vld [vmem:[#allocation2 + $0x110] sm:$0xff]  ;;  %vm22215_vm5 = vmmov %vm22122_vm0 }
 0x631   : > { %17367 = vmatprep.subr.bf16.mxu1 %v18804_v13 }
 0x632   : > { %v21454_v16 = vadd.f32 %v21393_v54, %v16430_v24  ;;  %v10544_v54 = vsel %vm22201_vm8, %v10537_v51, %v10543_v32  ;;  %v11560_v24 = vld [vmem:[#allocation2 + $0xf8] sm:$0xf0]  ;;  %v11632_v32 = vrot.slane %v21492_v31, 4  ;;  %vm22216_vm8 = vmmov %vm22122_vm0 }
 0x633   : > { %v11631_v51 = vrot.slane %v11560_v24, 4 }
 0x634   : > { %v16431_v60 = vpop.f32.mrb[12].mxu0  ;;  %17368 = vmatpush3.bf16.msra.mxu1 %v18804_v13 }
 0x635   : > { %v16432_v17 = vpop.f32.mrb[13].mxu0  ;;  %17377 = vmatprep.subr.bf16.mxu1 %v18805_v5 }
 0x636   : > { %v16433_v56 = vadd.f32 %v16432_v17, %v16431_v60  ;;  %v16434_v28 = vpop.f32.mrb[14].mxu0  ;;  %v18818_v17 = vld [vmem:[#allocation8 + $0xd0] sm:$0xff]  }
 0x637   : > { %v16435_v61 = vpop.f32.mrb[15].mxu0  ;;  %17370 = vmatmul.mubr.bf16.vlgmr.msra.gmra.mrb[200].mxu1 %v10538_v1 }
 0x638   : > { %v21463_v33 = vadd.f32 %v21405_v4, %v16433_v56  ;;  %v16436_v25 = vadd.f32 %v16435_v61, %v16434_v28  ;;  %17373 = vmatprep.mubr.bf16.mxu1 %v10544_v54  ;;  %17378 = vmatpush3.bf16.msra.mxu1 %v18805_v5  ;;  %v18817_v5 = vld [vmem:[#allocation8 + $0x110] sm:$0xff]   ;;  %v11633_v61 = vsel %vm22203_vm4, %v11631_v51, %v11632_v32  ;;  %v21520_v51 = vld [vmem:[#allocation2 + $0x138] sm:$0xff]  ;;  %vm22218_vm4 = vmmov %vm22122_vm0 }
 0x639   : > { %17379 = vmatprep.subr.bf16.mxu1 %v18806_v2 }
 0x63a   : > { %v21466_v36 = vadd.f32 %v21413_v59, %v16436_v25  ;;  %v18809_v59 = vld [vmem:[#allocation8 + $0x6a0] sm:$0xff]  }
 0x63b   : > { %v18821_v25 = vld [vmem:[#allocation8 + $0x120] sm:$0xff]  }
 0x63c   : > { %v16437_v0 = vpop.f32.mrb[16].mxu0  ;;  %17380 = vmatpush3.bf16.msra.mxu1 %v18806_v2 }
 0x63d   : > { %v16438_v46 = vpop.f32.mrb[17].mxu0  ;;  %17381 = vmatprep.subr.bf16.mxu1 %v18807_v58 }
 0x63e   : > { %v16439_v50 = vadd.f32 %v16438_v46, %v16437_v0  ;;  %v16440_v49 = vpop.f32.mrb[18].mxu0  ;;  %v18823_v46 = vld [vmem:[#allocation8 + $0x128] sm:$0xff]  }
 0x63f   : > { %v16441_v4 = vpop.f32.mrb[19].mxu0  ;;  %17374 = vmatmul.mubr.bf16.gmra.mrb[204].mxu1 %v10550_v39 }
 0x640   : > { %v21470_v44 = vadd.f32 %v21429_v52, %v16439_v50  ;;  %v16442_v9 = vadd.f32 %v16441_v4, %v16440_v49  ;;  %17382 = vmatpush3.bf16.msra.mxu1 %v18807_v58  ;;  %17393 = vmatprep.mubr.bf16.mxu1 %v21401_v21  ;;  %v18811_v21 = vld [vmem:[#allocation8 + $0x6b0] sm:$0xff]   ;;  %v18824_v4 = vld [vmem:[#allocation8 + $0xe8] sm:$0xff]  }
 0x641   : > { %17383 = vmatprep.subr.bf16.mxu1 %v18808_v12 }
 0x642   : > { %v21474_v42 = vadd.f32 %v21434_v37, %v16442_v9  ;;  %v18825_v9 = vld [vmem:[#allocation8 + $0x130] sm:$0xff]  }
 0x644   : > { %v16443_v38 = vpop.f32.mrb[20].mxu0  ;;  %17384 = vmatpush3.bf16.msra.mxu1 %v18808_v12 }
 0x645   : > { %v16444_v45 = vpop.f32.mrb[21].mxu0  ;;  %17385 = vmatprep.subr.bf16.mxu1 %v18809_v59 }
 0x646   : > { %v16445_v48 = vadd.f32 %v16444_v45, %v16443_v38  ;;  %v16446_v47 = vpop.f32.mrb[22].mxu0  ;;  %v18827_v38 = vld [vmem:[#allocation8 + $0x138] sm:$0xff]   ;;  %v21504_v45 = vld [vmem:[#allocation2 + $0x108] sm:$0xff] }
 0x647   : > { %v16447_v29 = vpop.f32.mrb[23].mxu0 }
 0x648   : > { %v21477_v52 = vadd.f32 %v21443_v18, %v16445_v48  ;;  %v16448_v27 = vadd.f32 %v16447_v29, %v16446_v47  ;;  %17386 = vmatpush3.bf16.msra.mxu1 %v18809_v59  ;;  %v18813_v18 = vld [vmem:[#allocation8 + $0x100] sm:$0xff]   ;;  %v18826_v59 = vld [vmem:[#allocation8 + $0xf0] sm:$0xff]   ;;  %v18828_v48 = vld [vmem:[#allocation8 + $0xf8] sm:$0xff]  }
 0x649   : > { %17387 = vmatprep.subr.bf16.mxu1 %v18810_v22  ;;  %v21506_v47 = vld [vmem:[#allocation2 + $0x128] sm:$0xff]  ;;  %v18829_v29 = vld [vmem:[#allocation8 + $0x40] sm:$0xff]  }
 0x64a   : > { %v21480_v15 = vadd.f32 %v21446_v26, %v16448_v27  ;;  %v18815_v26 = vld [vmem:[#allocation8 + $0x108] sm:$0xff]  }
 0x64c   : > { %v16477_v37 = vpop.f32.mrb[24].mxu0  ;;  %17388 = vmatpush3.bf16.msra.mxu1 %v18810_v22  ;;  %v11559_v22 = vld [vmem:[#allocation2 + $0xf0] sm:$0xf0] }
 0x64d   : > { %v16478_v20 = vpop.f32.mrb[25].mxu0  ;;  %17389 = vmatprep.subr.bf16.mxu1 %v18811_v21  ;;  %v11628_v27 = vrot.slane %v11559_v22, 4  ;;  %v18911_v22 = vld [vmem:[#allocation9 + $0x4] ss:$8 sps:$4 sm:$0xff]  }
 0x64e   : > { %v21482_v3 = vadd.f32 %v16478_v20, %v16477_v37  ;;  %v16480_v30 = vpop.f32.mrb[26].mxu0  ;;  %v11639_v37 = vrot.slane %v21506_v47, 4  ;;  %v18830_v20 = vld [vmem:[#allocation8] sm:$0xff]   ;;  %11313 = vmatprep.subr.bf16.mxu0 %v18911_v22  ;;  %v12548_v22 = vld [vmem:[#allocation2 + $0x168] sm:$0xff] }
 0x64f   : > { %v16481_v57 = vpop.f32.mrb[27].mxu0 }
 0x650   : > { %v21484_v43 = vadd.f32 %v16481_v57, %v16480_v30  ;;  %17390 = vmatpush3.bf16.msra.mxu1 %v18811_v21  ;;  %v11629_v21 = vrot.slane %v21504_v45, 4  ;;  %v11640_v57 = vsel %vm22205_vm2, %v11632_v32, %v11639_v37  ;;  %v18836_v32 = vld [vmem:[#allocation8 + $0x18] sm:$0xff]   ;;  %vm22220_vm2 = vmmov %vm22122_vm0 }
 0x651   : > { %17391 = vmatprep.subr.bf16.mxu1 %v18812_v8 }
 0x652   : > { %v11630_v30 = vsel %vm22204_vm12, %v11628_v27, %v11629_v21  ;;  %v18848_v27 = vld [vmem:[#allocation8 + $0x188] sm:$0xff]   ;;  %vm22219_vm12 = vmmov %vm22122_vm0 }
 0x654   : > { %v16483_v41 = vpop.f32.mrb[28].mxu0  ;;  %17392 = vmatpush3.bf16.msra.mxu1 %v18812_v8  ;;  %v18831_v8 = vld [vmem:[#allocation8 + $0x48] sm:$0xff]  }
 0x655   : > { %v16484_v10 = vpop.f32.mrb[29].mxu0  ;;  %16513 = vmatprep.subr.bf16.mxu1 %v18813_v18  ;;  %v21512_v18 = vld [vmem:[#allocation2 + $0x120] sm:$0xff] }
 0x656   : > { %v21486_v11 = vadd.f32 %v16484_v10, %v16483_v41  ;;  %v16486_v23 = vpop.f32.mrb[30].mxu0  ;;  %v18832_v41 = vld [vmem:[#allocation8 + $0x8] sm:$0xff]   ;;  %v18833_v10 = vld [vmem:[#allocation8 + $0x50] sm:$0xff]  }
 0x657   : > { %v16487_v13 = vpop.f32.mrb[31].mxu0  ;;  %17394 = vmatmul.mubr.bf16.vlgmr.msra.gmra.mrb[200].mxu1 %v21408_v14  ;;  %v18819_v14 = vld [vmem:[#allocation8 + $0x118] sm:$0xff]  }
 0x658   : > { %v21489_v19 = vadd.f32 %v16487_v13, %v16486_v23  ;;  %17397 = vmatprep.mubr.bf16.mxu1 %v21422_v53  ;;  %16514 = vmatpush3.bf16.msra.mxu1 %v18814_v63  ;;  %v10847_v53 = vld [vmem:[#allocation2 + $0x1d8] sm:$0xff]  ;;  %v21514_v63 = vld [vmem:[#allocation2 + $0x140] sm:$0xff]  ;;  %v18834_v13 = vld [vmem:[#allocation8 + $0x10] sm:$0xff]  }
 0x659   : > { %16515 = vmatprep.subr.bf16.mxu1 %v18815_v26  ;;  %v11637_v26 = vrot.slane %v21512_v18, 4  ;;  %v11645_v23 = vrot.slane %v21514_v63, 4 }
 0x65b   : > { %v11638_v24 = vsel %vm22206_vm11, %v11629_v21, %v11637_v26  ;;  %v18912_v21 = vld [vmem:[#allocation9 + $0x10] ss:$8 sps:$4 sm:$0xff]   ;;  %vm22221_vm11 = vmmov %vm22122_vm0 }
 0x65c   : > { %v16489_v60 = vpop.f32.mrb[32].mxu0  ;;  %16516 = vmatpush3.bf16.msra.mxu1 %v18816_v6  ;;  %v18835_v6 = vld [vmem:[#allocation8 + $0x58] sm:$0xff]  }
 0x65d   : > { %v16490_v2 = vpop.f32.mrb[33].mxu0  ;;  %16517 = vmatprep.subr.bf16.mxu1 %v18817_v5  ;;  %v11646_v5 = vsel %vm22207_vm9, %v11639_v37, %v11645_v23  ;;  %v18914_v37 = vld [vmem:[#allocation9 + $0x14] ss:$8 sps:$4 sm:$0xff]   ;;  %vm22222_vm9 = vmmov %vm22122_vm0 }
 0x65e   : > { %v21495_v56 = vadd.f32 %v16490_v2, %v16489_v60  ;;  %v16492_v28 = vpop.f32.mrb[34].mxu0  ;;  %v11563_v60 = vld [vmem:[#allocation2 + $0x158] sm:$0xf]  ;;  %v11643_v2 = vrot.slane %v21520_v51, 4 }
 0x65f   : > { %v16493_v1 = vpop.f32.mrb[35].mxu0  ;;  %17398 = vmatmul.mubr.bf16.gmra.mrb[204].mxu1 %v10847_v53  ;;  %v18839_v53 = vld [vmem:[#allocation8 + $0x68] sm:$0xff]  }
 0x660   : > { %v21498_v54 = vadd.f32 %v16493_v1, %v16492_v28  ;;  %16518 = vmatpush3.bf16.msra.mxu1 %v18818_v17  ;;  %11843 = vmatprep.mubr.bf16.mxu1 %v11633_v61  ;;  %v18837_v17 = vld [vmem:[#allocation8 + $0x60] sm:$0xff]   ;;  %v11644_v1 = vsel %vm22208_vm13, %v11637_v26, %v11643_v2  ;;  %v18918_v26 = vld [vmem:[#allocation9 + $0x30] ss:$8 sps:$4 sm:$0xff]   ;;  %vm22223_vm13 = vmmov %vm22122_vm0 }
 0x661   : > { %16519 = vmatprep.subr.bf16.mxu1 %v18819_v14  ;;  %v11651_v14 = vrot.slane %v11563_v60, 4  ;;  %v18838_v28 = vld [vmem:[#allocation8 + $0x20] sm:$0xff]   ;;  %v18856_v60 = vld [vmem:[#allocation8 + $0x1a8] sm:$0xff]  }
 0x663   : > { %v11652_v61 = vsel %vm22209_vm14, %v11645_v23, %v11651_v14  ;;  %v18920_v23 = vld [vmem:[#allocation9 + $0x34] ss:$8 sps:$4 sm:$0xff]   ;;  %vm22224_vm14 = vmmov %vm22122_vm0 }
 0x664   : > { %v16495_v58 = vpop.f32.mrb[36].mxu0  ;;  %16520 = vmatpush3.bf16.msra.mxu1 %v18820_v40  ;;  %v11562_v40 = vld [vmem:[#allocation2 + $0x150] sm:$0xf] }
 0x665   : > { %v16496_v0 = vpop.f32.mrb[37].mxu0  ;;  %16521 = vmatprep.subr.bf16.mxu1 %v18821_v25  ;;  %v18840_v25 = vld [vmem:[#allocation8 + $0x28] sm:$0xff]   ;;  %v18857_v14 = vld [vmem:[#allocation8 + $0x1f0] sm:$0xff]  }
 0x666   : > { %v21500_v12 = vadd.f32 %v16496_v0, %v16495_v58  ;;  %v16498_v50 = vpop.f32.mrb[38].mxu0  ;;  %v18841_v58 = vld [vmem:[#allocation8 + $0x70] sm:$0xff]  }
 0x667   : > { %v16499_v49 = vpop.f32.mrb[39].mxu0  ;;  %v18842_v0 = vld [vmem:[#allocation8 + $0x30] sm:$0xff]  }
 0x668   : > { %v21502_v39 = vadd.f32 %v16499_v49, %v16498_v50  ;;  %16522 = vmatpush3.bf16.msra.mxu1 %v18822_v35  ;;  %v11649_v35 = vrot.slane %v11562_v40, 4  ;;  %v11500_v49 = vld [vmem:[#allocation2 + $0xf8] sm:$0xff] }
 0x669   : > { %16523 = vmatprep.subr.bf16.mxu1 %v18823_v46  ;;  %v18843_v46 = vld [vmem:[#allocation8 + $0x78] sm:$0xff]  }
 0x66a   : > { %v11650_v50 = vsel %vm22210_vm7, %v11643_v2, %v11649_v35  ;;  %v18926_v2 = vld [vmem:[#allocation9 + $0x54] ss:$8 sps:$4 sm:$0xff]   ;;  %v18927_v35 = vld [vmem:[#allocation9 + $0x60] ss:$8 sps:$4 sm:$0xff]   ;;  %vm22225_vm7 = vmmov %vm22122_vm0 }
 0x66b   : > { %v18860_v40 = vld [vmem:[#allocation8 + $0x1b8] sm:$0xff]  }
 0x66c   : > { %16524 = vmatpush3.bf16.msra.mxu1 %v18824_v4  ;;  %v18844_v4 = vld [vmem:[#allocation8 + $0x38] sm:$0xff]  }
 0x66d   : > { %16525 = vmatprep.subr.bf16.mxu1 %v18825_v9  ;;  %v18845_v9 = vld [vmem:[#allocation8 + $0x1c0] sm:$0xff]  }
 0x670   : > { %16526 = vmatpush3.bf16.msra.mxu1 %v18826_v59  ;;  %v18846_v59 = vld [vmem:[#allocation8 + $0x180] sm:$0xff]  }
 0x671   : > { %16527 = vmatprep.subr.bf16.mxu1 %v18827_v38  ;;  %v18909_v38 = vld [vmem:[#allocation9] ss:$8 sps:$4 sm:$0xff]  }
 0x672   : > { %11314 = vmatpush1.bf16.msra.mxu0 %v18909_v38  ;;  %v18879_v38 = vld [vmem:[#allocation8 + $0x348] sm:$0xff]  }
 0x673   : > { %11315 = vmatprep.subr.bf16.mxu0 %v18914_v37  ;;  %v18883_v37 = vld [vmem:[#allocation8 + $0x358] sm:$0xff]  }
 0x674   : > { %16528 = vmatpush3.bf16.msra.mxu1 %v18828_v48  ;;  %v18847_v48 = vld [vmem:[#allocation8 + $0x1c8] sm:$0xff]  }
 0x675   : > { %16565 = vmatprep.subr.bf16.mxu1 %v18829_v29  ;;  %v11499_v29 = vld [vmem:[#allocation2 + $0xf0] sm:$0xff] }
 0x676   : > { %11316 = vmatpush1.bf16.msra.mxu0 %v18912_v21  ;;  %v18882_v21 = vld [vmem:[#allocation8 + $0x310] sm:$0xff]  }
 0x677   : > { %11844 = vmatmul.mubr.bf16.vlgmr.msra.gmra.mrb[208].mxu1 %v11630_v30  ;;  %v18915_v30 = vld [vmem:[#allocation9 + $0x20] ss:$8 sps:$4 sm:$0xff]  }
 0x678   : > { %11851 = vmatprep.mubr.bf16.mxu1 %v11640_v57  ;;  %16566 = vmatpush3.bf16.msra.mxu1 %v18830_v20  ;;  %v18849_v20 = vld [vmem:[#allocation8 + $0x1d0] sm:$0xff]  }
 0x679   : > { %16567 = vmatprep.subr.bf16.mxu1 %v18831_v8  ;;  %v18917_v8 = vld [vmem:[#allocation9 + $0x24] ss:$8 sps:$4 sm:$0xff]   ;;  %v18850_v57 = vld [vmem:[#allocation8 + $0x190] sm:$0xff]  }
 0x67a   : > { %11317 = vmatprep.subr.bf16.mxu0 %v18917_v8  ;;  %v21579_v8 = vld [vmem:[#allocation2 + $0x1a0] sm:$0xff] }
 0x67b   : > { %11318 = vmatpush1.bf16.msra.mxu0 %v18915_v30  ;;  %v18884_v30 = vld [vmem:[#allocation8 + $0x318] sm:$0xff]  }
 0x67c   : > { %16568 = vmatpush3.bf16.msra.mxu1 %v18832_v41  ;;  %v18851_v41 = vld [vmem:[#allocation8 + $0x1d8] sm:$0xff]   ;;  %11319 = vmatprep.subr.bf16.mxu0 %v18920_v23 }
 0x67d   : > { %16569 = vmatprep.subr.bf16.mxu1 %v18833_v10  ;;  %v18852_v10 = vld [vmem:[#allocation8 + $0x198] sm:$0xff]  }
 0x67e   : > { %v21585_v23 = vld [vmem:[#allocation2 + $0x1b8] sm:$0xff] }
 0x67f   : > { %11852 = vmatmul.mubr.bf16.gmra.mrb[212].mxu1 %v11638_v24  ;;  %11320 = vmatpush1.bf16.msra.mxu0 %v18918_v26  ;;  %v18921_v24 = vld [vmem:[#allocation9 + $0x40] ss:$8 sps:$4 sm:$0xff]   ;;  %v21582_v26 = vld [vmem:[#allocation2 + $0x198] sm:$0xff] }
 0x680   : > { %11859 = vmatprep.mubr.bf16.mxu1 %v11646_v5  ;;  %16570 = vmatpush3.bf16.msra.mxu1 %v18834_v13  ;;  %v18853_v13 = vld [vmem:[#allocation8 + $0x1e0] sm:$0xff]  }
 0x681   : > { %16571 = vmatprep.subr.bf16.mxu1 %v18835_v6  ;;  %v18923_v6 = vld [vmem:[#allocation9 + $0x44] ss:$8 sps:$4 sm:$0xff]  }
 0x682   : > { %v18854_v5 = vld [vmem:[#allocation8 + $0x1a0] sm:$0xff]   ;;  %11321 = vmatprep.subr.bf16.mxu0 %v18923_v6  ;;  %v12891_v6 = vld [vmem:[#allocation2 + $0x170] sm:$0xf0] }
 0x683   : > { %11322 = vmatpush1.bf16.msra.mxu0 %v18921_v24  ;;  %v18889_v24 = vld [vmem:[#allocation8 + $0x370] sm:$0xff]  }
 0x684   : > { %16572 = vmatpush3.bf16.msra.mxu1 %v18836_v32  ;;  %v18855_v32 = vld [vmem:[#allocation8 + $0x1e8] sm:$0xff]   ;;  %11323 = vmatprep.subr.bf16.mxu0 %v18926_v2  ;;  %v21589_v2 = vld [vmem:[#allocation2 + $0x1b0] sm:$0xff] }
 0x685   : > { %16573 = vmatprep.subr.bf16.mxu1 %v18837_v17  ;;  %v18924_v17 = vld [vmem:[#allocation9 + $0x50] ss:$8 sps:$4 sm:$0xff]  }
 0x687   : > { %11860 = vmatmul.mubr.bf16.gmra.mrb[216].mxu1 %v11644_v1  ;;  %11324 = vmatpush1.bf16.msra.mxu0 %v18924_v17  ;;  %v18859_v1 = vld [vmem:[#allocation8 + $0x1f8] sm:$0xff]  }
 0x688   : > { %11867 = vmatprep.mubr.bf16.mxu1 %v11652_v61  ;;  %16574 = vmatpush3.bf16.msra.mxu1 %v18838_v28  ;;  %v21533_v28 = vadd.f32 %v21463_v33, %v21486_v11  ;;  %v21538_v61 = vadd.f32 %v21451_v55, %v21482_v3  ;;  %v18861_v33 = vld [vmem:[#allocation8 + $0x280] sm:$0xff]   ;;  %v21547_v11 = vadd.f32 %v21454_v16, %v21484_v43  ;;  %v18863_v3 = vld [vmem:[#allocation8 + $0x288] sm:$0xff]   ;;  %v18891_v17 = vld [vmem:[#allocation8 + $0x378] sm:$0xff]  }
 0x689   : > { %16575 = vmatprep.subr.bf16.mxu1 %v18839_v53  ;;  %v18858_v53 = vld [vmem:[#allocation8 + $0x1b0] sm:$0xff]   ;;  %v21551_v55 = vadd.f32 %v21477_v52, %v21500_v12  ;;  %v21556_v16 = vadd.f32 %v21470_v44, %v21495_v56  ;;  %v18864_v43 = vld [vmem:[#allocation8 + $0x248] sm:$0xff]   ;;  %v21561_v52 = vadd.f32 %v21480_v15, %v21502_v39  ;;  %v21565_v12 = vadd.f32 %v21474_v42, %v21498_v54  ;;  %v21567_v44 = vld [vmem:[#allocation8 + $0x140] sm:$0xff]  }
 0x68a   : > { %v18867_v56 = vld [vmem:[#allocation8 + $0x298] sm:$0xff]   ;;  %v18869_v39 = vld [vmem:[#allocation8 + $0x2a0] sm:$0xff]   ;;  %v18871_v42 = vld [vmem:[#allocation8 + $0x2a8] sm:$0xff]  }
 0x68b   : > { %v18868_v15 = vld [vmem:[#allocation8 + $0x258] sm:$0xff]  }
 0x68c   : > { %16576 = vmatpush3.bf16.msra.mxu1 %v18840_v25  ;;  %v21543_v25 = vadd.f32 %v21466_v36, %v21489_v19  ;;  %v18930_v36 = vld [vmem:[#allocation9 + $0x70] ss:$8 sps:$4 sm:$0xff]  }
 0x68d   : > { %16577 = vmatprep.subr.bf16.mxu1 %v18841_v58  ;;  %v18862_v58 = vld [vmem:[#allocation8 + $0x240] sm:$0xff]   ;;  %v18865_v19 = vld [vmem:[#allocation8 + $0x290] sm:$0xff]   ;;  %v12216_v54 = vld [vmem:[#allocation2 + $0x158] sm:$0xff] }
 0x68f   : > { %11868 = vmatmul.mubr.bf16.gmra.mrb[220].mxu1 %v11650_v50  ;;  %v18873_v50 = vld [vmem:[#allocation8 + $0x2b0] sm:$0xff]  }
 0x690   : > { %16578 = vmatpush3.bf16.msra.mxu1 %v18842_v0  ;;  %12117 = vmatprep.mubr.bf16.mxu1 %v11500_v49  ;;  %v18929_v0 = vld [vmem:[#allocation9 + $0x64] ss:$8 sps:$4 sm:$0xff]   ;;  %v12215_v49 = vld [vmem:[#allocation2 + $0x150] sm:$0xff] }
 0x691   : > { %16579 = vmatprep.subr.bf16.mxu1 %v18843_v46  ;;  %11325 = vmatprep.subr.bf16.mxu0 %v18929_v0  ;;  %v18872_v46 = vld [vmem:[#allocation8 + $0x268] sm:$0xff]   ;;  %v18894_v0 = vld [vmem:[#allocation8 + $0x3c0] sm:$0xff]  }
 0x692   : > { %11326 = vmatpush1.bf16.msra.mxu0 %v18927_v35  ;;  %v12979_v35 = vrot.slane %v21579_v8, 4 }
 0x694   : > { %16580 = vmatpush3.bf16.msra.mxu1 %v18844_v4  ;;  %v12549_v4 = vld [vmem:[#allocation2 + $0x170] sm:$0xff] }
 0x695   : > { %16617 = vmatprep.subr.bf16.mxu1 %v18845_v9  ;;  %v18876_v9 = vld [vmem:[#allocation8 + $0x278] sm:$0xff]  }
 0x697   : > { %12118 = vmatmul.mubr.bf16.vlgmr.msra.gmra.mrb[224].mxu1 %v11499_v29  ;;  %v18880_v29 = vld [vmem:[#allocation8 + $0x308] sm:$0xff]  }
 0x698   : > { %12125 = vmatprep.mubr.bf16.mxu1 %v21492_v31  ;;  %16618 = vmatpush3.bf16.msra.mxu1 %v18846_v59  ;;  %v18877_v59 = vld [vmem:[#allocation8 + $0x340] sm:$0xff]  }
 0x699   : > { %16619 = vmatprep.subr.bf16.mxu1 %v18847_v48  ;;  %v21573_v48 = vld [vmem:[#allocation2 + $0x188] sm:$0xff] }
 0x69c   : > { %16620 = vmatpush3.bf16.msra.mxu1 %v18848_v27  ;;  %v18881_v27 = vld [vmem:[#allocation8 + $0x350] sm:$0xff]  }
 0x69d   : > { %16621 = vmatprep.subr.bf16.mxu1 %v18849_v20  ;;  %v21576_v20 = vld [vmem:[#allocation2 + $0x180] sm:$0xff] }
 0x69f   : > { %12126 = vmatmul.mubr.bf16.gmra.mrb[228].mxu1 %v21504_v45 }
 0x6a0   : > { %12133 = vmatprep.mubr.bf16.mxu1 %v21506_v47  ;;  %16622 = vmatpush3.bf16.msra.mxu1 %v18850_v57  ;;  %v18885_v57 = vld [vmem:[#allocation8 + $0x360] sm:$0xff]  }
 0x6a1   : > { %16623 = vmatprep.subr.bf16.mxu1 %v18851_v41  ;;  %v18886_v41 = vld [vmem:[#allocation8 + $0x320] sm:$0xff]  }
 0x6a4   : > { %16624 = vmatpush3.bf16.msra.mxu1 %v18852_v10  ;;  %v18887_v10 = vld [vmem:[#allocation8 + $0x368] sm:$0xff]  }
 0x6a5   : > { %16625 = vmatprep.subr.bf16.mxu1 %v18853_v13  ;;  %v18888_v13 = vld [vmem:[#allocation8 + $0x328] sm:$0xff]  }
 0x6a7   : > { %12134 = vmatmul.mubr.bf16.gmra.mrb[232].mxu1 %v21512_v18 }
 0x6a8   : > { %12141 = vmatprep.mubr.bf16.mxu1 %v21514_v63  ;;  %16626 = vmatpush3.bf16.msra.mxu1 %v18854_v5  ;;  %v12971_v5 = vrot.slane %v12891_v6, 4 }
 0x6a9   : > { %16627 = vmatprep.subr.bf16.mxu1 %v18855_v32  ;;  %v12972_v32 = vrot.slane %v21573_v48, 4 }
 0x6ac   : > { %16628 = vmatpush3.bf16.msra.mxu1 %v18856_v60  ;;  %v18890_v60 = vld [vmem:[#allocation8 + $0x330] sm:$0xff]  }
 0x6ad   : > { %16629 = vmatprep.subr.bf16.mxu1 %v18857_v14  ;;  %v12973_v14 = vsel %vm22211_vm1, %v12971_v5, %v12972_v32 }
 0x6af   : > { %12142 = vmatmul.mubr.bf16.gmra.mrb[236].mxu1 %v21520_v51 }
 0x6b0   : > { %16630 = vmatpush3.bf16.msra.mxu1 %v18858_v53  ;;  %12442 = vmatprep.mubr.bf16.mxu1 %v21492_v31  ;;  %v18932_v31 = vld [vmem:[#allocation9 + $0x74] ss:$8 sps:$4 sm:$0xff]   ;;  %v12890_v53 = vld [vmem:[#allocation2 + $0x168] sm:$0xf0] }
 0x6b1   : > { %16631 = vmatprep.subr.bf16.mxu1 %v18859_v1  ;;  %11327 = vmatprep.subr.bf16.mxu0 %v18932_v31  ;;  %v18892_v1 = vld [vmem:[#allocation8 + $0x338] sm:$0xff]  }
 0x6b2   : > { %11328 = vmatpush1.bf16.msra.mxu0 %v18930_v36  ;;  %v12980_v36 = vsel %vm22213_vm15, %v12972_v32, %v12979_v35  ;;  %v13289_v32 = vld [vmem:[#allocation2 + $0x1c8] sm:$0xff] }
 0x6b3   : > { %17401 = vmatprep.subr.bf16.mxu0 %v21567_v44 }
 0x6b4   : > { %16632 = vmatpush3.bf16.msra.mxu1 %v18860_v40  ;;  %v18893_v40 = vld [vmem:[#allocation8 + $0x400] sm:$0xff]  }
 0x6b5   : > { %16669 = vmatprep.subr.bf16.mxu1 %v18861_v33  ;;  %v12968_v33 = vrot.slane %v12890_v53, 4 }
 0x6b7   : > { %12443 = vmatmul.mubr.bf16.vlgmr.msra.gmra.mrb[240].mxu1 %v21504_v45  ;;  %v18866_v45 = vld [vmem:[#allocation8 + $0x250] sm:$0xff]  }
 0x6b8   : > { %12450 = vmatprep.mubr.bf16.mxu1 %v21506_v47  ;;  %16670 = vmatpush3.bf16.msra.mxu1 %v18862_v58  ;;  %v18870_v47 = vld [vmem:[#allocation8 + $0x260] sm:$0xff]   ;;  %v12969_v58 = vrot.slane %v21576_v20, 4 }
 0x6b9   : > { %16671 = vmatprep.subr.bf16.mxu1 %v18863_v3  ;;  %v18895_v3 = vld [vmem:[#allocation8 + $0x408] sm:$0xff]  }
 0x6ba   : > { %v12970_v31 = vsel %vm22212_vm3, %v12968_v33, %v12969_v58 }
 0x6bc   : > { %16672 = vmatpush3.bf16.msra.mxu1 %v18864_v43  ;;  %v18896_v43 = vld [vmem:[#allocation8 + $0x3c8] sm:$0xff]  }
 0x6bd   : > { %16673 = vmatprep.subr.bf16.mxu1 %v18865_v19  ;;  %v18897_v19 = vld [vmem:[#allocation8 + $0x410] sm:$0xff]  }
 0x6bf   : > { %12451 = vmatmul.mubr.bf16.gmra.mrb[244].mxu1 %v21512_v18  ;;  %v18874_v18 = vld [vmem:[#allocation8 + $0x270] sm:$0xff]  }
 0x6c0   : > { %12458 = vmatprep.mubr.bf16.mxu1 %v21514_v63  ;;  %16674 = vmatpush3.bf16.msra.mxu1 %v18866_v45  ;;  %v18875_v63 = vld [vmem:[#allocation8 + $0x2b8] sm:$0xff]   ;;  %v12977_v45 = vrot.slane %v21582_v26, 4 }
 0x6c1   : > { %16675 = vmatprep.subr.bf16.mxu1 %v18867_v56  ;;  %v12985_v56 = vrot.slane %v21585_v23, 4 }
 0x6c4   : > { %16676 = vmatpush3.bf16.msra.mxu1 %v18868_v15  ;;  %v18898_v15 = vld [vmem:[#allocation8 + $0x3d0] sm:$0xff]  }
 0x6c5   : > { %16677 = vmatprep.subr.bf16.mxu1 %v18869_v39  ;;  %v18899_v39 = vld [vmem:[#allocation8 + $0x418] sm:$0xff]  }
 0x6c7   : > { %12459 = vmatmul.mubr.bf16.gmra.mrb[248].mxu1 %v21520_v51  ;;  %v18878_v51 = vld [vmem:[#allocation8 + $0x300] sm:$0xff]  }
 0x6c8   : > { %12466 = vmatprep.mubr.bf16.mxu1 %v12216_v54  ;;  %16678 = vmatpush3.bf16.msra.mxu1 %v18870_v47  ;;  %v12978_v47 = vsel %vm22122_vm0, %v12969_v58, %v12977_v45  ;;  %v18900_v54 = vld [vmem:[#allocation8 + $0x3d8] sm:$0xff]  }
 0x6c9   : > { %16679 = vmatprep.subr.bf16.mxu1 %v18871_v42  ;;  %v12986_v42 = vsel %vm22214_vm6, %v12979_v35, %v12985_v56 }
 0x6cc   : > { %16680 = vmatpush3.bf16.msra.mxu1 %v18872_v46  ;;  %v12903_v46 = vld [vmem:[#allocation2 + $0x1d0] sm:$0xf] }
 0x6cd   : > { %16681 = vmatprep.subr.bf16.mxu1 %v18873_v50  ;;  %v18901_v50 = vld [vmem:[#allocation8 + $0x420] sm:$0xff]  }
 0x6cf   : > { %12467 = vmatmul.mubr.bf16.gmra.mrb[252].mxu1 %v12215_v49  ;;  %v18902_v49 = vld [vmem:[#allocation8 + $0x3e0] sm:$0xff]  }
 0x6d0   : > { %16682 = vmatpush3.bf16.msra.mxu1 %v18874_v18  ;;  %12784 = vmatprep.mubr.bf16.mxu1 %v12549_v4  ;;  %v12983_v18 = vrot.slane %v21589_v2, 4  ;;  %v18903_v4 = vld [vmem:[#allocation8 + $0x428] sm:$0xff]  }
 0x6d1   : > { %16683 = vmatprep.subr.bf16.mxu1 %v18875_v63  ;;  %v12991_v63 = vrot.slane %v12903_v46, 4  ;;  %v11561_v46 = vld [vmem:[#allocation2 + $0x100] sm:$0xf0] }
 0x6d4   : > { %16684 = vmatpush3.bf16.msra.mxu1 %v18876_v9  ;;  %v12984_v9 = vsel %vm22215_vm5, %v12977_v45, %v12983_v18  ;;  %v18935_v45 = vld [vmem:[#allocation8 + $0x150] sm:$0xff]  }
 0x6d5   : > { %16721 = vmatprep.subr.bf16.mxu1 %v18877_v59  ;;  %v12992_v59 = vsel %vm22216_vm8, %v12985_v56, %v12991_v63  ;;  %v11634_v63 = vrot.slane %v11561_v46, 4 }
 0x6d7   : > { %12785 = vmatmul.mubr.bf16.vlgmr.msra.gmra.mrb[0].mxu1 %v12548_v22  ;;  %v18905_v22 = vld [vmem:[#allocation8 + $0x430] sm:$0xff]  }
 0x6d8   : > { %12792 = vmatprep.mubr.bf16.mxu1 %v21573_v48  ;;  %16722 = vmatpush3.bf16.msra.mxu1 %v18878_v51  ;;  %v12902_v51 = vld [vmem:[#allocation2 + $0x1c8] sm:$0xf] }
 0x6d9   : > { %16723 = vmatprep.subr.bf16.mxu1 %v18879_v38  ;;  %v18904_v38 = vld [vmem:[#allocation8 + $0x3e8] sm:$0xff]  }
 0x6dc   : > { %16724 = vmatpush3.bf16.msra.mxu1 %v18880_v29  ;;  %v12989_v29 = vrot.slane %v12902_v51, 4  ;;  %v18940_v51 = vld [vmem:[#allocation8 + $0x178] sm:$0xff]  }
 0x6dd   : > { %16725 = vmatprep.subr.bf16.mxu1 %v18881_v27  ;;  %v18906_v27 = vld [vmem:[#allocation8 + $0x3f0] sm:$0xff]  }
 0x6df   : > { %12793 = vmatmul.mubr.bf16.gmra.mrb[4].mxu1 %v21576_v20 }
 0x6e0   : > { %12800 = vmatprep.mubr.bf16.mxu1 %v21579_v8  ;;  %16726 = vmatpush3.bf16.msra.mxu1 %v18882_v21  ;;  %v18907_v21 = vld [vmem:[#allocation8 + $0x438] sm:$0xff]  }
 0x6e1   : > { %16727 = vmatprep.subr.bf16.mxu1 %v18883_v37  ;;  %v12990_v37 = vsel %vm22217_vm10, %v12983_v18, %v12989_v29  ;;  %v21634_v29 = vld [vmem:[#allocation2 + $0x130] sm:$0xff] }
 0x6e4   : > { %16728 = vmatpush3.bf16.msra.mxu1 %v18884_v30  ;;  %v18908_v30 = vld [vmem:[#allocation8 + $0x3f8] sm:$0xff]  }
 0x6e5   : > { %16729 = vmatprep.subr.bf16.mxu1 %v18885_v57  ;;  %v13290_v57 = vld [vmem:[#allocation2 + $0x1d0] sm:$0xff] }
 0x6e7   : > { %12801 = vmatmul.mubr.bf16.gmra.mrb[8].mxu1 %v21582_v26 }
 0x6e8   : > { %12808 = vmatprep.mubr.bf16.mxu1 %v21585_v23  ;;  %16730 = vmatpush3.bf16.msra.mxu1 %v18886_v41 }
 0x6e9   : > { %16731 = vmatprep.subr.bf16.mxu1 %v18887_v10 }
 0x6ec   : > { %16732 = vmatpush3.bf16.msra.mxu1 %v18888_v13 }
 0x6ed   : > { %16733 = vmatprep.subr.bf16.mxu1 %v18889_v24 }
 0x6ef   : > { %12809 = vmatmul.mubr.bf16.gmra.mrb[12].mxu1 %v21589_v2 }
 0x6f0   : > { %16734 = vmatpush3.bf16.msra.mxu1 %v18890_v60  ;;  %13183 = vmatprep.mubr.bf16.mxu1 %v12973_v14 }
 0x6f1   : > { %16735 = vmatprep.subr.bf16.mxu1 %v18891_v17 }
 0x6f4   : > { %16736 = vmatpush3.bf16.msra.mxu1 %v18892_v1 }
 0x6f5   : > { %16773 = vmatprep.subr.bf16.mxu1 %v18893_v40 }
 0x6f7   : > { %13184 = vmatmul.mubr.bf16.vlgmr.msra.gmra.mrb[16].mxu1 %v12970_v31 }
 0x6f8   : > { %13191 = vmatprep.mubr.bf16.mxu1 %v12980_v36  ;;  %16774 = vmatpush3.bf16.msra.mxu1 %v18894_v0 }
 0x6f9   : > { %16775 = vmatprep.subr.bf16.mxu1 %v18895_v3 }
 0x6fc   : > { %16776 = vmatpush3.bf16.msra.mxu1 %v18896_v43 }
 0x6fd   : > { %16777 = vmatprep.subr.bf16.mxu1 %v18897_v19 }
 0x6ff   : > { %13192 = vmatmul.mubr.bf16.gmra.mrb[20].mxu1 %v12978_v47 }
 0x700   : > { %13199 = vmatprep.mubr.bf16.mxu1 %v12986_v42  ;;  %16778 = vmatpush3.bf16.msra.mxu1 %v18898_v15  ;;  %v18936_v42 = vld [vmem:[#allocation8 + $0x158] sm:$0xff]  }
 0x701   : > { %16779 = vmatprep.subr.bf16.mxu1 %v18899_v39 }
 0x704   : > { %16780 = vmatpush3.bf16.msra.mxu1 %v18900_v54  ;;  %v21627_v54 = vld [vmem:[#allocation2 + $0x118] sm:$0xff] }
 0x705   : > { %16781 = vmatprep.subr.bf16.mxu1 %v18901_v50  ;;  %v18939_v50 = vld [vmem:[#allocation8 + $0x170] sm:$0xff]  }
 0x707   : > { %13200 = vmatmul.mubr.bf16.gmra.mrb[24].mxu1 %v12984_v9 }
 0x708   : > { %13207 = vmatprep.mubr.bf16.mxu1 %v12992_v59  ;;  %16782 = vmatpush3.bf16.msra.mxu1 %v18902_v49  ;;  %v11635_v49 = vrot.slane %v21627_v54, 4 }
 0x709   : > { %16783 = vmatprep.subr.bf16.mxu1 %v18903_v4 }
 0x70c   : > { %16784 = vmatpush3.bf16.msra.mxu1 %v18904_v38 }
 0x70d   : > { %16785 = vmatprep.subr.bf16.mxu1 %v18905_v22 }
 0x70f   : > { %13208 = vmatmul.mubr.bf16.gmra.mrb[28].mxu1 %v12990_v37  ;;  %v18941_v37 = vld [vmem:[#allocation8 + $0x80] sm:$0xff]  }
 0x710   : > { %16786 = vmatpush3.bf16.msra.mxu1 %v18906_v27  ;;  %13516 = vmatprep.mubr.bf16.mxu1 %v21573_v48  ;;  %v14840_v48 = vld [vmem:[%s21926_s4] ss:$0 sm:$0xff]  ;;  %v11636_v27 = vsel %vm22218_vm4, %v11634_v63, %v11635_v49 }
 0x711   : > { %16787 = vmatprep.subr.bf16.mxu1 %v18907_v21  ;;  %v21637_v21 = vld [vmem:[#allocation2 + $0x148] sm:$0xff] }
 0x714   : > { %16788 = vmatpush3.bf16.msra.mxu1 %v18908_v30  ;;  %v11641_v30 = vrot.slane %v21634_v29, 4 }
 0x717   : > { %13517 = vmatmul.mubr.bf16.vlgmr.msra.gmra.mrb[32].mxu1 %v21576_v20 }
 0x718   : > { %13524 = vmatprep.mubr.bf16.mxu1 %v21579_v8 }
 0x71f   : > { %13525 = vmatmul.mubr.bf16.gmra.mrb[36].mxu1 %v21582_v26 }
 0x720   : > { %13532 = vmatprep.mubr.bf16.mxu1 %v21585_v23 }
 0x727   : > { %13533 = vmatmul.mubr.bf16.gmra.mrb[40].mxu1 %v21589_v2 }
 0x728   : > { %13540 = vmatprep.mubr.bf16.mxu1 %v13290_v57 }
 0x72a   : > { %v17395_v41 = vpop.f32.mrb[200].mxu1 }
 0x72b   : > { %v17673_v10 = vadd.f32 %v21533_v28, %v17395_v41  ;;  %v11139_v13 = vpop.f32.mrb[201].mxu1  ;;  %v11647_v41 = vrot.slane %v21637_v21, 4 }
 0x72c   : > { %v17682_v20 = vadd.f32 %v21538_v61, %v11139_v13  ;;  %v17396_v6 = vpop.f32.mrb[202].mxu1 }
 0x72d   : > { %v11187_v8 = vadd.f32 %v17673_v10, %v14840_v48  ;;  %v17691_v26 = vadd.f32 %v21543_v25, %v17396_v6  ;;  %v11142_v24 = vpop.f32.mrb[203].mxu1  ;;  %v11642_v6 = vsel %vm22219_vm12, %v11635_v49, %v11641_v30 }
 0x72e   : > { %v11185_v23 = vadd.f32 %v17682_v20, %v14840_v48  ;;  %v17700_v5 = vadd.f32 %v21547_v11, %v11142_v24  ;;  %v18934_v11 = vld [vmem:[#allocation8 + $0x148] sm:$0xff]   ;;  %v11564_v24 = vld [vmem:[#allocation2 + $0x160] sm:$0xf] }
 0x72f   : > { %v11188_v60 = vadd.f32 %v17691_v26, %v14840_v48  ;;  %13541 = vmatmul.mubr.bf16.gmra.mrb[44].mxu1 %v13289_v32  ;;  %v11195_v2 = vmax.f32 %v11187_v8, 0.0  ;;  %v18942_v20 = vld [vmem:[#allocation8 + $0x88] sm:$0xff]   ;;  %v11653_v32 = vrot.slane %v11564_v24, 4 }
 0x730   : > { %v11186_v17 = vadd.f32 %v17700_v5, %v14840_v48  ;;  %13789 = vmatprep.mubr.bf16.mxu1 %v22138_v7  ;;  %v11193_v28 = vmax.f32 %v11185_v23, 0.0  ;;  %v11648_v23 = vsel %vm22220_vm2, %v11641_v30, %v11647_v41  ;;  %v18943_v5 = vld [vmem:[#allocation8 + $0x90] sm:$0xff]  }
 0x731   : > { %v11196_v14 = vmax.f32 %v11188_v60, 0.0 }
 0x732   : > { %v11194_v53 = vmax.f32 %v11186_v17, 0.0  ;;  %v17399_v1 = vpop.f32.mrb[204].mxu1 }
 0x733   : > { %v11202_v61 = vpack.c.bf16 %v11196_v14, %v11195_v2  ;;  %v17709_v40 = vadd.f32 %v21551_v55, %v17399_v1  ;;  %v11155_v33 = vpop.f32.mrb[205].mxu1 }
 0x734   : > { %v11201_v25 = vpack.c.bf16 %v11194_v53, %v11193_v28  ;;  %v17718_v58 = vadd.f32 %v21556_v16, %v11155_v33  ;;  %v17400_v35 = vpop.f32.mrb[206].mxu1  ;;  %v18944_v28 = vld [vmem:[#allocation8 + $0x98] sm:$0xff]   ;;  %v11654_v53 = vsel %vm22221_vm11, %v11647_v41, %v11653_v32  ;;  %v18945_v33 = vld [vmem:[#allocation8 + $0xa0] sm:$0xff]   ;;  %v18955_v32 = vld [vmem:[#allocation8 + $0x230] sm:$0xff]  }
 0x735   : > { %v11191_v0 = vadd.f32 %v17709_v40, %v14840_v48  ;;  %v17727_v3 = vadd.f32 %v21561_v52, %v17400_v35  ;;  %v11158_v31 = vpop.f32.mrb[207].mxu1  ;;  %v11501_v40 = vld [vmem:[#allocation2 + $0x100] sm:$0xff] }
 0x736   : > { %v11189_v36 = vadd.f32 %v17718_v58, %v14840_v48  ;;  %v17736_v43 = vadd.f32 %v21565_v12, %v11158_v31  ;;  %11346 = vmatmul.mubr.bf16.vlgmr.msra.gmra.mrb[40].mxu0 %v11201_v25  ;;  %v18937_v12 = vld [vmem:[#allocation8 + $0x160] sm:$0xff]  }
 0x737   : > { %v11192_v19 = vadd.f32 %v17727_v3, %v14840_v48  ;;  %17402 = vmatpush3.bf16.msra.mxu0 %v21567_v44  ;;  %11355 = vmatprep.mubr.bf16.mxu0 %v22138_v7  ;;  %v11199_v56 = vmax.f32 %v11191_v0, 0.0  ;;  %v18938_v44 = vld [vmem:[#allocation8 + $0x168] sm:$0xff]  }
 0x738   : > { %v11190_v55 = vadd.f32 %v17736_v43, %v14840_v48  ;;  %17403 = vmatprep.subr.bf16.mxu0 %v18934_v11  ;;  %v11197_v15 = vmax.f32 %v11189_v36, 0.0  ;;  %v18946_v0 = vld [vmem:[#allocation8 + $0xa8] sm:$0xff]   ;;  %v18947_v36 = vld [vmem:[#allocation8 + $0xb0] sm:$0xff]  }
 0x739   : > { %v11200_v16 = vmax.f32 %v11192_v19, 0.0 }
 0x73a   : > { %v11198_v39 = vmax.f32 %v11190_v55, 0.0 }
 0x73b   : > { %v11204_v47 = vpack.c.bf16 %v11200_v16, %v11199_v56  ;;  %17404 = vmatpush3.bf16.msra.mxu0 %v18934_v11  ;;  %v18948_v56 = vld [vmem:[#allocation8 + $0xb8] sm:$0xff]  }
 0x73c   : > { %v11203_v52 = vpack.c.bf16 %v11198_v39, %v11197_v15  ;;  %17405 = vmatprep.subr.bf16.mxu0 %v18935_v45 }
 0x73e   : > { %11356 = vmatmul.mubr.bf16.gmra.mrb[44].mxu0 %v11202_v61 }
 0x73f   : > { %17406 = vmatpush3.bf16.msra.mxu0 %v18935_v45  ;;  %11365 = vmatprep.mubr.bf16.mxu0 %v22138_v7 }
 0x740   : > { %17407 = vmatprep.subr.bf16.mxu0 %v18936_v42 }
 0x743   : > { %17408 = vmatpush3.bf16.msra.mxu0 %v18936_v42 }
 0x744   : > { %17409 = vmatprep.subr.bf16.mxu0 %v18937_v12 }
 0x746   : > { %11366 = vmatmul.mubr.bf16.gmra.mrb[48].mxu0 %v11203_v52  ;;  %v18949_v52 = vld [vmem:[#allocation8 + $0x200] sm:$0xff]  }
 0x747   : > { %17410 = vmatpush3.bf16.msra.mxu0 %v18937_v12  ;;  %11375 = vmatprep.mubr.bf16.mxu0 %v22138_v7 }
 0x748   : > { %17411 = vmatprep.subr.bf16.mxu0 %v18938_v44 }
 0x74a   : > { %v16529_v18 = vpop.f32.mrb[208].mxu1 }
 0x74b   : > { %17412 = vmatpush3.bf16.msra.mxu0 %v18938_v44  ;;  %v16530_v4 = vpop.f32.mrb[209].mxu1 }
 0x74c   : > { %v21630_v9 = vadd.f32 %v16530_v4, %v16529_v18  ;;  %v16532_v59 = vpop.f32.mrb[210].mxu1  ;;  %17413 = vmatprep.subr.bf16.mxu0 %v18939_v50 }
 0x74d   : > { %v16533_v38 = vpop.f32.mrb[211].mxu1 }
 0x74e   : > { %v21632_v22 = vadd.f32 %v16533_v38, %v16532_v59  ;;  %11376 = vmatmul.mubr.bf16.gmra.mrb[52].mxu0 %v11204_v47 }
 0x74f   : > { %17414 = vmatpush3.bf16.msra.mxu0 %v18939_v50  ;;  %17417 = vmatprep.mubr.bf16.mxu0 %v11636_v27  ;;  %v18950_v50 = vld [vmem:[#allocation8 + $0x208] sm:$0xff]   ;;  %v18952_v27 = vld [vmem:[#allocation8 + $0x218] sm:$0xff]  }
 0x750   : > { %17415 = vmatprep.subr.bf16.mxu0 %v18940_v51 }
 0x752   : > { %v16535_v57 = vpop.f32.mrb[212].mxu1 }
 0x753   : > { %17416 = vmatpush3.bf16.msra.mxu0 %v18940_v51  ;;  %v16536_v48 = vpop.f32.mrb[213].mxu1 }
 0x754   : > { %v21641_v10 = vadd.f32 %v16536_v48, %v16535_v57  ;;  %v16538_v13 = vpop.f32.mrb[214].mxu1  ;;  %17425 = vmatprep.subr.bf16.mxu0 %v18941_v37  ;;  %v18953_v48 = vld [vmem:[#allocation8 + $0x220] sm:$0xff]  }
 0x755   : > { %v16539_v8 = vpop.f32.mrb[215].mxu1 }
 0x756   : > { %v21644_v26 = vadd.f32 %v16539_v8, %v16538_v13  ;;  %17418 = vmatmul.mubr.bf16.vlgmr.msra.gmra.mrb[56].mxu0 %v11642_v6  ;;  %v18954_v8 = vld [vmem:[#allocation8 + $0x228] sm:$0xff]  }
 0x757   : > { %17426 = vmatpush3.bf16.msra.mxu0 %v18941_v37  ;;  %17421 = vmatprep.mubr.bf16.mxu0 %v11648_v23 }
 0x758   : > { %17427 = vmatprep.subr.bf16.mxu0 %v18942_v20 }
 0x75a   : > { %v16541_v60 = vpop.f32.mrb[216].mxu1 }
 0x75b   : > { %17428 = vmatpush3.bf16.msra.mxu0 %v18942_v20  ;;  %v16542_v17 = vpop.f32.mrb[217].mxu1 }
 0x75c   : > { %v21647_v2 = vadd.f32 %v16542_v17, %v16541_v60  ;;  %v16544_v14 = vpop.f32.mrb[218].mxu1  ;;  %17429 = vmatprep.subr.bf16.mxu0 %v18943_v5 }
 0x75d   : > { %v16545_v1 = vpop.f32.mrb[219].mxu1 }
 0x75e   : > { %v16546_v61 = vadd.f32 %v16545_v1, %v16544_v14  ;;  %17422 = vmatmul.mubr.bf16.gmra.mrb[60].mxu0 %v11654_v53  ;;  %v18956_v14 = vld [vmem:[#allocation8 + $0x238] sm:$0xff]  }
 0x75f   : > { %17430 = vmatpush3.bf16.msra.mxu0 %v18943_v5  ;;  %17441 = vmatprep.mubr.bf16.mxu0 %v11501_v40  ;;  %v18957_v40 = vld [vmem:[#allocation8 + $0x2c0] sm:$0xff]  }
 0x760   : > { %17431 = vmatprep.subr.bf16.mxu0 %v18944_v28 }
 0x762   : > { %v16547_v25 = vpop.f32.mrb[220].mxu1 }
 0x763   : > { %17432 = vmatpush3.bf16.msra.mxu0 %v18944_v28  ;;  %v16548_v58 = vpop.f32.mrb[221].mxu1 }
 0x764   : > { %v21650_v35 = vadd.f32 %v16548_v58, %v16547_v25  ;;  %v16550_v11 = vpop.f32.mrb[222].mxu1  ;;  %17433 = vmatprep.subr.bf16.mxu0 %v18945_v33 }
 0x765   : > { %v16551_v3 = vpop.f32.mrb[223].mxu1 }
 0x766   : > { %v16552_v31 = vadd.f32 %v16551_v3, %v16550_v11  ;;  %v18958_v11 = vld [vmem:[#allocation8 + $0x2c8] sm:$0xff]  }
 0x767   : > { %17434 = vmatpush3.bf16.msra.mxu0 %v18945_v33 }
 0x768   : > { %17435 = vmatprep.subr.bf16.mxu0 %v18946_v0 }
 0x76a   : > { %v16581_v43 = vpop.f32.mrb[224].mxu1 }
 0x76b   : > { %17436 = vmatpush3.bf16.msra.mxu0 %v18946_v0  ;;  %v16582_v19 = vpop.f32.mrb[225].mxu1 }
 0x76c   : > { %v16583_v55 = vadd.f32 %v16582_v19, %v16581_v43  ;;  %v16584_v45 = vpop.f32.mrb[226].mxu1  ;;  %17437 = vmatprep.subr.bf16.mxu0 %v18947_v36  ;;  %v18959_v43 = vld [vmem:[#allocation8 + $0x2d0] sm:$0xff]  }
 0x76d   : > { %v16585_v16 = vpop.f32.mrb[227].mxu1 }
 0x76e   : > { %v17743_v15 = vadd.f32 %v16583_v55, %v21630_v9  ;;  %v16586_v39 = vadd.f32 %v16585_v16, %v16584_v45  ;;  %v18951_v9 = vld [vmem:[#allocation8 + $0x210] sm:$0xff]   ;;  %v18960_v16 = vld [vmem:[#allocation8 + $0x2d8] sm:$0xff]  }
 0x76f   : > { %17438 = vmatpush3.bf16.msra.mxu0 %v18947_v36 }
 0x770   : > { %v17755_v47 = vadd.f32 %v16586_v39, %v21632_v22  ;;  %17439 = vmatprep.subr.bf16.mxu0 %v18948_v56  ;;  %v12217_v39 = vld [vmem:[#allocation2 + $0x160] sm:$0xff] }
 0x772   : > { %v16587_v42 = vpop.f32.mrb[228].mxu1 }
 0x773   : > { %17440 = vmatpush3.bf16.msra.mxu0 %v18948_v56  ;;  %v16588_v12 = vpop.f32.mrb[229].mxu1 }
 0x774   : > { %v16589_v44 = vadd.f32 %v16588_v12, %v16587_v42  ;;  %v16590_v46 = vpop.f32.mrb[230].mxu1  ;;  %17449 = vmatprep.subr.bf16.mxu0 %v18949_v52  ;;  %v18961_v42 = vld [vmem:[#allocation8 + $0x2e0] sm:$0xff]  }
 0x775   : > { %v16591_v18 = vpop.f32.mrb[231].mxu1 }
 0x776   : > { %v17737_v63 = vadd.f32 %v16589_v44, %v21641_v10  ;;  %v16592_v49 = vadd.f32 %v16591_v18, %v16590_v46  ;;  %17442 = vmatmul.mubr.bf16.vlgmr.msra.gmra.mrb[56].mxu0 %v21627_v54  ;;  %v18962_v18 = vld [vmem:[#allocation8 + $0x2e8] sm:$0xff]  }
 0x777   : > { %17445 = vmatprep.mubr.bf16.mxu0 %v21634_v29  ;;  %17450 = vmatpush3.bf16.msra.mxu0 %v18949_v52 }
 0x778   : > { %v17749_v4 = vadd.f32 %v16592_v49, %v21644_v26  ;;  %17451 = vmatprep.subr.bf16.mxu0 %v18950_v50 }
 0x77a   : > { %v16593_v59 = vpop.f32.mrb[232].mxu1 }
 0x77b   : > { %17452 = vmatpush3.bf16.msra.mxu0 %v18950_v50  ;;  %v16594_v51 = vpop.f32.mrb[233].mxu1 }
 0x77c   : > { %v16595_v38 = vadd.f32 %v16594_v51, %v16593_v59  ;;  %v16596_v22 = vpop.f32.mrb[234].mxu1  ;;  %17453 = vmatprep.subr.bf16.mxu0 %v18951_v9  ;;  %v18963_v59 = vld [vmem:[#allocation8 + $0x2f0] sm:$0xff]  }
 0x77d   : > { %v16597_v37 = vpop.f32.mrb[235].mxu1 }
 0x77e   : > { %v17767_v30 = vadd.f32 %v16595_v38, %v21647_v2  ;;  %v16598_v57 = vadd.f32 %v16597_v37, %v16596_v22  ;;  %17446 = vmatmul.mubr.bf16.gmra.mrb[60].mxu0 %v21637_v21  ;;  %v18964_v37 = vld [vmem:[#allocation8 + $0x2f8] sm:$0xff]  }
 0x77f   : > { %17454 = vmatpush3.bf16.msra.mxu0 %v18951_v9  ;;  %17465 = vmatprep.mubr.bf16.mxu0 %v21627_v54 }
 0x780   : > { %v17779_v41 = vadd.f32 %v16598_v57, %v16546_v61  ;;  %17455 = vmatprep.subr.bf16.mxu0 %v18952_v27  ;;  %v18981_v57 = vld [vmem:[#allocation9] ss:$8 sps:$4 sm:$0xff]  }
 0x782   : > { %v16599_v10 = vpop.f32.mrb[236].mxu1 }
 0x783   : > { %17456 = vmatpush3.bf16.msra.mxu0 %v18952_v27  ;;  %v16600_v13 = vpop.f32.mrb[237].mxu1 }
 0x784   : > { %v16601_v20 = vadd.f32 %v16600_v13, %v16599_v10  ;;  %v16602_v6 = vpop.f32.mrb[238].mxu1  ;;  %17457 = vmatprep.subr.bf16.mxu0 %v18953_v48  ;;  %v18986_v13 = vld [vmem:[#allocation9 + $0x14] ss:$8 sps:$4 sm:$0xff]  }
 0x785   : > { %v16603_v26 = vpop.f32.mrb[239].mxu1 }
 0x786   : > { %v17761_v24 = vadd.f32 %v16601_v20, %v21650_v35  ;;  %v16604_v23 = vadd.f32 %v16603_v26, %v16602_v6  ;;  %v18965_v6 = vld [vmem:[#allocation8 + $0x380] sm:$0xff]  }
 0x787   : > { %17458 = vmatpush3.bf16.msra.mxu0 %v18953_v48  ;;  %v18989_v26 = vld [vmem:[#allocation9 + $0x24] ss:$8 sps:$4 sm:$0xff]  }
 0x788   : > { %v17773_v5 = vadd.f32 %v16604_v23, %v16552_v31  ;;  %17459 = vmatprep.subr.bf16.mxu0 %v18954_v8 }
 0x78a   : > { %v16633_v60 = vpop.f32.mrb[240].mxu1 }
 0x78b   : > { %17460 = vmatpush3.bf16.msra.mxu0 %v18954_v8  ;;  %v16634_v54 = vpop.f32.mrb[241].mxu1  ;;  %v18984_v8 = vld [vmem:[#allocation9 + $0x10] ss:$8 sps:$4 sm:$0xff]  }
 0x78c   : > { %v16635_v17 = vadd.f32 %v16634_v54, %v16633_v60  ;;  %v16636_v2 = vpop.f32.mrb[242].mxu1  ;;  %17461 = vmatprep.subr.bf16.mxu0 %v18955_v32  ;;  %v18966_v60 = vld [vmem:[#allocation8 + $0x388] sm:$0xff]  }
 0x78d   : > { %v16637_v28 = vpop.f32.mrb[243].mxu1  ;;  %v18987_v54 = vld [vmem:[#allocation9 + $0x20] ss:$8 sps:$4 sm:$0xff]  }
 0x78e   : > { %v21662_v53 = vadd.f32 %v17743_v15, %v16635_v17  ;;  %v16638_v1 = vadd.f32 %v16637_v28, %v16636_v2  ;;  %v21686_v2 = vld [vmem:[#allocation2 + $0x190] sm:$0xff] }
 0x78f   : > { %17462 = vmatpush3.bf16.msra.mxu0 %v18955_v32 }
 0x790   : > { %v21664_v61 = vadd.f32 %v17755_v47, %v16638_v1  ;;  %17463 = vmatprep.subr.bf16.mxu0 %v18956_v14  ;;  %v21692_v1 = vld [vmem:[#allocation2 + $0x1a8] sm:$0xff] }
 0x792   : > { %v16639_v33 = vpop.f32.mrb[244].mxu1 }
 0x793   : > { %17464 = vmatpush3.bf16.msra.mxu0 %v18956_v14  ;;  %v16640_v25 = vpop.f32.mrb[245].mxu1  ;;  %v18992_v14 = vld [vmem:[#allocation9 + $0x34] ss:$8 sps:$4 sm:$0xff]  }
 0x794   : > { %v16641_v58 = vadd.f32 %v16640_v25, %v16639_v33  ;;  %v16642_v35 = vpop.f32.mrb[246].mxu1  ;;  %17473 = vmatprep.subr.bf16.mxu0 %v18957_v40  ;;  %v18967_v33 = vld [vmem:[#allocation8 + $0x390] sm:$0xff]  }
 0x795   : > { %v16643_v0 = vpop.f32.mrb[247].mxu1  ;;  %v18990_v25 = vld [vmem:[#allocation9 + $0x30] ss:$8 sps:$4 sm:$0xff]  }
 0x796   : > { %v21666_v3 = vadd.f32 %v17737_v63, %v16641_v58  ;;  %v16644_v31 = vadd.f32 %v16643_v0, %v16642_v35  ;;  %17466 = vmatmul.mubr.bf16.vlgmr.msra.gmra.mrb[56].mxu0 %v21634_v29  ;;  %v12550_v29 = vld [vmem:[#allocation2 + $0x178] sm:$0xff]  ;;  %v18995_v58 = vld [vmem:[#allocation9 + $0x44] ss:$8 sps:$4 sm:$0xff]   ;;  %v12975_v0 = vrot.slane %v21686_v2, 4 }
 0x797   : > { %17469 = vmatprep.mubr.bf16.mxu0 %v21637_v21  ;;  %17474 = vmatpush3.bf16.msra.mxu0 %v18957_v40 }
 0x798   : > { %v21670_v36 = vadd.f32 %v17749_v4, %v16644_v31  ;;  %17475 = vmatprep.subr.bf16.mxu0 %v18958_v11 }
 0x79a   : > { %v16645_v19 = vpop.f32.mrb[248].mxu1 }
 0x79b   : > { %17476 = vmatpush3.bf16.msra.mxu0 %v18958_v11  ;;  %v16646_v55 = vpop.f32.mrb[249].mxu1 }
 0x79c   : > { %v16647_v45 = vadd.f32 %v16646_v55, %v16645_v19  ;;  %v16648_v56 = vpop.f32.mrb[250].mxu1  ;;  %17477 = vmatprep.subr.bf16.mxu0 %v18959_v43  ;;  %v18968_v19 = vld [vmem:[#allocation8 + $0x398] sm:$0xff]   ;;  %v18993_v55 = vld [vmem:[#allocation9 + $0x40] ss:$8 sps:$4 sm:$0xff]  }
 0x79d   : > { %v16649_v15 = vpop.f32.mrb[251].mxu1 }
 0x79e   : > { %v21672_v47 = vadd.f32 %v17767_v30, %v16647_v45  ;;  %v16650_v52 = vadd.f32 %v16649_v15, %v16648_v56  ;;  %17470 = vmatmul.mubr.bf16.gmra.mrb[60].mxu0 %v12217_v39  ;;  %v21699_v45 = vld [vmem:[#allocation2 + $0x1c0] sm:$0xff]  ;;  %v18998_v56 = vld [vmem:[#allocation9 + $0x54] ss:$8 sps:$4 sm:$0xff]  }
 0x79f   : > { %17478 = vmatpush3.bf16.msra.mxu0 %v18959_v43  ;;  %17489 = vmatprep.mubr.bf16.mxu0 %v12550_v29  ;;  %v18969_v29 = vld [vmem:[#allocation8 + $0x3a0] sm:$0xff]  }
 0x7a0   : > { %v21674_v21 = vadd.f32 %v17779_v41, %v16650_v52  ;;  %17479 = vmatprep.subr.bf16.mxu0 %v18960_v16  ;;  %v18983_v41 = vld [vmem:[#allocation9 + $0x4] ss:$8 sps:$4 sm:$0xff]  }
 0x7a1   : > { %13757 = vmatprep.subr.bf16.mxu1 %v18983_v41 }
 0x7a2   : > { %v16651_v12 = vpop.f32.mrb[252].mxu1  ;;  %13758 = vmatpush1.bf16.msra.mxu1 %v18981_v57 }
 0x7a3   : > { %17480 = vmatpush3.bf16.msra.mxu0 %v18960_v16  ;;  %v16652_v44 = vpop.f32.mrb[253].mxu1  ;;  %13759 = vmatprep.subr.bf16.mxu1 %v18986_v13 }
 0x7a4   : > { %v16653_v46 = vadd.f32 %v16652_v44, %v16651_v12  ;;  %v16654_v50 = vpop.f32.mrb[254].mxu1  ;;  %17481 = vmatprep.subr.bf16.mxu0 %v18961_v42 }
 0x7a5   : > { %v16655_v63 = vpop.f32.mrb[255].mxu1 }
 0x7a6   : > { %v21676_v49 = vadd.f32 %v17761_v24, %v16653_v46  ;;  %v16656_v4 = vadd.f32 %v16655_v63, %v16654_v50  ;;  %13760 = vmatpush1.bf16.msra.mxu1 %v18984_v8  ;;  %v18970_v50 = vld [vmem:[#allocation8 + $0x3a8] sm:$0xff]  }
 0x7a7   : > { %17482 = vmatpush3.bf16.msra.mxu0 %v18961_v42  ;;  %13761 = vmatprep.subr.bf16.mxu1 %v18989_v26  ;;  %v18996_v42 = vld [vmem:[#allocation9 + $0x50] ss:$8 sps:$4 sm:$0xff]  }
 0x7a8   : > { %v21678_v9 = vadd.f32 %v17773_v5, %v16656_v4  ;;  %17483 = vmatprep.subr.bf16.mxu0 %v18962_v18 }
 0x7aa   : > { %v16685_v51 = vpop.f32.mrb[0].mxu1  ;;  %13762 = vmatpush1.bf16.msra.mxu1 %v18987_v54 }
 0x7ab   : > { %17484 = vmatpush3.bf16.msra.mxu0 %v18962_v18  ;;  %v16686_v38 = vpop.f32.mrb[1].mxu1  ;;  %13763 = vmatprep.subr.bf16.mxu1 %v18992_v14  ;;  %v18975_v14 = vld [vmem:[#allocation8 + $0x450] sm:$0xff]  }
 0x7ac   : > { %v16687_v22 = vadd.f32 %v16686_v38, %v16685_v51  ;;  %v16688_v27 = vpop.f32.mrb[2].mxu1  ;;  %17485 = vmatprep.subr.bf16.mxu0 %v18963_v59 }
 0x7ad   : > { %v16689_v30 = vpop.f32.mrb[3].mxu1 }
 0x7ae   : > { %v21681_v48 = vadd.f32 %v21662_v53, %v16687_v22  ;;  %v16690_v10 = vadd.f32 %v16689_v30, %v16688_v27  ;;  %13764 = vmatpush1.bf16.msra.mxu1 %v18990_v25 }
 0x7af   : > { %17486 = vmatpush3.bf16.msra.mxu0 %v18963_v59  ;;  %13765 = vmatprep.subr.bf16.mxu1 %v18995_v58  ;;  %v18971_v59 = vld [vmem:[#allocation8 + $0x3b0] sm:$0xff]  }
 0x7b0   : > { %v21684_v20 = vadd.f32 %v21664_v61, %v16690_v10  ;;  %17487 = vmatprep.subr.bf16.mxu0 %v18964_v37  ;;  %v12892_v61 = vld [vmem:[#allocation2 + $0x178] sm:$0xf0]  ;;  %v12981_v10 = vrot.slane %v21692_v1, 4 }
 0x7b1   : > { %v12974_v11 = vrot.slane %v12892_v61, 4 }
 0x7b2   : > { %v16691_v24 = vpop.f32.mrb[4].mxu1  ;;  %13766 = vmatpush1.bf16.msra.mxu1 %v18993_v55 }
 0x7b3   : > { %17488 = vmatpush3.bf16.msra.mxu0 %v18964_v37  ;;  %v16692_v23 = vpop.f32.mrb[5].mxu1  ;;  %v12976_v39 = vsel %vm22222_vm9, %v12974_v11, %v12975_v0  ;;  %13767 = vmatprep.subr.bf16.mxu1 %v18998_v56  ;;  %v18972_v37 = vld [vmem:[#allocation8 + $0x3b8] sm:$0xff]   ;;  %v18978_v56 = vld [vmem:[#allocation8 + $0x468] sm:$0xff]  }
 0x7b4   : > { %v16693_v5 = vadd.f32 %v16692_v23, %v16691_v24  ;;  %v16694_v32 = vpop.f32.mrb[6].mxu1  ;;  %17497 = vmatprep.subr.bf16.mxu0 %v18965_v6  ;;  %v18974_v23 = vld [vmem:[#allocation8 + $0x448] sm:$0xff]  }
 0x7b5   : > { %v16695_v17 = vpop.f32.mrb[7].mxu1 }
 0x7b6   : > { %v21689_v28 = vadd.f32 %v21666_v3, %v16693_v5  ;;  %v16696_v53 = vadd.f32 %v16695_v17, %v16694_v32  ;;  %17490 = vmatmul.mubr.bf16.vlgmr.msra.gmra.mrb[56].mxu0 %v21686_v2  ;;  %13768 = vmatpush1.bf16.msra.mxu1 %v18996_v42 }
 0x7b7   : > { %17493 = vmatprep.mubr.bf16.mxu0 %v21692_v1  ;;  %17498 = vmatpush3.bf16.msra.mxu0 %v18965_v6  ;;  %v12987_v6 = vrot.slane %v21699_v45, 4 }
 0x7b8   : > { %v21696_v40 = vadd.f32 %v21670_v36, %v16696_v53  ;;  %17499 = vmatprep.subr.bf16.mxu0 %v18966_v60 }
 0x7b9   : > { %v12988_v54 = vsel %vm22224_vm14, %v12981_v10, %v12987_v6 }
 0x7ba   : > { %v16697_v35 = vpop.f32.mrb[8].mxu1 }
 0x7bb   : > { %17500 = vmatpush3.bf16.msra.mxu0 %v18966_v60  ;;  %v16698_v3 = vpop.f32.mrb[9].mxu1  ;;  %v12904_v60 = vld [vmem:[#allocation2 + $0x1d8] sm:$0xf] }
 0x7bc   : > { %v16699_v31 = vadd.f32 %v16698_v3, %v16697_v35  ;;  %v16700_v43 = vpop.f32.mrb[10].mxu1  ;;  %17501 = vmatprep.subr.bf16.mxu0 %v18967_v33  ;;  %v12993_v53 = vrot.slane %v12904_v60, 4 }
 0x7bd   : > { %v16701_v36 = vpop.f32.mrb[11].mxu1 }
 0x7be   : > { %v21702_v16 = vadd.f32 %v21672_v47, %v16699_v31  ;;  %v16702_v15 = vadd.f32 %v16701_v36, %v16700_v43  ;;  %17494 = vmatmul.mubr.bf16.gmra.mrb[60].mxu0 %v21699_v45  ;;  %v12994_v35 = vsel %vm22225_vm7, %v12987_v6, %v12993_v53  ;;  %v18977_v31 = vld [vmem:[#allocation8 + $0x460] sm:$0xff]  }
 0x7bf   : > { %17502 = vmatpush3.bf16.msra.mxu0 %v18967_v33  ;;  %17513 = vmatprep.mubr.bf16.mxu0 %v12976_v39 }
 0x7c0   : > { %v21709_v52 = vadd.f32 %v21674_v21, %v16702_v15  ;;  %17503 = vmatprep.subr.bf16.mxu0 %v18968_v19 }
 0x7c2   : > { %v16703_v12 = vpop.f32.mrb[12].mxu1 }
 0x7c3   : > { %17504 = vmatpush3.bf16.msra.mxu0 %v18968_v19  ;;  %v16704_v47 = vpop.f32.mrb[13].mxu1 }
 0x7c4   : > { %v16705_v44 = vadd.f32 %v16704_v47, %v16703_v12  ;;  %v16706_v46 = vpop.f32.mrb[14].mxu1  ;;  %17505 = vmatprep.subr.bf16.mxu0 %v18969_v29 }
 0x7c5   : > { %v16707_v18 = vpop.f32.mrb[15].mxu1 }
 0x7c6   : > { %v21712_v63 = vadd.f32 %v21676_v49, %v16705_v44  ;;  %v16708_v4 = vadd.f32 %v16707_v18, %v16706_v46  ;;  %v18980_v44 = vld [vmem:[#allocation8 + $0x478] sm:$0xff]  }
 0x7c7   : > { %17506 = vmatpush3.bf16.msra.mxu0 %v18969_v29 }
 0x7c8   : > { %v21715_v21 = vadd.f32 %v21678_v9, %v16708_v4  ;;  %17507 = vmatprep.subr.bf16.mxu0 %v18970_v50  ;;  %v18973_v9 = vld [vmem:[#allocation8 + $0x440] sm:$0xff]  }
 0x7ca   : > { %v16737_v51 = vpop.f32.mrb[16].mxu1 }
 0x7cb   : > { %17508 = vmatpush3.bf16.msra.mxu0 %v18970_v50  ;;  %v16738_v38 = vpop.f32.mrb[17].mxu1 }
 0x7cc   : > { %v16739_v22 = vadd.f32 %v16738_v38, %v16737_v51  ;;  %v16740_v27 = vpop.f32.mrb[18].mxu1  ;;  %17509 = vmatprep.subr.bf16.mxu0 %v18971_v59 }
 0x7cd   : > { %v16741_v30 = vpop.f32.mrb[19].mxu1 }
 0x7ce   : > { %v21718_v57 = vadd.f32 %v21681_v48, %v16739_v22  ;;  %v16742_v49 = vadd.f32 %v16741_v30, %v16740_v27  ;;  %v12982_v48 = vsel %vm22223_vm13, %v12975_v0, %v12981_v10 }
 0x7cf   : > { %17510 = vmatpush3.bf16.msra.mxu0 %v18971_v59 }
 0x7d0   : > { %v21721_v41 = vadd.f32 %v21684_v20, %v16742_v49  ;;  %17511 = vmatprep.subr.bf16.mxu0 %v18972_v37  ;;  %v13291_v49 = vld [vmem:[#allocation2 + $0x1d8] sm:$0xff] }
 0x7d2   : > { %v16743_v13 = vpop.f32.mrb[20].mxu1 }
 0x7d3   : > { %17512 = vmatpush3.bf16.msra.mxu0 %v18972_v37  ;;  %v16744_v8 = vpop.f32.mrb[21].mxu1 }
 0x7d4   : > { %v16745_v26 = vadd.f32 %v16744_v8, %v16743_v13  ;;  %v16746_v24 = vpop.f32.mrb[22].mxu1  ;;  %17521 = vmatprep.subr.bf16.mxu0 %v18973_v9 }
 0x7d5   : > { %v16747_v5 = vpop.f32.mrb[23].mxu1 }
 0x7d6   : > { %v21729_v20 = vadd.f32 %v21689_v28, %v16745_v26  ;;  %v16748_v32 = vadd.f32 %v16747_v5, %v16746_v24  ;;  %17514 = vmatmul.mubr.bf16.vlgmr.msra.gmra.mrb[56].mxu0 %v12982_v48  ;;  %v18976_v28 = vld [vmem:[#allocation8 + $0x458] sm:$0xff]   ;;  %v14857_v26 = vld [vmem:[%s19468_s15 + $0x80] sm:$0xff]  ;;  %v14858_v5 = vld [vmem:[%s19468_s15 + $0x88] sm:$0xff] }
 0x7d7   : > { %17517 = vmatprep.mubr.bf16.mxu0 %v12988_v54  ;;  %17522 = vmatpush3.bf16.msra.mxu0 %v18973_v9  ;;  %v11395_v54 = vunpack.c.h.bf16 %v14857_v26 }
 0x7d8   : > { %v21733_v17 = vadd.f32 %v21696_v40, %v16748_v32  ;;  %17523 = vmatprep.subr.bf16.mxu0 %v18974_v23  ;;  %v11394_v32 = vunpack.c.l.bf16 %v14857_v26 }
 0x7da   : > { %v16749_v61 = vpop.f32.mrb[24].mxu1 }
 0x7db   : > { %17524 = vmatpush3.bf16.msra.mxu0 %v18974_v23  ;;  %v16750_v33 = vpop.f32.mrb[25].mxu1 }
 0x7dc   : > { %v16751_v25 = vadd.f32 %v16750_v33, %v16749_v61  ;;  %v16752_v58 = vpop.f32.mrb[26].mxu1  ;;  %17525 = vmatprep.subr.bf16.mxu0 %v18975_v14  ;;  %v11396_v61 = vunpack.c.l.bf16 %v14858_v5 }
 0x7dd   : > { %v16753_v11 = vpop.f32.mrb[27].mxu1 }
 0x7de   : > { %v21737_v0 = vadd.f32 %v21702_v16, %v16751_v25  ;;  %v16754_v3 = vadd.f32 %v16753_v11, %v16752_v58  ;;  %17518 = vmatmul.mubr.bf16.gmra.mrb[60].mxu0 %v12994_v35  ;;  %v11397_v58 = vunpack.c.h.bf16 %v14858_v5 }
 0x7df   : > { %17526 = vmatpush3.bf16.msra.mxu0 %v18975_v14  ;;  %17537 = vmatprep.mubr.bf16.mxu0 %v21686_v2 }
 0x7e0   : > { %v21741_v40 = vadd.f32 %v21709_v52, %v16754_v3  ;;  %17527 = vmatprep.subr.bf16.mxu0 %v18976_v28  ;;  %v18979_v52 = vld [vmem:[#allocation8 + $0x470] sm:$0xff]  }
 0x7e2   : > { %v16755_v43 = vpop.f32.mrb[28].mxu1 }
 0x7e3   : > { %17528 = vmatpush3.bf16.msra.mxu0 %v18976_v28  ;;  %v16756_v19 = vpop.f32.mrb[29].mxu1 }
 0x7e4   : > { %v16757_v55 = vadd.f32 %v16756_v19, %v16755_v43  ;;  %v16758_v36 = vpop.f32.mrb[30].mxu1  ;;  %17529 = vmatprep.subr.bf16.mxu0 %v18977_v31  ;;  %v14859_v43 = vld [vmem:[%s19468_s15 + $0x90] sm:$0xff] }
 0x7e5   : > { %v16759_v15 = vpop.f32.mrb[31].mxu1 }
 0x7e6   : > { %v21744_v16 = vadd.f32 %v21712_v63, %v16757_v55  ;;  %v16760_v39 = vadd.f32 %v16759_v15, %v16758_v36  ;;  %v14860_v15 = vld [vmem:[%s19468_s15 + $0x98] sm:$0xff] }
 0x7e7   : > { %17530 = vmatpush3.bf16.msra.mxu0 %v18977_v31 }
 0x7e8   : > { %v21747_v2 = vadd.f32 %v21715_v21, %v16760_v39  ;;  %17531 = vmatprep.subr.bf16.mxu0 %v18978_v56 }
 0x7ea   : > { %v16789_v29 = vpop.f32.mrb[32].mxu1 }
 0x7eb   : > { %17532 = vmatpush3.bf16.msra.mxu0 %v18978_v56  ;;  %v16790_v42 = vpop.f32.mrb[33].mxu1 }
 0x7ec   : > { %v21749_v12 = vadd.f32 %v16790_v42, %v16789_v29  ;;  %v16792_v47 = vpop.f32.mrb[34].mxu1  ;;  %17533 = vmatprep.subr.bf16.mxu0 %v18979_v52 }
 0x7ed   : > { %v16793_v46 = vpop.f32.mrb[35].mxu1 }
 0x7ee   : > { %v21751_v50 = vadd.f32 %v16793_v46, %v16792_v47 }
 0x7ef   : > { %17534 = vmatpush3.bf16.msra.mxu0 %v18979_v52  ;;  %v11398_v52 = vunpack.c.l.bf16 %v14859_v43 }
 0x7f0   : > { %17535 = vmatprep.subr.bf16.mxu0 %v18980_v44 }
 0x7f2   : > { %v16795_v18 = vpop.f32.mrb[36].mxu1 }
 0x7f3   : > { %17536 = vmatpush3.bf16.msra.mxu0 %v18980_v44  ;;  %v16796_v63 = vpop.f32.mrb[37].mxu1  ;;  %v11399_v44 = vunpack.c.h.bf16 %v14859_v43 }
 0x7f4   : > { %v21753_v4 = vadd.f32 %v16796_v63, %v16795_v18  ;;  %v16798_v21 = vpop.f32.mrb[38].mxu1  ;;  %v11400_v63 = vunpack.c.l.bf16 %v14860_v15 }
 0x7f5   : > { %v16799_v59 = vpop.f32.mrb[39].mxu1 }
 0x7f6   : > { %v21755_v51 = vadd.f32 %v16799_v59, %v16798_v21  ;;  %17538 = vmatmul.mubr.bf16.vlgmr.msra.gmra.mrb[56].mxu0 %v21692_v1  ;;  %v11221_v1 = vld [vmem:[%s21928_s6] sm:$0x3] }
 0x7f7   : > { %17541 = vmatprep.mubr.bf16.mxu0 %v21699_v45  ;;  %v21772_v23 = vrot.slane %v11221_v1, %v20935_v62  ;;  %v21775_v48 = vrot.slane %v11221_v1, %v20941_v34  ;;  %v14861_v1 = vld [vmem:[%s19468_s15 + $0xa0] sm:$0xff] }
 0x7fa   : > { %v16801_v38 = vpop.f32.mrb[40].mxu1 }
 0x7fb   : > { %v16802_v22 = vpop.f32.mrb[41].mxu1 }
 0x7fc   : > { %v21759_v27 = vadd.f32 %v16802_v22, %v16801_v38  ;;  %v16804_v37 = vpop.f32.mrb[42].mxu1  ;;  %v11401_v22 = vunpack.c.h.bf16 %v14860_v15  ;;  %v14863_v15 = vld [vmem:[%s19468_s15 + $0xb0] sm:$0xff] }
 0x7fd   : > { %v16805_v30 = vpop.f32.mrb[43].mxu1 }
 0x7fe   : > { %v21761_v9 = vadd.f32 %v16805_v30, %v16804_v37  ;;  %17542 = vmatmul.mubr.bf16.gmra.mrb[60].mxu0 %v13291_v49 }
 0x802   : > { %v16807_v10 = vpop.f32.mrb[44].mxu1 }
 0x803   : > { %v16808_v13 = vpop.f32.mrb[45].mxu1 }
 0x804   : > { %v21766_v6 = vadd.f32 %v16808_v13, %v16807_v10  ;;  %v16810_v45 = vpop.f32.mrb[46].mxu1 }
 0x805   : > { %v16811_v8 = vpop.f32.mrb[47].mxu1 }
 0x806   : > { %v21769_v24 = vadd.f32 %v16811_v8, %v16810_v45 }
 0x809   : > { %v11347_v60 = vpop.f32.mrb[40].mxu0 }
 0x80a   : > { %v11348_v14 = vadd.f32 %v11347_v60, %v21772_v23  ;;  %v11349_v53 = vpop.f32.mrb[41].mxu0 }
 0x80b   : > { %v11350_v33 = vadd.f32 %v11349_v53, %v21775_v48  ;;  %v11351_v25 = vpop.f32.mrb[42].mxu0 }
 0x80c   : > { %v11410_v28 = vadd.f32 %v11394_v32, %v11348_v14  ;;  %v11352_v35 = vadd.f32 %v11351_v25, %v21772_v23  ;;  %v11353_v11 = vpop.f32.mrb[43].mxu0  ;;  %v14862_v32 = vld [vmem:[%s19468_s15 + $0xa8] sm:$0xff] }
 0x80d   : > { %v11411_v3 = vadd.f32 %v11395_v54, %v11350_v33  ;;  %v11354_v31 = vadd.f32 %v11353_v11, %v21775_v48  ;;  %v11402_v54 = vunpack.c.l.bf16 %v14861_v1  ;;  %v11403_v33 = vunpack.c.h.bf16 %v14861_v1 }
 0x80e   : > { %v11426_v19 = vmax.f32 %v11410_v28, 0.0  ;;  %v11412_v55 = vadd.f32 %v11396_v61, %v11352_v35  ;;  %v11404_v28 = vunpack.c.l.bf16 %v14862_v32 }
 0x80f   : > { %v11427_v36 = vmax.f32 %v11411_v3, 0.0  ;;  %v11413_v56 = vadd.f32 %v11397_v58, %v11354_v31  ;;  %v11405_v31 = vunpack.c.h.bf16 %v14862_v32 }
 0x810   : > { %v11428_v39 = vmax.f32 %v11412_v55, 0.0 }
 0x811   : > { %v15088_v29 = vpack.c.bf16 %v11427_v36, %v11426_v19  ;;  %v11429_v42 = vmax.f32 %v11413_v56, 0.0  ;;  %v11357_v47 = vpop.f32.mrb[44].mxu0 }
 0x812   : > { %v11358_v46 = vadd.f32 %v11357_v47, %v21772_v23  ;;  %v11359_v18 = vpop.f32.mrb[45].mxu0  ;;  %v14864_v47 = vld [vmem:[%s19468_s15 + $0xb8] sm:$0xff] }
 0x813   : > { %14873 = vst [vmem:[%s20972_s21 + $0x80] sm:$0xff] %v15088_v29  ;;  %v15089_v21 = vpack.c.bf16 %v11429_v42, %v11428_v39  ;;  %v11360_v59 = vadd.f32 %v11359_v18, %v21775_v48  ;;  %v11361_v38 = vpop.f32.mrb[46].mxu0 }
 0x814   : > { %v11414_v37 = vadd.f32 %v11398_v52, %v11358_v46  ;;  %v11362_v30 = vadd.f32 %v11361_v38, %v21772_v23  ;;  %v11363_v49 = vpop.f32.mrb[47].mxu0  ;;  %v11406_v46 = vunpack.c.l.bf16 %v14863_v15 }
 0x815   : > { %14874 = vst [vmem:[%s20972_s21 + $0x88] sm:$0xff] %v15089_v21  ;;  %v11415_v10 = vadd.f32 %v11399_v44, %v11360_v59  ;;  %v11364_v13 = vadd.f32 %v11363_v49, %v21775_v48  ;;  %v11407_v59 = vunpack.c.h.bf16 %v14863_v15 }
 0x816   : > { %v11430_v45 = vmax.f32 %v11414_v37, 0.0  ;;  %v11416_v8 = vadd.f32 %v11400_v63, %v11362_v30  ;;  %v11408_v37 = vunpack.c.l.bf16 %v14864_v47 }
 0x817   : > { %v11431_v26 = vmax.f32 %v11415_v10, 0.0  ;;  %v11417_v5 = vadd.f32 %v11401_v22, %v11364_v13  ;;  %v11409_v13 = vunpack.c.h.bf16 %v14864_v47 }
 0x818   : > { %v11432_v60 = vmax.f32 %v11416_v8, 0.0 }
 0x819   : > { %v15090_v14 = vpack.c.bf16 %v11431_v26, %v11430_v45  ;;  %v11433_v53 = vmax.f32 %v11417_v5, 0.0  ;;  %v11367_v61 = vpop.f32.mrb[48].mxu0 }
 0x81a   : > { %v11368_v25 = vadd.f32 %v11367_v61, %v21772_v23  ;;  %v11369_v58 = vpop.f32.mrb[49].mxu0 }
 0x81b   : > { %14875 = vst [vmem:[%s20972_s21 + $0x90] sm:$0xff] %v15090_v14  ;;  %v15091_v35 = vpack.c.bf16 %v11433_v53, %v11432_v60  ;;  %v11370_v11 = vadd.f32 %v11369_v58, %v21775_v48  ;;  %v11371_v3 = vpop.f32.mrb[50].mxu0  ;;  %v17741_v58 = vadd.f32 %v21729_v20, %v21753_v4  ;;  %v17771_v20 = vadd.f32 %v21737_v0, %v21759_v27 }
 0x81c   : > { %v11418_v43 = vadd.f32 %v11402_v54, %v11368_v25  ;;  %v11372_v19 = vadd.f32 %v11371_v3, %v21772_v23  ;;  %v11373_v55 = vpop.f32.mrb[51].mxu0  ;;  %v17765_v3 = vadd.f32 %v21744_v16, %v21766_v6  ;;  %v15025_v16 = vld [vmem:[%s21926_s4] ss:$0 sm:$0xff] }
 0x81d   : > { %14876 = vst [vmem:[%s20972_s21 + $0x98] sm:$0xff] %v15091_v35  ;;  %v11419_v36 = vadd.f32 %v11403_v33, %v11370_v11  ;;  %v11374_v56 = vadd.f32 %v11373_v55, %v21775_v48  ;;  %v18999_v35 = vld [vmem:[#allocation9 + $0x60] ss:$8 sps:$4 sm:$0xff]   ;;  %v19001_v11 = vld [vmem:[#allocation9 + $0x64] ss:$8 sps:$4 sm:$0xff]  }
 0x81e   : > { %v11434_v39 = vmax.f32 %v11418_v43, 0.0  ;;  %v11420_v52 = vadd.f32 %v11404_v28, %v11372_v19  ;;  %v17753_v28 = vadd.f32 %v21733_v17, %v21755_v51  ;;  %13769 = vmatprep.subr.bf16.mxu1 %v19001_v11  ;;  %v19002_v43 = vld [vmem:[#allocation9 + $0x70] ss:$8 sps:$4 sm:$0xff]  }
 0x81f   : > { %v11435_v29 = vmax.f32 %v11419_v36, 0.0  ;;  %v11421_v42 = vadd.f32 %v11405_v31, %v11374_v56  ;;  %v19004_v31 = vld [vmem:[#allocation9 + $0x74] ss:$8 sps:$4 sm:$0xff]   ;;  %13770 = vmatpush1.bf16.msra.mxu1 %v18999_v35 }
 0x820   : > { %v11436_v44 = vmax.f32 %v11420_v52, 0.0  ;;  %13771 = vmatprep.subr.bf16.mxu1 %v19004_v31  ;;  %v15044_v35 = vld [vmem:[%s19468_s15 + $0xd0] sm:$0xff] }
 0x821   : > { %v15092_v18 = vpack.c.bf16 %v11435_v29, %v11434_v39  ;;  %v11437_v63 = vmax.f32 %v11421_v42, 0.0  ;;  %v11377_v21 = vpop.f32.mrb[52].mxu0 }
 0x822   : > { %v11378_v38 = vadd.f32 %v11377_v21, %v21772_v23  ;;  %v11379_v22 = vpop.f32.mrb[53].mxu0 }
 0x823   : > { %14877 = vst [vmem:[%s20972_s21 + $0xa0] sm:$0xff] %v15092_v18  ;;  %v15093_v30 = vpack.c.bf16 %v11437_v63, %v11436_v44  ;;  %v11380_v49 = vadd.f32 %v11379_v22, %v21775_v48  ;;  %v11381_v10 = vpop.f32.mrb[54].mxu0  ;;  %13772 = vmatpush1.bf16.msra.mxu1 %v19002_v43 }
 0x824   : > { %v11422_v1 = vadd.f32 %v11406_v46, %v11378_v38  ;;  %v11382_v45 = vadd.f32 %v11381_v10, %v21772_v23  ;;  %v11383_v8 = vpop.f32.mrb[55].mxu0  ;;  %v17747_v23 = vadd.f32 %v21718_v57, %v21749_v12  ;;  %v17777_v57 = vadd.f32 %v21747_v2, %v21769_v24 }
 0x825   : > { %14878 = vst [vmem:[%s20972_s21 + $0xa8] sm:$0xff] %v15093_v30  ;;  %v11423_v26 = vadd.f32 %v11407_v59, %v11380_v49  ;;  %v11384_v5 = vadd.f32 %v11383_v8, %v21775_v48  ;;  %v17759_v48 = vadd.f32 %v21721_v41, %v21751_v50  ;;  %v17783_v41 = vadd.f32 %v21741_v40, %v21761_v9  ;;  %v15042_v8 = vld [vmem:[%s19468_s15 + $0xc0] sm:$0xff] }
 0x826   : > { %v11438_v32 = vmax.f32 %v11422_v1, 0.0  ;;  %v11424_v60 = vadd.f32 %v11408_v37, %v11382_v45  ;;  %v13665_v45 = vld [vmem:[%s21928_s6] sm:$0x3] }
 0x827   : > { %v11439_v54 = vmax.f32 %v11423_v26, 0.0  ;;  %v11425_v14 = vadd.f32 %v11409_v13, %v11384_v5  ;;  %v21835_v26 = vrot.slane %v13665_v45, %v20935_v62  ;;  %v21838_v5 = vrot.slane %v13665_v45, %v20941_v34 }
 0x828   : > { %v11440_v53 = vmax.f32 %v11424_v60, 0.0  ;;  %v13838_v60 = vunpack.c.l.bf16 %v15042_v8 }
 0x829   : > { %v15094_v61 = vpack.c.bf16 %v11439_v54, %v11438_v32  ;;  %v11441_v33 = vmax.f32 %v11425_v14, 0.0  ;;  %v15043_v32 = vld [vmem:[%s19468_s15 + $0xc8] sm:$0xff]  ;;  %v13839_v14 = vunpack.c.h.bf16 %v15042_v8 }
 0x82b   : > { %14879 = vst [vmem:[%s20972_s21 + $0xb0] sm:$0xff] %v15094_v61  ;;  %v15095_v25 = vpack.c.bf16 %v11441_v33, %v11440_v53  ;;  %v13840_v61 = vunpack.c.l.bf16 %v15043_v32 }
 0x82d   : > { %14880 = vst [vmem:[%s20972_s21 + $0xb8] sm:$0xff] %v15095_v25 }
 0x8c9   : > { %v17539_v17 = vpop.f32.mrb[56].mxu0 }
 0x8ca   : > { %v17742_v12 = vadd.f32 %v17741_v58, %v17539_v17  ;;  %v13583_v50 = vpop.f32.mrb[57].mxu0  ;;  %v13841_v58 = vunpack.c.h.bf16 %v15043_v32 }
 0x8cb   : > { %v17748_v4 = vadd.f32 %v17747_v23, %v13583_v50  ;;  %v17540_v51 = vpop.f32.mrb[58].mxu0  ;;  %v13843_v50 = vunpack.c.h.bf16 %v15044_v35 }
 0x8cc   : > { %v13631_v6 = vadd.f32 %v17742_v12, %v15025_v16  ;;  %v17754_v19 = vadd.f32 %v17753_v28, %v17540_v51  ;;  %v13586_v0 = vpop.f32.mrb[59].mxu0 }
 0x8cd   : > { %v13629_v27 = vadd.f32 %v17748_v4, %v15025_v16  ;;  %v17760_v55 = vadd.f32 %v17759_v48, %v13586_v0 }
 0x8ce   : > { %v13632_v36 = vadd.f32 %v17754_v19, %v15025_v16  ;;  %v13639_v24 = vmax.f32 %v13631_v6, 0.0 }
 0x8cf   : > { %v13630_v2 = vadd.f32 %v17760_v55, %v15025_v16  ;;  %v13637_v15 = vmax.f32 %v13629_v27, 0.0 }
 0x8d0   : > { %v13640_v56 = vmax.f32 %v13632_v36, 0.0 }
 0x8d1   : > { %v13638_v40 = vmax.f32 %v13630_v2, 0.0  ;;  %v17543_v9 = vpop.f32.mrb[60].mxu0 }
 0x8d2   : > { %v13646_v39 = vpack.c.bf16 %v13640_v56, %v13639_v24  ;;  %v17766_v52 = vadd.f32 %v17765_v3, %v17543_v9  ;;  %v13599_v29 = vpop.f32.mrb[61].mxu0 }
 0x8d3   : > { %v13645_v42 = vpack.c.bf16 %v13638_v40, %v13637_v15  ;;  %v17772_v47 = vadd.f32 %v17771_v20, %v13599_v29  ;;  %v17544_v44 = vpop.f32.mrb[62].mxu0  ;;  %v15045_v20 = vld [vmem:[%s19468_s15 + $0xd8] sm:$0xff]  ;;  %v15046_v40 = vld [vmem:[%s19468_s15 + $0xe0] sm:$0xff] }
 0x8d4   : > { %v13635_v46 = vadd.f32 %v17766_v52, %v15025_v16  ;;  %v17778_v18 = vadd.f32 %v17777_v57, %v17544_v44  ;;  %v13602_v63 = vpop.f32.mrb[63].mxu0  ;;  %v13844_v6 = vunpack.c.l.bf16 %v15045_v20  ;;  %v13845_v55 = vunpack.c.h.bf16 %v15045_v20 }
 0x8d5   : > { %v13633_v21 = vadd.f32 %v17772_v47, %v15025_v16  ;;  %v17784_v59 = vadd.f32 %v17783_v41, %v13602_v63  ;;  %13790 = vmatmul.mubr.bf16.vlgmr.msra.gmra.mrb[48].mxu1 %v13645_v42  ;;  %v13842_v41 = vunpack.c.l.bf16 %v15044_v35  ;;  %v15047_v42 = vld [vmem:[%s19468_s15 + $0xe8] sm:$0xff]  ;;  %v13846_v44 = vunpack.c.l.bf16 %v15046_v40 }
 0x8d6   : > { %v13636_v38 = vadd.f32 %v17778_v18, %v15025_v16  ;;  %13799 = vmatprep.mubr.bf16.mxu1 %v22138_v7  ;;  %v13643_v37 = vmax.f32 %v13635_v46, 0.0 }
 0x8d7   : > { %v13634_v22 = vadd.f32 %v17784_v59, %v15025_v16  ;;  %v13641_v49 = vmax.f32 %v13633_v21, 0.0  ;;  %v13847_v21 = vunpack.c.h.bf16 %v15046_v40 }
 0x8d8   : > { %v13644_v30 = vmax.f32 %v13636_v38, 0.0 }
 0x8d9   : > { %v13642_v10 = vmax.f32 %v13634_v22, 0.0  ;;  %v13848_v22 = vunpack.c.l.bf16 %v15047_v42 }
 0x8da   : > { %v13648_v13 = vpack.c.bf16 %v13644_v30, %v13643_v37 }
 0x8db   : > { %v13647_v1 = vpack.c.bf16 %v13642_v10, %v13641_v49  ;;  %v13849_v10 = vunpack.c.h.bf16 %v15047_v42 }
 0x8dd   : > { %13800 = vmatmul.mubr.bf16.gmra.mrb[52].mxu1 %v13646_v39 }
 0x8de   : > { %13809 = vmatprep.mubr.bf16.mxu1 %v22138_v7 }
 0x8e5   : > { %13810 = vmatmul.mubr.bf16.gmra.mrb[56].mxu1 %v13647_v1 }
 0x8e6   : > { %13819 = vmatprep.mubr.bf16.mxu1 %v22138_v7 }
 0x8ed   : > { %13820 = vmatmul.mubr.bf16.gmra.mrb[60].mxu1 %v13648_v13 }
 0x9a8   : > { %v13791_v54 = vpop.f32.mrb[48].mxu1 }
 0x9a9   : > { %v13792_v53 = vadd.f32 %v13791_v54, %v21835_v26  ;;  %v13793_v7 = vpop.f32.mrb[49].mxu1 }
 0x9aa   : > { %v13794_v33 = vadd.f32 %v13793_v7, %v21838_v5  ;;  %v13795_v25 = vpop.f32.mrb[50].mxu1 }
 0x9ab   : > { %v13854_v23 = vadd.f32 %v13838_v60, %v13792_v53  ;;  %v13796_v62 = vadd.f32 %v13795_v25, %v21835_v26  ;;  %v13797_v28 = vpop.f32.mrb[51].mxu1  ;;  %v15048_v60 = vld [vmem:[%s19468_s15 + $0xf0] sm:$0xff] }
 0x9ac   : > { %v13855_v34 = vadd.f32 %v13839_v14, %v13794_v33  ;;  %v13798_v48 = vadd.f32 %v13797_v28, %v21838_v5  ;;  %v13850_v25 = vunpack.c.l.bf16 %v15048_v60  ;;  %v13851_v28 = vunpack.c.h.bf16 %v15048_v60 }
 0x9ad   : > { %v13870_v11 = vmax.f32 %v13854_v23, 0.0  ;;  %v13856_v3 = vadd.f32 %v13840_v61, %v13796_v62  ;;  %v15049_v61 = vld [vmem:[%s19468_s15 + $0xf8] sm:$0xff]  ;;  %s15104_s15 = sshll.u32 %s19284_s28, 12  ;;  %s19220_s28 = smov [#allocation11]  }
 0x9ae   : > { %v13871_v31 = vmax.f32 %v13855_v34, 0.0  ;;  %v13857_v43 = vadd.f32 %v13841_v58, %v13798_v48  ;;  %v13852_v35 = vunpack.c.l.bf16 %v15049_v61  ;;  %s21874_s11 = scalar_lea.hbm %s21929_s7, %s15104_s15  ;;  %s19139_s14 = sshll.u32 %s19220_s28, 4  ;;  %s19140_s14 = int_to_ptr.vmem [resolvable:$false] %s19139_s14 }
 0x9af   : > { %v13872_v57 = vmax.f32 %v13856_v3, 0.0  ;;  %s19141_s22 = scalar_lea.vmem %s19140_s14, 8192  ;;  %p19142_p12 = scmp.lt.s32.totalorder %s21876_s16, %s19140_s14 }
 0x9b0   : > { %v15096_v17 = vpack.c.bf16 %v13871_v31, %v13870_v11  ;;  %v13873_v16 = vmax.f32 %v13857_v43, 0.0  ;;  %v13801_v12 = vpop.f32.mrb[52].mxu1  ;;  %v13853_v43 = vunpack.c.h.bf16 %v15049_v61  ;;  %p19143_p2 = scmp.lt.s32.totalorder %s19141_s22, %s19135_s9 }
 0x9b1   : > { %v13802_v4 = vadd.f32 %v13801_v12, %v21835_v26  ;;  %v13803_v51 = vpop.f32.mrb[53].mxu1 }
 0x9b2   : > { %15058 = vst [vmem:[%s20972_s21 + $0xc0] sm:$0xff] %v15096_v17  ;;  %v15097_v19 = vpack.c.bf16 %v13873_v16, %v13872_v57  ;;  %v13804_v0 = vadd.f32 %v13803_v51, %v21838_v5  ;;  %v13805_v27 = vpop.f32.mrb[54].mxu1  ;;  %p19144_p1 = por %p19143_p2, %p19142_p12 }
 0x9b3   : > { %v13858_v36 = vadd.f32 %v13842_v41, %v13802_v4  ;;  %v13806_v2 = vadd.f32 %v13805_v27, %v21835_v26  ;;  %v13807_v24 = vpop.f32.mrb[55].mxu1 }
 0x9b4   : > { %15059 = vst [vmem:[%s20972_s21 + $0xc8] sm:$0xff] %v15097_v19  ;;  %v13859_v56 = vadd.f32 %v13843_v50, %v13804_v0  ;;  %v13808_v15 = vadd.f32 %v13807_v24, %v21838_v5  ;;  %p19145_p4 = pnand %p19144_p1, %p19138_p7 }
 0x9b5   : > { %v13874_v9 = vmax.f32 %v13858_v36, 0.0  ;;  %v13860_v39 = vadd.f32 %v13844_v6, %v13806_v2 }
 0x9b6   : > { %v13875_v52 = vmax.f32 %v13859_v56, 0.0  ;;  %v13861_v29 = vadd.f32 %v13845_v55, %v13808_v15 }
 0x9b7   : > { %v13876_v47 = vmax.f32 %v13860_v39, 0.0 }
 0x9b8   : > { %v15098_v46 = vpack.c.bf16 %v13875_v52, %v13874_v9  ;;  %v13877_v18 = vmax.f32 %v13861_v29, 0.0  ;;  %v13811_v63 = vpop.f32.mrb[56].mxu1 }
 0x9b9   : > { %v13812_v59 = vadd.f32 %v13811_v63, %v21835_v26  ;;  %v13813_v38 = vpop.f32.mrb[57].mxu1 }
 0x9ba   : > { %15060 = vst [vmem:[%s20972_s21 + $0xd0] sm:$0xff] %v15098_v46  ;;  %v15099_v37 = vpack.c.bf16 %v13877_v18, %v13876_v47  ;;  %v13814_v30 = vadd.f32 %v13813_v38, %v21838_v5  ;;  %v13815_v49 = vpop.f32.mrb[58].mxu1 }
 0x9bb   : > { %v13862_v13 = vadd.f32 %v13846_v44, %v13812_v59  ;;  %v13816_v1 = vadd.f32 %v13815_v49, %v21835_v26  ;;  %v13817_v45 = vpop.f32.mrb[59].mxu1 }
 0x9bc   : > { %15061 = vst [vmem:[%s20972_s21 + $0xd8] sm:$0xff] %v15099_v37  ;;  %v13863_v8 = vadd.f32 %v13847_v21, %v13814_v30  ;;  %v13818_v32 = vadd.f32 %v13817_v45, %v21838_v5 }
 0x9bd   : > { %v13878_v54 = vmax.f32 %v13862_v13, 0.0  ;;  %v13864_v14 = vadd.f32 %v13848_v22, %v13816_v1 }
 0x9be   : > { %v13879_v53 = vmax.f32 %v13863_v8, 0.0  ;;  %v13865_v7 = vadd.f32 %v13849_v10, %v13818_v32 }
 0x9bf   : > { %v13880_v33 = vmax.f32 %v13864_v14, 0.0 }
 0x9c0   : > { %v15100_v58 = vpack.c.bf16 %v13879_v53, %v13878_v54  ;;  %v13881_v23 = vmax.f32 %v13865_v7, 0.0  ;;  %v13821_v62 = vpop.f32.mrb[60].mxu1 }
 0x9c1   : > { %v13822_v34 = vadd.f32 %v13821_v62, %v21835_v26  ;;  %v13823_v48 = vpop.f32.mrb[61].mxu1 }
 0x9c2   : > { %15062 = vst [vmem:[%s20972_s21 + $0xe0] sm:$0xff] %v15100_v58  ;;  %v15101_v11 = vpack.c.bf16 %v13881_v23, %v13880_v33  ;;  %v13824_v3 = vadd.f32 %v13823_v48, %v21838_v5  ;;  %v13825_v31 = vpop.f32.mrb[62].mxu1 }
 0x9c3   : > { %v13866_v20 = vadd.f32 %v13850_v25, %v13822_v34  ;;  %v13826_v57 = vadd.f32 %v13825_v31, %v21835_v26  ;;  %v13827_v41 = vpop.f32.mrb[63].mxu1 }
 0x9c4   : > { %15063 = vst [vmem:[%s20972_s21 + $0xe8] sm:$0xff] %v15101_v11  ;;  %v13867_v17 = vadd.f32 %v13851_v28, %v13824_v3  ;;  %v13828_v16 = vadd.f32 %v13827_v41, %v21838_v5 }
 0x9c5   : > { %v13882_v12 = vmax.f32 %v13866_v20, 0.0  ;;  %v13868_v50 = vadd.f32 %v13852_v35, %v13826_v57 }
 0x9c6   : > { %v13883_v4 = vmax.f32 %v13867_v17, 0.0  ;;  %v13869_v51 = vadd.f32 %v13853_v43, %v13828_v16 }
 0x9c7   : > { %v13884_v6 = vmax.f32 %v13868_v50, 0.0 }
 0x9c8   : > { %v15102_v19 = vpack.c.bf16 %v13883_v4, %v13882_v12  ;;  %v13885_v0 = vmax.f32 %v13869_v51, 0.0 }
 0x9ca   : > { %15064 = vst [vmem:[%s20972_s21 + $0xf0] sm:$0xff] %v15102_v19  ;;  %v15103_v26 = vpack.c.bf16 %v13885_v0, %v13884_v6 }
 0x9cc   : > { %15065 = vst [vmem:[%s20972_s21 + $0xf8] sm:$0xff] %v15103_v26 }
 0x9cd   : > { %19148 = shalt.err (!%p19145_p4)
}
 0x9ce   : > { %s19149_s21 = scalar_lea.hbm %s21874_s11, 4096  ;;  %s19153_s17 = scalar_lea.hbm %s21929_s7, 8192 }
 0x9cf   : > { %p19150_p9 = scmp.ne.s32.totalorder %s21874_s11, %s19149_s21  ;;  %p19154_p8 = scmp.lt.u32.totalorder %s21874_s11, %s21929_s7 }
 0x9d0   : > { %p19155_p13 = scmp.lt.u32.totalorder %s19153_s17, %s19149_s21  ;;  %p19157_p10 = scmp.lt.u32.totalorder %s19149_s21, %s21874_s11 }
 0x9d1   : > { %p19151_p0 = pnand %p19150_p9, %p19411_p5 }
 0x9d2   : > { %p19156_p6 = por %p19155_p13, %p19154_p8 }
 0x9d3   : > { %p19152_p11 = pneg %p19151_p0 }
 0x9d4   : > { %p19158_p3 = por %p19157_p10, %p19156_p6 }
 0x9d6   : > { %p19159_p7 = pnand %p19158_p3, %p19152_p11 }
 0x9d8   : > { %19162 = shalt.err (!%p19159_p7)
}
 0x9d9   : > { %s19221_s29 = smov 128   ;;  %s19222_s23 = smov 8  }
 0x9da   : > { %18007 = dma.vmem_to_hbm [thread:$0]  (%p19411_p5), %s21876_s16, 4096, %s21874_s11, %s13944_s30, %s19221_s29, %s19221_s29, %s19222_s23  }
 0x9db PF: > { %s22226_s9 = sld [smem:[#allocation16_spill]]  ;;  %s13972_s28 = sand.u32 1, %s19197_s24  }
 0x9dc   : > { %p22228_p2 = scmp.ge.s32.totalorder %s19209_s27, 2  ;;  %s13973_s14 = scalar_lea.sflag [#allocation5], %s13972_s28 }
 0x9e1   : > { %p22227_p12 = scmp.ne.s32.totalorder %s22226_s9, 0 }
 0x9e3   : > { %p18024_p1 = pnand %p22228_p2, %p22227_p12 }
 0x9e5   : > { %19192 = dma.done.wait (!%p18024_p1), %s13973_s14, 4096  }
 0x9e6   : > { %19194 = vsyncadd (!%p18024_p1), %s13973_s14, 4294963200  ;;  %p22_p4 = scmp.ge.s32.totalorder %s19397_s8, 4   ;;  %s22229_s24 = smov %s19201_s25 }
 0x9e7   : > { %s22230_s25 = smov %s19205_s26  ;;  %s22231_s26 = smov %s19407_s19 }
 0x9e8   : > { %s22232_s27 = smov %s19397_s8  ;;  %24 = sbr.rel (!%p22_p4) target bundleno = 7 (0x7), region = 122 }
 0x9ef   :  { %13978 = vsyncpa [#allocation4], 1 }
 0x9f0   :  { %13980 = vsyncpa [#allocation4 + $0x1], 1 }
 0x9f1   :  { %13981 = vsyncpa [#allocation7], 1 }
 0x9f2   :  { %13982 = vsyncpa [#allocation10], 1 }
 0x9f3   :  { %13983 = vsyncpa [#allocation5], 1 }
 0x9f4   :  { %13985 = vsyncpa [#allocation5 + $0x1], 1 }

</bundles_post_ra>
